<compile_context>
chip_gen: v5e
topology: v5e:2x2
jax: 0.10.0
libtpu: 0.0.40
codegen_flags: <defaults>
</compile_context>

<pallas_src>
import jax
import jax.numpy as jnp
from jax.experimental import pallas as pl
from jax.experimental.pallas import tpu as pltpu

HALF_DIM = 512            # each of text / image / text1 / image1 / prompt
CORRE_DIM = 1024          # concat of two 512-d inputs
HIDDEN = 256
CONCAT3 = 3 * HIDDEN      # 768
OUT_DIM = 48
OUT_PAD = 128             # lane-dense padded output width
BN_EPS = 1e-5
TILE_B_MAX = 512          # bigger batch tiles -> better HBM DMA efficiency
VMEM_LIMIT_BYTES = 40 << 20   # fits v7x 64 MiB; v5e scoped default (16 MiB) too low


def cross_module_kernel(
    # activations ((tile_b, 512) each; bf16 preferred, f32 accepted)
    text_ref, image_ref, text1_ref, image1_ref, prompt_ref,
    # bf16 BN-folded weights
    wt_ref,    # (512, 512) : [Wp_text | W1_text] fused
    wpp_ref,   # (512, 256) : Wp_prompt
    w1i_ref,   # (512, 256) : W1_image
    w2t_ref,   # (512, 256) : W2_text1
    w2i_ref,   # (512, 256) : W2_image1
    w3_ref,    # (768, 256) : W3 (row blocks: hp | h1 | h2)
    w4_ref,    # (256, 128) : W4 zero-padded to 128 output lanes
    # f32 folded shifts (bias*scale + shift)
    tp_ref, t1_ref, t2_ref, t3_ref, t4_ref,
    # output
    out_ref,   # (tile_b, 128) f32
):
    f32 = jnp.float32
    bf16 = jnp.bfloat16

    # No-op casts when the producer already feeds bf16 (recommended).
    text = text_ref[...].astype(bf16)
    image = image_ref[...].astype(bf16)
    text1 = text1_ref[...].astype(bf16)
    image1 = image1_ref[...].astype(bf16)
    prompt = prompt_ref[...].astype(bf16)

    # Shared-text matmul: one (tb,512)x(512,512) push covers the text halves of
    # both c_specific_p and c_specific_1.
    tt = jnp.dot(text, wt_ref[...], preferred_element_type=f32)          # (tb, 512)

    hp = jnp.maximum(
        tt[:, :HIDDEN]
        + jnp.dot(prompt, wpp_ref[...], preferred_element_type=f32)
        + tp_ref[...], 0.0)                                              # (tb, 256)
    h1 = jnp.maximum(
        tt[:, HIDDEN:]
        + jnp.dot(image, w1i_ref[...], preferred_element_type=f32)
        + t1_ref[...], 0.0)
    h2 = jnp.maximum(
        jnp.dot(text1, w2t_ref[...], preferred_element_type=f32)
        + jnp.dot(image1, w2i_ref[...], preferred_element_type=f32)
        + t2_ref[...], 0.0)

    # c_specific_3 stage 1 : K-split of W3 replaces concat([hp, h1, h2]).
    h3 = (jnp.dot(hp.astype(bf16), w3_ref[pl.ds(0, HIDDEN), :],
                  preferred_element_type=f32)
          + jnp.dot(h1.astype(bf16), w3_ref[pl.ds(HIDDEN, HIDDEN), :],
                    preferred_element_type=f32)
          + jnp.dot(h2.astype(bf16), w3_ref[pl.ds(2 * HIDDEN, HIDDEN), :],
                    preferred_element_type=f32))
    h3 = jnp.maximum(h3 + t3_ref[...], 0.0)                              # (tb, 256)

    # c_specific_3 stage 2 (padded to 128 lanes; pad cols are exactly 0).
    out = jnp.maximum(
        jnp.dot(h3.astype(bf16), w4_ref[...], preferred_element_type=f32)
        + t4_ref[...], 0.0)
    out_ref[...] = out.astype(out_ref.dtype)


def _round_up(x, m):
    return ((x + m - 1) // m) * m


def _pick_tile_b(b_pad, max_tile=TILE_B_MAX):
    """Batch tile that (a) divides b_pad exactly (no padding / ragged blocks),
    (b) is <= max_tile, preferring (c) >= 2 tiles so v7x's two TensorCores both
    get work on the "parallel" axis, and (d) a multiple of 16 (native bf16
    sublane tiling)."""
    divs = [t for t in range(8, min(max_tile, b_pad) + 1, 8) if b_pad % t == 0]
    for need_multi, need_16 in ((True, True), (True, False),
                                (False, True), (False, False)):
        cand = [t for t in divs
                if (b_pad // t >= 2 or not need_multi)
                and (t % 16 == 0 or not need_16)]
        if cand:
            return max(cand)
    return min(b_pad, 8)


def _run_pallas(acts, kernel_params, b_pad, tile_b, single_buffer_params):
    nb = b_pad // tile_b
    act_spec = pl.BlockSpec((tile_b, HALF_DIM), lambda i: (i, 0))

    def resident(arr):
        # Full-extent block, constant index_map -> loaded once, stays in VMEM.
        if single_buffer_params:
            return pl.BlockSpec(arr.shape, lambda i: (0, 0),
                                pipeline_mode=pl.Buffered(1))
        return pl.BlockSpec(arr.shape, lambda i: (0, 0))

    param_specs = [resident(p) for p in kernel_params]

    return pl.pallas_call(
        cross_module_kernel,
        out_shape=jax.ShapeDtypeStruct((b_pad, OUT_PAD), jnp.float32),
        grid=(nb,),
        in_specs=[act_spec] * 5 + param_specs,
        out_specs=pl.BlockSpec((tile_b, OUT_PAD), lambda i: (i, 0)),
        compiler_params=pltpu.CompilerParams(
            dimension_semantics=("parallel",),
            vmem_limit_bytes=VMEM_LIMIT_BYTES,
        ),
    )(*acts, *kernel_params)


def cross_module_forward(text, image, text1, image1, prompt, kernel_params,
                         return_padded=False):
    """kernel_params = output of prepare_kernel_params().

    Feed the five activations in bf16 (cast at their producer, not here) to
    halve activation HBM traffic; f32 also accepted.  Returns (B, 48) f32, or
    the raw padded (B_pad, 128) buffer if return_padded=True (skips the extra
    post-kernel slice pass when downstream can consume it directly)."""
    B = text.shape[0]
    B_pad = _round_up(B, 8)          # pads only when B % 8 != 0 ((8,128) rule)
    tile_b = _pick_tile_b(B_pad)

    def maybe_pad(x):
        x = jnp.asarray(x)           # keep producer dtype (no wrapper f32 cast)
        if x.shape[0] == B_pad:
            return x
        return jnp.pad(x, ((0, B_pad - x.shape[0]), (0, 0)))

    acts = [maybe_pad(a) for a in (text, image, text1, image1, prompt)]

    try:
        out = _run_pallas(acts, kernel_params, B_pad, tile_b,
                          single_buffer_params=True)
    except Exception:
        # pl.Buffered(1) unsupported on this jax version -> default buffering
        # (same results, ~2 MB more VMEM).
        out = _run_pallas(acts, kernel_params, B_pad, tile_b,
                          single_buffer_params=False)

    if return_padded:
        return out
    return out[:B, :OUT_DIM]


def _make_layer_params(key, in_dim, out_dim):
    """Deterministic Linear + BatchNorm1d(eval) params; BN as scale/shift."""
    k_w, k_b, k_g, k_bt, k_m, k_v = jax.random.split(key, 6)
    bound = 1.0 / (in_dim ** 0.5)
    w = jax.random.uniform(k_w, (in_dim, out_dim), jnp.float32, -bound, bound)
    b = jax.random.uniform(k_b, (1, out_dim), jnp.float32, -bound, bound)
    gamma = 1.0 + 0.1 * jax.random.normal(k_g, (1, out_dim), jnp.float32)
    beta = 0.1 * jax.random.normal(k_bt, (1, out_dim), jnp.float32)
    run_mean = 0.1 * jax.random.normal(k_m, (1, out_dim), jnp.float32)
    run_var = 1.0 + 0.1 * jax.random.uniform(k_v, (1, out_dim), jnp.float32)
    scale = gamma / jnp.sqrt(run_var + BN_EPS)
    shift = beta - run_mean * scale
    return w, b, scale, shift


def _fold(w, b, s, t):
    """(x@w + b)*s + t  ==  x @ (w*s) + (b*s + t)."""
    return w * s, b * s + t


def prepare_kernel_params(raw):
    """Fold bias+BN into weights, split/fuse along K, pad last layer, cast bf16."""
    # TODO(synk): optional fp8 weight/activation path for v7x (needs per-tensor
    # scaling and re-validation against the f32 reference).
    (wp, bp, sp, tp), (w1, b1, s1, t1), (w2, b2, s2, t2), \
        (w3, b3, s3, t3), (w4, b4, s4, t4) = raw

    wp_f, tp_f = _fold(wp, bp, sp, tp)
    w1_f, t1_f = _fold(w1, b1, s1, t1)
    w2_f, t2_f = _fold(w2, b2, s2, t2)
    w3_f, t3_f = _fold(w3, b3, s3, t3)
    w4_f, t4_f = _fold(w4, b4, s4, t4)

    # Shared-text fusion: text multiplies both Wp[:512] and W1[:512].
    wt = jnp.concatenate([wp_f[:HALF_DIM], w1_f[:HALF_DIM]], axis=1)   # (512, 512)
    wpp = wp_f[HALF_DIM:]                                              # (512, 256)
    w1i = w1_f[HALF_DIM:]
    w2t = w2_f[:HALF_DIM]
    w2i = w2_f[HALF_DIM:]

    w4_pad = jnp.zeros((HIDDEN, OUT_PAD), jnp.float32).at[:, :OUT_DIM].set(w4_f)
    t4_pad = jnp.zeros((1, OUT_PAD), jnp.float32).at[:, :OUT_DIM].set(t4_f)

    bf = lambda x: x.astype(jnp.bfloat16)
    return (bf(wt), bf(wpp), bf(w1i), bf(w2t), bf(w2i), bf(w3_f), bf(w4_pad),
            tp_f, t1_f, t2_f, t3_f, t4_pad)


def _reference_f32(text, image, text1, image1, prompt, raw):
    """Original module math (eval mode), f32 weights."""
    def lbr(x, p):
        w, b, s, t = p
        return jnp.maximum((x.astype(jnp.float32) @ w + b) * s + t, 0.0)
    pp, p1, p2, p3, p4 = raw
    f = lambda x: jnp.asarray(x, jnp.float32)
    hp = lbr(jnp.concatenate([f(text), f(prompt)], axis=1), pp)
    h1 = lbr(jnp.concatenate([f(text), f(image)], axis=1), p1)
    h2 = lbr(jnp.concatenate([f(text1), f(image1)], axis=1), p2)
    z = jnp.concatenate([hp, h1, h2], axis=1)
    return lbr(lbr(z, p3), p4)


def _reference_bf16(text, image, text1, image1, prompt, kp):
    """Mirror of the kernel math (bf16 operands, f32 accumulate) in plain JAX."""
    (wt, wpp, w1i, w2t, w2i, w3, w4, tp, t1, t2, t3, t4) = kp
    f = lambda x: x.astype(jnp.float32)
    q = lambda x: x.astype(jnp.bfloat16).astype(jnp.float32)
    tt = q(text) @ f(wt)
    hp = jnp.maximum(tt[:, :HIDDEN] + q(prompt) @ f(wpp) + tp, 0.0)
    h1 = jnp.maximum(tt[:, HIDDEN:] + q(image) @ f(w1i) + t1, 0.0)
    h2 = jnp.maximum(q(text1) @ f(w2t) + q(image1) @ f(w2i) + t2, 0.0)
    h3 = jnp.maximum(q(hp) @ f(w3[:HIDDEN]) + q(h1) @ f(w3[HIDDEN:2 * HIDDEN])
                     + q(h2) @ f(w3[2 * HIDDEN:]) + t3, 0.0)
    out = jnp.maximum(q(h3) @ f(w4) + t4, 0.0)
    return out[:, :OUT_DIM]


if __name__ == "__main__":
    key = jax.random.PRNGKey(0)
    k_in, k_p, k_1, k_2, k_3, k_4 = jax.random.split(key, 6)

    # Small demo batch; B=32 -> tile_b=16, nb=2 (exercises the multi-tile
    # "parallel" batch grid, i.e. both TensorCores on v7x).
    B = 32
    kt, ki, kt1, ki1, kp = jax.random.split(k_in, 5)
    # Activations produced directly in bf16 (the recommended way to feed this
    # kernel: cast at the producer, not via a standalone wrapper cast).
    text = jax.random.normal(kt, (B, HALF_DIM), jnp.bfloat16)
    image = jax.random.normal(ki, (B, HALF_DIM), jnp.bfloat16)
    text1 = jax.random.normal(kt1, (B, HALF_DIM), jnp.bfloat16)
    image1 = jax.random.normal(ki1, (B, HALF_DIM), jnp.bfloat16)
    prompt = jax.random.normal(kp, (B, HALF_DIM), jnp.bfloat16)

    raw = (
        _make_layer_params(k_p, CORRE_DIM, HIDDEN),   # c_specific_p
        _make_layer_params(k_1, CORRE_DIM, HIDDEN),   # c_specific_1
        _make_layer_params(k_2, CORRE_DIM, HIDDEN),   # c_specific_2
        _make_layer_params(k_3, CONCAT3, HIDDEN),     # c_specific_3 stage 1
        _make_layer_params(k_4, HIDDEN, OUT_DIM),     # c_specific_3 stage 2
    )
    kparams = prepare_kernel_params(raw)

    out = cross_module_forward(text, image, text1, image1, prompt, kparams)
    out = jax.block_until_ready(out)
    assert out.shape == (B, OUT_DIM)

    # Tight check against a reference using identical bf16-folded weights.
    ref_q = _reference_bf16(text, image, text1, image1, prompt, kparams)
    assert jnp.allclose(out, ref_q, atol=2e-3, rtol=2e-3), \
        float(jnp.max(jnp.abs(out - ref_q)))

    # Loose check against the original f32 module math (bf16 weight quant noise).
    ref_f = _reference_f32(text, image, text1, image1, prompt, raw)
    assert jnp.allclose(out, ref_f, atol=5e-2, rtol=5e-2), \
        float(jnp.max(jnp.abs(out - ref_f)))

    print("KERNEL_OK")
</pallas_src>

<mosaic_0001>
module attributes {stable_mosaic.version = 11 : i64} {
  func.func @cross_module_kernel(%arg0: i32, %arg1: memref<16x512xbf16, #tpu.memory_space<vmem>>, %arg2: memref<16x512xbf16, #tpu.memory_space<vmem>>, %arg3: memref<16x512xbf16, #tpu.memory_space<vmem>>, %arg4: memref<16x512xbf16, #tpu.memory_space<vmem>>, %arg5: memref<16x512xbf16, #tpu.memory_space<vmem>>, %arg6: memref<512x512xbf16, #tpu.memory_space<vmem>>, %arg7: memref<512x256xbf16, #tpu.memory_space<vmem>>, %arg8: memref<512x256xbf16, #tpu.memory_space<vmem>>, %arg9: memref<512x256xbf16, #tpu.memory_space<vmem>>, %arg10: memref<512x256xbf16, #tpu.memory_space<vmem>>, %arg11: memref<768x256xbf16, #tpu.memory_space<vmem>>, %arg12: memref<256x128xbf16, #tpu.memory_space<vmem>>, %arg13: memref<1x256xf32, #tpu.memory_space<vmem>>, %arg14: memref<1x256xf32, #tpu.memory_space<vmem>>, %arg15: memref<1x256xf32, #tpu.memory_space<vmem>>, %arg16: memref<1x256xf32, #tpu.memory_space<vmem>>, %arg17: memref<1x128xf32, #tpu.memory_space<vmem>>, %arg18: memref<16x128xf32, #tpu.memory_space<vmem>>) attributes {dimension_semantics = [#tpu.dimension_semantics<parallel>], iteration_bounds = array<i64: 2>, scalar_prefetch = 0 : i64, scratch_operands = 0 : i64, tpu.core_type = #tpu.core_type<tc>, window_params = [{transform_indices = @transform_0, window_bounds = array<i64: 16, 512>}, {transform_indices = @transform_1, window_bounds = array<i64: 16, 512>}, {transform_indices = @transform_2, window_bounds = array<i64: 16, 512>}, {transform_indices = @transform_3, window_bounds = array<i64: 16, 512>}, {transform_indices = @transform_4, window_bounds = array<i64: 16, 512>}, {pipeline_mode = #tpu.pipeline_mode<synchronous>, transform_indices = @transform_5, window_bounds = array<i64: 512, 512>}, {pipeline_mode = #tpu.pipeline_mode<synchronous>, transform_indices = @transform_6, window_bounds = array<i64: 512, 256>}, {pipeline_mode = #tpu.pipeline_mode<synchronous>, transform_indices = @transform_7, window_bounds = array<i64: 512, 256>}, {pipeline_mode = #tpu.pipeline_mode<synchronous>, transform_indices = @transform_8, window_bounds = array<i64: 512, 256>}, {pipeline_mode = #tpu.pipeline_mode<synchronous>, transform_indices = @transform_9, window_bounds = array<i64: 512, 256>}, {pipeline_mode = #tpu.pipeline_mode<synchronous>, transform_indices = @transform_10, window_bounds = array<i64: 768, 256>}, {pipeline_mode = #tpu.pipeline_mode<synchronous>, transform_indices = @transform_11, window_bounds = array<i64: 256, 128>}, {pipeline_mode = #tpu.pipeline_mode<synchronous>, transform_indices = @transform_12, window_bounds = array<i64: 1, 256>}, {pipeline_mode = #tpu.pipeline_mode<synchronous>, transform_indices = @transform_13, window_bounds = array<i64: 1, 256>}, {pipeline_mode = #tpu.pipeline_mode<synchronous>, transform_indices = @transform_14, window_bounds = array<i64: 1, 256>}, {pipeline_mode = #tpu.pipeline_mode<synchronous>, transform_indices = @transform_15, window_bounds = array<i64: 1, 256>}, {pipeline_mode = #tpu.pipeline_mode<synchronous>, transform_indices = @transform_16, window_bounds = array<i64: 1, 128>}, {transform_indices = @transform_17, window_bounds = array<i64: 16, 128>}]} {
    %c0 = arith.constant 0 : index
    %c0_0 = arith.constant 0 : index
    %0 = vector.load %arg1[%c0, %c0_0] : memref<16x512xbf16, #tpu.memory_space<vmem>>, vector<16x512xbf16>
    %c0_1 = arith.constant 0 : index
    %c0_2 = arith.constant 0 : index
    %1 = vector.load %arg2[%c0_1, %c0_2] : memref<16x512xbf16, #tpu.memory_space<vmem>>, vector<16x512xbf16>
    %c0_3 = arith.constant 0 : index
    %c0_4 = arith.constant 0 : index
    %2 = vector.load %arg3[%c0_3, %c0_4] : memref<16x512xbf16, #tpu.memory_space<vmem>>, vector<16x512xbf16>
    %c0_5 = arith.constant 0 : index
    %c0_6 = arith.constant 0 : index
    %3 = vector.load %arg4[%c0_5, %c0_6] : memref<16x512xbf16, #tpu.memory_space<vmem>>, vector<16x512xbf16>
    %c0_7 = arith.constant 0 : index
    %c0_8 = arith.constant 0 : index
    %4 = vector.load %arg5[%c0_7, %c0_8] : memref<16x512xbf16, #tpu.memory_space<vmem>>, vector<16x512xbf16>
    %c0_9 = arith.constant 0 : index
    %c0_10 = arith.constant 0 : index
    %5 = vector.load %arg6[%c0_9, %c0_10] : memref<512x512xbf16, #tpu.memory_space<vmem>>, vector<512x512xbf16>
    %cst = arith.constant dense<0.000000e+00> : vector<16x512xf32>
    %6 = tpu.matmul %0, %5, %cst {dimension_numbers = #tpu.dot_dimension_numbers<[1], [0], [0], [1], [0, 0, 1, 1], [], []>} : vector<16x512xbf16>, vector<512x512xbf16>, vector<16x512xf32> -> vector<16x512xf32>
    %7 = vector.extract_strided_slice %6 {offsets = [0, 0], sizes = [16, 256], strides = [1, 1]} : vector<16x512xf32> to vector<16x256xf32>
    %c0_11 = arith.constant 0 : index
    %c0_12 = arith.constant 0 : index
    %8 = vector.load %arg7[%c0_11, %c0_12] : memref<512x256xbf16, #tpu.memory_space<vmem>>, vector<512x256xbf16>
    %cst_13 = arith.constant dense<0.000000e+00> : vector<16x256xf32>
    %9 = tpu.matmul %4, %8, %cst_13 {dimension_numbers = #tpu.dot_dimension_numbers<[1], [0], [0], [1], [0, 0, 1, 1], [], []>} : vector<16x512xbf16>, vector<512x256xbf16>, vector<16x256xf32> -> vector<16x256xf32>
    %10 = arith.addf %7, %9 : vector<16x256xf32>
    %c0_14 = arith.constant 0 : index
    %c0_15 = arith.constant 0 : index
    %11 = vector.load %arg13[%c0_14, %c0_15] : memref<1x256xf32, #tpu.memory_space<vmem>>, vector<1x256xf32>
    %12 = vector.broadcast %11 : vector<1x256xf32> to vector<16x256xf32>
    %13 = arith.addf %10, %12 : vector<16x256xf32>
    %cst_16 = arith.constant 0.000000e+00 : f32
    %14 = vector.broadcast %cst_16 : f32 to vector<16x256xf32>
    %15 = arith.maximumf %13, %14 : vector<16x256xf32>
    %16 = vector.extract_strided_slice %6 {offsets = [0, 256], sizes = [16, 256], strides = [1, 1]} : vector<16x512xf32> to vector<16x256xf32>
    %c0_17 = arith.constant 0 : index
    %c0_18 = arith.constant 0 : index
    %17 = vector.load %arg8[%c0_17, %c0_18] : memref<512x256xbf16, #tpu.memory_space<vmem>>, vector<512x256xbf16>
    %cst_19 = arith.constant dense<0.000000e+00> : vector<16x256xf32>
    %18 = tpu.matmul %1, %17, %cst_19 {dimension_numbers = #tpu.dot_dimension_numbers<[1], [0], [0], [1], [0, 0, 1, 1], [], []>} : vector<16x512xbf16>, vector<512x256xbf16>, vector<16x256xf32> -> vector<16x256xf32>
    %19 = arith.addf %16, %18 : vector<16x256xf32>
    %c0_20 = arith.constant 0 : index
    %c0_21 = arith.constant 0 : index
    %20 = vector.load %arg14[%c0_20, %c0_21] : memref<1x256xf32, #tpu.memory_space<vmem>>, vector<1x256xf32>
    %21 = vector.broadcast %20 : vector<1x256xf32> to vector<16x256xf32>
    %22 = arith.addf %19, %21 : vector<16x256xf32>
    %cst_22 = arith.constant 0.000000e+00 : f32
    %23 = vector.broadcast %cst_22 : f32 to vector<16x256xf32>
    %24 = arith.maximumf %22, %23 : vector<16x256xf32>
    %c0_23 = arith.constant 0 : index
    %c0_24 = arith.constant 0 : index
    %25 = vector.load %arg9[%c0_23, %c0_24] : memref<512x256xbf16, #tpu.memory_space<vmem>>, vector<512x256xbf16>
    %cst_25 = arith.constant dense<0.000000e+00> : vector<16x256xf32>
    %26 = tpu.matmul %2, %25, %cst_25 {dimension_numbers = #tpu.dot_dimension_numbers<[1], [0], [0], [1], [0, 0, 1, 1], [], []>} : vector<16x512xbf16>, vector<512x256xbf16>, vector<16x256xf32> -> vector<16x256xf32>
    %c0_26 = arith.constant 0 : index
    %c0_27 = arith.constant 0 : index
    %27 = vector.load %arg10[%c0_26, %c0_27] : memref<512x256xbf16, #tpu.memory_space<vmem>>, vector<512x256xbf16>
    %cst_28 = arith.constant dense<0.000000e+00> : vector<16x256xf32>
    %28 = tpu.matmul %3, %27, %cst_28 {dimension_numbers = #tpu.dot_dimension_numbers<[1], [0], [0], [1], [0, 0, 1, 1], [], []>} : vector<16x512xbf16>, vector<512x256xbf16>, vector<16x256xf32> -> vector<16x256xf32>
    %29 = arith.addf %26, %28 : vector<16x256xf32>
    %c0_29 = arith.constant 0 : index
    %c0_30 = arith.constant 0 : index
    %30 = vector.load %arg15[%c0_29, %c0_30] : memref<1x256xf32, #tpu.memory_space<vmem>>, vector<1x256xf32>
    %31 = vector.broadcast %30 : vector<1x256xf32> to vector<16x256xf32>
    %32 = arith.addf %29, %31 : vector<16x256xf32>
    %cst_31 = arith.constant 0.000000e+00 : f32
    %33 = vector.broadcast %cst_31 : f32 to vector<16x256xf32>
    %34 = arith.maximumf %32, %33 : vector<16x256xf32>
    %35 = arith.truncf %15 : vector<16x256xf32> to vector<16x256xbf16>
    %c0_32 = arith.constant 0 : index
    %c0_33 = arith.constant 0 : index
    %36 = vector.load %arg11[%c0_32, %c0_33] : memref<768x256xbf16, #tpu.memory_space<vmem>>, vector<256x256xbf16>
    %cst_34 = arith.constant dense<0.000000e+00> : vector<16x256xf32>
    %37 = tpu.matmul %35, %36, %cst_34 {dimension_numbers = #tpu.dot_dimension_numbers<[1], [0], [0], [1], [0, 0, 1, 1], [], []>} : vector<16x256xbf16>, vector<256x256xbf16>, vector<16x256xf32> -> vector<16x256xf32>
    %38 = arith.truncf %24 : vector<16x256xf32> to vector<16x256xbf16>
    %c256 = arith.constant 256 : index
    %c0_35 = arith.constant 0 : index
    %39 = vector.load %arg11[%c256, %c0_35] : memref<768x256xbf16, #tpu.memory_space<vmem>>, vector<256x256xbf16>
    %cst_36 = arith.constant dense<0.000000e+00> : vector<16x256xf32>
    %40 = tpu.matmul %38, %39, %cst_36 {dimension_numbers = #tpu.dot_dimension_numbers<[1], [0], [0], [1], [0, 0, 1, 1], [], []>} : vector<16x256xbf16>, vector<256x256xbf16>, vector<16x256xf32> -> vector<16x256xf32>
    %41 = arith.addf %37, %40 : vector<16x256xf32>
    %42 = arith.truncf %34 : vector<16x256xf32> to vector<16x256xbf16>
    %c512 = arith.constant 512 : index
    %c0_37 = arith.constant 0 : index
    %43 = vector.load %arg11[%c512, %c0_37] : memref<768x256xbf16, #tpu.memory_space<vmem>>, vector<256x256xbf16>
    %cst_38 = arith.constant dense<0.000000e+00> : vector<16x256xf32>
    %44 = tpu.matmul %42, %43, %cst_38 {dimension_numbers = #tpu.dot_dimension_numbers<[1], [0], [0], [1], [0, 0, 1, 1], [], []>} : vector<16x256xbf16>, vector<256x256xbf16>, vector<16x256xf32> -> vector<16x256xf32>
    %45 = arith.addf %41, %44 : vector<16x256xf32>
    %c0_39 = arith.constant 0 : index
    %c0_40 = arith.constant 0 : index
    %46 = vector.load %arg16[%c0_39, %c0_40] : memref<1x256xf32, #tpu.memory_space<vmem>>, vector<1x256xf32>
    %47 = vector.broadcast %46 : vector<1x256xf32> to vector<16x256xf32>
    %48 = arith.addf %45, %47 : vector<16x256xf32>
    %cst_41 = arith.constant 0.000000e+00 : f32
    %49 = vector.broadcast %cst_41 : f32 to vector<16x256xf32>
    %50 = arith.maximumf %48, %49 : vector<16x256xf32>
    %51 = arith.truncf %50 : vector<16x256xf32> to vector<16x256xbf16>
    %c0_42 = arith.constant 0 : index
    %c0_43 = arith.constant 0 : index
    %52 = vector.load %arg12[%c0_42, %c0_43] : memref<256x128xbf16, #tpu.memory_space<vmem>>, vector<256x128xbf16>
    %cst_44 = arith.constant dense<0.000000e+00> : vector<16x128xf32>
    %53 = tpu.matmul %51, %52, %cst_44 {dimension_numbers = #tpu.dot_dimension_numbers<[1], [0], [0], [1], [0, 0, 1, 1], [], []>} : vector<16x256xbf16>, vector<256x128xbf16>, vector<16x128xf32> -> vector<16x128xf32>
    %c0_45 = arith.constant 0 : index
    %c0_46 = arith.constant 0 : index
    %54 = vector.load %arg17[%c0_45, %c0_46] : memref<1x128xf32, #tpu.memory_space<vmem>>, vector<1x128xf32>
    %55 = vector.broadcast %54 : vector<1x128xf32> to vector<16x128xf32>
    %56 = arith.addf %53, %55 : vector<16x128xf32>
    %cst_47 = arith.constant 0.000000e+00 : f32
    %57 = vector.broadcast %cst_47 : f32 to vector<16x128xf32>
    %58 = arith.maximumf %56, %57 : vector<16x128xf32>
    %c0_48 = arith.constant 0 : index
    %c0_49 = arith.constant 0 : index
    %59 = vector.load %arg18[%c0_48, %c0_49] : memref<16x128xf32, #tpu.memory_space<vmem>>, vector<16x128xf32>
    tpu.vector_store %arg18[%c0_48, %c0_49], %58 {strides = array<i32>} : memref<16x128xf32, #tpu.memory_space<vmem>>, vector<16x128xf32>,
    return
  }
  func.func @transform_0(%arg0: i32) -> (i32, i32) {
    %c0_i32 = arith.constant 0 : i32
    %c0_i32_0 = arith.constant 0 : i32
    return %arg0, %c0_i32 : i32, i32
  }
  func.func @transform_1(%arg0: i32) -> (i32, i32) {
    %c0_i32 = arith.constant 0 : i32
    %c0_i32_0 = arith.constant 0 : i32
    return %arg0, %c0_i32 : i32, i32
  }
  func.func @transform_2(%arg0: i32) -> (i32, i32) {
    %c0_i32 = arith.constant 0 : i32
    %c0_i32_0 = arith.constant 0 : i32
    return %arg0, %c0_i32 : i32, i32
  }
  func.func @transform_3(%arg0: i32) -> (i32, i32) {
    %c0_i32 = arith.constant 0 : i32
    %c0_i32_0 = arith.constant 0 : i32
    return %arg0, %c0_i32 : i32, i32
  }
  func.func @transform_4(%arg0: i32) -> (i32, i32) {
    %c0_i32 = arith.constant 0 : i32
    %c0_i32_0 = arith.constant 0 : i32
    return %arg0, %c0_i32 : i32, i32
  }
  func.func @transform_5(%arg0: i32) -> (i32, i32) {
    %c0_i32 = arith.constant 0 : i32
    %c0_i32_0 = arith.constant 0 : i32
    %c0_i32_1 = arith.constant 0 : i32
    return %c0_i32, %c0_i32_0 : i32, i32
  }
  func.func @transform_6(%arg0: i32) -> (i32, i32) {
    %c0_i32 = arith.constant 0 : i32
    %c0_i32_0 = arith.constant 0 : i32
    %c0_i32_1 = arith.constant 0 : i32
    return %c0_i32, %c0_i32_0 : i32, i32
  }
  func.func @transform_7(%arg0: i32) -> (i32, i32) {
    %c0_i32 = arith.constant 0 : i32
    %c0_i32_0 = arith.constant 0 : i32
    %c0_i32_1 = arith.constant 0 : i32
    return %c0_i32, %c0_i32_0 : i32, i32
  }
  func.func @transform_8(%arg0: i32) -> (i32, i32) {
    %c0_i32 = arith.constant 0 : i32
    %c0_i32_0 = arith.constant 0 : i32
    %c0_i32_1 = arith.constant 0 : i32
    return %c0_i32, %c0_i32_0 : i32, i32
  }
  func.func @transform_9(%arg0: i32) -> (i32, i32) {
    %c0_i32 = arith.constant 0 : i32
    %c0_i32_0 = arith.constant 0 : i32
    %c0_i32_1 = arith.constant 0 : i32
    return %c0_i32, %c0_i32_0 : i32, i32
  }
  func.func @transform_10(%arg0: i32) -> (i32, i32) {
    %c0_i32 = arith.constant 0 : i32
    %c0_i32_0 = arith.constant 0 : i32
    %c0_i32_1 = arith.constant 0 : i32
    return %c0_i32, %c0_i32_0 : i32, i32
  }
  func.func @transform_11(%arg0: i32) -> (i32, i32) {
    %c0_i32 = arith.constant 0 : i32
    %c0_i32_0 = arith.constant 0 : i32
    %c0_i32_1 = arith.constant 0 : i32
    return %c0_i32, %c0_i32_0 : i32, i32
  }
  func.func @transform_12(%arg0: i32) -> (i32, i32) {
    %c0_i32 = arith.constant 0 : i32
    %c0_i32_0 = arith.constant 0 : i32
    %c0_i32_1 = arith.constant 0 : i32
    return %c0_i32, %c0_i32_0 : i32, i32
  }
  func.func @transform_13(%arg0: i32) -> (i32, i32) {
    %c0_i32 = arith.constant 0 : i32
    %c0_i32_0 = arith.constant 0 : i32
    %c0_i32_1 = arith.constant 0 : i32
    return %c0_i32, %c0_i32_0 : i32, i32
  }
  func.func @transform_14(%arg0: i32) -> (i32, i32) {
    %c0_i32 = arith.constant 0 : i32
    %c0_i32_0 = arith.constant 0 : i32
    %c0_i32_1 = arith.constant 0 : i32
    return %c0_i32, %c0_i32_0 : i32, i32
  }
  func.func @transform_15(%arg0: i32) -> (i32, i32) {
    %c0_i32 = arith.constant 0 : i32
    %c0_i32_0 = arith.constant 0 : i32
    %c0_i32_1 = arith.constant 0 : i32
    return %c0_i32, %c0_i32_0 : i32, i32
  }
  func.func @transform_16(%arg0: i32) -> (i32, i32) {
    %c0_i32 = arith.constant 0 : i32
    %c0_i32_0 = arith.constant 0 : i32
    %c0_i32_1 = arith.constant 0 : i32
    return %c0_i32, %c0_i32_0 : i32, i32
  }
  func.func @transform_17(%arg0: i32) -> (i32, i32) {
    %c0_i32 = arith.constant 0 : i32
    %c0_i32_0 = arith.constant 0 : i32
    return %arg0, %c0_i32 : i32, i32
  }
}

module attributes {stable_mosaic.version = 11 : i64} {
  func.func @cross_module_kernel(%arg0: i32, %arg1: memref<16x512xbf16, #tpu.memory_space<vmem>>, %arg2: memref<16x512xbf16, #tpu.memory_space<vmem>>, %arg3: memref<16x512xbf16, #tpu.memory_space<vmem>>, %arg4: memref<16x512xbf16, #tpu.memory_space<vmem>>, %arg5: memref<16x512xbf16, #tpu.memory_space<vmem>>, %arg6: memref<512x512xbf16, #tpu.memory_space<vmem>>, %arg7: memref<512x256xbf16, #tpu.memory_space<vmem>>, %arg8: memref<512x256xbf16, #tpu.memory_space<vmem>>, %arg9: memref<512x256xbf16, #tpu.memory_space<vmem>>, %arg10: memref<512x256xbf16, #tpu.memory_space<vmem>>, %arg11: memref<768x256xbf16, #tpu.memory_space<vmem>>, %arg12: memref<256x128xbf16, #tpu.memory_space<vmem>>, %arg13: memref<1x256xf32, #tpu.memory_space<vmem>>, %arg14: memref<1x256xf32, #tpu.memory_space<vmem>>, %arg15: memref<1x256xf32, #tpu.memory_space<vmem>>, %arg16: memref<1x256xf32, #tpu.memory_space<vmem>>, %arg17: memref<1x128xf32, #tpu.memory_space<vmem>>, %arg18: memref<16x128xf32, #tpu.memory_space<vmem>>) attributes {dimension_semantics = [#tpu.dimension_semantics<parallel>], iteration_bounds = array<i64: 2>, scalar_prefetch = 0 : i64, scratch_operands = 0 : i64, tpu.core_type = #tpu.core_type<tc>, window_params = [{transform_indices = @transform_0, window_bounds = array<i64: 16, 512>}, {transform_indices = @transform_1, window_bounds = array<i64: 16, 512>}, {transform_indices = @transform_2, window_bounds = array<i64: 16, 512>}, {transform_indices = @transform_3, window_bounds = array<i64: 16, 512>}, {transform_indices = @transform_4, window_bounds = array<i64: 16, 512>}, {pipeline_mode = #tpu.pipeline_mode<synchronous>, transform_indices = @transform_5, window_bounds = array<i64: 512, 512>}, {pipeline_mode = #tpu.pipeline_mode<synchronous>, transform_indices = @transform_6, window_bounds = array<i64: 512, 256>}, {pipeline_mode = #tpu.pipeline_mode<synchronous>, transform_indices = @transform_7, window_bounds = array<i64: 512, 256>}, {pipeline_mode = #tpu.pipeline_mode<synchronous>, transform_indices = @transform_8, window_bounds = array<i64: 512, 256>}, {pipeline_mode = #tpu.pipeline_mode<synchronous>, transform_indices = @transform_9, window_bounds = array<i64: 512, 256>}, {pipeline_mode = #tpu.pipeline_mode<synchronous>, transform_indices = @transform_10, window_bounds = array<i64: 768, 256>}, {pipeline_mode = #tpu.pipeline_mode<synchronous>, transform_indices = @transform_11, window_bounds = array<i64: 256, 128>}, {pipeline_mode = #tpu.pipeline_mode<synchronous>, transform_indices = @transform_12, window_bounds = array<i64: 1, 256>}, {pipeline_mode = #tpu.pipeline_mode<synchronous>, transform_indices = @transform_13, window_bounds = array<i64: 1, 256>}, {pipeline_mode = #tpu.pipeline_mode<synchronous>, transform_indices = @transform_14, window_bounds = array<i64: 1, 256>}, {pipeline_mode = #tpu.pipeline_mode<synchronous>, transform_indices = @transform_15, window_bounds = array<i64: 1, 256>}, {pipeline_mode = #tpu.pipeline_mode<synchronous>, transform_indices = @transform_16, window_bounds = array<i64: 1, 128>}, {transform_indices = @transform_17, window_bounds = array<i64: 16, 128>}]} {
    %c0 = arith.constant 0 : index
    %c0_0 = arith.constant 0 : index
    %0 = vector.load %arg1[%c0, %c0_0] : memref<16x512xbf16, #tpu.memory_space<vmem>>, vector<16x512xbf16>
    %c0_1 = arith.constant 0 : index
    %c0_2 = arith.constant 0 : index
    %1 = vector.load %arg2[%c0_1, %c0_2] : memref<16x512xbf16, #tpu.memory_space<vmem>>, vector<16x512xbf16>
    %c0_3 = arith.constant 0 : index
    %c0_4 = arith.constant 0 : index
    %2 = vector.load %arg3[%c0_3, %c0_4] : memref<16x512xbf16, #tpu.memory_space<vmem>>, vector<16x512xbf16>
    %c0_5 = arith.constant 0 : index
    %c0_6 = arith.constant 0 : index
    %3 = vector.load %arg4[%c0_5, %c0_6] : memref<16x512xbf16, #tpu.memory_space<vmem>>, vector<16x512xbf16>
    %c0_7 = arith.constant 0 : index
    %c0_8 = arith.constant 0 : index
    %4 = vector.load %arg5[%c0_7, %c0_8] : memref<16x512xbf16, #tpu.memory_space<vmem>>, vector<16x512xbf16>
    %c0_9 = arith.constant 0 : index
    %c0_10 = arith.constant 0 : index
    %5 = vector.load %arg6[%c0_9, %c0_10] : memref<512x512xbf16, #tpu.memory_space<vmem>>, vector<512x512xbf16>
    %cst = arith.constant dense<0.000000e+00> : vector<16x512xf32>
    %6 = tpu.matmul %0, %5, %cst {dimension_numbers = #tpu.dot_dimension_numbers<[1], [0], [0], [1], [0, 0, 1, 1], [], []>} : vector<16x512xbf16>, vector<512x512xbf16>, vector<16x512xf32> -> vector<16x512xf32>
    %7 = vector.extract_strided_slice %6 {offsets = [0, 0], sizes = [16, 256], strides = [1, 1]} : vector<16x512xf32> to vector<16x256xf32>
    %c0_11 = arith.constant 0 : index
    %c0_12 = arith.constant 0 : index
    %8 = vector.load %arg7[%c0_11, %c0_12] : memref<512x256xbf16, #tpu.memory_space<vmem>>, vector<512x256xbf16>
    %cst_13 = arith.constant dense<0.000000e+00> : vector<16x256xf32>
    %9 = tpu.matmul %4, %8, %cst_13 {dimension_numbers = #tpu.dot_dimension_numbers<[1], [0], [0], [1], [0, 0, 1, 1], [], []>} : vector<16x512xbf16>, vector<512x256xbf16>, vector<16x256xf32> -> vector<16x256xf32>
    %10 = arith.addf %7, %9 : vector<16x256xf32>
    %c0_14 = arith.constant 0 : index
    %c0_15 = arith.constant 0 : index
    %11 = vector.load %arg13[%c0_14, %c0_15] : memref<1x256xf32, #tpu.memory_space<vmem>>, vector<1x256xf32>
    %12 = vector.broadcast %11 : vector<1x256xf32> to vector<16x256xf32>
    %13 = arith.addf %10, %12 : vector<16x256xf32>
    %cst_16 = arith.constant 0.000000e+00 : f32
    %14 = vector.broadcast %cst_16 : f32 to vector<16x256xf32>
    %15 = arith.maximumf %13, %14 : vector<16x256xf32>
    %16 = vector.extract_strided_slice %6 {offsets = [0, 256], sizes = [16, 256], strides = [1, 1]} : vector<16x512xf32> to vector<16x256xf32>
    %c0_17 = arith.constant 0 : index
    %c0_18 = arith.constant 0 : index
    %17 = vector.load %arg8[%c0_17, %c0_18] : memref<512x256xbf16, #tpu.memory_space<vmem>>, vector<512x256xbf16>
    %cst_19 = arith.constant dense<0.000000e+00> : vector<16x256xf32>
    %18 = tpu.matmul %1, %17, %cst_19 {dimension_numbers = #tpu.dot_dimension_numbers<[1], [0], [0], [1], [0, 0, 1, 1], [], []>} : vector<16x512xbf16>, vector<512x256xbf16>, vector<16x256xf32> -> vector<16x256xf32>
    %19 = arith.addf %16, %18 : vector<16x256xf32>
    %c0_20 = arith.constant 0 : index
    %c0_21 = arith.constant 0 : index
    %20 = vector.load %arg14[%c0_20, %c0_21] : memref<1x256xf32, #tpu.memory_space<vmem>>, vector<1x256xf32>
    %21 = vector.broadcast %20 : vector<1x256xf32> to vector<16x256xf32>
    %22 = arith.addf %19, %21 : vector<16x256xf32>
    %cst_22 = arith.constant 0.000000e+00 : f32
    %23 = vector.broadcast %cst_22 : f32 to vector<16x256xf32>
    %24 = arith.maximumf %22, %23 : vector<16x256xf32>
    %c0_23 = arith.constant 0 : index
    %c0_24 = arith.constant 0 : index
    %25 = vector.load %arg9[%c0_23, %c0_24] : memref<512x256xbf16, #tpu.memory_space<vmem>>, vector<512x256xbf16>
    %cst_25 = arith.constant dense<0.000000e+00> : vector<16x256xf32>
    %26 = tpu.matmul %2, %25, %cst_25 {dimension_numbers = #tpu.dot_dimension_numbers<[1], [0], [0], [1], [0, 0, 1, 1], [], []>} : vector<16x512xbf16>, vector<512x256xbf16>, vector<16x256xf32> -> vector<16x256xf32>
    %c0_26 = arith.constant 0 : index
    %c0_27 = arith.constant 0 : index
    %27 = vector.load %arg10[%c0_26, %c0_27] : memref<512x256xbf16, #tpu.memory_space<vmem>>, vector<512x256xbf16>
    %cst_28 = arith.constant dense<0.000000e+00> : vector<16x256xf32>
    %28 = tpu.matmul %3, %27, %cst_28 {dimension_numbers = #tpu.dot_dimension_numbers<[1], [0], [0], [1], [0, 0, 1, 1], [], []>} : vector<16x512xbf16>, vector<512x256xbf16>, vector<16x256xf32> -> vector<16x256xf32>
    %29 = arith.addf %26, %28 : vector<16x256xf32>
    %c0_29 = arith.constant 0 : index
    %c0_30 = arith.constant 0 : index
    %30 = vector.load %arg15[%c0_29, %c0_30] : memref<1x256xf32, #tpu.memory_space<vmem>>, vector<1x256xf32>
    %31 = vector.broadcast %30 : vector<1x256xf32> to vector<16x256xf32>
    %32 = arith.addf %29, %31 : vector<16x256xf32>
    %cst_31 = arith.constant 0.000000e+00 : f32
    %33 = vector.broadcast %cst_31 : f32 to vector<16x256xf32>
    %34 = arith.maximumf %32, %33 : vector<16x256xf32>
    %35 = arith.truncf %15 : vector<16x256xf32> to vector<16x256xbf16>
    %c0_32 = arith.constant 0 : index
    %c0_33 = arith.constant 0 : index
    %36 = vector.load %arg11[%c0_32, %c0_33] : memref<768x256xbf16, #tpu.memory_space<vmem>>, vector<256x256xbf16>
    %cst_34 = arith.constant dense<0.000000e+00> : vector<16x256xf32>
    %37 = tpu.matmul %35, %36, %cst_34 {dimension_numbers = #tpu.dot_dimension_numbers<[1], [0], [0], [1], [0, 0, 1, 1], [], []>} : vector<16x256xbf16>, vector<256x256xbf16>, vector<16x256xf32> -> vector<16x256xf32>
    %38 = arith.truncf %24 : vector<16x256xf32> to vector<16x256xbf16>
    %c256 = arith.constant 256 : index
    %c0_35 = arith.constant 0 : index
    %39 = vector.load %arg11[%c256, %c0_35] : memref<768x256xbf16, #tpu.memory_space<vmem>>, vector<256x256xbf16>
    %cst_36 = arith.constant dense<0.000000e+00> : vector<16x256xf32>
    %40 = tpu.matmul %38, %39, %cst_36 {dimension_numbers = #tpu.dot_dimension_numbers<[1], [0], [0], [1], [0, 0, 1, 1], [], []>} : vector<16x256xbf16>, vector<256x256xbf16>, vector<16x256xf32> -> vector<16x256xf32>
    %41 = arith.addf %37, %40 : vector<16x256xf32>
    %42 = arith.truncf %34 : vector<16x256xf32> to vector<16x256xbf16>
    %c512 = arith.constant 512 : index
    %c0_37 = arith.constant 0 : index
    %43 = vector.load %arg11[%c512, %c0_37] : memref<768x256xbf16, #tpu.memory_space<vmem>>, vector<256x256xbf16>
    %cst_38 = arith.constant dense<0.000000e+00> : vector<16x256xf32>
    %44 = tpu.matmul %42, %43, %cst_38 {dimension_numbers = #tpu.dot_dimension_numbers<[1], [0], [0], [1], [0, 0, 1, 1], [], []>} : vector<16x256xbf16>, vector<256x256xbf16>, vector<16x256xf32> -> vector<16x256xf32>
    %45 = arith.addf %41, %44 : vector<16x256xf32>
    %c0_39 = arith.constant 0 : index
    %c0_40 = arith.constant 0 : index
    %46 = vector.load %arg16[%c0_39, %c0_40] : memref<1x256xf32, #tpu.memory_space<vmem>>, vector<1x256xf32>
    %47 = vector.broadcast %46 : vector<1x256xf32> to vector<16x256xf32>
    %48 = arith.addf %45, %47 : vector<16x256xf32>
    %cst_41 = arith.constant 0.000000e+00 : f32
    %49 = vector.broadcast %cst_41 : f32 to vector<16x256xf32>
    %50 = arith.maximumf %48, %49 : vector<16x256xf32>
    %51 = arith.truncf %50 : vector<16x256xf32> to vector<16x256xbf16>
    %c0_42 = arith.constant 0 : index
    %c0_43 = arith.constant 0 : index
    %52 = vector.load %arg12[%c0_42, %c0_43] : memref<256x128xbf16, #tpu.memory_space<vmem>>, vector<256x128xbf16>
    %cst_44 = arith.constant dense<0.000000e+00> : vector<16x128xf32>
    %53 = tpu.matmul %51, %52, %cst_44 {dimension_numbers = #tpu.dot_dimension_numbers<[1], [0], [0], [1], [0, 0, 1, 1], [], []>} : vector<16x256xbf16>, vector<256x128xbf16>, vector<16x128xf32> -> vector<16x128xf32>
    %c0_45 = arith.constant 0 : index
    %c0_46 = arith.constant 0 : index
    %54 = vector.load %arg17[%c0_45, %c0_46] : memref<1x128xf32, #tpu.memory_space<vmem>>, vector<1x128xf32>
    %55 = vector.broadcast %54 : vector<1x128xf32> to vector<16x128xf32>
    %56 = arith.addf %53, %55 : vector<16x128xf32>
    %cst_47 = arith.constant 0.000000e+00 : f32
    %57 = vector.broadcast %cst_47 : f32 to vector<16x128xf32>
    %58 = arith.maximumf %56, %57 : vector<16x128xf32>
    %c0_48 = arith.constant 0 : index
    %c0_49 = arith.constant 0 : index
    %59 = vector.load %arg18[%c0_48, %c0_49] : memref<16x128xf32, #tpu.memory_space<vmem>>, vector<16x128xf32>
    tpu.vector_store %arg18[%c0_48, %c0_49], %58 {strides = array<i32>} : memref<16x128xf32, #tpu.memory_space<vmem>>, vector<16x128xf32>,
    return
  }
  func.func @transform_0(%arg0: i32) -> (i32, i32) {
    %c0_i32 = arith.constant 0 : i32
    %c0_i32_0 = arith.constant 0 : i32
    return %arg0, %c0_i32 : i32, i32
  }
  func.func @transform_1(%arg0: i32) -> (i32, i32) {
    %c0_i32 = arith.constant 0 : i32
    %c0_i32_0 = arith.constant 0 : i32
    return %arg0, %c0_i32 : i32, i32
  }
  func.func @transform_2(%arg0: i32) -> (i32, i32) {
    %c0_i32 = arith.constant 0 : i32
    %c0_i32_0 = arith.constant 0 : i32
    return %arg0, %c0_i32 : i32, i32
  }
  func.func @transform_3(%arg0: i32) -> (i32, i32) {
    %c0_i32 = arith.constant 0 : i32
    %c0_i32_0 = arith.constant 0 : i32
    return %arg0, %c0_i32 : i32, i32
  }
  func.func @transform_4(%arg0: i32) -> (i32, i32) {
    %c0_i32 = arith.constant 0 : i32
    %c0_i32_0 = arith.constant 0 : i32
    return %arg0, %c0_i32 : i32, i32
  }
  func.func @transform_5(%arg0: i32) -> (i32, i32) {
    %c0_i32 = arith.constant 0 : i32
    %c0_i32_0 = arith.constant 0 : i32
    %c0_i32_1 = arith.constant 0 : i32
    return %c0_i32, %c0_i32_0 : i32, i32
  }
  func.func @transform_6(%arg0: i32) -> (i32, i32) {
    %c0_i32 = arith.constant 0 : i32
    %c0_i32_0 = arith.constant 0 : i32
    %c0_i32_1 = arith.constant 0 : i32
    return %c0_i32, %c0_i32_0 : i32, i32
  }
  func.func @transform_7(%arg0: i32) -> (i32, i32) {
    %c0_i32 = arith.constant 0 : i32
    %c0_i32_0 = arith.constant 0 : i32
    %c0_i32_1 = arith.constant 0 : i32
    return %c0_i32, %c0_i32_0 : i32, i32
  }
  func.func @transform_8(%arg0: i32) -> (i32, i32) {
    %c0_i32 = arith.constant 0 : i32
    %c0_i32_0 = arith.constant 0 : i32
    %c0_i32_1 = arith.constant 0 : i32
    return %c0_i32, %c0_i32_0 : i32, i32
  }
  func.func @transform_9(%arg0: i32) -> (i32, i32) {
    %c0_i32 = arith.constant 0 : i32
    %c0_i32_0 = arith.constant 0 : i32
    %c0_i32_1 = arith.constant 0 : i32
    return %c0_i32, %c0_i32_0 : i32, i32
  }
  func.func @transform_10(%arg0: i32) -> (i32, i32) {
    %c0_i32 = arith.constant 0 : i32
    %c0_i32_0 = arith.constant 0 : i32
    %c0_i32_1 = arith.constant 0 : i32
    return %c0_i32, %c0_i32_0 : i32, i32
  }
  func.func @transform_11(%arg0: i32) -> (i32, i32) {
    %c0_i32 = arith.constant 0 : i32
    %c0_i32_0 = arith.constant 0 : i32
    %c0_i32_1 = arith.constant 0 : i32
    return %c0_i32, %c0_i32_0 : i32, i32
  }
  func.func @transform_12(%arg0: i32) -> (i32, i32) {
    %c0_i32 = arith.constant 0 : i32
    %c0_i32_0 = arith.constant 0 : i32
    %c0_i32_1 = arith.constant 0 : i32
    return %c0_i32, %c0_i32_0 : i32, i32
  }
  func.func @transform_13(%arg0: i32) -> (i32, i32) {
    %c0_i32 = arith.constant 0 : i32
    %c0_i32_0 = arith.constant 0 : i32
    %c0_i32_1 = arith.constant 0 : i32
    return %c0_i32, %c0_i32_0 : i32, i32
  }
  func.func @transform_14(%arg0: i32) -> (i32, i32) {
    %c0_i32 = arith.constant 0 : i32
    %c0_i32_0 = arith.constant 0 : i32
    %c0_i32_1 = arith.constant 0 : i32
    return %c0_i32, %c0_i32_0 : i32, i32
  }
  func.func @transform_15(%arg0: i32) -> (i32, i32) {
    %c0_i32 = arith.constant 0 : i32
    %c0_i32_0 = arith.constant 0 : i32
    %c0_i32_1 = arith.constant 0 : i32
    return %c0_i32, %c0_i32_0 : i32, i32
  }
  func.func @transform_16(%arg0: i32) -> (i32, i32) {
    %c0_i32 = arith.constant 0 : i32
    %c0_i32_0 = arith.constant 0 : i32
    %c0_i32_1 = arith.constant 0 : i32
    return %c0_i32, %c0_i32_0 : i32, i32
  }
  func.func @transform_17(%arg0: i32) -> (i32, i32) {
    %c0_i32 = arith.constant 0 : i32
    %c0_i32_0 = arith.constant 0 : i32
    return %arg0, %c0_i32 : i32, i32
  }
}

</mosaic_0001>

<bundles_post_ra>
// kernel: tpu_custom_call.1
= control target key start
LH: loop header
LB: loop body
LE: loop exit
PB: predicated region body
PF: predicated region fallthrough
CT: control target
= control target key end

     0   :  { %s9133_s0 = inlined_call_operand.hbm [shape: bf16[32,512], index: 0, kind: input, shape index: {}]   ;;  %s9134_s1 = inlined_call_operand.hbm [shape: bf16[32,512], index: 1, kind: input, shape index: {}]   ;;  %s9135_s2 = inlined_call_operand.hbm [shape: bf16[32,512], index: 2, kind: input, shape index: {}]   ;;  %s9136_s3 = inlined_call_operand.hbm [shape: bf16[32,512], index: 3, kind: input, shape index: {}]   ;;  %s9137_s4 = inlined_call_operand.hbm [shape: bf16[32,512], index: 4, kind: input, shape index: {}]   ;;  %s9138_s5 = inlined_call_operand.hbm [shape: bf16[512,512], index: 5, kind: input, shape index: {}]   ;;  %s9139_s6 = inlined_call_operand.hbm [shape: bf16[512,256], index: 6, kind: input, shape index: {}]   ;;  %s9140_s7 = inlined_call_operand.hbm [shape: bf16[512,256], index: 7, kind: input, shape index: {}]   ;;  %s9141_s8 = inlined_call_operand.hbm [shape: bf16[512,256], index: 8, kind: input, shape index: {}]   ;;  %s9142_s9 = inlined_call_operand.hbm [shape: bf16[512,256], index: 9, kind: input, shape index: {}]   ;;  %s9143_s10 = inlined_call_operand.hbm [shape: bf16[768,256], index: 10, kind: input, shape index: {}]   ;;  %s9144_s11 = inlined_call_operand.hbm [shape: bf16[256,128], index: 11, kind: input, shape index: {}]   ;;  %s9145_s12 = inlined_call_operand.vmem [shape: f32[1,256], index: 12, kind: input, shape index: {}]   ;;  %s9146_s13 = inlined_call_operand.vmem [shape: f32[1,256], index: 13, kind: input, shape index: {}]   ;;  %s9147_s14 = inlined_call_operand.vmem [shape: f32[1,256], index: 14, kind: input, shape index: {}]   ;;  %s9148_s15 = inlined_call_operand.vmem [shape: f32[1,256], index: 15, kind: input, shape index: {}]   ;;  %s9149_s16 = inlined_call_operand.vmem [shape: f32[1,128], index: 16, kind: input, shape index: {}]   ;;  %s9150_s17 = inlined_call_operand.hbm [shape: f32[32,128], index: 17, kind: output, shape index: {}]  }
   0x1   :  { %9178 = sst [smem:[#allocation40_spill]] %s9133_s0 }
   0x2   :  { %9179 = sst [smem:[#allocation41_spill]] %s9134_s1 }
   0x3   :  { %9180 = sst [smem:[#allocation42_spill]] %s9136_s3 }
   0x4   :  { %9181 = sst [smem:[#allocation43_spill]] %s9138_s5 }
   0x5   :  { %9182 = sst [smem:[#allocation44_spill]] %s9139_s6 }
   0x6   :  { %9183 = sst [smem:[#allocation45_spill]] %s9140_s7 }
   0x7   :  { %9184 = sst [smem:[#allocation46_spill]] %s9141_s8 }
   0x8   :  { %9185 = sst [smem:[#allocation47_spill]] %s9142_s9 }
   0x9   :  { %9186 = sst [smem:[#allocation48_spill]] %s9143_s10 }
   0xa   :  { %9187 = sst [smem:[#allocation49_spill]] %s9144_s11 }
   0xb   :  { %9188 = sst [smem:[#allocation50_spill]] %s9145_s12 }
   0xc   :  { %9189 = sst [smem:[#allocation51_spill]] %s9146_s13 }
   0xd   :  { %9190 = sst [smem:[#allocation52_spill]] %s9147_s14 }
   0xe   :  { %9191 = sst [smem:[#allocation53_spill]] %s9148_s15 }
   0xf   :  { %9192 = sst [smem:[#allocation54_spill]] %s9149_s16 }
  0x10   :  { %9193 = sst [smem:[#allocation55_spill]] %s9150_s17 }
  0x11   :  { %22 = vsyncpa [#allocation3], 0 }
  0x12   :  { %24 = vsyncpa [#allocation3 + $0x1], 0 }
  0x13   :  { %25 = vsyncpa [#allocation6], 0 }
  0x14   :  { %27 = vsyncpa [#allocation6 + $0x1], 0 }
  0x15   :  { %28 = vsyncpa [#allocation9], 0 }
  0x16   :  { %30 = vsyncpa [#allocation9 + $0x1], 0 }
  0x17   :  { %31 = vsyncpa [#allocation12], 0 }
  0x18   :  { %32 = vsyncpa [#allocation15], 0 }
  0x19   :  { %33 = vsyncpa [#allocation18], 0 }
  0x1a   :  { %34 = vsyncpa [#allocation21], 0 }
  0x1b   :  { %35 = vsyncpa [#allocation4], 0 }
  0x1c   :  { %37 = vsyncpa [#allocation4 + $0x1], 0  ;;  %s8524_s24 = smov 0   ;;  %s8526_s25 = smov 0  }
  0x1d   :  { %s8528_s26 = smov 0   ;;  %s8530_s27 = smov 0  }
  0x1e LB: > { %9194 = sst [smem:[#allocation31_spill]] %s8405_s24  ;;  %s8548_s30 = sadd.s32 4294967295, %s8417_s27   ;;  %s8417_s27 = sphi %s8530_s27, %s9247_s27   ;;  %s8413_s26 = sphi %s8528_s26, %s9251_s26   ;;  %s8409_s25 = sphi %s8526_s25, %s9250_s25   ;;  %s8405_s24 = sphi %s8524_s24, %s9248_s24  }
  0x1f   : > { %9195 = sst [smem:[#allocation32_spill]] %s8409_s25  ;;  %p5181_p0 = scmp.ge.s32.totalorder %s8417_s27, 1 }
  0x20   : > { %9196 = sst [smem:[#allocation33_spill]] %s8417_s27  ;;  %p9170_p1 = scmp.eq.s32.totalorder %s8548_s30, 0 }
  0x21   : > { %s9197_s5 = sld [smem:[#allocation43_spill]]  ;;  %p456_p2 = scmp.lt.s32.totalorder %s8417_s27, 3 }
  0x22   : > { %9198 = sst [smem:[#allocation34_spill]] %s8548_s30  ;;  %s8419_s19 = smov [#allocation11]  }
  0x23   : > { %p8553_p3 = pnand %p5181_p0, %p456_p2  ;;  %s469_s1 = sshll.u32 %s8419_s19, 4  ;;  %s470_s1 = int_to_ptr.vmem [resolvable:$true] %s469_s1 }
  0x24   : > { %s9201_s7 = sld [smem:[#allocation45_spill]]  ;;  %s9154_s28 = smov 256  }
  0x25   : > { %p7860_p4 = pneg %p8553_p3  ;;  %s9160_s29 = smov 16  }
  0x26   : > { %s8422_s19 = smov [#allocation14]   ;;  %s9202_s9 = sld [smem:[#allocation47_spill]] }
  0x27   : > { %s467_s0 = sshll.u32 %s9197_s5, 4  ;;  %p8562_p6 = pnand %p7860_p4, %p9170_p1  ;;  %s468_s0 = int_to_ptr.hbm [resolvable:$true] %s467_s0 }
  0x28   : > { %s497_s21 = sshll.u32 %s8422_s19, 4  ;;  %s9156_s17 = smov 128   ;;  %s498_s21 = int_to_ptr.vmem [resolvable:$true] %s497_s21 }
  0x29   : > { %7863 = dma.hbm_to_vmem [thread:$0]  (!%p8562_p6), %s468_s0, 16384, %s470_s1, [#allocation12], %s9154_s28, %s9154_s28, %s9160_s29  }
  0x2a   : > { %s495_s23 = sshll.u32 %s9201_s7, 4  ;;  %s9158_s16 = smov 8   ;;  %s496_s23 = int_to_ptr.hbm [resolvable:$true] %s495_s23 }
  0x2b   : > { %7869 = dma.hbm_to_vmem [thread:$0]  (!%p8562_p6), %s496_s23, 8192, %s498_s21, [#allocation15], %s9156_s17, %s9156_s17, %s9158_s16  }
  0x2c   : > { %s523_s7 = sshll.u32 %s9202_s9, 4  ;;  %s8425_s0 = smov [#allocation17]   ;;  %s524_s7 = int_to_ptr.hbm [resolvable:$true] %s523_s7 }
  0x2d   : > { %s525_s1 = sshll.u32 %s8425_s0, 4  ;;  %s5180_s5 = sadd.s32 4294967294, %s8417_s27   ;;  %s526_s1 = int_to_ptr.vmem [resolvable:$true] %s525_s1 }
  0x2e   : > { %7875 = dma.hbm_to_vmem [thread:$0]  (!%p8562_p6), %s524_s7, 8192, %s526_s1, [#allocation18], %s9156_s17, %s9156_s17, %s9158_s16  }
  0x2f   : > { %s8589_s19 = sadd.s32 1, %s8417_s27   ;;  %s50_s22 = sadd.s32 1, %s8413_s26 }
  0x30   : > { %9203 = sst [smem:[#allocation35_spill]] %s8589_s19  ;;  %s47_s28 = ssub.s32 %s8417_s27, %s8589_s19 }
  0x31   : > { %p57_p7 = scmp.ne.s32.totalorder %s8413_s26, %s8409_s25  ;;  %p48_p8 = scmp.eq.s32.totalorder %s47_s28, 0 }
  0x32   : > { %p58_p9 = scmp.eq.s32.totalorder %s8417_s27, 0  ;;  %p63_p10 = scmp.ne.s32.totalorder %s8409_s25, %s8405_s24 }
  0x33   : > { %p443_p11 = scmp.eq.s32.totalorder %s8548_s30, 1  ;;  %p449_p2 = scmp.eq.s32.totalorder %s5180_s5, 1 }
  0x34   : > { %s8601_s23 = scalar_select %p48_p8, %s8413_s26, %s50_s22  }
  0x35   : > { %p59_p12 = por %p58_p9, %p57_p7  ;;  %p8605_p13 = por %p9170_p1, %p63_p10 }
  0x36   : > { %9204 = sst [smem:[#allocation36_spill]] %s8601_s23  ;;  %p8609_p0 = por %p443_p11, %p57_p7 }
  0x37   : > { %s9205_s7 = scalar_select %p8605_p13, 1, 0 }
  0x38   : > { %s9207_s21 = scalar_select %p8609_p0, 1, 0 }
  0x39   : > { %9206 = sst [smem:[#allocation37_spill]] %s9205_s7  ;;  %p7909_p4 = scmp.lt.s32.totalorder %s8417_s27, 2 }
  0x3a   : > { %9208 = sst [smem:[#allocation38_spill]] %s9207_s21  ;;  %s9166_s0 = sand.u32 1, %s8413_s26  }
  0x3b   : > { %p8615_p5 = por %p449_p2, %p63_p10  ;;  %s8621_s1 = sshll.u32 %s9166_s0, 5 }
  0x3c   : > { %s8624_s22 = sshll.u32 %s8417_s27, 5  ;;  %p8626_p8 = pnand %p7909_p4, %p59_p12 }
  0x3d   : > { %s9209_s28 = scalar_select %p8615_p5, 1, 0 }
  0x3e   : > { %s605_s16 = sand.u32 1, %s8417_s27   ;;  %s9212_s9 = sld [smem:[#allocation41_spill]] }
  0x3f   : > { %9210 = sst [smem:[#allocation39_spill]] %s9209_s28  ;;  %s609_s19 = scalar_lea.vmem [#allocation5], %s8621_s1 }
  0x40   : > { %s618_s24 = sshll.u32 %s609_s19, 4  ;;  %s8636_s0 = scalar_lea.sflag [#allocation6], %s605_s16  ;;  %s619_s24 = int_to_ptr.vmem [resolvable:$true] %s618_s24 }
  0x41   : > { %p8640_p9 = pneg %p8626_p8 }
  0x44   : > { %s615_s23 = scalar_lea.hbm %s9212_s9, %s8624_s22 }
  0x45   : > { %s616_s28 = sshll.u32 %s615_s23, 4  ;;  %s8064_s23 = scalar_lea.hbm %s9212_s9, 64  ;;  %s617_s28 = int_to_ptr.hbm [resolvable:$true] %s616_s28 }
  0x46   : > { %s8057_s21 = sshra.s32 %s617_s28, 4  ;;  %s8058_s21 = int_to_ptr.hbm [resolvable:$true] %s8057_s21 }
  0x47   : > { %s8059_s15 = scalar_lea.hbm %s8058_s21, 32  ;;  %p8065_p12 = scmp.lt.s32.totalorder %s8058_s21, %s9212_s9 }
  0x48   : > { %p8060_p7 = scmp.ne.s32.totalorder %s8058_s21, %s8059_s15  ;;  %p8066_p2 = scmp.lt.s32.totalorder %s8064_s23, %s8059_s15 }
  0x4a   : > { %p8062_p10 = pnand %p8640_p9, %p8060_p7  ;;  %p8067_p4 = por %p8066_p2, %p8065_p12 }
  0x4c   : > { %p8063_p11 = pneg %p8062_p10 }
  0x4e   : > { %p8068_p1 = pnand %p8067_p4, %p8063_p11 }
  0x50   : > { %8071 = shalt.err (!%p8068_p1)
}
  0x51   : > { %s9214_s13 = smov 16   ;;  %s9215_s12 = smov 256  }
  0x52   : > { %7888 = dma.hbm_to_vmem [thread:$0]  (!%p8626_p8), %s617_s28, 512, %s619_s24, %s8636_s0, %s9215_s12, %s9215_s12, %s9214_s13  }
  0x53   : > { %s9216_s3 = sld [smem:[#allocation42_spill]]  ;;  %s655_s21 = scalar_lea.vmem [#allocation8], %s8621_s1 }
  0x54   : > { %s664_s15 = sshll.u32 %s655_s21, 4  ;;  %s8663_s23 = scalar_lea.sflag [#allocation9], %s605_s16  ;;  %s665_s15 = int_to_ptr.vmem [resolvable:$true] %s664_s15 }
  0x59   : > { %s661_s30 = scalar_lea.hbm %s9216_s3, %s8624_s22  ;;  %s8094_s28 = scalar_lea.hbm %s9216_s3, 64 }
  0x5a   : > { %s662_s27 = sshll.u32 %s661_s30, 4  ;;  %s663_s27 = int_to_ptr.hbm [resolvable:$true] %s662_s27 }
  0x5b   : > { %s8087_s5 = sshra.s32 %s663_s27, 4  ;;  %s8088_s5 = int_to_ptr.hbm [resolvable:$true] %s8087_s5 }
  0x5c   : > { %s8089_s9 = scalar_lea.hbm %s8088_s5, 32  ;;  %p8095_p11 = scmp.lt.s32.totalorder %s8088_s5, %s9216_s3 }
  0x5d   : > { %p8090_p1 = scmp.ne.s32.totalorder %s8088_s5, %s8089_s9  ;;  %p8096_p12 = scmp.lt.s32.totalorder %s8094_s28, %s8089_s9 }
  0x5f   : > { %p8092_p7 = pnand %p8090_p1, %p8640_p9  ;;  %p8097_p2 = por %p8096_p12, %p8095_p11 }
  0x61   : > { %p8093_p10 = pneg %p8092_p7 }
  0x63   : > { %p8098_p4 = pnand %p8097_p2, %p8093_p10 }
  0x65   : > { %8101 = shalt.err (!%p8098_p4)
}
  0x66   : > { %7894 = dma.hbm_to_vmem [thread:$0]  (!%p8626_p8), %s663_s27, 512, %s665_s15, %s8663_s23, %s9215_s12, %s9215_s12, %s9214_s13  }
  0x67   : > { %s9217_s6 = sld [smem:[#allocation44_spill]]  ;;  %s8426_s21 = smov [#allocation13]  }
  0x68   : > { %s483_s5 = sshll.u32 %s8426_s21, 4  ;;  %s9218_s8 = sld [smem:[#allocation46_spill]]  ;;  %s484_s5 = int_to_ptr.vmem [resolvable:$true] %s483_s5 }
  0x69   : > { %s9219_s29 = smov 8   ;;  %s9220_s19 = smov 128  }
  0x6a   : > { %s8427_s27 = smov [#allocation16]   ;;  %s9221_s10 = sld [smem:[#allocation48_spill]] }
  0x6b   : > { %s511_s15 = sshll.u32 %s8427_s27, 4  ;;  %s9222_s11 = sld [smem:[#allocation49_spill]]  ;;  %s512_s15 = int_to_ptr.vmem [resolvable:$true] %s511_s15 }
  0x6c   : > { %s8429_s3 = smov [#allocation20]   ;;  %s8430_s16 = smov 64  }
  0x6d   : > { %s481_s7 = sshll.u32 %s9217_s6, 4  ;;  %s553_s27 = sshll.u32 %s8429_s3, 4  ;;  %s482_s7 = int_to_ptr.hbm [resolvable:$true] %s481_s7  ;;  %s554_s27 = int_to_ptr.vmem [resolvable:$true] %s553_s27 }
  0x6e   : > { %s509_s28 = sshll.u32 %s9218_s8, 4  ;;  %s9223_s9 = sld [smem:[#allocation40_spill]]  ;;  %s510_s28 = int_to_ptr.hbm [resolvable:$true] %s509_s28 }
  0x6f   : > { %7866 = dma.hbm_to_vmem [thread:$0]  (!%p8562_p6), %s482_s7, 8192, %s484_s5, [#allocation12], %s9220_s19, %s9220_s19, %s9219_s29  }
  0x70   : > { %s537_s30 = sshll.u32 %s9221_s10, 4  ;;  %s8428_s5 = smov [#allocation19]   ;;  %s538_s30 = int_to_ptr.hbm [resolvable:$true] %s537_s30 }
  0x71   : > { %7872 = dma.hbm_to_vmem [thread:$0]  (!%p8562_p6), %s510_s28, 8192, %s512_s15, [#allocation15], %s9220_s19, %s9220_s19, %s9219_s29  }
  0x72   : > { %s551_s7 = sshll.u32 %s9222_s11, 4  ;;  %s539_s24 = sshll.u32 %s8428_s5, 4  ;;  %s552_s7 = int_to_ptr.hbm [resolvable:$true] %s551_s7  ;;  %s540_s24 = int_to_ptr.vmem [resolvable:$true] %s539_s24 }
  0x73   : > { %7878 = dma.hbm_to_vmem [thread:$0]  (!%p8562_p6), %s538_s30, 12288, %s540_s24, [#allocation18], %s9220_s19, %s9220_s19, %s9219_s29  }
  0x74   : > { %s8431_s28 = smov 4   ;;  %s592_s5 = scalar_lea.hbm %s9223_s9, %s8624_s22 }
  0x75   : > { %7881 = dma.hbm_to_vmem [thread:$0]  (!%p8562_p6), %s552_s7, 2048, %s554_s27, [#allocation21], %s8430_s16, %s8430_s16, %s8431_s28  }
  0x76   : > { %s586_s6 = scalar_lea.vmem [#allocation2], %s8621_s1  ;;  %s593_s10 = sshll.u32 %s592_s5, 4  ;;  %s594_s10 = int_to_ptr.hbm [resolvable:$true] %s593_s10 }
  0x77   : > { %s595_s8 = sshll.u32 %s586_s6, 4  ;;  %s9224_s11 = sand.u32 1, %s8413_s26   ;;  %s596_s8 = int_to_ptr.vmem [resolvable:$true] %s595_s8 }
  0x78   : > { %s583_s25 = scalar_lea.sflag [#allocation3], %s9224_s11  ;;  %s8237_s29 = sshra.s32 %s594_s10, 4  ;;  %s8238_s29 = int_to_ptr.hbm [resolvable:$true] %s8237_s29 }
  0x79   : > { %s8239_s19 = scalar_lea.hbm %s8238_s29, 32  ;;  %s8244_s7 = scalar_lea.hbm %s9223_s9, 64 }
  0x7a   : > { %p8240_p1 = scmp.ne.s32.totalorder %s8238_s29, %s8239_s19  ;;  %p8245_p6 = scmp.lt.s32.totalorder %s8238_s29, %s9223_s9 }
  0x7b   : > { %p8246_p11 = scmp.lt.s32.totalorder %s8244_s7, %s8239_s19 }
  0x7c   : > { %p8242_p7 = pnand %p8240_p1, %p8640_p9 }
  0x7d   : > { %p8247_p12 = por %p8246_p11, %p8245_p6 }
  0x7e   : > { %p8243_p10 = pneg %p8242_p7 }
  0x80   : > { %p8248_p2 = pnand %p8247_p12, %p8243_p10 }
  0x82   : > { %8251 = shalt.err (!%p8248_p2)
}
  0x83   : > { %7885 = dma.hbm_to_vmem [thread:$0]  (!%p8626_p8), %s594_s10, 512, %s596_s8, %s583_s25, %s9215_s12, %s9215_s12, %s9214_s13  }
  0x84   : > { %s638_s27 = scalar_lea.hbm %s9135_s2, %s8624_s22  ;;  %s632_s16 = scalar_lea.vmem [#allocation7], %s8621_s1 }
  0x85   : > { %s641_s28 = sshll.u32 %s632_s16, 4  ;;  %s639_s15 = sshll.u32 %s638_s27, 4  ;;  %s642_s28 = int_to_ptr.vmem [resolvable:$true] %s641_s28  ;;  %s640_s15 = int_to_ptr.hbm [resolvable:$true] %s639_s15 }
  0x86   : > { %s8267_s21 = sshra.s32 %s640_s15, 4  ;;  %s8274_s8 = scalar_lea.hbm %s9135_s2, 64  ;;  %s8268_s21 = int_to_ptr.hbm [resolvable:$true] %s8267_s21 }
  0x87   : > { %s8269_s5 = scalar_lea.hbm %s8268_s21, 32  ;;  %p8275_p10 = scmp.lt.s32.totalorder %s8268_s21, %s9135_s2 }
  0x88   : > { %p8270_p4 = scmp.ne.s32.totalorder %s8268_s21, %s8269_s5  ;;  %p8276_p6 = scmp.lt.s32.totalorder %s8274_s8, %s8269_s5 }
  0x8a   : > { %p8272_p1 = pnand %p8270_p4, %p8640_p9  ;;  %p8277_p11 = por %p8276_p6, %p8275_p10 }
  0x8c   : > { %p8273_p7 = pneg %p8272_p1 }
  0x8e   : > { %p8278_p12 = pnand %p8277_p11, %p8273_p7 }
  0x90   : > { %8281 = shalt.err (!%p8278_p12)
}
  0x91   : > { %7891 = dma.hbm_to_vmem [thread:$0]  (!%p8626_p8), %s640_s15, 512, %s642_s28, %s8636_s0, %s9215_s12, %s9215_s12, %s9214_s13  }
  0x92   : > { %s684_s7 = scalar_lea.hbm %s9137_s4, %s8624_s22  ;;  %s678_s24 = scalar_lea.vmem [#allocation10], %s8621_s1 }
  0x93   : > { %s687_s3 = sshll.u32 %s678_s24, 4  ;;  %s685_s6 = sshll.u32 %s684_s7, 4  ;;  %s688_s3 = int_to_ptr.vmem [resolvable:$true] %s687_s3  ;;  %s686_s6 = int_to_ptr.hbm [resolvable:$true] %s685_s6 }
  0x94   : > { %s8297_s11 = sshra.s32 %s686_s6, 4  ;;  %s8304_s0 = scalar_lea.hbm %s9137_s4, 64  ;;  %s8298_s11 = int_to_ptr.hbm [resolvable:$true] %s8297_s11 }
  0x95   : > { %s8299_s27 = scalar_lea.hbm %s8298_s11, 32  ;;  %p8305_p7 = scmp.lt.s32.totalorder %s8298_s11, %s9137_s4 }
  0x96   : > { %p8300_p2 = scmp.ne.s32.totalorder %s8298_s11, %s8299_s27  ;;  %p8306_p10 = scmp.lt.s32.totalorder %s8304_s0, %s8299_s27 }
  0x98   : > { %p8302_p4 = pnand %p8300_p2, %p8640_p9  ;;  %p8307_p6 = por %p8306_p10, %p8305_p7 }
  0x9a   : > { %p8303_p1 = pneg %p8302_p4 }
  0x9c   : > { %p8308_p11 = pnand %p8307_p6, %p8303_p1 }
  0x9e   : > { %8311 = shalt.err (!%p8308_p11)
}
  0x9f   : > { %7897 = dma.hbm_to_vmem [thread:$0]  (!%p8626_p8), %s686_s6, 512, %s688_s3, %s8663_s23, %s9215_s12, %s9215_s12, %s9214_s13  }
  0xa0   : > { %699 = sbr.rel (%p8553_p3) target bundleno = 1024 (0x400), region = 88  ;;  %s9225_s14 = sld [smem:[#allocation32_spill]] (!%p8553_p3) }
  0xa6   : > { %s8769_s22 = sand.u32 1, %s9225_s14  }
  0xa7   : > { %s5211_s5 = sshll.u32 %s8769_s22, 5  ;;  %s702_s29 = scalar_lea.sflag [#allocation3], %s8769_s22 }
  0xa8   : > { %s8773_s19 = scalar_lea.vmem [#allocation2], %s5211_s5 }
  0xa9   : > { %8372 = dma.done.wait (%p8605_p13), %s702_s29, 512  }
  0xaa   : > { %8374 = vsyncadd (%p8605_p13), %s702_s29, 4294966784  ;;  %s9227_s17 = sld [smem:[#allocation34_spill]]  ;;  %s8780_s18 = scalar_lea.vmem [#allocation5], %s5211_s5 }
  0xb0   : > { %s711_s12 = sand.u32 1, %s9227_s17  }
  0xb1   : > { %s712_s13 = scalar_lea.sflag [#allocation6], %s711_s12 }
  0xb2   : > { %8376 = dma.done.wait (%p8605_p13), %s712_s13, 1024  }
  0xb3   : > { %8378 = vsyncadd (%p8605_p13), %s712_s13, 4294966272  ;;  %s8786_s23 = scalar_lea.vmem [#allocation7], %s5211_s5  ;;  %s732_s8 = scalar_lea.sflag [#allocation9], %s711_s12 }
  0xb4   : > { %s8788_s10 = scalar_lea.vmem [#allocation8], %s5211_s5 }
  0xb5   : > { %8380 = dma.done.wait (%p8605_p13), %s732_s8, 1024  }
  0xb6   : > { %8382 = vsyncadd (%p8605_p13), %s732_s8, 4294966272  ;;  %s8794_s25 = scalar_lea.vmem [#allocation10], %s5211_s5  ;;  %p9228_p3 = scmp.eq.s32.totalorder %s9227_s17, 0 }
  0xb8   : > { %8384 = dma.done.wait (%p9228_p3), [#allocation12], 24576   ;;  %p9229_p8 = pmov %p9228_p3 }
  0xb9   : > { %p9230_p9 = pmov %p9228_p3 }
  0xba   : > { %8386 = vsyncadd (%p9229_p8), [#allocation12], 4294942720 }
  0xbb   : > { %8388 = dma.done.wait (%p9230_p9), [#allocation15], 16384   ;;  %p9231_p12 = pmov %p9228_p3 }
  0xbc   : > { %p9232_p2 = pmov %p9228_p3 }
  0xbd   : > { %8390 = vsyncadd (%p9231_p12), [#allocation15], 4294950912 }
  0xbe   : > { %8392 = dma.done.wait (%p9232_p2), [#allocation18], 20480   ;;  %p9233_p4 = pmov %p9232_p2 }
  0xbf   : > { %p9234_p13 = pmov %p9232_p2 }
  0xc0   : > { %8394 = vsyncadd (%p9233_p4), [#allocation18], 4294946816 }
  0xc1   : > { %8396 = dma.done.wait (%p9234_p13), [#allocation21], 2048   ;;  %p9235_p1 = pmov %p9232_p2 }
  0xc2   : > { %v5354_v0 = vld [vmem:[#allocation11 + $0xe0] sm:$0xf]  ;;  %v7353_v1 = vld [vmem:[#allocation11 + $0xec] sm:$0xf0]  ;;  %s9236_s7 = sld [smem:[#allocation50_spill]]  ;;  %s7819_s12 = sshll.u32 %s9227_s17, 4 }
  0xc3   : > { %8398 = vsyncadd (%p9235_p1), [#allocation21], 4294965248  ;;  %v5482_v2 = vld [vmem:[#allocation11 + $0x1e0] sm:$0xf]  ;;  %v5355_v3 = vor.u32 %v7353_v1, %v5354_v0  ;;  %v7385_v4 = vld [vmem:[#allocation11 + $0x1ec] sm:$0xf0] }
  0xc4   : > { %v5610_v5 = vld [vmem:[#allocation11 + $0x2e0] sm:$0xf]  ;;  %v7417_v6 = vld [vmem:[#allocation11 + $0x2ec] sm:$0xf0]  ;;  %v5483_v7 = vor.u32 %v7385_v4, %v5482_v2  ;;  %s9237_s6 = sld [smem:[#allocation51_spill]]  ;;  %s4939_s24 = scalar_lea.sflag [#allocation4], %s8769_s22 }
  0xc5   : > { %v5611_v8 = vor.u32 %v7417_v6, %v5610_v5  ;;  %v5738_v9 = vld [vmem:[#allocation11 + $0x3e0] sm:$0xf]  ;;  %v7449_v10 = vld [vmem:[#allocation11 + $0x3ec] sm:$0xf0]  ;;  %1666 = vmatpush.bf16.msra.mxu0 %v5355_v3  ;;  %s9238_s0 = sld [smem:[#allocation52_spill]] }
  0xc6   : > { %v5338_v11 = vld [vmem:[#allocation11 + $0xc0] sm:$0xf]  ;;  %v5739_v12 = vor.u32 %v7449_v10, %v5738_v9  ;;  %v7349_v13 = vld [vmem:[#allocation11 + $0xcc] sm:$0xf0]  ;;  %1680 = vmatpush.bf16.msra.mxu1 %v5483_v7  ;;  %s9239_s14 = sld [smem:[#allocation53_spill]] }
  0xc7   : > { %v5466_v14 = vld [vmem:[#allocation11 + $0x1c0] sm:$0xf]  ;;  %v7381_v15 = vld [vmem:[#allocation11 + $0x1cc] sm:$0xf0]  ;;  %1694 = vmatpush.bf16.msra.mxu2 %v5611_v8  ;;  %v5339_v16 = vor.u32 %v7349_v13, %v5338_v11  ;;  %s9240_s29 = sld [smem:[#allocation54_spill]] }
  0xc8   : > { %v5467_v17 = vor.u32 %v7381_v15, %v5466_v14  ;;  %v5594_v18 = vld [vmem:[#allocation11 + $0x2c0] sm:$0xf]  ;;  %v7413_v19 = vld [vmem:[#allocation11 + $0x2cc] sm:$0xf0]  ;;  %1708 = vmatpush.bf16.msra.mxu3 %v5739_v12  ;;  %s9241_s8 = sld [smem:[#allocation55_spill]] }
  0xc9   : > { %v5722_v20 = vld [vmem:[#allocation11 + $0x3c0] sm:$0xf]  ;;  %v5595_v21 = vor.u32 %v7413_v19, %v5594_v18  ;;  %v7445_v22 = vld [vmem:[#allocation11 + $0x3cc] sm:$0xf0]  ;;  %1667 = vmatpush.bf16.msra.mxu0 %v5339_v16 }
  0xca   : > { %v5322_v23 = vld [vmem:[#allocation11 + $0xa0] sm:$0xf]  ;;  %v7345_v24 = vld [vmem:[#allocation11 + $0xac] sm:$0xf0]  ;;  %v5723_v25 = vor.u32 %v7445_v22, %v5722_v20  ;;  %1681 = vmatpush.bf16.msra.mxu1 %v5467_v17 }
  0xcb   : > { %v5450_v26 = vld [vmem:[#allocation11 + $0x1a0] sm:$0xf]  ;;  %v7377_v27 = vld [vmem:[#allocation11 + $0x1ac] sm:$0xf0]  ;;  %v5323_v29 = vor.u32 %v7345_v24, %v5322_v23  ;;  %1695 = vmatpush.bf16.msra.mxu2 %v5595_v21 }
  0xcc   : > { %v5578_v28 = vld [vmem:[#allocation11 + $0x2a0] sm:$0xf]  ;;  %v7409_v30 = vld [vmem:[#allocation11 + $0x2ac] sm:$0xf0]  ;;  %v5451_v33 = vor.u32 %v7377_v27, %v5450_v26  ;;  %1709 = vmatpush.bf16.msra.mxu3 %v5723_v25 }
  0xcd   : > { %v5706_v31 = vld [vmem:[#allocation11 + $0x3a0] sm:$0xf]  ;;  %v7441_v32 = vld [vmem:[#allocation11 + $0x3ac] sm:$0xf0]  ;;  %v5579_v34 = vor.u32 %v7409_v30, %v5578_v28  ;;  %1668 = vmatpush.bf16.msra.mxu0 %v5323_v29  ;;  %v7351_v28 = vld [vmem:[#allocation11 + $0xe4] sm:$0xf] }
  0xce   : > { %v5306_v35 = vld [vmem:[#allocation11 + $0x80] sm:$0xf]  ;;  %v7341_v36 = vld [vmem:[#allocation11 + $0x8c] sm:$0xf0]  ;;  %v5707_v38 = vor.u32 %v7441_v32, %v5706_v31  ;;  %1682 = vmatpush.bf16.msra.mxu1 %v5451_v33  ;;  %v5356_v29 = vld [vmem:[#allocation11 + $0xf0] sm:$0xf0] }
  0xcf   : > { %v5434_v37 = vld [vmem:[#allocation11 + $0x180] sm:$0xf]  ;;  %v7373_v39 = vld [vmem:[#allocation11 + $0x18c] sm:$0xf0]  ;;  %v5307_v44 = vor.u32 %v7341_v36, %v5306_v35  ;;  %1696 = vmatpush.bf16.msra.mxu2 %v5579_v34  ;;  %v7383_v30 = vld [vmem:[#allocation11 + $0x1e4] sm:$0xf] }
  0xd0   : > { %v5562_v40 = vld [vmem:[#allocation11 + $0x280] sm:$0xf]  ;;  %v7405_v41 = vld [vmem:[#allocation11 + $0x28c] sm:$0xf0]  ;;  %v5435_v45 = vor.u32 %v7373_v39, %v5434_v37  ;;  %1710 = vmatpush.bf16.msra.mxu3 %v5707_v38  ;;  %v5484_v32 = vld [vmem:[#allocation11 + $0x1f0] sm:$0xf0] }
  0xd1   : > { %v5690_v42 = vld [vmem:[#allocation11 + $0x380] sm:$0xf]  ;;  %v7437_v43 = vld [vmem:[#allocation11 + $0x38c] sm:$0xf0]  ;;  %v5563_v46 = vor.u32 %v7405_v41, %v5562_v40  ;;  %1669 = vmatpush.bf16.msra.mxu0 %v5307_v44  ;;  %v7415_v33 = vld [vmem:[#allocation11 + $0x2e4] sm:$0xf]  ;;  %v5359_v40 = vor.u32 %v7351_v28, %v5356_v29  ;;  %v5487_v41 = vor.u32 %v7383_v30, %v5484_v32 }
  0xd2   : > { %v5290_v47 = vld [vmem:[#allocation11 + $0x60] sm:$0xf]  ;;  %v7337_v48 = vld [vmem:[#allocation11 + $0x6c] sm:$0xf0]  ;;  %v5691_v50 = vor.u32 %v7437_v43, %v5690_v42  ;;  %1683 = vmatpush.bf16.msra.mxu1 %v5435_v45  ;;  %v5612_v34 = vld [vmem:[#allocation11 + $0x2f0] sm:$0xf0] }
  0xd3   : > { %v5418_v49 = vld [vmem:[#allocation11 + $0x160] sm:$0xf]  ;;  %v7369_v51 = vld [vmem:[#allocation11 + $0x16c] sm:$0xf0]  ;;  %v5291_v56 = vor.u32 %v7337_v48, %v5290_v47  ;;  %1697 = vmatpush.bf16.msra.mxu2 %v5563_v46  ;;  %v7447_v37 = vld [vmem:[#allocation11 + $0x3e4] sm:$0xf]  ;;  %v5615_v42 = vor.u32 %v7415_v33, %v5612_v34 }
  0xd4   : > { %v5546_v52 = vld [vmem:[#allocation11 + $0x260] sm:$0xf]  ;;  %v7401_v53 = vld [vmem:[#allocation11 + $0x26c] sm:$0xf0]  ;;  %v5419_v57 = vor.u32 %v7369_v51, %v5418_v49  ;;  %1711 = vmatpush.bf16.msra.mxu3 %v5691_v50  ;;  %v5740_v38 = vld [vmem:[#allocation11 + $0x3f0] sm:$0xf0] }
  0xd5   : > { %v5674_v54 = vld [vmem:[#allocation11 + $0x360] sm:$0xf]  ;;  %v7433_v55 = vld [vmem:[#allocation11 + $0x36c] sm:$0xf0]  ;;  %v5547_v58 = vor.u32 %v7401_v53, %v5546_v52  ;;  %1670 = vmatpush.bf16.msra.mxu0 %v5291_v56  ;;  %v7347_v43 = vld [vmem:[#allocation11 + $0xc4] sm:$0xf]  ;;  %v5743_v46 = vor.u32 %v7447_v37, %v5740_v38 }
  0xd6   : > { %v5274_v59 = vld [vmem:[#allocation11 + $0x40] sm:$0xf]  ;;  %v7333_v60 = vld [vmem:[#allocation11 + $0x4c] sm:$0xf0]  ;;  %v5675_v62 = vor.u32 %v7433_v55, %v5674_v54  ;;  %1684 = vmatpush.bf16.msra.mxu1 %v5419_v57  ;;  %v5340_v44 = vld [vmem:[#allocation11 + $0xd0] sm:$0xf0] }
  0xd7   : > { %v5402_v61 = vld [vmem:[#allocation11 + $0x140] sm:$0xf]  ;;  %v7365_v63 = vld [vmem:[#allocation11 + $0x14c] sm:$0xf0]  ;;  %v5275_v4 = vor.u32 %v7333_v60, %v5274_v59  ;;  %1698 = vmatpush.bf16.msra.mxu2 %v5547_v58  ;;  %v7379_v45 = vld [vmem:[#allocation11 + $0x1c4] sm:$0xf]  ;;  %v5343_v52 = vor.u32 %v7347_v43, %v5340_v44 }
  0xd8   : > { %v5530_v0 = vld [vmem:[#allocation11 + $0x240] sm:$0xf]  ;;  %v7397_v1 = vld [vmem:[#allocation11 + $0x24c] sm:$0xf0]  ;;  %v5403_v5 = vor.u32 %v7365_v63, %v5402_v61  ;;  %1712 = vmatpush.bf16.msra.mxu3 %v5675_v62  ;;  %v5468_v47 = vld [vmem:[#allocation11 + $0x1d0] sm:$0xf0] }
  0xd9   : > { %v5658_v2 = vld [vmem:[#allocation11 + $0x340] sm:$0xf]  ;;  %v7429_v3 = vld [vmem:[#allocation11 + $0x34c] sm:$0xf0]  ;;  %v5531_v6 = vor.u32 %v7397_v1, %v5530_v0  ;;  %1671 = vmatpush.bf16.msra.mxu0 %v5275_v4  ;;  %v7411_v48 = vld [vmem:[#allocation11 + $0x2c4] sm:$0xf]  ;;  %v5471_v56 = vor.u32 %v7379_v45, %v5468_v47 }
  0xda   : > { %v5258_v7 = vld [vmem:[#allocation11 + $0x20] sm:$0xf]  ;;  %v7329_v8 = vld [vmem:[#allocation11 + $0x2c] sm:$0xf0]  ;;  %v5659_v10 = vor.u32 %v7429_v3, %v5658_v2  ;;  %1685 = vmatpush.bf16.msra.mxu1 %v5403_v5  ;;  %v5596_v49 = vld [vmem:[#allocation11 + $0x2d0] sm:$0xf0] }
  0xdb   : > { %v5386_v9 = vld [vmem:[#allocation11 + $0x120] sm:$0xf]  ;;  %v7361_v11 = vld [vmem:[#allocation11 + $0x12c] sm:$0xf0]  ;;  %v5259_v16 = vor.u32 %v7329_v8, %v5258_v7  ;;  %1699 = vmatpush.bf16.msra.mxu2 %v5531_v6  ;;  %v7443_v50 = vld [vmem:[#allocation11 + $0x3c4] sm:$0xf]  ;;  %v5599_v57 = vor.u32 %v7411_v48, %v5596_v49 }
  0xdc   : > { %v5514_v12 = vld [vmem:[#allocation11 + $0x220] sm:$0xf]  ;;  %v7393_v13 = vld [vmem:[#allocation11 + $0x22c] sm:$0xf0]  ;;  %v5387_v19 = vor.u32 %v7361_v11, %v5386_v9  ;;  %1713 = vmatpush.bf16.msra.mxu3 %v5659_v10  ;;  %v5724_v51 = vld [vmem:[#allocation11 + $0x3d0] sm:$0xf0] }
  0xdd   : > { %v5642_v14 = vld [vmem:[#allocation11 + $0x320] sm:$0xf]  ;;  %v7425_v15 = vld [vmem:[#allocation11 + $0x32c] sm:$0xf0]  ;;  %v5515_v20 = vor.u32 %v7393_v13, %v5514_v12  ;;  %1672 = vmatpush.bf16.msra.mxu0 %v5259_v16  ;;  %v7343_v53 = vld [vmem:[#allocation11 + $0xa4] sm:$0xf]  ;;  %v5727_v61 = vor.u32 %v7443_v50, %v5724_v51 }
  0xde   : > { %v5242_v17 = vld [vmem:[#allocation11] sm:$0xf]  ;;  %v7325_v18 = vld [vmem:[#allocation11 + $0xc] sm:$0xf0]  ;;  %v5643_v24 = vor.u32 %v7425_v15, %v5642_v14  ;;  %1686 = vmatpush.bf16.msra.mxu1 %v5387_v19  ;;  %v5324_v54 = vld [vmem:[#allocation11 + $0xb0] sm:$0xf0] }
  0xdf   : > { %v5370_v21 = vld [vmem:[#allocation11 + $0x100] sm:$0xf]  ;;  %v7357_v22 = vld [vmem:[#allocation11 + $0x10c] sm:$0xf0]  ;;  %v5243_v31 = vor.u32 %v7325_v18, %v5242_v17  ;;  %1700 = vmatpush.bf16.msra.mxu2 %v5515_v20  ;;  %v7375_v55 = vld [vmem:[#allocation11 + $0x1a4] sm:$0xf]  ;;  %v5327_v5 = vor.u32 %v7343_v53, %v5324_v54 }
  0xe0   : > { %v5498_v23 = vld [vmem:[#allocation11 + $0x200] sm:$0xf]  ;;  %v7389_v25 = vld [vmem:[#allocation11 + $0x20c] sm:$0xf0]  ;;  %v5371_v35 = vor.u32 %v7357_v22, %v5370_v21  ;;  %1714 = vmatpush.bf16.msra.mxu3 %v5643_v24  ;;  %v5452_v58 = vld [vmem:[#allocation11 + $0x1b0] sm:$0xf0] }
  0xe1   : > { %v5626_v26 = vld [vmem:[#allocation11 + $0x300] sm:$0xf]  ;;  %v7421_v27 = vld [vmem:[#allocation11 + $0x30c] sm:$0xf0]  ;;  %v5499_v36 = vor.u32 %v7389_v25, %v5498_v23  ;;  %1673 = vmatpush.bf16.msra.mxu0 %v5243_v31  ;;  %v7407_v59 = vld [vmem:[#allocation11 + $0x2a4] sm:$0xf]  ;;  %v5455_v10 = vor.u32 %v7375_v55, %v5452_v58 }
  0xe2   : > { %v5627_v39 = vor.u32 %v7421_v27, %v5626_v26  ;;  %1687 = vmatpush.bf16.msra.mxu1 %v5371_v35  ;;  %v5234_v60 = vld [vmem:[%s8773_s19 + $0x8] sm:$0xf]  ;;  %v5580_v62 = vld [vmem:[#allocation11 + $0x2b0] sm:$0xf0]  ;;  %v7439_v63 = vld [vmem:[#allocation11 + $0x3a4] sm:$0xf] }
  0xe3   : > { %1701 = vmatpush.bf16.msra.mxu2 %v5499_v36  ;;  %v7306_v0 = vld [vmem:[%s8773_s19 + $0x14] sm:$0xf0]  ;;  %v5708_v1 = vld [vmem:[#allocation11 + $0x3b0] sm:$0xf0]  ;;  %v7339_v2 = vld [vmem:[#allocation11 + $0x84] sm:$0xf]  ;;  %v5583_v11 = vor.u32 %v7407_v59, %v5580_v62 }
  0xe4   : > { %1715 = vmatpush.bf16.msra.mxu3 %v5627_v39  ;;  %v5308_v3 = vld [vmem:[#allocation11 + $0x90] sm:$0xf0]  ;;  %v8814_v4 = vor.u32 %v7306_v0, %v5234_v60  ;;  %v7371_v6 = vld [vmem:[#allocation11 + $0x184] sm:$0xf]  ;;  %v7304_v12 = vld [vmem:[%s8773_s19 + $0xc] sm:$0xf]  ;;  %v5711_v15 = vor.u32 %v7439_v63, %v5708_v1 }
  0xe5   : > { %1722 = vmatpush.bf16.msrb.mxu0 %v5359_v40  ;;  %v5436_v7 = vld [vmem:[#allocation11 + $0x190] sm:$0xf0]  ;;  %v7403_v8 = vld [vmem:[#allocation11 + $0x284] sm:$0xf]  ;;  %v5236_v13 = vld [vmem:[%s8773_s19 + $0x18] sm:$0xf0]  ;;  %v5311_v24 = vor.u32 %v7339_v2, %v5308_v3 }
  0xe6   : > { %1736 = vmatpush.bf16.msrb.mxu1 %v5487_v41  ;;  %v5564_v9 = vld [vmem:[#allocation11 + $0x290] sm:$0xf0]  ;;  %v5226_v14 = vld [vmem:[%s8773_s19] sm:$0xf]  ;;  %1702 = vmatmul.bf16.vlgmr.msra.gmra.mxu2 %v8814_v4  ;;  %v8820_v16 = vor.u32 %v7304_v12, %v5236_v13  ;;  %v7305_v17 = vld [vmem:[%s8773_s19 + $0xc] sm:$0xf0]  ;;  %v5439_v25 = vor.u32 %v7371_v6, %v5436_v7 }
  0xe7   : > { %1750 = vmatpush.bf16.msrb.mxu2 %v5615_v42  ;;  %v7303_v18 = vld [vmem:[%s8773_s19 + $0x4] sm:$0xf]  ;;  %v5228_v19 = vld [vmem:[%s8773_s19 + $0x10] sm:$0xf0]  ;;  %v8825_v22 = vor.u32 %v7305_v17, %v5226_v14  ;;  %v5567_v26 = vor.u32 %v7403_v8, %v5564_v9  ;;  %v5362_v9 = vld [vmem:[#allocation11 + $0xe8] sm:$0xf] }
  0xe8   : > { %1764 = vmatpush.bf16.msrb.mxu3 %v5743_v46  ;;  %v7435_v20 = vld [vmem:[#allocation11 + $0x384] sm:$0xf]  ;;  %v5692_v21 = vld [vmem:[#allocation11 + $0x390] sm:$0xf0]  ;;  %v8827_v23 = vor.u32 %v7303_v18, %v5228_v19  ;;  %v7386_v13 = vld [vmem:[#allocation11 + $0x1f4] sm:$0xf0] }
  0xe9   : > { %1723 = vmatpush.bf16.msrb.mxu0 %v5343_v52  ;;  %1716 = vmatmul.bf16.vlgmr.msra.gmra.mxu3 %v8820_v16  ;;  %v7335_v27 = vld [vmem:[#allocation11 + $0x64] sm:$0xf]  ;;  %v5292_v28 = vld [vmem:[#allocation11 + $0x70] sm:$0xf0]  ;;  %v5695_v30 = vor.u32 %v7435_v20, %v5692_v21  ;;  %v5618_v14 = vld [vmem:[#allocation11 + $0x2e8] sm:$0xf] }
  0xea   : > { %1737 = vmatpush.bf16.msrb.mxu1 %v5471_v56  ;;  %v7367_v29 = vld [vmem:[#allocation11 + $0x164] sm:$0xf]  ;;  %v5420_v31 = vld [vmem:[#allocation11 + $0x170] sm:$0xf0]  ;;  %1674 = vmatmul.bf16.vlgmr.msra.gmra.mxu0 %v8825_v22  ;;  %v5295_v36 = vor.u32 %v7335_v27, %v5292_v28  ;;  %v5746_v19 = vld [vmem:[#allocation11 + $0x3e8] sm:$0xf] }
  0xeb   : > { %1751 = vmatpush.bf16.msrb.mxu2 %v5599_v57  ;;  %v7399_v32 = vld [vmem:[#allocation11 + $0x264] sm:$0xf]  ;;  %v5548_v33 = vld [vmem:[#allocation11 + $0x270] sm:$0xf0]  ;;  %1688 = vmatmul.bf16.vlgmr.msra.gmra.mxu1 %v8827_v23  ;;  %v5423_v37 = vor.u32 %v7367_v29, %v5420_v31  ;;  %v7450_v20 = vld [vmem:[#allocation11 + $0x3f4] sm:$0xf0] }
  0xec   : > { %1765 = vmatpush.bf16.msrb.mxu3 %v5727_v61  ;;  %v7431_v34 = vld [vmem:[#allocation11 + $0x364] sm:$0xf]  ;;  %v5676_v35 = vld [vmem:[#allocation11 + $0x370] sm:$0xf0]  ;;  %v5551_v38 = vor.u32 %v7399_v32, %v5548_v33  ;;  %v5346_v27 = vld [vmem:[#allocation11 + $0xc8] sm:$0xf] }
  0xed   : > { %1724 = vmatpush.bf16.msrb.mxu0 %v5327_v5  ;;  %v7331_v39 = vld [vmem:[#allocation11 + $0x44] sm:$0xf]  ;;  %v5276_v40 = vld [vmem:[#allocation11 + $0x50] sm:$0xf0]  ;;  %v5679_v42 = vor.u32 %v7431_v34, %v5676_v35  ;;  %v7350_v28 = vld [vmem:[#allocation11 + $0xd4] sm:$0xf0] }
  0xee   : > { %1738 = vmatpush.bf16.msrb.mxu1 %v5455_v10  ;;  %v7363_v41 = vld [vmem:[#allocation11 + $0x144] sm:$0xf]  ;;  %v5404_v43 = vld [vmem:[#allocation11 + $0x150] sm:$0xf0]  ;;  %v5279_v48 = vor.u32 %v7331_v39, %v5276_v40  ;;  %v7354_v10 = vld [vmem:[#allocation11 + $0xf4] sm:$0xf0] }
  0xef   : > { %1752 = vmatpush.bf16.msrb.mxu2 %v5583_v11  ;;  %v7395_v44 = vld [vmem:[#allocation11 + $0x244] sm:$0xf]  ;;  %v5532_v45 = vld [vmem:[#allocation11 + $0x250] sm:$0xf0]  ;;  %v5407_v49 = vor.u32 %v7363_v41, %v5404_v43  ;;  %v5490_v11 = vld [vmem:[#allocation11 + $0x1e8] sm:$0xf] }
  0xf0   : > { %1766 = vmatpush.bf16.msrb.mxu3 %v5711_v15  ;;  %v7427_v46 = vld [vmem:[#allocation11 + $0x344] sm:$0xf]  ;;  %v5660_v47 = vld [vmem:[#allocation11 + $0x350] sm:$0xf0]  ;;  %v5535_v50 = vor.u32 %v7395_v44, %v5532_v45  ;;  %v7418_v15 = vld [vmem:[#allocation11 + $0x2f4] sm:$0xf0] }
  0xf1   : > { %1725 = vmatpush.bf16.msrb.mxu0 %v5311_v24  ;;  %v7327_v51 = vld [vmem:[#allocation11 + $0x24] sm:$0xf]  ;;  %v5260_v52 = vld [vmem:[#allocation11 + $0x30] sm:$0xf0]  ;;  %v5663_v54 = vor.u32 %v7427_v46, %v5660_v47  ;;  %v5363_v24 = vor.u32 %v7354_v10, %v5362_v9  ;;  %v5474_v29 = vld [vmem:[#allocation11 + $0x1c8] sm:$0xf] }
  0xf2   : > { %1739 = vmatpush.bf16.msrb.mxu1 %v5439_v25  ;;  %v7359_v53 = vld [vmem:[#allocation11 + $0x124] sm:$0xf]  ;;  %v5388_v55 = vld [vmem:[#allocation11 + $0x130] sm:$0xf0]  ;;  %v5263_v60 = vor.u32 %v7327_v51, %v5260_v52  ;;  %v5491_v25 = vor.u32 %v7386_v13, %v5490_v11  ;;  %v7382_v31 = vld [vmem:[#allocation11 + $0x1d4] sm:$0xf0] }
  0xf3   : > { %1753 = vmatpush.bf16.msrb.mxu2 %v5567_v26  ;;  %v7391_v56 = vld [vmem:[#allocation11 + $0x224] sm:$0xf]  ;;  %v5516_v57 = vld [vmem:[#allocation11 + $0x230] sm:$0xf0]  ;;  %v5391_v63 = vor.u32 %v7359_v53, %v5388_v55  ;;  %v5619_v26 = vor.u32 %v7418_v15, %v5618_v14  ;;  %v5602_v32 = vld [vmem:[#allocation11 + $0x2c8] sm:$0xf] }
  0xf4   : > { %1767 = vmatpush.bf16.msrb.mxu3 %v5695_v30  ;;  %v7423_v58 = vld [vmem:[#allocation11 + $0x324] sm:$0xf]  ;;  %v5644_v59 = vld [vmem:[#allocation11 + $0x330] sm:$0xf0]  ;;  %v5519_v0 = vor.u32 %v7391_v56, %v5516_v57  ;;  %v5747_v30 = vor.u32 %v7450_v20, %v5746_v19  ;;  %v7414_v33 = vld [vmem:[#allocation11 + $0x2d4] sm:$0xf0] }
  0xf5   : > { %1726 = vmatpush.bf16.msrb.mxu0 %v5295_v36  ;;  %v7323_v61 = vld [vmem:[#allocation11 + $0x4] sm:$0xf]  ;;  %v5244_v62 = vld [vmem:[#allocation11 + $0x10] sm:$0xf0]  ;;  %v5647_v5 = vor.u32 %v7423_v58, %v5644_v59  ;;  %v5730_v34 = vld [vmem:[#allocation11 + $0x3c8] sm:$0xf]  ;;  %v5347_v36 = vor.u32 %v7350_v28, %v5346_v27 }
  0xf6   : > { %1740 = vmatpush.bf16.msrb.mxu1 %v5423_v37  ;;  %v7355_v1 = vld [vmem:[#allocation11 + $0x104] sm:$0xf]  ;;  %v5372_v2 = vld [vmem:[#allocation11 + $0x110] sm:$0xf0]  ;;  %v5247_v12 = vor.u32 %v7323_v61, %v5244_v62  ;;  %v7446_v35 = vld [vmem:[#allocation11 + $0x3d4] sm:$0xf0]  ;;  %v5475_v37 = vor.u32 %v7382_v31, %v5474_v29 }
  0xf7   : > { %1754 = vmatpush.bf16.msrb.mxu2 %v5551_v38  ;;  %v7387_v3 = vld [vmem:[#allocation11 + $0x204] sm:$0xf]  ;;  %v5500_v6 = vld [vmem:[#allocation11 + $0x210] sm:$0xf0]  ;;  %v5375_v17 = vor.u32 %v7355_v1, %v5372_v2  ;;  %v5603_v38 = vor.u32 %v7414_v33, %v5602_v32  ;;  %v5330_v39 = vld [vmem:[#allocation11 + $0xa8] sm:$0xf] }
  0xf8   : > { %1768 = vmatpush.bf16.msrb.mxu3 %v5679_v42  ;;  %v7419_v7 = vld [vmem:[#allocation11 + $0x304] sm:$0xf]  ;;  %v5628_v8 = vld [vmem:[#allocation11 + $0x310] sm:$0xf0]  ;;  %v5503_v18 = vor.u32 %v7387_v3, %v5500_v6  ;;  %v7346_v40 = vld [vmem:[#allocation11 + $0xb4] sm:$0xf0]  ;;  %v5731_v42 = vor.u32 %v7446_v35, %v5730_v34 }
  0xf9   : > { %1727 = vmatpush.bf16.msrb.mxu0 %v5279_v48  ;;  %v5631_v21 = vor.u32 %v7419_v7, %v5628_v8  ;;  %v5458_v41 = vld [vmem:[#allocation11 + $0x1a8] sm:$0xf]  ;;  %v7378_v43 = vld [vmem:[#allocation11 + $0x1b4] sm:$0xf0]  ;;  %v5331_v48 = vor.u32 %v7346_v40, %v5330_v39  ;;  %s5223_s19 = sshll.u32 %s8769_s22, 4  ;;  %s8347_s27 = scalar_lea.hbm %s9241_s8, 32 }
  0xfa   : > { %1741 = vmatpush.bf16.msrb.mxu1 %v5407_v49  ;;  %v5586_v44 = vld [vmem:[#allocation11 + $0x2a8] sm:$0xf]  ;;  %v7410_v45 = vld [vmem:[#allocation11 + $0x2b4] sm:$0xf0]  ;;  %v5459_v49 = vor.u32 %v7378_v43, %v5458_v41  ;;  %s851_s13 = scalar_lea.vmem [#allocation22], %s5223_s19 }
  0xfb   : > { %1755 = vmatpush.bf16.msrb.mxu2 %v5535_v50  ;;  %v5714_v46 = vld [vmem:[#allocation11 + $0x3a8] sm:$0xf]  ;;  %v7442_v47 = vld [vmem:[#allocation11 + $0x3b4] sm:$0xf0]  ;;  %v5587_v50 = vor.u32 %v7410_v45, %v5586_v44  ;;  %s4951_s20 = sshll.u32 %s851_s13, 4  ;;  %s4952_s20 = int_to_ptr.vmem [resolvable:$true] %s4951_s20 }
  0xfc   : > { %1769 = vmatpush.bf16.msrb.mxu3 %v5663_v54  ;;  %v5314_v51 = vld [vmem:[#allocation11 + $0x88] sm:$0xf]  ;;  %v7342_v52 = vld [vmem:[#allocation11 + $0x94] sm:$0xf0]  ;;  %v5715_v54 = vor.u32 %v7442_v47, %v5714_v46 }
  0xfd   : > { %1728 = vmatpush.bf16.msrb.mxu0 %v5263_v60  ;;  %v5442_v53 = vld [vmem:[#allocation11 + $0x188] sm:$0xf]  ;;  %v7374_v55 = vld [vmem:[#allocation11 + $0x194] sm:$0xf0]  ;;  %v5315_v60 = vor.u32 %v7342_v52, %v5314_v51  ;;  %v5492_v52 = vld [vmem:[#allocation11 + $0x1f8] sm:$0xf0] }
  0xfe   : > { %1742 = vmatpush.bf16.msrb.mxu1 %v5391_v63  ;;  %v5570_v56 = vld [vmem:[#allocation11 + $0x288] sm:$0xf]  ;;  %v7406_v57 = vld [vmem:[#allocation11 + $0x294] sm:$0xf0]  ;;  %v5443_v61 = vor.u32 %v7374_v55, %v5442_v53  ;;  %v7416_v53 = vld [vmem:[#allocation11 + $0x2ec] sm:$0xf] }
  0xff   : > { %1756 = vmatpush.bf16.msrb.mxu2 %v5519_v0  ;;  %v5698_v58 = vld [vmem:[#allocation11 + $0x388] sm:$0xf]  ;;  %v7438_v59 = vld [vmem:[#allocation11 + $0x394] sm:$0xf0]  ;;  %v5571_v62 = vor.u32 %v7406_v57, %v5570_v56  ;;  %v7448_v57 = vld [vmem:[#allocation11 + $0x3ec] sm:$0xf] }
 0x100   : > { %1770 = vmatpush.bf16.msrb.mxu3 %v5647_v5  ;;  %v5298_v63 = vld [vmem:[#allocation11 + $0x68] sm:$0xf]  ;;  %v7338_v0 = vld [vmem:[#allocation11 + $0x74] sm:$0xf0]  ;;  %v5699_v2 = vor.u32 %v7438_v59, %v5698_v58  ;;  %v5748_v58 = vld [vmem:[#allocation11 + $0x3f8] sm:$0xf0] }
 0x101   : > { %1729 = vmatpush.bf16.msrb.mxu0 %v5247_v12  ;;  %v5426_v1 = vld [vmem:[#allocation11 + $0x168] sm:$0xf]  ;;  %v7370_v3 = vld [vmem:[#allocation11 + $0x174] sm:$0xf0]  ;;  %v5299_v9 = vor.u32 %v7338_v0, %v5298_v63  ;;  %v7348_v63 = vld [vmem:[#allocation11 + $0xcc] sm:$0xf] }
 0x102   : > { %1743 = vmatpush.bf16.msrb.mxu1 %v5375_v17  ;;  %v5554_v5 = vld [vmem:[#allocation11 + $0x268] sm:$0xf]  ;;  %v7402_v6 = vld [vmem:[#allocation11 + $0x274] sm:$0xf0]  ;;  %v5427_v10 = vor.u32 %v7370_v3, %v5426_v1  ;;  %v5348_v0 = vld [vmem:[#allocation11 + $0xd8] sm:$0xf0] }
 0x103   : > { %1757 = vmatpush.bf16.msrb.mxu2 %v5503_v18  ;;  %v5682_v7 = vld [vmem:[#allocation11 + $0x368] sm:$0xf]  ;;  %v7434_v8 = vld [vmem:[#allocation11 + $0x374] sm:$0xf0]  ;;  %v5555_v11 = vor.u32 %v7402_v6, %v5554_v5  ;;  %v7380_v1 = vld [vmem:[#allocation11 + $0x1cc] sm:$0xf] }
 0x104   : > { %1771 = vmatpush.bf16.msrb.mxu3 %v5631_v21  ;;  %1730 = vmatmul.bf16.vlgmr.msrb.gmra.mxu0 %v8825_v22  ;;  %v5282_v12 = vld [vmem:[#allocation11 + $0x48] sm:$0xf]  ;;  %v7334_v13 = vld [vmem:[#allocation11 + $0x54] sm:$0xf0]  ;;  %v5683_v15 = vor.u32 %v7434_v8, %v5682_v7  ;;  %v5476_v3 = vld [vmem:[#allocation11 + $0x1d8] sm:$0xf0] }
 0x105   : > { %1778 = vmatpush.bf16.msra.mxu0 %v5363_v24  ;;  %1744 = vmatmul.bf16.vlgmr.msrb.gmra.mxu1 %v8827_v23  ;;  %v5410_v14 = vld [vmem:[#allocation11 + $0x148] sm:$0xf]  ;;  %v7366_v17 = vld [vmem:[#allocation11 + $0x154] sm:$0xf0]  ;;  %v5283_v24 = vor.u32 %v7334_v13, %v5282_v12  ;;  %v7412_v5 = vld [vmem:[#allocation11 + $0x2cc] sm:$0xf] }
 0x106   : > { %1792 = vmatpush.bf16.msra.mxu1 %v5491_v25  ;;  %1758 = vmatmul.bf16.vlgmr.msrb.gmra.mxu2 %v8814_v4  ;;  %v5538_v18 = vld [vmem:[#allocation11 + $0x248] sm:$0xf]  ;;  %v7398_v19 = vld [vmem:[#allocation11 + $0x254] sm:$0xf0]  ;;  %v5411_v25 = vor.u32 %v7366_v17, %v5410_v14  ;;  %v5604_v6 = vld [vmem:[#allocation11 + $0x2d8] sm:$0xf0] }
 0x107   : > { %1806 = vmatpush.bf16.msra.mxu2 %v5619_v26  ;;  %1772 = vmatmul.bf16.vlgmr.msrb.gmra.mxu3 %v8820_v16  ;;  %v5666_v20 = vld [vmem:[#allocation11 + $0x348] sm:$0xf]  ;;  %v7430_v21 = vld [vmem:[#allocation11 + $0x354] sm:$0xf0]  ;;  %v5539_v26 = vor.u32 %v7398_v19, %v5538_v18  ;;  %v7444_v7 = vld [vmem:[#allocation11 + $0x3cc] sm:$0xf] }
 0x108   : > { %1820 = vmatpush.bf16.msra.mxu3 %v5747_v30  ;;  %v5266_v27 = vld [vmem:[#allocation11 + $0x28] sm:$0xf]  ;;  %v7330_v28 = vld [vmem:[#allocation11 + $0x34] sm:$0xf0]  ;;  %v5667_v30 = vor.u32 %v7430_v21, %v5666_v20  ;;  %v5732_v8 = vld [vmem:[#allocation11 + $0x3d8] sm:$0xf0] }
 0x109   : > { %1779 = vmatpush.bf16.msra.mxu0 %v5347_v36  ;;  %v5394_v29 = vld [vmem:[#allocation11 + $0x128] sm:$0xf]  ;;  %v7362_v31 = vld [vmem:[#allocation11 + $0x134] sm:$0xf0]  ;;  %v5267_v36 = vor.u32 %v7330_v28, %v5266_v27  ;;  %v7344_v12 = vld [vmem:[#allocation11 + $0xac] sm:$0xf] }
 0x10a   : > { %1793 = vmatpush.bf16.msra.mxu1 %v5475_v37  ;;  %v5522_v32 = vld [vmem:[#allocation11 + $0x228] sm:$0xf]  ;;  %v7394_v33 = vld [vmem:[#allocation11 + $0x234] sm:$0xf0]  ;;  %v5395_v39 = vor.u32 %v7362_v31, %v5394_v29  ;;  %v5332_v13 = vld [vmem:[#allocation11 + $0xb8] sm:$0xf0] }
 0x10b   : > { %1807 = vmatpush.bf16.msra.mxu2 %v5603_v38  ;;  %v5650_v34 = vld [vmem:[#allocation11 + $0x328] sm:$0xf]  ;;  %v7426_v35 = vld [vmem:[#allocation11 + $0x334] sm:$0xf0]  ;;  %v5523_v40 = vor.u32 %v7394_v33, %v5522_v32  ;;  %v7376_v14 = vld [vmem:[#allocation11 + $0x1ac] sm:$0xf] }
 0x10c   : > { %1821 = vmatpush.bf16.msra.mxu3 %v5731_v42  ;;  %v5250_v37 = vld [vmem:[#allocation11 + $0x8] sm:$0xf]  ;;  %v7326_v38 = vld [vmem:[#allocation11 + $0x14] sm:$0xf0]  ;;  %v5651_v44 = vor.u32 %v7426_v35, %v5650_v34  ;;  %v5460_v17 = vld [vmem:[#allocation11 + $0x1b8] sm:$0xf0] }
 0x10d   : > { %1780 = vmatpush.bf16.msra.mxu0 %v5331_v48  ;;  %v5378_v41 = vld [vmem:[#allocation11 + $0x108] sm:$0xf]  ;;  %v7358_v42 = vld [vmem:[#allocation11 + $0x114] sm:$0xf0]  ;;  %v7352_v48 = vld [vmem:[#allocation11 + $0xec] sm:$0xf]  ;;  %v5251_v51 = vor.u32 %v7326_v38, %v5250_v37 }
 0x10e   : > { %1794 = vmatpush.bf16.msra.mxu1 %v5459_v49  ;;  %v5506_v43 = vld [vmem:[#allocation11 + $0x208] sm:$0xf]  ;;  %v7390_v45 = vld [vmem:[#allocation11 + $0x214] sm:$0xf0]  ;;  %v5364_v49 = vld [vmem:[#allocation11 + $0xf8] sm:$0xf0]  ;;  %v5379_v55 = vor.u32 %v7358_v42, %v5378_v41 }
 0x10f   : > { %1808 = vmatpush.bf16.msra.mxu2 %v5587_v50  ;;  %v5634_v46 = vld [vmem:[#allocation11 + $0x308] sm:$0xf]  ;;  %v7422_v47 = vld [vmem:[#allocation11 + $0x314] sm:$0xf0]  ;;  %v7384_v50 = vld [vmem:[#allocation11 + $0x1ec] sm:$0xf]  ;;  %v5507_v56 = vor.u32 %v7390_v45, %v5506_v43 }
 0x110   : > { %1822 = vmatpush.bf16.msra.mxu3 %v5715_v54  ;;  %v5620_v54 = vld [vmem:[#allocation11 + $0x2f8] sm:$0xf0]  ;;  %v5635_v59 = vor.u32 %v7422_v47, %v5634_v46  ;;  %v7408_v18 = vld [vmem:[#allocation11 + $0x2ac] sm:$0xf] }
 0x111   : > { %1781 = vmatpush.bf16.msra.mxu0 %v5315_v60  ;;  %v5367_v60 = vor.u32 %v7352_v48, %v5364_v49  ;;  %v5588_v19 = vld [vmem:[#allocation11 + $0x2b8] sm:$0xf0]  ;;  %v7440_v20 = vld [vmem:[#allocation11 + $0x3ac] sm:$0xf] }
 0x112   : > { %1795 = vmatpush.bf16.msra.mxu1 %v5443_v61  ;;  %v5495_v61 = vor.u32 %v7384_v50, %v5492_v52  ;;  %v5716_v21 = vld [vmem:[#allocation11 + $0x3b8] sm:$0xf0]  ;;  %v7340_v27 = vld [vmem:[#allocation11 + $0x8c] sm:$0xf] }
 0x113   : > { %1809 = vmatpush.bf16.msra.mxu2 %v5571_v62  ;;  %v5623_v62 = vor.u32 %v7416_v53, %v5620_v54  ;;  %v5316_v28 = vld [vmem:[#allocation11 + $0x98] sm:$0xf0]  ;;  %v7372_v29 = vld [vmem:[#allocation11 + $0x18c] sm:$0xf] }
 0x114   : > { %1823 = vmatpush.bf16.msra.mxu3 %v5699_v2  ;;  %v5751_v2 = vor.u32 %v7448_v57, %v5748_v58  ;;  %v5444_v31 = vld [vmem:[#allocation11 + $0x198] sm:$0xf0]  ;;  %v7404_v32 = vld [vmem:[#allocation11 + $0x28c] sm:$0xf] }
 0x115   : > { %1782 = vmatpush.bf16.msra.mxu0 %v5299_v9  ;;  %v5351_v9 = vor.u32 %v7348_v63, %v5348_v0  ;;  %v5572_v33 = vld [vmem:[#allocation11 + $0x298] sm:$0xf0]  ;;  %v7436_v34 = vld [vmem:[#allocation11 + $0x38c] sm:$0xf]  ;;  %v5447_v37 = vor.u32 %v7372_v29, %v5444_v31  ;;  %v5954_v29 = vld [vmem:[#allocation13 + $0x170] sm:$0xf] }
 0x116   : > { %1796 = vmatpush.bf16.msra.mxu1 %v5427_v10  ;;  %v5479_v10 = vor.u32 %v7380_v1, %v5476_v3  ;;  %v5700_v35 = vld [vmem:[#allocation11 + $0x398] sm:$0xf0]  ;;  %v5575_v38 = vor.u32 %v7404_v32, %v5572_v33  ;;  %v7368_v41 = vld [vmem:[#allocation11 + $0x16c] sm:$0xf]  ;;  %v6018_v33 = vld [vmem:[#allocation13 + $0x1f0] sm:$0xf] }
 0x117   : > { %1810 = vmatpush.bf16.msra.mxu2 %v5555_v11  ;;  %v5607_v11 = vor.u32 %v7412_v5, %v5604_v6  ;;  %v5703_v42 = vor.u32 %v7436_v34, %v5700_v35  ;;  %v5428_v43 = vld [vmem:[#allocation11 + $0x178] sm:$0xf0]  ;;  %v7432_v46 = vld [vmem:[#allocation11 + $0x36c] sm:$0xf]  ;;  %v7514_v34 = vld [vmem:[#allocation13 + $0x1f4] sm:$0xf0] }
 0x118   : > { %1824 = vmatpush.bf16.msra.mxu3 %v5683_v15  ;;  %v5735_v15 = vor.u32 %v7444_v7, %v5732_v8  ;;  %v5556_v45 = vld [vmem:[#allocation11 + $0x278] sm:$0xf0]  ;;  %v5431_v49 = vor.u32 %v7368_v41, %v5428_v43  ;;  %v7364_v53 = vld [vmem:[#allocation11 + $0x14c] sm:$0xf]  ;;  %v5882_v41 = vld [vmem:[#allocation13 + $0xe0] sm:$0xf] }
 0x119   : > { %1783 = vmatpush.bf16.msra.mxu0 %v5283_v24  ;;  %v5335_v24 = vor.u32 %v7344_v12, %v5332_v13  ;;  %v5684_v47 = vld [vmem:[#allocation11 + $0x378] sm:$0xf0]  ;;  %v7428_v58 = vld [vmem:[#allocation11 + $0x34c] sm:$0xf]  ;;  %v7480_v43 = vld [vmem:[#allocation13 + $0xe4] sm:$0xf0] }
 0x11a   : > { %1797 = vmatpush.bf16.msra.mxu1 %v5411_v25  ;;  %v5463_v25 = vor.u32 %v7376_v14, %v5460_v17  ;;  %v5284_v52 = vld [vmem:[#allocation11 + $0x58] sm:$0xf0]  ;;  %v5687_v54 = vor.u32 %v7432_v46, %v5684_v47  ;;  %v7328_v63 = vld [vmem:[#allocation11 + $0x2c] sm:$0xf]  ;;  %v6010_v46 = vld [vmem:[#allocation13 + $0x1e0] sm:$0xf] }
 0x11b   : > { %1811 = vmatpush.bf16.msra.mxu2 %v5539_v26  ;;  %v5591_v26 = vor.u32 %v7408_v18, %v5588_v19  ;;  %v5540_v57 = vld [vmem:[#allocation11 + $0x258] sm:$0xf0]  ;;  %v7360_v1 = vld [vmem:[#allocation11 + $0x12c] sm:$0xf]  ;;  %v7512_v47 = vld [vmem:[#allocation13 + $0x1e4] sm:$0xf0] }
 0x11c   : > { %1825 = vmatpush.bf16.msra.mxu3 %v5667_v30  ;;  %v5719_v30 = vor.u32 %v7440_v20, %v5716_v21  ;;  %v5268_v0 = vld [vmem:[#allocation11 + $0x38] sm:$0xf0]  ;;  %v7392_v5 = vld [vmem:[#allocation11 + $0x22c] sm:$0xf] }
 0x11d   : > { %1784 = vmatpush.bf16.msra.mxu0 %v5267_v36  ;;  %v5319_v36 = vor.u32 %v7340_v27, %v5316_v28  ;;  %v5396_v3 = vld [vmem:[#allocation11 + $0x138] sm:$0xf0]  ;;  %v7424_v7 = vld [vmem:[#allocation11 + $0x32c] sm:$0xf]  ;;  %v7482_v28 = vld [vmem:[#allocation13 + $0xf4] sm:$0xf0] }
 0x11e   : > { %1798 = vmatpush.bf16.msra.mxu1 %v5395_v39  ;;  %v7336_v39 = vld [vmem:[#allocation11 + $0x6c] sm:$0xf]  ;;  %v5524_v6 = vld [vmem:[#allocation11 + $0x238] sm:$0xf0]  ;;  %v5399_v12 = vor.u32 %v7360_v1, %v5396_v3  ;;  %v5866_v1 = vld [vmem:[#allocation13 + $0xc0] sm:$0xf] }
 0x11f   : > { %1812 = vmatpush.bf16.msra.mxu2 %v5523_v40  ;;  %v5300_v40 = vld [vmem:[#allocation11 + $0x78] sm:$0xf0]  ;;  %v5527_v13 = vor.u32 %v7392_v5, %v5524_v6  ;;  %v7356_v14 = vld [vmem:[#allocation11 + $0x10c] sm:$0xf]  ;;  %v5930_v3 = vld [vmem:[#allocation13 + $0x140] sm:$0xf] }
 0x120   : > { %1826 = vmatpush.bf16.msra.mxu3 %v5651_v44  ;;  %v7400_v44 = vld [vmem:[#allocation11 + $0x26c] sm:$0xf]  ;;  %v5303_v48 = vor.u32 %v7336_v39, %v5300_v40  ;;  %v5652_v8 = vld [vmem:[#allocation11 + $0x338] sm:$0xf0]  ;;  %v5818_v39 = vld [vmem:[#allocation13 + $0x60] sm:$0xf] }
 0x121   : > { %1785 = vmatpush.bf16.msra.mxu0 %v5251_v51  ;;  %v5559_v50 = vor.u32 %v7400_v44, %v5556_v45  ;;  %v7332_v51 = vld [vmem:[#allocation11 + $0x4c] sm:$0xf]  ;;  %v5655_v18 = vor.u32 %v7424_v7, %v5652_v8  ;;  %v5508_v19 = vld [vmem:[#allocation11 + $0x218] sm:$0xf0]  ;;  %v7464_v40 = vld [vmem:[#allocation13 + $0x64] sm:$0xf0] }
 0x122   : > { %1799 = vmatpush.bf16.msra.mxu1 %v5379_v55  ;;  %v5412_v55 = vld [vmem:[#allocation11 + $0x158] sm:$0xf0]  ;;  %v7388_v17 = vld [vmem:[#allocation11 + $0x20c] sm:$0xf]  ;;  %v5946_v44 = vld [vmem:[#allocation13 + $0x160] sm:$0xf] }
 0x123   : > { %1813 = vmatpush.bf16.msra.mxu2 %v5507_v56  ;;  %v7396_v56 = vld [vmem:[#allocation11 + $0x24c] sm:$0xf]  ;;  %v5636_v21 = vld [vmem:[#allocation11 + $0x318] sm:$0xf0]  ;;  %v5511_v32 = vor.u32 %v7388_v17, %v5508_v19  ;;  %v7496_v45 = vld [vmem:[#allocation13 + $0x164] sm:$0xf0] }
 0x124   : > { %1827 = vmatpush.bf16.msra.mxu3 %v5635_v59  ;;  %1786 = vmatmul.bf16.vlgmr.msra.gmra.mxu0 %v8825_v22  ;;  %v5668_v59 = vld [vmem:[#allocation11 + $0x358] sm:$0xf0]  ;;  %v7420_v20 = vld [vmem:[#allocation11 + $0x30c] sm:$0xf]  ;;  %v7492_v5 = vld [vmem:[#allocation13 + $0x144] sm:$0xf0] }
 0x125   : > { %1834 = vmatpush.bf16.msrb.mxu0 %v5367_v60  ;;  %1800 = vmatmul.bf16.vlgmr.msra.gmra.mxu1 %v8827_v23  ;;  %v5287_v60 = vor.u32 %v7332_v51, %v5284_v52  ;;  %v5639_v35 = vor.u32 %v7420_v20, %v5636_v21  ;;  %v5810_v51 = vld [vmem:[#allocation13 + $0x50] sm:$0xf]  ;;  %v7462_v52 = vld [vmem:[#allocation13 + $0x54] sm:$0xf0]  ;;  %v5994_v6 = vld [vmem:[#allocation13 + $0x1c0] sm:$0xf] }
 0x126   : > { %1848 = vmatpush.bf16.msrb.mxu1 %v5495_v61  ;;  %1814 = vmatmul.bf16.vlgmr.msra.gmra.mxu2 %v8814_v4  ;;  %v5415_v61 = vor.u32 %v7364_v53, %v5412_v55  ;;  %v5874_v53 = vld [vmem:[#allocation13 + $0xd0] sm:$0xf]  ;;  %v7478_v55 = vld [vmem:[#allocation13 + $0xd4] sm:$0xf0]  ;;  %v5786_v21 = vld [vmem:[#allocation13 + $0x20] sm:$0xf] }
 0x127   : > { %1862 = vmatpush.bf16.msrb.mxu2 %v5623_v62  ;;  %1828 = vmatmul.bf16.vlgmr.msra.gmra.mxu3 %v8820_v16  ;;  %v5543_v62 = vor.u32 %v7396_v56, %v5540_v57  ;;  %v5938_v56 = vld [vmem:[#allocation13 + $0x150] sm:$0xf]  ;;  %v7494_v57 = vld [vmem:[#allocation13 + $0x154] sm:$0xf0] }
 0x128   : > { %1876 = vmatpush.bf16.msrb.mxu3 %v5751_v2  ;;  %v5671_v2 = vor.u32 %v7428_v58, %v5668_v59  ;;  %v6002_v58 = vld [vmem:[#allocation13 + $0x1d0] sm:$0xf]  ;;  %v7510_v59 = vld [vmem:[#allocation13 + $0x1d4] sm:$0xf0] }
 0x129   : > { %1835 = vmatpush.bf16.msrb.mxu0 %v5351_v9  ;;  %v5271_v9 = vor.u32 %v7328_v63, %v5268_v0  ;;  %v5802_v63 = vld [vmem:[#allocation13 + $0x40] sm:$0xf]  ;;  %v7460_v0 = vld [vmem:[#allocation13 + $0x44] sm:$0xf0]  ;;  %v5794_v8 = vld [vmem:[#allocation13 + $0x30] sm:$0xf] }
 0x12a   : > { %1849 = vmatpush.bf16.msrb.mxu1 %v5479_v10  ;;  %v7324_v10 = vld [vmem:[#allocation11 + $0xc] sm:$0xf]  ;;  %v7506_v17 = vld [vmem:[#allocation13 + $0x1b4] sm:$0xf0] }
 0x12b   : > { %1863 = vmatpush.bf16.msrb.mxu2 %v5607_v11  ;;  %v5252_v11 = vld [vmem:[#allocation11 + $0x18] sm:$0xf0] }
 0x12c   : > { %1877 = vmatpush.bf16.msrb.mxu3 %v5735_v15  ;;  %v5380_v15 = vld [vmem:[#allocation11 + $0x118] sm:$0xf0]  ;;  %v5255_v27 = vor.u32 %v7324_v10, %v5252_v11  ;;  %v5858_v10 = vld [vmem:[#allocation13 + $0xb0] sm:$0xf] }
 0x12d   : > { %1836 = vmatpush.bf16.msrb.mxu0 %v5335_v24  ;;  %v5826_v24 = vld [vmem:[#allocation13 + $0x70] sm:$0xf]  ;;  %v5383_v31 = vor.u32 %v7356_v14, %v5380_v15  ;;  %v7490_v14 = vld [vmem:[#allocation13 + $0x134] sm:$0xf0] }
 0x12e   : > { %1850 = vmatpush.bf16.msrb.mxu1 %v5463_v25  ;;  %v7466_v25 = vld [vmem:[#allocation13 + $0x74] sm:$0xf0]  ;;  %v5986_v15 = vld [vmem:[#allocation13 + $0x1b0] sm:$0xf] }
 0x12f   : > { %1864 = vmatpush.bf16.msrb.mxu2 %v5591_v26  ;;  %v5890_v26 = vld [vmem:[#allocation13 + $0xf0] sm:$0xf] }
 0x130   : > { %1878 = vmatpush.bf16.msrb.mxu3 %v5719_v30  ;;  %v7498_v30 = vld [vmem:[#allocation13 + $0x174] sm:$0xf0] }
 0x131   : > { %1837 = vmatpush.bf16.msrb.mxu0 %v5319_v36  ;;  %v5827_v36 = vor.u32 %v7466_v25, %v5826_v24  ;;  %v7456_v24 = vld [vmem:[#allocation13 + $0x24] sm:$0xf0]  ;;  %v5850_v25 = vld [vmem:[#allocation13 + $0xa0] sm:$0xf] }
 0x132   : > { %1851 = vmatpush.bf16.msrb.mxu1 %v5447_v37  ;;  %v5891_v37 = vor.u32 %v7482_v28, %v5890_v26  ;;  %v5987_v26 = vor.u32 %v7506_v17, %v5986_v15  ;;  %v5914_v28 = vld [vmem:[#allocation13 + $0x120] sm:$0xf] }
 0x133   : > { %1865 = vmatpush.bf16.msrb.mxu2 %v5575_v38  ;;  %v5955_v38 = vor.u32 %v7498_v30, %v5954_v29  ;;  %v7488_v29 = vld [vmem:[#allocation13 + $0x124] sm:$0xf0]  ;;  %v5978_v30 = vld [vmem:[#allocation13 + $0x1a0] sm:$0xf] }
 0x134   : > { %1879 = vmatpush.bf16.msrb.mxu3 %v5703_v42  ;;  %v6019_v42 = vor.u32 %v7514_v34, %v6018_v33  ;;  %v5778_v33 = vld [vmem:[#allocation13 + $0x10] sm:$0xf] }
 0x135   : > { %1838 = vmatpush.bf16.msrb.mxu0 %v5303_v48  ;;  %v5819_v48 = vor.u32 %v7464_v40, %v5818_v39  ;;  %v5906_v40 = vld [vmem:[#allocation13 + $0x110] sm:$0xf] }
 0x136   : > { %1852 = vmatpush.bf16.msrb.mxu1 %v5431_v49  ;;  %v5883_v49 = vor.u32 %v7480_v43, %v5882_v41  ;;  %v7486_v41 = vld [vmem:[#allocation13 + $0x114] sm:$0xf0] }
 0x137   : > { %1866 = vmatpush.bf16.msrb.mxu2 %v5559_v50  ;;  %v5947_v50 = vor.u32 %v7496_v45, %v5946_v44  ;;  %v7502_v43 = vld [vmem:[#allocation13 + $0x194] sm:$0xf0]  ;;  %v5770_v44 = vld [vmem:[#allocation13] sm:$0xf]  ;;  %v7452_v45 = vld [vmem:[#allocation13 + $0x4] sm:$0xf0] }
 0x138   : > { %1880 = vmatpush.bf16.msrb.mxu3 %v5687_v54  ;;  %v6011_v54 = vor.u32 %v7512_v47, %v6010_v46  ;;  %v5834_v47 = vld [vmem:[#allocation13 + $0x80] sm:$0xf] }
 0x139   : > { %1839 = vmatpush.bf16.msrb.mxu0 %v5287_v60  ;;  %v5811_v60 = vor.u32 %v7462_v52, %v5810_v51  ;;  %v5907_v52 = vor.u32 %v7486_v41, %v5906_v40 }
 0x13a   : > { %1853 = vmatpush.bf16.msrb.mxu1 %v5415_v61  ;;  %v5875_v61 = vor.u32 %v7478_v55, %v5874_v53  ;;  %v5962_v53 = vld [vmem:[#allocation13 + $0x180] sm:$0xf]  ;;  %v7465_v55 = vld [vmem:[#allocation13 + $0x74] sm:$0xf] }
 0x13b   : > { %1867 = vmatpush.bf16.msrb.mxu2 %v5543_v62  ;;  %v5939_v62 = vor.u32 %v7494_v57, %v5938_v56  ;;  %v5828_v57 = vld [vmem:[#allocation13 + $0x78] sm:$0xf0] }
 0x13c   : > { %1881 = vmatpush.bf16.msrb.mxu3 %v5671_v2  ;;  %v6003_v2 = vor.u32 %v7510_v59, %v6002_v58  ;;  %v7481_v58 = vld [vmem:[#allocation13 + $0xf4] sm:$0xf]  ;;  %v5892_v59 = vld [vmem:[#allocation13 + $0xf8] sm:$0xf0] }
 0x13d   : > { %1840 = vmatpush.bf16.msrb.mxu0 %v5271_v9  ;;  %v7458_v9 = vld [vmem:[#allocation13 + $0x34] sm:$0xf0] }
 0x13e   : > { %1854 = vmatpush.bf16.msrb.mxu1 %v5399_v12  ;;  %v7474_v12 = vld [vmem:[#allocation13 + $0xb4] sm:$0xf0] }
 0x13f   : > { %1868 = vmatpush.bf16.msrb.mxu2 %v5527_v13  ;;  %v5922_v13 = vld [vmem:[#allocation13 + $0x130] sm:$0xf]  ;;  %v5859_v19 = vor.u32 %v7474_v12, %v5858_v10  ;;  %v5895_v10 = vor.u32 %v7481_v58, %v5892_v59  ;;  %v7479_v12 = vld [vmem:[#allocation13 + $0xe4] sm:$0xf]  ;;  %v5860_v59 = vld [vmem:[#allocation13 + $0xb8] sm:$0xf0] }
 0x140   : > { %1882 = vmatpush.bf16.msrb.mxu3 %v5655_v18  ;;  %v5795_v18 = vor.u32 %v7458_v9, %v5794_v8  ;;  %v5923_v20 = vor.u32 %v7490_v14, %v5922_v13  ;;  %v5754_v8 = vld [vmem:[%s8794_s25] sm:$0xf]  ;;  %v7321_v9 = vld [vmem:[%s8794_s25 + $0xc] sm:$0xf0]  ;;  %v7319_v13 = vld [vmem:[%s8794_s25 + $0x4] sm:$0xf] }
 0x141   : > { %1841 = vmatpush.bf16.msrb.mxu0 %v5255_v27  ;;  %v7472_v27 = vld [vmem:[#allocation13 + $0xa4] sm:$0xf0]  ;;  %v5756_v14 = vld [vmem:[%s8794_s25 + $0x10] sm:$0xf0] }
 0x142   : > { %1855 = vmatpush.bf16.msrb.mxu1 %v5383_v31  ;;  %v7504_v31 = vld [vmem:[#allocation13 + $0x1a4] sm:$0xf0]  ;;  %v5851_v34 = vor.u32 %v7472_v27, %v5850_v25  ;;  %v6012_v25 = vld [vmem:[#allocation13 + $0x1e8] sm:$0xf0] }
 0x143   : > { %1869 = vmatpush.bf16.msrb.mxu2 %v5511_v32  ;;  %v5787_v32 = vor.u32 %v7456_v24, %v5786_v21  ;;  %v5979_v39 = vor.u32 %v7504_v31, %v5978_v30  ;;  %v7511_v24 = vld [vmem:[#allocation13 + $0x1e4] sm:$0xf]  ;;  %v7461_v31 = vld [vmem:[#allocation13 + $0x54] sm:$0xf] }
 0x144   : > { %1883 = vmatpush.bf16.msrb.mxu3 %v5639_v35  ;;  %1842 = vmatmul.bf16.vlgmr.msrb.gmra.mxu0 %v8825_v22  ;;  %v5803_v22 = vor.u32 %v7460_v0, %v5802_v63  ;;  %v5915_v35 = vor.u32 %v7488_v29, %v5914_v28  ;;  %v5771_v63 = vor.u32 %v7452_v45, %v5770_v44  ;;  %v6020_v0 = vld [vmem:[#allocation13 + $0x1f8] sm:$0xf0]  ;;  %v5804_v44 = vld [vmem:[#allocation13 + $0x48] sm:$0xf0]  ;;  %v7475_v45 = vld [vmem:[#allocation13 + $0xc4] sm:$0xf] }
 0x145   : > { %2294 = vmatpush.bf16.msra.mxu0 %v5827_v36  ;;  %1856 = vmatmul.bf16.vlgmr.msrb.gmra.mxu1 %v8827_v23  ;;  %v5931_v23 = vor.u32 %v7492_v5, %v5930_v3  ;;  %v7454_v36 = vld [vmem:[#allocation13 + $0x14] sm:$0xf0]  ;;  %v7320_v5 = vld [vmem:[%s8794_s25 + $0xc] sm:$0xf]  ;;  %v8858_v28 = vor.u32 %v7319_v13, %v5756_v14  ;;  %v7453_v14 = vld [vmem:[#allocation13 + $0x14] sm:$0xf] }
 0x146   : > { %2308 = vmatpush.bf16.msra.mxu1 %v5891_v37  ;;  %1870 = vmatmul.bf16.vlgmr.msrb.gmra.mxu2 %v8814_v4  ;;  %v7476_v4 = vld [vmem:[#allocation13 + $0xc4] sm:$0xf0]  ;;  %v5842_v37 = vld [vmem:[#allocation13 + $0x90] sm:$0xf]  ;;  %v5779_v46 = vor.u32 %v7454_v36, %v5778_v33  ;;  %v7477_v33 = vld [vmem:[#allocation13 + $0xd4] sm:$0xf] }
 0x147   : > { %2322 = vmatpush.bf16.msra.mxu2 %v5955_v38  ;;  %1884 = vmatmul.bf16.vlgmr.msrb.gmra.mxu3 %v8820_v16  ;;  %v7508_v16 = vld [vmem:[#allocation13 + $0x1c4] sm:$0xf0]  ;;  %v5867_v7 = vor.u32 %v7476_v4, %v5866_v1  ;;  %v7470_v38 = vld [vmem:[#allocation13 + $0x94] sm:$0xf0]  ;;  %v7493_v36 = vld [vmem:[#allocation13 + $0x154] sm:$0xf] }
 0x148   : > { %2336 = vmatpush.bf16.msra.mxu3 %v6019_v42  ;;  %v5995_v11 = vor.u32 %v7508_v16, %v5994_v6  ;;  %v5970_v42 = vld [vmem:[#allocation13 + $0x190] sm:$0xf]  ;;  %v5843_v51 = vor.u32 %v7470_v38, %v5842_v37  ;;  %v5762_v1 = vld [vmem:[%s8794_s25 + $0x8] sm:$0xf]  ;;  %v5764_v6 = vld [vmem:[%s8794_s25 + $0x18] sm:$0xf0] }
 0x149   : > { %2295 = vmatpush.bf16.msra.mxu0 %v5819_v48  ;;  %v7468_v48 = vld [vmem:[#allocation13 + $0x84] sm:$0xf0]  ;;  %v5971_v56 = vor.u32 %v7502_v43, %v5970_v42  ;;  %v7463_v16 = vld [vmem:[#allocation13 + $0x64] sm:$0xf]  ;;  %v8854_v21 = vor.u32 %v7320_v5, %v5764_v6  ;;  %v5940_v37 = vld [vmem:[#allocation13 + $0x158] sm:$0xf0] }
 0x14a   : > { %2309 = vmatpush.bf16.msra.mxu1 %v5883_v49  ;;  %v5898_v49 = vld [vmem:[#allocation13 + $0x100] sm:$0xf]  ;;  %v5835_v4 = vor.u32 %v7468_v48, %v5834_v47  ;;  %v7509_v38 = vld [vmem:[#allocation13 + $0x1d4] sm:$0xf]  ;;  %v5943_v42 = vor.u32 %v7493_v36, %v5940_v37  ;;  %v7459_v43 = vld [vmem:[#allocation13 + $0x44] sm:$0xf] }
 0x14b   : > { %2323 = vmatpush.bf16.msra.mxu2 %v5947_v50  ;;  %v7484_v50 = vld [vmem:[#allocation13 + $0x104] sm:$0xf0]  ;;  %v5868_v47 = vld [vmem:[#allocation13 + $0xc8] sm:$0xf0]  ;;  %v7491_v48 = vld [vmem:[#allocation13 + $0x144] sm:$0xf] }
 0x14c   : > { %2337 = vmatpush.bf16.msra.mxu3 %v6011_v54  ;;  %v7500_v54 = vld [vmem:[#allocation13 + $0x184] sm:$0xf0]  ;;  %v5899_v3 = vor.u32 %v7484_v50, %v5898_v49  ;;  %v5932_v49 = vld [vmem:[#allocation13 + $0x148] sm:$0xf0]  ;;  %v7507_v50 = vld [vmem:[#allocation13 + $0x1c4] sm:$0xf] }
 0x14d   : > { %2296 = vmatpush.bf16.msra.mxu0 %v5811_v60  ;;  %v7497_v60 = vld [vmem:[#allocation13 + $0x174] sm:$0xf]  ;;  %v7471_v5 = vld [vmem:[#allocation13 + $0xa4] sm:$0xf] }
 0x14e   : > { %2310 = vmatpush.bf16.msra.mxu1 %v5875_v61  ;;  %v5956_v61 = vld [vmem:[#allocation13 + $0x178] sm:$0xf0] }
 0x14f   : > { %2324 = vmatpush.bf16.msra.mxu2 %v5939_v62  ;;  %v7513_v62 = vld [vmem:[#allocation13 + $0x1f4] sm:$0xf] }
 0x150   : > { %2338 = vmatpush.bf16.msra.mxu3 %v6003_v2  ;;  %v7322_v2 = vld [vmem:[%s8794_s25 + $0x14] sm:$0xf0]  ;;  %v6023_v15 = vor.u32 %v7513_v62, %v6020_v0  ;;  %v7505_v62 = vld [vmem:[#allocation13 + $0x1b4] sm:$0xf]  ;;  %s4950_s25 = scalar_lea.hbm %s9241_s8, %s7819_s12 }
 0x151   : > { %2297 = vmatpush.bf16.msra.mxu0 %v5803_v22  ;;  %v5963_v22 = vor.u32 %v7500_v54, %v5962_v53  ;;  %v8852_v17 = vor.u32 %v7322_v2, %v5762_v1  ;;  %v5871_v53 = vor.u32 %v7475_v45, %v5868_v47  ;;  %v5935_v54 = vor.u32 %v7491_v48, %v5932_v49  ;;  %v7499_v45 = vld [vmem:[#allocation13 + $0x184] sm:$0xf]  ;;  %v6098_v47 = vld [vmem:[#allocation14 + $0x70] sm:$0xf]  ;;  %v7530_v48 = vld [vmem:[#allocation14 + $0x74] sm:$0xf0] }
 0x152   : > { %2311 = vmatpush.bf16.msra.mxu1 %v5867_v7  ;;  %v5831_v7 = vor.u32 %v7465_v55, %v5828_v57  ;;  %v7457_v55 = vld [vmem:[#allocation13 + $0x34] sm:$0xf]  ;;  %v6162_v49 = vld [vmem:[#allocation14 + $0xf0] sm:$0xf]  ;;  %s4953_s30 = sshll.u32 %s4950_s25, 4  ;;  %s4954_s30 = int_to_ptr.hbm [resolvable:$true] %s4953_s30 }
 0x153   : > { %2325 = vmatpush.bf16.msra.mxu2 %v5931_v23  ;;  %v5820_v23 = vld [vmem:[#allocation13 + $0x68] sm:$0xf0]  ;;  %v7473_v57 = vld [vmem:[#allocation13 + $0xb4] sm:$0xf]  ;;  %s8341_s17 = sshra.s32 %s4954_s30, 4  ;;  %s8342_s17 = int_to_ptr.hbm [resolvable:$true] %s8341_s17 }
 0x154   : > { %2339 = vmatpush.bf16.msra.mxu3 %v5995_v11  ;;  %v5959_v11 = vor.u32 %v7497_v60, %v5956_v61  ;;  %v5823_v27 = vor.u32 %v7463_v16, %v5820_v23  ;;  %v7489_v60 = vld [vmem:[#allocation13 + $0x134] sm:$0xf]  ;;  %v5924_v61 = vld [vmem:[#allocation13 + $0x138] sm:$0xf0]  ;;  %v5863_v1 = vor.u32 %v7473_v57, %v5860_v59  ;;  %v5852_v16 = vld [vmem:[#allocation13 + $0xa8] sm:$0xf0]  ;;  %v6099_v59 = vor.u32 %v7530_v48, %v6098_v47  ;;  %p8348_p11 = scmp.lt.s32.totalorder %s8342_s17, %s9241_s8 }
 0x155   : > { %2298 = vmatpush.bf16.msra.mxu0 %v5795_v18  ;;  %v5884_v18 = vld [vmem:[#allocation13 + $0xe8] sm:$0xf0]  ;;  %v5927_v2 = vor.u32 %v7489_v60, %v5924_v61  ;;  %v7503_v23 = vld [vmem:[#allocation13 + $0x1a4] sm:$0xf]  ;;  %v7578_v57 = vld [vmem:[#allocation14 + $0x1f4] sm:$0xf0] }
 0x156   : > { %2312 = vmatpush.bf16.msra.mxu1 %v5859_v19  ;;  %v7495_v19 = vld [vmem:[#allocation13 + $0x164] sm:$0xf]  ;;  %v5887_v29 = vor.u32 %v7479_v12, %v5884_v18  ;;  %v5855_v12 = vor.u32 %v7471_v5, %v5852_v16  ;;  %v7469_v18 = vld [vmem:[#allocation13 + $0x94] sm:$0xf]  ;;  %v6282_v5 = vld [vmem:[#allocation14 + $0x1e0] sm:$0xf] }
 0x157   : > { %2326 = vmatpush.bf16.msra.mxu2 %v5923_v20  ;;  %v5948_v20 = vld [vmem:[#allocation13 + $0x168] sm:$0xf0]  ;;  %v7554_v47 = vld [vmem:[#allocation14 + $0x134] sm:$0xf0]  ;;  %s8343_s3 = scalar_lea.hbm %s8342_s17, 16 }
 0x158   : > { %2340 = vmatpush.bf16.msra.mxu3 %v5987_v26  ;;  %v8856_v26 = vor.u32 %v7321_v9, %v5754_v8  ;;  %v5951_v30 = vor.u32 %v7495_v19, %v5948_v20  ;;  %v5980_v8 = vld [vmem:[#allocation13 + $0x1a8] sm:$0xf0]  ;;  %p8344_p7 = scmp.ne.s32.totalorder %s8342_s17, %s8343_s3  ;;  %p8349_p3 = scmp.lt.s32.totalorder %s8347_s27, %s8343_s3 }
 0x159   : > { %2299 = vmatpush.bf16.msra.mxu0 %v5787_v32  ;;  %v5812_v32 = vld [vmem:[#allocation13 + $0x58] sm:$0xf0]  ;;  %v5983_v20 = vor.u32 %v7503_v23, %v5980_v8  ;;  %v6082_v23 = vld [vmem:[#allocation14 + $0x50] sm:$0xf]  ;;  %v7526_v8 = vld [vmem:[#allocation14 + $0x54] sm:$0xf0] }
 0x15a   : > { %2313 = vmatpush.bf16.msra.mxu1 %v5851_v34  ;;  %v6015_v34 = vor.u32 %v7511_v24, %v6012_v25  ;;  %v5815_v40 = vor.u32 %v7461_v31, %v5812_v32  ;;  %v5844_v24 = vld [vmem:[#allocation13 + $0x98] sm:$0xf0]  ;;  %v7485_v25 = vld [vmem:[#allocation13 + $0x114] sm:$0xf]  ;;  %p8345_p10 = pnand %p8344_p7, %p8609_p0  ;;  %p8350_p8 = por %p8349_p3, %p8348_p11 }
 0x15b   : > { %2327 = vmatpush.bf16.msra.mxu2 %v5915_v35  ;;  %v5876_v35 = vld [vmem:[#allocation13 + $0xd8] sm:$0xf0]  ;;  %v5847_v37 = vor.u32 %v7469_v18, %v5844_v24  ;;  %v6274_v18 = vld [vmem:[#allocation14 + $0x1d0] sm:$0xf] }
 0x15c   : > { %2341 = vmatpush.bf16.msra.mxu3 %v5979_v39  ;;  %v6004_v39 = vld [vmem:[#allocation13 + $0x1d8] sm:$0xf0]  ;;  %v5879_v41 = vor.u32 %v7477_v33, %v5876_v35  ;;  %v5772_v35 = vld [vmem:[#allocation13 + $0x8] sm:$0xf0]  ;;  %p8346_p6 = pneg %p8345_p10 }
 0x15d   : > { %2300 = vmatpush.bf16.msra.mxu0 %v5779_v46  ;;  %v6007_v46 = vor.u32 %v7509_v38, %v6004_v39  ;;  %v5972_v31 = vld [vmem:[#allocation13 + $0x198] sm:$0xf0]  ;;  %v7467_v39 = vld [vmem:[#allocation13 + $0x84] sm:$0xf] }
 0x15e   : > { %2314 = vmatpush.bf16.msra.mxu1 %v5843_v51  ;;  %v5996_v51 = vld [vmem:[#allocation13 + $0x1c8] sm:$0xf0]  ;;  %p8351_p9 = pnand %p8350_p8, %p8346_p6 }
 0x15f   : > { %2328 = vmatpush.bf16.msra.mxu2 %v5907_v52  ;;  %v5807_v52 = vor.u32 %v7459_v43, %v5804_v44  ;;  %v5999_v58 = vor.u32 %v7507_v50, %v5996_v51  ;;  %v5900_v44 = vld [vmem:[#allocation13 + $0x108] sm:$0xf0]  ;;  %v7546_v51 = vld [vmem:[#allocation14 + $0xf4] sm:$0xf0] }
 0x160   : > { %2342 = vmatpush.bf16.msra.mxu3 %v5971_v56  ;;  %v5796_v56 = vld [vmem:[#allocation13 + $0x38] sm:$0xf0]  ;;  %v6163_v60 = vor.u32 %v7546_v51, %v6162_v49  ;;  %v6258_v49 = vld [vmem:[#allocation14 + $0x1b0] sm:$0xf] }
 0x161   : > { %2301 = vmatpush.bf16.msra.mxu0 %v5771_v63  ;;  %v5988_v63 = vld [vmem:[#allocation13 + $0x1b8] sm:$0xf0]  ;;  %v5799_v0 = vor.u32 %v7457_v55, %v5796_v56  ;;  %v6290_v56 = vld [vmem:[#allocation14 + $0x1f0] sm:$0xf] }
 0x162   : > { %2315 = vmatpush.bf16.msra.mxu1 %v5835_v4  ;;  %v7455_v4 = vld [vmem:[#allocation13 + $0x24] sm:$0xf]  ;;  %v5991_v6 = vor.u32 %v7505_v62, %v5988_v63  ;;  %v6090_v62 = vld [vmem:[#allocation14 + $0x60] sm:$0xf]  ;;  %v7528_v63 = vld [vmem:[#allocation14 + $0x64] sm:$0xf0] }
 0x163   : > { %2329 = vmatpush.bf16.msra.mxu2 %v5899_v3  ;;  %v5788_v3 = vld [vmem:[#allocation13 + $0x28] sm:$0xf0]  ;;  %v6091_v16 = vor.u32 %v7528_v63, %v6090_v62  ;;  %v6250_v63 = vld [vmem:[#allocation14 + $0x1a0] sm:$0xf] }
 0x164   : > { %2343 = vmatpush.bf16.msra.mxu3 %v5963_v22  ;;  %2302 = vmatmul.bf16.vlgmr.msra.gmra.mxu0 %v8856_v26  ;;  %v7487_v22 = vld [vmem:[#allocation13 + $0x124] sm:$0xf]  ;;  %v5791_v9 = vor.u32 %v7455_v4, %v5788_v3  ;;  %v6218_v4 = vld [vmem:[#allocation14 + $0x160] sm:$0xf]  ;;  %v7560_v3 = vld [vmem:[#allocation14 + $0x164] sm:$0xf0] }
 0x165   : > { %2350 = vmatpush.bf16.msrb.mxu0 %v5831_v7  ;;  %2316 = vmatmul.bf16.vlgmr.msra.gmra.mxu1 %v8858_v28  ;;  %v5916_v7 = vld [vmem:[#allocation13 + $0x128] sm:$0xf0] }
 0x166   : > { %2364 = vmatpush.bf16.msrb.mxu1 %v5895_v10  ;;  %2330 = vmatmul.bf16.vlgmr.msra.gmra.mxu2 %v8852_v17  ;;  %v5919_v13 = vor.u32 %v7487_v22, %v5916_v7  ;;  %v6219_v7 = vor.u32 %v7560_v3, %v6218_v4  ;;  %v6050_v4 = vld [vmem:[#allocation14 + $0x10] sm:$0xf] }
 0x167   : > { %2378 = vmatpush.bf16.msrb.mxu2 %v5959_v11  ;;  %2344 = vmatmul.bf16.vlgmr.msra.gmra.mxu3 %v8854_v21  ;;  %v1675_v10 = vpop.f32.mrf.mxu0 }
 0x168   : > { %2392 = vmatpush.bf16.msrb.mxu3 %v6023_v15  ;;  %v1689_v11 = vpop.f32.mrf.mxu1  ;;  %v5780_v15 = vld [vmem:[#allocation13 + $0x18] sm:$0xf0] }
 0x169   : > { %2351 = vmatpush.bf16.msrb.mxu0 %v5823_v27  ;;  %v1690_v19 = vadd.f32 %v1689_v11, %v1675_v10  ;;  %v5908_v27 = vld [vmem:[#allocation13 + $0x118] sm:$0xf0]  ;;  %v5783_v33 = vor.u32 %v7453_v14, %v5780_v15  ;;  %v6210_v14 = vld [vmem:[#allocation14 + $0x150] sm:$0xf]  ;;  %v7558_v15 = vld [vmem:[#allocation14 + $0x154] sm:$0xf0] }
 0x16a   : > { %2365 = vmatpush.bf16.msrb.mxu1 %v5887_v29  ;;  %v1703_v29 = vpop.f32.mrf.mxu2  ;;  %v5911_v38 = vor.u32 %v7485_v25, %v5908_v27  ;;  %v6211_v25 = vor.u32 %v7558_v15, %v6210_v14  ;;  %v6074_v27 = vld [vmem:[#allocation14 + $0x40] sm:$0xf]  ;;  %v7516_v15 = vld [vmem:[#allocation14 + $0x4] sm:$0xf0] }
 0x16b   : > { %2379 = vmatpush.bf16.msrb.mxu2 %v5951_v30  ;;  %v7501_v30 = vld [vmem:[#allocation13 + $0x194] sm:$0xf]  ;;  %v1704_v32 = vadd.f32 %v1703_v29, %v1690_v19  ;;  %v7574_v19 = vld [vmem:[#allocation14 + $0x1d4] sm:$0xf0]  ;;  %v6138_v29 = vld [vmem:[#allocation14 + $0xc0] sm:$0xf] }
 0x16c   : > { %2393 = vmatpush.bf16.msrb.mxu3 %v6015_v34  ;;  %v7451_v34 = vld [vmem:[#allocation13 + $0x4] sm:$0xf]  ;;  %v1717_v36 = vpop.f32.mrf.mxu3  ;;  %v5975_v43 = vor.u32 %v7501_v30, %v5972_v31  ;;  %v6275_v31 = vor.u32 %v7574_v19, %v6274_v18  ;;  %v6042_v14 = vld [vmem:[#allocation14] sm:$0xf] }
 0x16d   : > { %2352 = vmatpush.bf16.msrb.mxu0 %v5815_v40  ;;  %v5836_v40 = vld [vmem:[#allocation13 + $0x88] sm:$0xf0]  ;;  %v5775_v50 = vor.u32 %v7451_v34, %v5772_v35  ;;  %v7572_v34 = vld [vmem:[#allocation14 + $0x1c4] sm:$0xf0]  ;;  %v6106_v19 = vld [vmem:[#allocation14 + $0x80] sm:$0xf] }
 0x16e   : > { %2366 = vmatpush.bf16.msrb.mxu1 %v5879_v41  ;;  %v7483_v41 = vld [vmem:[#allocation13 + $0x104] sm:$0xf] }
 0x16f   : > { %2380 = vmatpush.bf16.msrb.mxu2 %v5943_v42  ;;  %v8864_v42 = vadd.f32 %v1717_v36, %v1704_v32  ;;  %v5903_v55 = vor.u32 %v7483_v41, %v5900_v44  ;;  %v8866_v10 = vpop.f32.mrf.mxu0  ;;  %v6202_v32 = vld [vmem:[#allocation14 + $0x140] sm:$0xf] }
 0x170   : > { %2394 = vmatpush.bf16.msrb.mxu3 %v6007_v46  ;;  %v5964_v46 = vld [vmem:[#allocation13 + $0x188] sm:$0xf0]  ;;  %v8868_v11 = vpop.f32.mrf.mxu1 }
 0x171   : > { %2353 = vmatpush.bf16.msrb.mxu0 %v5807_v52  ;;  %v6226_v52 = vld [vmem:[#allocation14 + $0x170] sm:$0xf] }
 0x172   : > { %2367 = vmatpush.bf16.msrb.mxu1 %v5871_v53  ;;  %v7562_v53 = vld [vmem:[#allocation14 + $0x174] sm:$0xf0]  ;;  %v8874_v30 = vpop.f32.mrf.mxu2 }
 0x173   : > { %2381 = vmatpush.bf16.msrb.mxu2 %v5935_v54  ;;  %v5839_v54 = vor.u32 %v7467_v39, %v5836_v40  ;;  %v6227_v61 = vor.u32 %v7562_v53, %v6226_v52  ;;  %v7522_v39 = vld [vmem:[#allocation14 + $0x34] sm:$0xf0]  ;;  %v6130_v40 = vld [vmem:[#allocation14 + $0xb0] sm:$0xf] }
 0x174   : > { %2395 = vmatpush.bf16.msrb.mxu3 %v5999_v58  ;;  %v5967_v58 = vor.u32 %v7499_v45, %v5964_v46  ;;  %v8876_v35 = vpop.f32.mrf.mxu3  ;;  %v7538_v45 = vld [vmem:[#allocation14 + $0xb4] sm:$0xf0]  ;;  %v6194_v46 = vld [vmem:[#allocation14 + $0x130] sm:$0xf] }
 0x175   : > { %2354 = vmatpush.bf16.msrb.mxu0 %v5799_v0  ;;  %v6154_v0 = vld [vmem:[#allocation14 + $0xe0] sm:$0xf]  ;;  %v6131_v52 = vor.u32 %v7538_v45, %v6130_v40  ;;  %v6195_v53 = vor.u32 %v7554_v47, %v6194_v46  ;;  %v6034_v40 = vld [vmem:[%s8780_s18 + $0x8] sm:$0xf]  ;;  %v7308_v45 = vld [vmem:[%s8780_s18 + $0xc] sm:$0xf] }
 0x176   : > { %2368 = vmatpush.bf16.msrb.mxu1 %v5863_v1  ;;  %v6291_v1 = vor.u32 %v7578_v57, %v6290_v56  ;;  %v6122_v56 = vld [vmem:[#allocation14 + $0xa0] sm:$0xf]  ;;  %v6036_v46 = vld [vmem:[%s8780_s18 + $0x18] sm:$0xf0]  ;;  %v7527_v47 = vld [vmem:[#allocation14 + $0x64] sm:$0xf] }
 0x177   : > { %2382 = vmatpush.bf16.msrb.mxu2 %v5927_v2  ;;  %v7544_v2 = vld [vmem:[#allocation14 + $0xe4] sm:$0xf0] }
 0x178   : > { %2396 = vmatpush.bf16.msrb.mxu3 %v5991_v6  ;;  %v7576_v6 = vld [vmem:[#allocation14 + $0x1e4] sm:$0xf0]  ;;  %v6155_v22 = vor.u32 %v7544_v2, %v6154_v0 }
 0x179   : > { %2355 = vmatpush.bf16.msrb.mxu0 %v5791_v9  ;;  %v6146_v9 = vld [vmem:[#allocation14 + $0xd0] sm:$0xf]  ;;  %v7568_v0 = vld [vmem:[#allocation14 + $0x1a4] sm:$0xf0] }
 0x17a   : > { %2369 = vmatpush.bf16.msrb.mxu1 %v5855_v12  ;;  %v6283_v12 = vor.u32 %v7576_v6, %v6282_v5 }
 0x17b   : > { %2383 = vmatpush.bf16.msrb.mxu2 %v5919_v13  ;;  %v7542_v13 = vld [vmem:[#allocation14 + $0xd4] sm:$0xf0] }
 0x17c   : > { %2397 = vmatpush.bf16.msrb.mxu3 %v5983_v20  ;;  %v6083_v20 = vor.u32 %v7526_v8, %v6082_v23  ;;  %v6147_v24 = vor.u32 %v7542_v13, %v6146_v9  ;;  %v6251_v23 = vor.u32 %v7568_v0, %v6250_v63  ;;  %v6178_v8 = vld [vmem:[#allocation14 + $0x110] sm:$0xf]  ;;  %v7550_v9 = vld [vmem:[#allocation14 + $0x114] sm:$0xf0]  ;;  %v8890_v63 = vor.u32 %v7308_v45, %v6036_v46  ;;  %v7575_v0 = vld [vmem:[#allocation14 + $0x1e4] sm:$0xf] }
 0x17d   : > { %2356 = vmatpush.bf16.msrb.mxu0 %v5783_v33  ;;  %v6266_v33 = vld [vmem:[#allocation14 + $0x1c0] sm:$0xf]  ;;  %v7566_v13 = vld [vmem:[#allocation14 + $0x194] sm:$0xf0] }
 0x17e   : > { %2370 = vmatpush.bf16.msrb.mxu1 %v5847_v37  ;;  %v6267_v44 = vor.u32 %v7572_v34, %v6266_v33  ;;  %v7545_v33 = vld [vmem:[#allocation14 + $0xf4] sm:$0xf]  ;;  %v6164_v34 = vld [vmem:[#allocation14 + $0xf8] sm:$0xf0] }
 0x17f   : > { %2384 = vmatpush.bf16.msrb.mxu2 %v5911_v38  ;;  %v6066_v38 = vld [vmem:[#allocation14 + $0x30] sm:$0xf] }
 0x180   : > { %2398 = vmatpush.bf16.msrb.mxu3 %v5975_v43  ;;  %v6067_v51 = vor.u32 %v7522_v39, %v6066_v38  ;;  %v6043_v38 = vor.u32 %v7516_v15, %v6042_v14  ;;  %v6292_v39 = vld [vmem:[#allocation14 + $0x1f8] sm:$0xf0]  ;;  %v7557_v14 = vld [vmem:[#allocation14 + $0x154] sm:$0xf] }
 0x181   : > { %2357 = vmatpush.bf16.msrb.mxu0 %v5775_v50  ;;  %v1731_v41 = vpop.f32.mrf.mxu0  ;;  %v7570_v50 = vld [vmem:[#allocation14 + $0x1b4] sm:$0xf0]  ;;  %v6212_v15 = vld [vmem:[#allocation14 + $0x158] sm:$0xf0] }
 0x182   : > { %2371 = vmatpush.bf16.msrb.mxu1 %v5839_v54  ;;  %v1745_v43 = vpop.f32.mrf.mxu1  ;;  %v6058_v54 = vld [vmem:[#allocation14 + $0x20] sm:$0xf] }
 0x183   : > { %2385 = vmatpush.bf16.msrb.mxu2 %v5903_v55  ;;  %v1746_v48 = vadd.f32 %v1745_v43, %v1731_v41  ;;  %v7520_v55 = vld [vmem:[#allocation14 + $0x24] sm:$0xf0]  ;;  %v7310_v41 = vld [vmem:[%s8780_s18 + $0x14] sm:$0xf0] }
 0x184   : > { %2399 = vmatpush.bf16.msrb.mxu3 %v5967_v58  ;;  %2358 = vmatmul.bf16.vlgmr.msrb.gmra.mxu0 %v8856_v26  ;;  %v7556_v26 = vld [vmem:[#allocation14 + $0x144] sm:$0xf0]  ;;  %v6259_v58 = vor.u32 %v7570_v50, %v6258_v49  ;;  %v6059_v2 = vor.u32 %v7520_v55, %v6058_v54  ;;  %v6092_v50 = vld [vmem:[#allocation14 + $0x68] sm:$0xf0]  ;;  %v7543_v55 = vld [vmem:[#allocation14 + $0xe4] sm:$0xf] }
 0x185   : > { %2828 = vmatpush.bf16.msra.mxu0 %v6099_v59  ;;  %2372 = vmatmul.bf16.vlgmr.msrb.gmra.mxu1 %v8858_v28  ;;  %v6203_v37 = vor.u32 %v7556_v26, %v6202_v32  ;;  %v7536_v59 = vld [vmem:[#allocation14 + $0xa4] sm:$0xf0]  ;;  %v6100_v26 = vld [vmem:[#allocation14 + $0x78] sm:$0xf0] }
 0x186   : > { %2842 = vmatpush.bf16.msra.mxu1 %v6163_v60  ;;  %2386 = vmatmul.bf16.vlgmr.msrb.gmra.mxu2 %v8852_v17  ;;  %v7524_v17 = vld [vmem:[#allocation14 + $0x44] sm:$0xf0]  ;;  %v6186_v60 = vld [vmem:[#allocation14 + $0x120] sm:$0xf]  ;;  %v6123_v5 = vor.u32 %v7536_v59, %v6122_v56  ;;  %v7307_v56 = vld [vmem:[%s8780_s18 + $0x4] sm:$0xf]  ;;  %v8888_v59 = vor.u32 %v7310_v41, %v6034_v40 }
 0x187   : > { %2856 = vmatpush.bf16.msra.mxu2 %v6227_v61  ;;  %2400 = vmatmul.bf16.vlgmr.msrb.gmra.mxu3 %v8854_v21  ;;  %v7540_v21 = vld [vmem:[#allocation14 + $0xc4] sm:$0xf0]  ;;  %v6075_v28 = vor.u32 %v7524_v17, %v6074_v27  ;;  %v6179_v17 = vor.u32 %v7550_v9, %v6178_v8  ;;  %v7521_v40 = vld [vmem:[#allocation14 + $0x34] sm:$0xf]  ;;  %v6068_v41 = vld [vmem:[#allocation14 + $0x38] sm:$0xf0] }
 0x188   : > { %2870 = vmatpush.bf16.msra.mxu3 %v6291_v1  ;;  %v6139_v36 = vor.u32 %v7540_v21, %v6138_v29  ;;  %v7552_v61 = vld [vmem:[#allocation14 + $0x124] sm:$0xf0]  ;;  %v6234_v29 = vld [vmem:[#allocation14 + $0x180] sm:$0xf]  ;;  %v7529_v21 = vld [vmem:[#allocation14 + $0x74] sm:$0xf] }
 0x189   : > { %2829 = vmatpush.bf16.msra.mxu0 %v6091_v16  ;;  %v1759_v57 = vpop.f32.mrf.mxu2  ;;  %v6187_v6 = vor.u32 %v7552_v61, %v6186_v60  ;;  %v7518_v16 = vld [vmem:[#allocation14 + $0x14] sm:$0xf0]  ;;  %v6103_v49 = vor.u32 %v7529_v21, %v6100_v26  ;;  %v6156_v60 = vld [vmem:[#allocation14 + $0xe8] sm:$0xf0]  ;;  %v7559_v61 = vld [vmem:[#allocation14 + $0x164] sm:$0xf]  ;;  %v8896_v8 = vpop.f32.mrf.mxu0 }
 0x18a   : > { %2843 = vmatpush.bf16.msra.mxu1 %v6155_v22  ;;  %v1760_v62 = vadd.f32 %v1759_v57, %v1746_v48  ;;  %v1773_v1 = vpop.f32.mrf.mxu3  ;;  %v6114_v22 = vld [vmem:[#allocation14 + $0x90] sm:$0xf]  ;;  %v6051_v18 = vor.u32 %v7518_v16, %v6050_v4  ;;  %v6028_v57 = vld [vmem:[%s8780_s18 + $0x10] sm:$0xf0]  ;;  %v6095_v4 = vor.u32 %v7527_v47, %v6092_v50  ;;  %v8898_v9 = vpop.f32.mrf.mxu1  ;;  %v7555_v26 = vld [vmem:[#allocation14 + $0x144] sm:$0xf] }
 0x18b   : > { %2857 = vmatpush.bf16.msra.mxu2 %v6219_v7  ;;  %v7534_v7 = vld [vmem:[#allocation14 + $0x94] sm:$0xf0]  ;;  %v6132_v47 = vld [vmem:[#allocation14 + $0xb8] sm:$0xf0] }
 0x18c   : > { %2871 = vmatpush.bf16.msra.mxu3 %v6283_v12  ;;  %v8878_v3 = vadd.f32 %v1773_v1, %v1760_v62  ;;  %v6242_v12 = vld [vmem:[#allocation14 + $0x190] sm:$0xf]  ;;  %v6115_v27 = vor.u32 %v7534_v7, %v6114_v22  ;;  %v6220_v62 = vld [vmem:[#allocation14 + $0x168] sm:$0xf0]  ;;  %v7525_v22 = vld [vmem:[#allocation14 + $0x54] sm:$0xf] }
 0x18d   : > { %2830 = vmatpush.bf16.msra.mxu0 %v6083_v20  ;;  %v7532_v20 = vld [vmem:[#allocation14 + $0x84] sm:$0xf0]  ;;  %v6243_v32 = vor.u32 %v7566_v13, %v6242_v12  ;;  %v6284_v1 = vld [vmem:[#allocation14 + $0x1e8] sm:$0xf0]  ;;  %v6223_v16 = vor.u32 %v7559_v61, %v6220_v62  ;;  %v6084_v7 = vld [vmem:[#allocation14 + $0x58] sm:$0xf0] }
 0x18e   : > { %2844 = vmatpush.bf16.msra.mxu1 %v6147_v24  ;;  %v6170_v24 = vld [vmem:[#allocation14 + $0x100] sm:$0xf]  ;;  %v6107_v43 = vor.u32 %v7532_v20, %v6106_v19  ;;  %v6287_v12 = vor.u32 %v7575_v0, %v6284_v1  ;;  %v6148_v13 = vld [vmem:[#allocation14 + $0xd8] sm:$0xf0]  ;;  %v6087_v20 = vor.u32 %v7525_v22, %v6084_v7  ;;  %v6124_v62 = vld [vmem:[#allocation14 + $0xa8] sm:$0xf0] }
 0x18f   : > { %2858 = vmatpush.bf16.msra.mxu2 %v6211_v25  ;;  %v7548_v25 = vld [vmem:[#allocation14 + $0x104] sm:$0xf0]  ;;  %v6276_v19 = vld [vmem:[#allocation14 + $0x1d8] sm:$0xf0]  ;;  %v7551_v0 = vld [vmem:[#allocation14 + $0x124] sm:$0xf] }
 0x190   : > { %2872 = vmatpush.bf16.msra.mxu3 %v6275_v31  ;;  %v7564_v31 = vld [vmem:[#allocation14 + $0x184] sm:$0xf0]  ;;  %v6188_v1 = vld [vmem:[#allocation14 + $0x128] sm:$0xf0] }
 0x191   : > { %2831 = vmatpush.bf16.msra.mxu0 %v6075_v28  ;;  %v7561_v28 = vld [vmem:[#allocation14 + $0x174] sm:$0xf]  ;;  %v6235_v48 = vor.u32 %v7564_v31, %v6234_v29  ;;  %v7539_v29 = vld [vmem:[#allocation14 + $0xc4] sm:$0xf]  ;;  %v8904_v31 = vpop.f32.mrf.mxu2 }
 0x192   : > { %2845 = vmatpush.bf16.msra.mxu1 %v6139_v36  ;;  %v6228_v36 = vld [vmem:[#allocation14 + $0x178] sm:$0xf0] }
 0x193   : > { %2859 = vmatpush.bf16.msra.mxu2 %v6203_v37  ;;  %v7577_v37 = vld [vmem:[#allocation14 + $0x1f4] sm:$0xf]  ;;  %v6231_v54 = vor.u32 %v7561_v28, %v6228_v36  ;;  %v6268_v28 = vld [vmem:[#allocation14 + $0x1c8] sm:$0xf0]  ;;  %v8906_v36 = vpop.f32.mrf.mxu3 }
 0x194   : > { %2873 = vmatpush.bf16.msra.mxu3 %v6267_v44  ;;  %v6171_v44 = vor.u32 %v7548_v25, %v6170_v24  ;;  %v6215_v25 = vor.u32 %v7557_v14, %v6212_v15  ;;  %v7517_v14 = vld [vmem:[#allocation14 + $0x14] sm:$0xf]  ;;  %v6052_v15 = vld [vmem:[#allocation14 + $0x18] sm:$0xf0] }
 0x195   : > { %2832 = vmatpush.bf16.msra.mxu0 %v6067_v51  ;;  %v6026_v51 = vld [vmem:[%s8780_s18] sm:$0xf] }
 0x196   : > { %2846 = vmatpush.bf16.msra.mxu1 %v6131_v52  ;;  %v7309_v52 = vld [vmem:[%s8780_s18 + $0xc] sm:$0xf0] }
 0x197   : > { %2860 = vmatpush.bf16.msra.mxu2 %v6195_v53  ;;  %v6167_v53 = vor.u32 %v7545_v33, %v6164_v34  ;;  %v6204_v33 = vld [vmem:[#allocation14 + $0x148] sm:$0xf0]  ;;  %v7571_v34 = vld [vmem:[#allocation14 + $0x1c4] sm:$0xf] }
 0x198   : > { %2874 = vmatpush.bf16.msra.mxu3 %v6259_v58  ;;  %v6295_v58 = vor.u32 %v7577_v37, %v6292_v39  ;;  %v6207_v39 = vor.u32 %v7555_v26, %v6204_v33  ;;  %v6271_v46 = vor.u32 %v7571_v34, %v6268_v28  ;;  %v7531_v34 = vld [vmem:[#allocation14 + $0x84] sm:$0xf]  ;;  %v6108_v28 = vld [vmem:[#allocation14 + $0x88] sm:$0xf0] }
 0x199   : > { %2833 = vmatpush.bf16.msra.mxu0 %v6059_v2  ;;  %v8892_v2 = vor.u32 %v7309_v52, %v6026_v51  ;;  %v7569_v51 = vld [vmem:[#allocation14 + $0x1b4] sm:$0xf]  ;;  %v6260_v52 = vld [vmem:[#allocation14 + $0x1b8] sm:$0xf0] }
 0x19a   : > { %2847 = vmatpush.bf16.msra.mxu1 %v6123_v5  ;;  %v8894_v5 = vor.u32 %v7307_v56, %v6028_v57  ;;  %v7519_v56 = vld [vmem:[#allocation14 + $0x24] sm:$0xf]  ;;  %v6060_v57 = vld [vmem:[#allocation14 + $0x28] sm:$0xf0]  ;;  %v6263_v61 = vor.u32 %v7569_v51, %v6260_v52  ;;  %v6562_v52 = vld [vmem:[#allocation17 + $0x1f0] sm:$0xf] }
 0x19b   : > { %2861 = vmatpush.bf16.msra.mxu2 %v6187_v6  ;;  %v6159_v6 = vor.u32 %v7543_v55, %v6156_v60  ;;  %v6063_v7 = vor.u32 %v7519_v56, %v6060_v57 }
 0x19c   : > { %2875 = vmatpush.bf16.msra.mxu3 %v6251_v23  ;;  %v7541_v23 = vld [vmem:[#allocation14 + $0xd4] sm:$0xf] }
 0x19d   : > { %2834 = vmatpush.bf16.msra.mxu0 %v6051_v18  ;;  %v7573_v18 = vld [vmem:[#allocation14 + $0x1d4] sm:$0xf]  ;;  %v6151_v24 = vor.u32 %v7541_v23, %v6148_v13  ;;  %v6191_v13 = vor.u32 %v7551_v0, %v6188_v1  ;;  %v7672_v0 = vld [vmem:[#allocation17 + $0xe4] sm:$0xf0]  ;;  %v6490_v1 = vld [vmem:[#allocation17 + $0x160] sm:$0xf] }
 0x19e   : > { %2848 = vmatpush.bf16.msra.mxu1 %v6115_v27  ;;  %v7523_v27 = vld [vmem:[#allocation14 + $0x44] sm:$0xf]  ;;  %v6279_v21 = vor.u32 %v7573_v18, %v6276_v19  ;;  %v7533_v18 = vld [vmem:[#allocation14 + $0x94] sm:$0xf] }
 0x19f   : > { %2862 = vmatpush.bf16.msra.mxu2 %v6179_v17  ;;  %v6076_v17 = vld [vmem:[#allocation14 + $0x48] sm:$0xf0] }
 0x1a0   : > { %2876 = vmatpush.bf16.msra.mxu3 %v6243_v32  ;;  %v6140_v32 = vld [vmem:[#allocation14 + $0xc8] sm:$0xf0]  ;;  %v6079_v37 = vor.u32 %v7523_v27, %v6076_v17  ;;  %v7565_v27 = vld [vmem:[#allocation14 + $0x194] sm:$0xf]  ;;  %v6244_v17 = vld [vmem:[#allocation14 + $0x198] sm:$0xf0] }
 0x1a1   : > { %2835 = vmatpush.bf16.msra.mxu0 %v6043_v38  ;;  %v6143_v38 = vor.u32 %v7539_v29, %v6140_v32  ;;  %v6055_v29 = vor.u32 %v7517_v14, %v6052_v15  ;;  %v6044_v32 = vld [vmem:[#allocation14 + $0x8] sm:$0xf0]  ;;  %v6354_v14 = vld [vmem:[#allocation17 + $0x50] sm:$0xf]  ;;  %v7654_v15 = vld [vmem:[#allocation17 + $0x54] sm:$0xf0] }
 0x1a2   : > { %2849 = vmatpush.bf16.msra.mxu1 %v6107_v43  ;;  %v7537_v43 = vld [vmem:[#allocation14 + $0xb4] sm:$0xf]  ;;  %v1801_v45 = vpop.f32.mrf.mxu1 }
 0x1a3   : > { %2863 = vmatpush.bf16.msra.mxu2 %v6171_v44  ;;  %v1787_v44 = vpop.f32.mrf.mxu0 }
 0x1a4   : > { %2877 = vmatpush.bf16.msra.mxu3 %v6235_v48  ;;  %2836 = vmatmul.bf16.vlgmr.msra.gmra.mxu0 %v8892_v2  ;;  %v7553_v48 = vld [vmem:[#allocation14 + $0x134] sm:$0xf]  ;;  %v1802_v50 = vadd.f32 %v1801_v45, %v1787_v44  ;;  %v7658_v44 = vld [vmem:[#allocation17 + $0x74] sm:$0xf0]  ;;  %v6434_v45 = vld [vmem:[#allocation17 + $0xf0] sm:$0xf] }
 0x1a5   : > { %2884 = vmatpush.bf16.msrb.mxu0 %v6103_v49  ;;  %2850 = vmatmul.bf16.vlgmr.msra.gmra.mxu1 %v8894_v5  ;;  %v6196_v49 = vld [vmem:[#allocation14 + $0x138] sm:$0xf0] }
 0x1a6   : > { %2898 = vmatpush.bf16.msrb.mxu1 %v6167_v53  ;;  %2864 = vmatmul.bf16.vlgmr.msra.gmra.mxu2 %v8888_v59  ;;  %v6071_v53 = vor.u32 %v7521_v40, %v6068_v41  ;;  %v6199_v55 = vor.u32 %v7553_v48, %v6196_v49  ;;  %v7563_v40 = vld [vmem:[#allocation14 + $0x184] sm:$0xf]  ;;  %v6236_v41 = vld [vmem:[#allocation14 + $0x188] sm:$0xf0]  ;;  %v6498_v48 = vld [vmem:[#allocation17 + $0x170] sm:$0xf] }
 0x1a7   : > { %2912 = vmatpush.bf16.msrb.mxu2 %v6231_v54  ;;  %2878 = vmatmul.bf16.vlgmr.msra.gmra.mxu3 %v8890_v63  ;;  %v6135_v54 = vor.u32 %v7537_v43, %v6132_v47  ;;  %v6370_v43 = vld [vmem:[#allocation17 + $0x70] sm:$0xf]  ;;  %v7674_v47 = vld [vmem:[#allocation17 + $0xf4] sm:$0xf0] }
 0x1a8   : > { %2926 = vmatpush.bf16.msrb.mxu3 %v6295_v58  ;;  %v7535_v58 = vld [vmem:[#allocation14 + $0xa4] sm:$0xf]  ;;  %v7690_v49 = vld [vmem:[#allocation17 + $0x174] sm:$0xf0]  ;;  %v6435_v56 = vor.u32 %v7674_v47, %v6434_v45 }
 0x1a9   : > { %2885 = vmatpush.bf16.msrb.mxu0 %v6095_v4  ;;  %v1815_v60 = vpop.f32.mrf.mxu2  ;;  %v6499_v57 = vor.u32 %v7690_v49, %v6498_v48  ;;  %v7650_v47 = vld [vmem:[#allocation17 + $0x34] sm:$0xf0]  ;;  %v6402_v48 = vld [vmem:[#allocation17 + $0xb0] sm:$0xf] }
 0x1aa   : > { %2899 = vmatpush.bf16.msrb.mxu1 %v6159_v6  ;;  %v1816_v4 = vadd.f32 %v1815_v60, %v1802_v50  ;;  %v7567_v6 = vld [vmem:[#allocation14 + $0x1a4] sm:$0xf]  ;;  %v1829_v22 = vpop.f32.mrf.mxu3  ;;  %v6111_v50 = vor.u32 %v7531_v34, %v6108_v28  ;;  %v7656_v60 = vld [vmem:[#allocation17 + $0x64] sm:$0xf0]  ;;  %v6410_v34 = vld [vmem:[#allocation17 + $0xc0] sm:$0xf] }
 0x1ab   : > { %2913 = vmatpush.bf16.msrb.mxu2 %v6223_v16  ;;  %v6252_v16 = vld [vmem:[#allocation14 + $0x1a8] sm:$0xf0] }
 0x1ac   : > { %2927 = vmatpush.bf16.msrb.mxu3 %v6287_v12  ;;  %v8908_v23 = vadd.f32 %v1829_v22, %v1816_v4  ;;  %v6127_v12 = vor.u32 %v7535_v58, %v6124_v62  ;;  %v6255_v19 = vor.u32 %v7567_v6, %v6252_v16  ;;  %v6362_v58 = vld [vmem:[#allocation17 + $0x60] sm:$0xf]  ;;  %v7688_v4 = vld [vmem:[#allocation17 + $0x164] sm:$0xf0] }
 0x1ad   : > { %2886 = vmatpush.bf16.msrb.mxu0 %v6087_v20  ;;  %v6116_v20 = vld [vmem:[#allocation14 + $0x98] sm:$0xf0]  ;;  %v6554_v6 = vld [vmem:[#allocation17 + $0x1e0] sm:$0xf]  ;;  %v7704_v16 = vld [vmem:[#allocation17 + $0x1e4] sm:$0xf0]  ;;  %v6363_v22 = vor.u32 %v7656_v60, %v6362_v58 }
 0x1ae   : > { %2900 = vmatpush.bf16.msrb.mxu1 %v6151_v24  ;;  %v7549_v24 = vld [vmem:[#allocation14 + $0x114] sm:$0xf]  ;;  %v6119_v26 = vor.u32 %v7533_v18, %v6116_v20  ;;  %v6418_v18 = vld [vmem:[#allocation17 + $0xd0] sm:$0xf]  ;;  %v6555_v20 = vor.u32 %v7704_v16, %v6554_v6  ;;  %v7664_v6 = vld [vmem:[#allocation17 + $0xa4] sm:$0xf0] }
 0x1af   : > { %2914 = vmatpush.bf16.msrb.mxu2 %v6215_v25  ;;  %v6180_v25 = vld [vmem:[#allocation14 + $0x118] sm:$0xf0]  ;;  %v6458_v16 = vld [vmem:[#allocation17 + $0x120] sm:$0xf] }
 0x1b0   : > { %2928 = vmatpush.bf16.msrb.mxu3 %v6279_v21  ;;  %v7515_v21 = vld [vmem:[#allocation14 + $0x4] sm:$0xf]  ;;  %v6183_v33 = vor.u32 %v7549_v24, %v6180_v25  ;;  %v7670_v24 = vld [vmem:[#allocation17 + $0xd4] sm:$0xf0]  ;;  %v6482_v25 = vld [vmem:[#allocation17 + $0x150] sm:$0xf] }
 0x1b1   : > { %2887 = vmatpush.bf16.msrb.mxu0 %v6079_v37  ;;  %v7547_v37 = vld [vmem:[#allocation14 + $0x104] sm:$0xf]  ;;  %v8918_v28 = vpop.f32.mrf.mxu2 }
 0x1b2   : > { %2901 = vmatpush.bf16.msrb.mxu1 %v6143_v38  ;;  %v6247_v38 = vor.u32 %v7565_v27, %v6244_v17  ;;  %v7686_v27 = vld [vmem:[#allocation17 + $0x154] sm:$0xf0]  ;;  %v6546_v17 = vld [vmem:[#allocation17 + $0x1d0] sm:$0xf] }
 0x1b3   : > { %2915 = vmatpush.bf16.msrb.mxu2 %v6207_v39  ;;  %v6172_v39 = vld [vmem:[#allocation14 + $0x108] sm:$0xf0] }
 0x1b4   : > { %2929 = vmatpush.bf16.msrb.mxu3 %v6271_v46  ;;  %v6047_v46 = vor.u32 %v7515_v21, %v6044_v32  ;;  %v6175_v51 = vor.u32 %v7547_v37, %v6172_v39  ;;  %v6355_v21 = vor.u32 %v7654_v15, %v6354_v14  ;;  %v6419_v32 = vor.u32 %v7670_v24, %v6418_v18  ;;  %v8920_v39 = vpop.f32.mrf.mxu3  ;;  %v6522_v14 = vld [vmem:[#allocation17 + $0x1a0] sm:$0xf]  ;;  %v7696_v15 = vld [vmem:[#allocation17 + $0x1a4] sm:$0xf0] }
 0x1b5   : > { %2888 = vmatpush.bf16.msrb.mxu0 %v6071_v53  ;;  %v7706_v53 = vld [vmem:[#allocation17 + $0x1f4] sm:$0xf0] }
 0x1b6   : > { %2902 = vmatpush.bf16.msrb.mxu1 %v6135_v54  ;;  %v6239_v54 = vor.u32 %v7563_v40, %v6236_v41  ;;  %v6563_v62 = vor.u32 %v7706_v53, %v6562_v52  ;;  %v6538_v40 = vld [vmem:[#allocation17 + $0x1c0] sm:$0xf]  ;;  %v7700_v41 = vld [vmem:[#allocation17 + $0x1c4] sm:$0xf0]  ;;  %v6466_v52 = vld [vmem:[#allocation17 + $0x130] sm:$0xf] }
 0x1b7   : > { %2916 = vmatpush.bf16.msrb.mxu2 %v6199_v55  ;;  %v6371_v55 = vor.u32 %v7658_v44, %v6370_v43  ;;  %v7682_v53 = vld [vmem:[#allocation17 + $0x134] sm:$0xf0] }
 0x1b8   : > { %2930 = vmatpush.bf16.msrb.mxu3 %v6263_v61  ;;  %v6426_v61 = vld [vmem:[#allocation17 + $0xe0] sm:$0xf]  ;;  %v6467_v60 = vor.u32 %v7682_v53, %v6466_v52  ;;  %v7657_v52 = vld [vmem:[#allocation17 + $0x74] sm:$0xf]  ;;  %v6372_v53 = vld [vmem:[#allocation17 + $0x78] sm:$0xf0] }
 0x1b9   : > { %2889 = vmatpush.bf16.msrb.mxu0 %v6063_v7  ;;  %v8910_v7 = vpop.f32.mrf.mxu0 }
 0x1ba   : > { %2903 = vmatpush.bf16.msrb.mxu1 %v6127_v12  ;;  %v6427_v12 = vor.u32 %v7672_v0, %v6426_v61  ;;  %v6330_v61 = vld [vmem:[#allocation17 + $0x20] sm:$0xf] }
 0x1bb   : > { %2917 = vmatpush.bf16.msrb.mxu2 %v6191_v13  ;;  %v6491_v13 = vor.u32 %v7688_v4, %v6490_v1  ;;  %v6394_v0 = vld [vmem:[#allocation17 + $0xa0] sm:$0xf] }
 0x1bc   : > { %2931 = vmatpush.bf16.msrb.mxu3 %v6255_v19  ;;  %v8912_v19 = vpop.f32.mrf.mxu1  ;;  %v6395_v24 = vor.u32 %v7664_v6, %v6394_v0  ;;  %v6564_v0 = vld [vmem:[#allocation17 + $0x1f8] sm:$0xf0] }
 0x1bd   : > { %2890 = vmatpush.bf16.msrb.mxu0 %v6055_v29  ;;  %v7702_v29 = vld [vmem:[#allocation17 + $0x1d4] sm:$0xf0] }
 0x1be   : > { %2904 = vmatpush.bf16.msrb.mxu1 %v6119_v26  ;;  %v6483_v26 = vor.u32 %v7686_v27, %v6482_v25  ;;  %v6547_v37 = vor.u32 %v7702_v29, %v6546_v17  ;;  %v6322_v27 = vld [vmem:[#allocation17 + $0x10] sm:$0xf]  ;;  %v7646_v17 = vld [vmem:[#allocation17 + $0x14] sm:$0xf0] }
 0x1bf   : > { %2918 = vmatpush.bf16.msrb.mxu2 %v6183_v33  ;;  %v6346_v33 = vld [vmem:[#allocation17 + $0x40] sm:$0xf]  ;;  %v6386_v29 = vld [vmem:[#allocation17 + $0x90] sm:$0xf] }
 0x1c0   : > { %2932 = vmatpush.bf16.msrb.mxu3 %v6247_v38  ;;  %v6474_v38 = vld [vmem:[#allocation17 + $0x140] sm:$0xf] }
 0x1c1   : > { %2891 = vmatpush.bf16.msrb.mxu0 %v6047_v46  ;;  %v1843_v43 = vpop.f32.mrf.mxu0  ;;  %v6338_v46 = vld [vmem:[#allocation17 + $0x30] sm:$0xf] }
 0x1c2   : > { %2905 = vmatpush.bf16.msrb.mxu1 %v6111_v50  ;;  %v6539_v50 = vor.u32 %v7700_v41, %v6538_v40  ;;  %v6323_v40 = vor.u32 %v7646_v17, %v6322_v27  ;;  %v7644_v41 = vld [vmem:[#allocation17 + $0x4] sm:$0xf0]  ;;  %v7317_v27 = vld [vmem:[%s8788_s10 + $0xc] sm:$0xf0] }
 0x1c3   : > { %2919 = vmatpush.bf16.msrb.mxu2 %v6175_v51  ;;  %v7666_v51 = vld [vmem:[#allocation17 + $0xb4] sm:$0xf0] }
 0x1c4   : > { %2933 = vmatpush.bf16.msrb.mxu3 %v6239_v54  ;;  %2892 = vmatmul.bf16.vlgmr.msrb.gmra.mxu0 %v8892_v2  ;;  %v7684_v2 = vld [vmem:[#allocation17 + $0x144] sm:$0xf0]  ;;  %v1857_v49 = vpop.f32.mrf.mxu1  ;;  %v6403_v58 = vor.u32 %v7666_v51, %v6402_v48  ;;  %v6506_v48 = vld [vmem:[#allocation17 + $0x180] sm:$0xf] }
 0x1c5   : > { %3426 = vmatpush.bf16.msra.mxu0 %v6371_v55  ;;  %2906 = vmatmul.bf16.vlgmr.msrb.gmra.mxu1 %v8894_v5  ;;  %v6475_v45 = vor.u32 %v7684_v2, %v6474_v38  ;;  %v1858_v54 = vadd.f32 %v1857_v49, %v1843_v43  ;;  %v6530_v55 = vld [vmem:[#allocation17 + $0x1b0] sm:$0xf]  ;;  %v7694_v38 = vld [vmem:[#allocation17 + $0x194] sm:$0xf0]  ;;  %v6314_v2 = vld [vmem:[#allocation17] sm:$0xf] }
 0x1c6   : > { %3440 = vmatpush.bf16.msra.mxu1 %v6435_v56  ;;  %2920 = vmatmul.bf16.vlgmr.msrb.gmra.mxu2 %v8888_v59  ;;  %v7652_v59 = vld [vmem:[#allocation17 + $0x44] sm:$0xf0]  ;;  %v7698_v56 = vld [vmem:[#allocation17 + $0x1b4] sm:$0xf0] }
 0x1c7   : > { %3454 = vmatpush.bf16.msra.mxu2 %v6499_v57  ;;  %2934 = vmatmul.bf16.vlgmr.msrb.gmra.mxu3 %v8890_v63  ;;  %v7668_v63 = vld [vmem:[#allocation17 + $0xc4] sm:$0xf0]  ;;  %v6347_v5 = vor.u32 %v7652_v59, %v6346_v33  ;;  %v6339_v57 = vor.u32 %v7650_v47, %v6338_v46  ;;  %v6531_v4 = vor.u32 %v7698_v56, %v6530_v55  ;;  %v7662_v33 = vld [vmem:[#allocation17 + $0x94] sm:$0xf0]  ;;  %v6450_v59 = vld [vmem:[#allocation17 + $0x110] sm:$0xf] }
 0x1c8   : > { %3468 = vmatpush.bf16.msra.mxu3 %v6563_v62  ;;  %v6411_v44 = vor.u32 %v7668_v63, %v6410_v34  ;;  %v7648_v62 = vld [vmem:[#allocation17 + $0x24] sm:$0xf0]  ;;  %v7678_v34 = vld [vmem:[#allocation17 + $0x114] sm:$0xf0]  ;;  %v6514_v63 = vld [vmem:[#allocation17 + $0x190] sm:$0xf] }
 0x1c9   : > { %3427 = vmatpush.bf16.msra.mxu0 %v6363_v22  ;;  %v1871_v1 = vpop.f32.mrf.mxu2  ;;  %v7680_v22 = vld [vmem:[#allocation17 + $0x124] sm:$0xf0]  ;;  %v6331_v18 = vor.u32 %v7648_v62, %v6330_v61  ;;  %v6442_v46 = vld [vmem:[#allocation17 + $0x100] sm:$0xf]  ;;  %v7673_v55 = vld [vmem:[#allocation17 + $0xf4] sm:$0xf] }
 0x1ca   : > { %3441 = vmatpush.bf16.msra.mxu1 %v6427_v12  ;;  %v1872_v12 = vadd.f32 %v1871_v1, %v1858_v54  ;;  %v6459_v25 = vor.u32 %v7680_v22, %v6458_v16  ;;  %v7660_v43 = vld [vmem:[#allocation17 + $0x84] sm:$0xf0]  ;;  %v6436_v56 = vld [vmem:[#allocation17 + $0xf8] sm:$0xf0]  ;;  %v7705_v62 = vld [vmem:[#allocation17 + $0x1f4] sm:$0xf] }
 0x1cb   : > { %3455 = vmatpush.bf16.msra.mxu2 %v6491_v13  ;;  %v1885_v13 = vpop.f32.mrf.mxu3  ;;  %v7676_v47 = vld [vmem:[#allocation17 + $0x104] sm:$0xf0]  ;;  %v6500_v61 = vld [vmem:[#allocation17 + $0x178] sm:$0xf0]  ;;  %v7655_v16 = vld [vmem:[#allocation17 + $0x64] sm:$0xf]  ;;  %v6439_v17 = vor.u32 %v7673_v55, %v6436_v56 }
 0x1cc   : > { %3469 = vmatpush.bf16.msra.mxu3 %v6555_v20  ;;  %v8922_v20 = vadd.f32 %v1885_v13, %v1872_v12  ;;  %v7692_v51 = vld [vmem:[#allocation17 + $0x184] sm:$0xf0]  ;;  %v6443_v6 = vor.u32 %v7676_v47, %v6442_v46  ;;  %v6364_v22 = vld [vmem:[#allocation17 + $0x68] sm:$0xf0]  ;;  %v7318_v13 = vld [vmem:[%s8788_s10 + $0x14] sm:$0xf0] }
 0x1cd   : > { %3428 = vmatpush.bf16.msra.mxu0 %v6355_v21  ;;  %v1845_v21 = vpop.f32.mrf.mxu0  ;;  %v6306_v12 = vld [vmem:[%s8788_s10 + $0x8] sm:$0xf]  ;;  %v7653_v46 = vld [vmem:[#allocation17 + $0x54] sm:$0xf]  ;;  %v6356_v47 = vld [vmem:[#allocation17 + $0x58] sm:$0xf0] }
 0x1ce   : > { %3442 = vmatpush.bf16.msra.mxu1 %v6419_v32  ;;  %v1859_v32 = vpop.f32.mrf.mxu1  ;;  %v6359_v55 = vor.u32 %v7653_v46, %v6356_v47 }
 0x1cf   : > { %3456 = vmatpush.bf16.msra.mxu2 %v6483_v26  ;;  %v6523_v26 = vor.u32 %v7696_v15, %v6522_v14  ;;  %v7316_v14 = vld [vmem:[%s8788_s10 + $0xc] sm:$0xf]  ;;  %v6507_v15 = vor.u32 %v7692_v51, %v6506_v48  ;;  %v7669_v48 = vld [vmem:[#allocation17 + $0xd4] sm:$0xf] }
 0x1d0   : > { %3470 = vmatpush.bf16.msra.mxu3 %v6547_v37  ;;  %v1860_v37 = vadd.f32 %v1859_v32, %v1845_v21  ;;  %v7671_v21 = vld [vmem:[#allocation17 + $0xe4] sm:$0xf]  ;;  %v7685_v51 = vld [vmem:[#allocation17 + $0x154] sm:$0xf] }
 0x1d1   : > { %3429 = vmatpush.bf16.msra.mxu0 %v6347_v5  ;;  %v6378_v5 = vld [vmem:[#allocation17 + $0x80] sm:$0xf]  ;;  %v1873_v49 = vpop.f32.mrf.mxu2  ;;  %v7315_v32 = vld [vmem:[%s8788_s10 + $0x4] sm:$0xf] }
 0x1d2   : > { %3443 = vmatpush.bf16.msra.mxu1 %v6411_v44  ;;  %v6387_v44 = vor.u32 %v7662_v33, %v6386_v29  ;;  %v1874_v54 = vadd.f32 %v1873_v49, %v1860_v37  ;;  %v6567_v33 = vor.u32 %v7705_v62, %v6564_v0  ;;  %v6492_v37 = vld [vmem:[#allocation17 + $0x168] sm:$0xf0] }
 0x1d3   : > { %3457 = vmatpush.bf16.msra.mxu2 %v6475_v45  ;;  %v6451_v45 = vor.u32 %v7678_v34, %v6450_v59  ;;  %v6428_v59 = vld [vmem:[#allocation17 + $0xe8] sm:$0xf0]  ;;  %v7687_v34 = vld [vmem:[#allocation17 + $0x164] sm:$0xf] }
 0x1d4   : > { %3471 = vmatpush.bf16.msra.mxu3 %v6539_v50  ;;  %v6515_v50 = vor.u32 %v7694_v38, %v6514_v63  ;;  %v8934_v63 = vor.u32 %v7318_v13, %v6306_v12  ;;  %v7703_v38 = vld [vmem:[#allocation17 + $0x1e4] sm:$0xf]  ;;  %v6412_v0 = vld [vmem:[#allocation17 + $0xc8] sm:$0xf0] }
 0x1d5   : > { %3430 = vmatpush.bf16.msra.mxu0 %v6339_v57  ;;  %v7689_v57 = vld [vmem:[#allocation17 + $0x174] sm:$0xf] }
 0x1d6   : > { %3444 = vmatpush.bf16.msra.mxu1 %v6403_v58  ;;  %v1887_v58 = vpop.f32.mrf.mxu3  ;;  %v6503_v29 = vor.u32 %v7689_v57, %v6500_v61  ;;  %v7667_v61 = vld [vmem:[#allocation17 + $0xc4] sm:$0xf] }
 0x1d7   : > { %3458 = vmatpush.bf16.msra.mxu2 %v6467_v60  ;;  %v6315_v60 = vor.u32 %v7644_v41, %v6314_v2  ;;  %v8924_v1 = vadd.f32 %v1887_v58, %v1874_v54  ;;  %v6556_v2 = vld [vmem:[#allocation17 + $0x1e8] sm:$0xf0]  ;;  %v6548_v54 = vld [vmem:[#allocation17 + $0x1d8] sm:$0xf0]  ;;  %v7651_v58 = vld [vmem:[#allocation17 + $0x44] sm:$0xf] }
 0x1d8   : > { %3472 = vmatpush.bf16.msra.mxu3 %v6531_v4  ;;  %v6379_v4 = vor.u32 %v7660_v43, %v6378_v5  ;;  %v6367_v5 = vor.u32 %v7655_v16, %v6364_v22  ;;  %v6559_v49 = vor.u32 %v7703_v38, %v6556_v2  ;;  %v7699_v16 = vld [vmem:[#allocation17 + $0x1c4] sm:$0xf]  ;;  %v6540_v22 = vld [vmem:[#allocation17 + $0x1c8] sm:$0xf0] }
 0x1d9   : > { %3431 = vmatpush.bf16.msra.mxu0 %v6331_v18  ;;  %v6375_v18 = vor.u32 %v7657_v52, %v6372_v53  ;;  %v6484_v52 = vld [vmem:[#allocation17 + $0x158] sm:$0xf0]  ;;  %v7701_v53 = vld [vmem:[#allocation17 + $0x1d4] sm:$0xf] }
 0x1da   : > { %3445 = vmatpush.bf16.msra.mxu1 %v6395_v24  ;;  %v6308_v24 = vld [vmem:[%s8788_s10 + $0x18] sm:$0xf0]  ;;  %v6487_v57 = vor.u32 %v7685_v51, %v6484_v52  ;;  %v6551_v62 = vor.u32 %v7701_v53, %v6548_v54  ;;  %v6460_v51 = vld [vmem:[#allocation17 + $0x128] sm:$0xf0]  ;;  %v7695_v52 = vld [vmem:[#allocation17 + $0x1a4] sm:$0xf]  ;;  %v1692_v54 = vadd.f32 %v8868_v11, %v8866_v10 }
 0x1db   : > { %3459 = vmatpush.bf16.msra.mxu2 %v6459_v25  ;;  %v6298_v25 = vld [vmem:[%s8788_s10] sm:$0xf]  ;;  %v6524_v53 = vld [vmem:[#allocation17 + $0x1a8] sm:$0xf0] }
 0x1dc   : > { %3473 = vmatpush.bf16.msra.mxu3 %v6523_v26  ;;  %v6300_v26 = vld [vmem:[%s8788_s10 + $0x10] sm:$0xf0]  ;;  %v8938_v41 = vor.u32 %v7317_v27, %v6298_v25  ;;  %v6340_v25 = vld [vmem:[#allocation17 + $0x38] sm:$0xf0]  ;;  %v6527_v11 = vor.u32 %v7695_v52, %v6524_v53 }
 0x1dd   : > { %3432 = vmatpush.bf16.msra.mxu0 %v6323_v40  ;;  %v8936_v40 = vor.u32 %v7316_v14, %v6308_v24  ;;  %v8940_v43 = vor.u32 %v7315_v32, %v6300_v26  ;;  %v6415_v14 = vor.u32 %v7667_v61, %v6412_v0  ;;  %v7649_v24 = vld [vmem:[#allocation17 + $0x34] sm:$0xf]  ;;  %v6468_v26 = vld [vmem:[#allocation17 + $0x138] sm:$0xf0] }
 0x1de   : > { %3446 = vmatpush.bf16.msra.mxu1 %v6387_v44  ;;  %v6431_v44 = vor.u32 %v7671_v21, %v6428_v59  ;;  %v7665_v27 = vld [vmem:[#allocation17 + $0xb4] sm:$0xf]  ;;  %v6404_v21 = vld [vmem:[#allocation17 + $0xb8] sm:$0xf0] }
 0x1df   : > { %3460 = vmatpush.bf16.msra.mxu2 %v6451_v45  ;;  %v6495_v45 = vor.u32 %v7687_v34, %v6492_v37  ;;  %v7681_v32 = vld [vmem:[#allocation17 + $0x134] sm:$0xf]  ;;  %v6532_v59 = vld [vmem:[#allocation17 + $0x1b8] sm:$0xf0]  ;;  %v6343_v34 = vor.u32 %v7649_v24, %v6340_v25  ;;  %v6407_v37 = vor.u32 %v7665_v27, %v6404_v21  ;;  %v7643_v27 = vld [vmem:[#allocation17 + $0x4] sm:$0xf] }
 0x1e0   : > { %3474 = vmatpush.bf16.msra.mxu3 %v6515_v50  ;;  %v6420_v50 = vld [vmem:[#allocation17 + $0xd8] sm:$0xf0]  ;;  %v6471_v38 = vor.u32 %v7681_v32, %v6468_v26  ;;  %v7645_v0 = vld [vmem:[#allocation17 + $0x14] sm:$0xf]  ;;  %v7659_v32 = vld [vmem:[#allocation17 + $0x84] sm:$0xf] }
 0x1e1   : > { %3433 = vmatpush.bf16.msra.mxu0 %v6315_v60  ;;  %v6423_v56 = vor.u32 %v7669_v48, %v6420_v50  ;;  %v6348_v60 = vld [vmem:[#allocation17 + $0x48] sm:$0xf0]  ;;  %v2303_v13 = vpop.f32.mrf.mxu0  ;;  %v7679_v50 = vld [vmem:[#allocation17 + $0x124] sm:$0xf] }
 0x1e2   : > { %3447 = vmatpush.bf16.msra.mxu1 %v6379_v4  ;;  %v7683_v4 = vld [vmem:[#allocation17 + $0x144] sm:$0xf]  ;;  %v6351_v12 = vor.u32 %v7651_v58, %v6348_v60  ;;  %v6463_v61 = vor.u32 %v7679_v50, %v6460_v51  ;;  %v6380_v26 = vld [vmem:[#allocation17 + $0x88] sm:$0xf0]  ;;  %v6770_v50 = vld [vmem:[#allocation16 + $0x170] sm:$0xf] }
 0x1e3   : > { %3461 = vmatpush.bf16.msra.mxu2 %v6443_v6  ;;  %v6476_v6 = vld [vmem:[#allocation17 + $0x148] sm:$0xf0]  ;;  %v7626_v51 = vld [vmem:[#allocation16 + $0x174] sm:$0xf0]  ;;  %v6383_v52 = vor.u32 %v7659_v32, %v6380_v26  ;;  %v6754_v26 = vld [vmem:[#allocation16 + $0x150] sm:$0xf] }
 0x1e4   : > { %3475 = vmatpush.bf16.msra.mxu3 %v6507_v15  ;;  %3434 = vmatmul.bf16.vlgmr.msra.gmra.mxu0 %v8938_v41  ;;  %v6479_v15 = vor.u32 %v7683_v4, %v6476_v6  ;;  %v6324_v4 = vld [vmem:[#allocation17 + $0x18] sm:$0xf0]  ;;  %v7661_v6 = vld [vmem:[#allocation17 + $0x94] sm:$0xf]  ;;  %v7606_v32 = vld [vmem:[#allocation16 + $0xd4] sm:$0xf0] }
 0x1e5   : > { %3482 = vmatpush.bf16.msrb.mxu0 %v6375_v18  ;;  %3448 = vmatmul.bf16.vlgmr.msra.gmra.mxu1 %v8940_v43  ;;  %v2317_v18 = vpop.f32.mrf.mxu1  ;;  %v6327_v25 = vor.u32 %v7645_v0, %v6324_v4  ;;  %v7592_v0 = vld [vmem:[#allocation16 + $0x64] sm:$0xf0]  ;;  %v6698_v4 = vld [vmem:[#allocation16 + $0xe0] sm:$0xf] }
 0x1e6   : > { %3496 = vmatpush.bf16.msrb.mxu1 %v6439_v17  ;;  %3462 = vmatmul.bf16.vlgmr.msra.gmra.mxu2 %v8934_v63  ;;  %v6543_v17 = vor.u32 %v7699_v16, %v6540_v22  ;;  %v6388_v22 = vld [vmem:[#allocation17 + $0x98] sm:$0xf0] }
 0x1e7   : > { %3510 = vmatpush.bf16.msrb.mxu2 %v6503_v29  ;;  %3476 = vmatmul.bf16.vlgmr.msra.gmra.mxu3 %v8936_v40  ;;  %v2318_v29 = vadd.f32 %v2317_v18, %v2303_v13  ;;  %v6452_v13 = vld [vmem:[#allocation17 + $0x118] sm:$0xf0]  ;;  %v1706_v18 = vadd.f32 %v8874_v30, %v1692_v54  ;;  %v7691_v30 = vld [vmem:[#allocation17 + $0x184] sm:$0xf]  ;;  %v6834_v54 = vld [vmem:[#allocation16 + $0x1f0] sm:$0xf] }
 0x1e8   : > { %3524 = vmatpush.bf16.msrb.mxu3 %v6567_v33  ;;  %v7697_v33 = vld [vmem:[#allocation17 + $0x1b4] sm:$0xf] }
 0x1e9   : > { %3483 = vmatpush.bf16.msrb.mxu0 %v6367_v5  ;;  %v2331_v2 = vpop.f32.mrf.mxu2  ;;  %v7647_v5 = vld [vmem:[#allocation17 + $0x24] sm:$0xf]  ;;  %v6535_v46 = vor.u32 %v7697_v33, %v6532_v59  ;;  %v2305_v58 = vpop.f32.mrf.mxu0 }
 0x1ea   : > { %3497 = vmatpush.bf16.msrb.mxu1 %v6431_v44  ;;  %v6332_v44 = vld [vmem:[#allocation17 + $0x28] sm:$0xf0]  ;;  %v2332_v47 = vadd.f32 %v2331_v2, %v2318_v29  ;;  %v2345_v48 = vpop.f32.mrf.mxu3  ;;  %v6391_v29 = vor.u32 %v7661_v6, %v6388_v22  ;;  %v7675_v33 = vld [vmem:[#allocation17 + $0x104] sm:$0xf]  ;;  %v6762_v22 = vld [vmem:[#allocation16 + $0x160] sm:$0xf] }
 0x1eb   : > { %3511 = vmatpush.bf16.msrb.mxu2 %v6495_v45  ;;  %v7663_v45 = vld [vmem:[#allocation17 + $0xa4] sm:$0xf]  ;;  %v6508_v2 = vld [vmem:[#allocation17 + $0x188] sm:$0xf0] }
 0x1ec   : > { %3525 = vmatpush.bf16.msrb.mxu3 %v6559_v49  ;;  %v6396_v49 = vld [vmem:[#allocation17 + $0xa8] sm:$0xf0] }
 0x1ed   : > { %3484 = vmatpush.bf16.msrb.mxu0 %v6359_v55  ;;  %v2346_v55 = vadd.f32 %v2345_v48, %v2332_v47  ;;  %v6399_v60 = vor.u32 %v7663_v45, %v6396_v49  ;;  %v6706_v45 = vld [vmem:[#allocation16 + $0xf0] sm:$0xf]  ;;  %v7610_v49 = vld [vmem:[#allocation16 + $0xf4] sm:$0xf0] }
 0x1ee   : > { %3498 = vmatpush.bf16.msrb.mxu1 %v6423_v56  ;;  %v8951_v56 = vld [vmem:[%s9236_s7] sm:$0x3] }
 0x1ef   : > { %3512 = vmatpush.bf16.msrb.mxu2 %v6487_v57  ;;  %v6335_v57 = vor.u32 %v7647_v5, %v6332_v44  ;;  %v2406_v10 = vadd.f32 %v2346_v55, %v8864_v42  ;;  %v2412_v24 = vperm.slane %v8951_v56, 0  ;;  %v6642_v5 = vld [vmem:[#allocation16 + $0x70] sm:$0xf]  ;;  %v7594_v44 = vld [vmem:[#allocation16 + $0x74] sm:$0xf0] }
 0x1f0   : > { %3526 = vmatpush.bf16.msrb.mxu3 %v6551_v62  ;;  %v2319_v62 = vpop.f32.mrf.mxu1  ;;  %v7642_v55 = vld [vmem:[#allocation16 + $0x1f4] sm:$0xf0] }
 0x1f1   : > { %3485 = vmatpush.bf16.msrb.mxu0 %v6351_v12  ;;  %v2320_v16 = vadd.f32 %v2319_v62, %v2305_v58  ;;  %v7677_v12 = vld [vmem:[#allocation17 + $0x114] sm:$0xf]  ;;  %v2333_v42 = vpop.f32.mrf.mxu2  ;;  %v2416_v56 = vadd.f32 %v2412_v24, %v2406_v10  ;;  %v6511_v58 = vor.u32 %v7691_v30, %v6508_v2  ;;  %v6771_v62 = vor.u32 %v7626_v51, %v6770_v50  ;;  %v6618_v2 = vld [vmem:[#allocation16 + $0x40] sm:$0xf] }
 0x1f2   : > { %3499 = vmatpush.bf16.msrb.mxu1 %v6415_v14  ;;  %v7693_v14 = vld [vmem:[#allocation17 + $0x194] sm:$0xf]  ;;  %v6455_v21 = vor.u32 %v7677_v12, %v6452_v13  ;;  %v7624_v12 = vld [vmem:[#allocation16 + $0x164] sm:$0xf0]  ;;  %v6826_v13 = vld [vmem:[#allocation16 + $0x1e0] sm:$0xf] }
 0x1f3   : > { %3513 = vmatpush.bf16.msrb.mxu2 %v6479_v15  ;;  %v6516_v15 = vld [vmem:[#allocation17 + $0x198] sm:$0xf0]  ;;  %v2420_v10 = vmax.f32 %v2416_v56, 0.0 }
 0x1f4   : > { %3527 = vmatpush.bf16.msrb.mxu3 %v6543_v17  ;;  %v6316_v17 = vld [vmem:[#allocation17 + $0x8] sm:$0xf0]  ;;  %v6519_v59 = vor.u32 %v7693_v14, %v6516_v15  ;;  %v7640_v14 = vld [vmem:[#allocation16 + $0x1e4] sm:$0xf0] }
 0x1f5   : > { %3486 = vmatpush.bf16.msrb.mxu0 %v6343_v34  ;;  %v2334_v34 = vadd.f32 %v2333_v42, %v2320_v16  ;;  %v6319_v48 = vor.u32 %v7643_v27, %v6316_v17  ;;  %v7608_v16 = vld [vmem:[#allocation16 + $0xe4] sm:$0xf0]  ;;  %v6763_v27 = vor.u32 %v7624_v12, %v6762_v22  ;;  %v6626_v17 = vld [vmem:[#allocation16 + $0x50] sm:$0xf]  ;;  %v6827_v42 = vor.u32 %v7640_v14, %v6826_v13  ;;  %v6666_v22 = vld [vmem:[#allocation16 + $0xa0] sm:$0xf] }
 0x1f6   : > { %3500 = vmatpush.bf16.msrb.mxu1 %v6407_v37  ;;  %v2347_v37 = vpop.f32.mrf.mxu3 }
 0x1f7   : > { %3514 = vmatpush.bf16.msrb.mxu2 %v6471_v38  ;;  %v6444_v38 = vld [vmem:[#allocation17 + $0x108] sm:$0xf0]  ;;  %v2348_v47 = vadd.f32 %v2347_v37, %v2334_v34  ;;  %v7638_v34 = vld [vmem:[#allocation16 + $0x1d4] sm:$0xf0] }
 0x1f8   : > { %3528 = vmatpush.bf16.msrb.mxu3 %v6535_v46  ;;  %v1720_v46 = vadd.f32 %v8876_v35, %v1706_v18  ;;  %v6447_v53 = vor.u32 %v7675_v33, %v6444_v38  ;;  %v6634_v35 = vld [vmem:[#allocation16 + $0x60] sm:$0xf]  ;;  %v7622_v33 = vld [vmem:[#allocation16 + $0x154] sm:$0xf0] }
 0x1f9   : > { %3487 = vmatpush.bf16.msrb.mxu0 %v6335_v57  ;;  %v6635_v18 = vor.u32 %v7592_v0, %v6634_v35  ;;  %v6755_v30 = vor.u32 %v7622_v33, %v6754_v26  ;;  %v7582_v26 = vld [vmem:[#allocation16 + $0x14] sm:$0xf0]  ;;  %v6658_v33 = vld [vmem:[#allocation16 + $0x90] sm:$0xf] }
 0x1fa   : > { %3501 = vmatpush.bf16.msrb.mxu1 %v6399_v60  ;;  %v2408_v57 = vadd.f32 %v2348_v47, %v1720_v46  ;;  %v6643_v60 = vor.u32 %v7594_v44, %v6642_v5  ;;  %v7588_v5 = vld [vmem:[#allocation16 + $0x44] sm:$0xf0]  ;;  %v6682_v44 = vld [vmem:[#allocation16 + $0xc0] sm:$0xf] }
 0x1fb   : > { %3515 = vmatpush.bf16.msrb.mxu2 %v6463_v61  ;;  %v6707_v61 = vor.u32 %v7610_v49, %v6706_v45  ;;  %v6746_v46 = vld [vmem:[#allocation16 + $0x140] sm:$0xf]  ;;  %v7620_v47 = vld [vmem:[#allocation16 + $0x144] sm:$0xf0] }
 0x1fc   : > { %3529 = vmatpush.bf16.msrb.mxu3 %v6527_v11  ;;  %v2418_v6 = vadd.f32 %v2412_v24, %v2408_v57  ;;  %v6835_v11 = vor.u32 %v7642_v55, %v6834_v54  ;;  %v7590_v24 = vld [vmem:[#allocation16 + $0x54] sm:$0xf0]  ;;  %v6747_v50 = vor.u32 %v7620_v47, %v6746_v46  ;;  %v6674_v54 = vld [vmem:[#allocation16 + $0xb0] sm:$0xf]  ;;  %v6650_v46 = vld [vmem:[#allocation16 + $0x80] sm:$0xf] }
 0x1fd   : > { %3488 = vmatpush.bf16.msrb.mxu0 %v6327_v25  ;;  %v6699_v25 = vor.u32 %v7608_v16, %v6698_v4  ;;  %v6627_v37 = vor.u32 %v7590_v24, %v6626_v17  ;;  %v7602_v57 = vld [vmem:[#allocation16 + $0xb4] sm:$0xf0]  ;;  %v7584_v16 = vld [vmem:[#allocation16 + $0x24] sm:$0xf0] }
 0x1fe   : > { %3502 = vmatpush.bf16.msrb.mxu1 %v6391_v29  ;;  %v2422_v15 = vmax.f32 %v2418_v6, 0.0  ;;  %v6690_v29 = vld [vmem:[#allocation16 + $0xd0] sm:$0xf]  ;;  %v6675_v0 = vor.u32 %v7602_v57, %v6674_v54  ;;  %v7596_v47 = vld [vmem:[#allocation16 + $0x84] sm:$0xf0] }
 0x1ff   : > { %3516 = vmatpush.bf16.msrb.mxu2 %v6455_v21  ;;  %v6691_v38 = vor.u32 %v7606_v32, %v6690_v29  ;;  %v6594_v29 = vld [vmem:[#allocation16 + $0x10] sm:$0xf]  ;;  %v6708_v54 = vld [vmem:[#allocation16 + $0xf8] sm:$0xf0]  ;;  %v7641_v57 = vld [vmem:[#allocation16 + $0x1f4] sm:$0xf] }
 0x200   : > { %3530 = vmatpush.bf16.msrb.mxu3 %v6519_v59  ;;  %v8957_v21 = vpack.c.bf16 %v2422_v15, %v2420_v10  ;;  %v6818_v59 = vld [vmem:[#allocation16 + $0x1d0] sm:$0xf]  ;;  %v7600_v10 = vld [vmem:[#allocation16 + $0xa4] sm:$0xf0]  ;;  %v6730_v15 = vld [vmem:[#allocation16 + $0x120] sm:$0xf] }
 0x201   : > { %3489 = vmatpush.bf16.msrb.mxu0 %v6319_v48  ;;  %v6819_v45 = vor.u32 %v7638_v34, %v6818_v59  ;;  %v6810_v48 = vld [vmem:[#allocation16 + $0x1c0] sm:$0xf]  ;;  %v2359_v49 = vpop.f32.mrf.mxu0  ;;  %v7598_v59 = vld [vmem:[#allocation16 + $0x94] sm:$0xf0] }
 0x202   : > { %3503 = vmatpush.bf16.msrb.mxu1 %v6383_v52  ;;  %v2373_v51 = vpop.f32.mrf.mxu1  ;;  %v6610_v52 = vld [vmem:[#allocation16 + $0x30] sm:$0xf] }
 0x203   : > { %3517 = vmatpush.bf16.msrb.mxu2 %v6447_v53  ;;  %v7586_v53 = vld [vmem:[#allocation16 + $0x34] sm:$0xf0]  ;;  %v2374_v56 = vadd.f32 %v2373_v51, %v2359_v49 }
 0x204   : > { %3531 = vmatpush.bf16.msrb.mxu3 %v6511_v58  ;;  %3490 = vmatmul.bf16.vlgmr.msrb.gmra.mxu0 %v8938_v41  ;;  %v7604_v41 = vld [vmem:[#allocation16 + $0xc4] sm:$0xf0]  ;;  %v6738_v58 = vld [vmem:[#allocation16 + $0x130] sm:$0xf]  ;;  %v6611_v35 = vor.u32 %v7586_v53, %v6610_v52  ;;  %v6644_v52 = vld [vmem:[#allocation16 + $0x78] sm:$0xf0] }
 0x205   : > { %3878 = vmatpush.bf16.msra.mxu0 %v6643_v60  ;;  %3504 = vmatmul.bf16.vlgmr.msrb.gmra.mxu1 %v8940_v43  ;;  %v6619_v43 = vor.u32 %v7588_v5, %v6618_v2  ;;  %v7618_v60 = vld [vmem:[#allocation16 + $0x134] sm:$0xf0]  ;;  %v6786_v2 = vld [vmem:[#allocation16 + $0x190] sm:$0xf]  ;;  %v7609_v53 = vld [vmem:[#allocation16 + $0xf4] sm:$0xf] }
 0x206   : > { %3892 = vmatpush.bf16.msra.mxu1 %v6707_v61  ;;  %3518 = vmatmul.bf16.vlgmr.msrb.gmra.mxu2 %v8934_v63  ;;  %v7636_v63 = vld [vmem:[#allocation16 + $0x1c4] sm:$0xf0]  ;;  %v6802_v61 = vld [vmem:[#allocation16 + $0x1b0] sm:$0xf]  ;;  %v6739_v4 = vor.u32 %v7618_v60, %v6738_v58  ;;  %v7630_v5 = vld [vmem:[#allocation16 + $0x194] sm:$0xf0] }
 0x207   : > { %3906 = vmatpush.bf16.msra.mxu2 %v6771_v62  ;;  %3532 = vmatmul.bf16.vlgmr.msrb.gmra.mxu3 %v8936_v40  ;;  %v6683_v40 = vor.u32 %v7604_v41, %v6682_v44  ;;  %v6811_v55 = vor.u32 %v7636_v63, %v6810_v48  ;;  %v7634_v62 = vld [vmem:[#allocation16 + $0x1b4] sm:$0xf0]  ;;  %v6586_v44 = vld [vmem:[#allocation16] sm:$0xf]  ;;  %v6595_v41 = vor.u32 %v7582_v26, %v6594_v29  ;;  %v7612_v63 = vld [vmem:[#allocation16 + $0x104] sm:$0xf0] }
 0x208   : > { %3920 = vmatpush.bf16.msra.mxu3 %v6835_v11  ;;  %v6602_v11 = vld [vmem:[#allocation16 + $0x20] sm:$0xf]  ;;  %v6803_v12 = vor.u32 %v7634_v62, %v6802_v61  ;;  %v6787_v51 = vor.u32 %v7630_v5, %v6786_v2  ;;  %v6836_v60 = vld [vmem:[#allocation16 + $0x1f8] sm:$0xf0]  ;;  %v7313_v62 = vld [vmem:[%s8786_s23 + $0xc] sm:$0xf0] }
 0x209   : > { %3879 = vmatpush.bf16.msra.mxu0 %v6635_v18  ;;  %v2387_v6 = vpop.f32.mrf.mxu2  ;;  %v7616_v18 = vld [vmem:[#allocation16 + $0x124] sm:$0xf0]  ;;  %v6603_v24 = vor.u32 %v7584_v16, %v6602_v11  ;;  %v6714_v48 = vld [vmem:[#allocation16 + $0x100] sm:$0xf]  ;;  %v7311_v11 = vld [vmem:[%s8786_s23 + $0x4] sm:$0xf] }
 0x20a   : > { %3893 = vmatpush.bf16.msra.mxu1 %v6699_v25  ;;  %v2388_v13 = vadd.f32 %v2387_v6, %v2374_v56  ;;  %v2401_v14 = vpop.f32.mrf.mxu3  ;;  %v6794_v25 = vld [vmem:[#allocation16 + $0x1a0] sm:$0xf]  ;;  %v6731_v32 = vor.u32 %v7616_v18, %v6730_v15  ;;  %v6772_v56 = vld [vmem:[#allocation16 + $0x178] sm:$0xf0]  ;;  %v7314_v6 = vld [vmem:[%s8786_s23 + $0x14] sm:$0xf0] }
 0x20b   : > { %3907 = vmatpush.bf16.msra.mxu2 %v6763_v27  ;;  %v7632_v27 = vld [vmem:[#allocation16 + $0x1a4] sm:$0xf0]  ;;  %v6570_v61 = vld [vmem:[%s8786_s23] sm:$0xf]  ;;  %v7591_v18 = vld [vmem:[#allocation16 + $0x64] sm:$0xf] }
 0x20c   : > { %3921 = vmatpush.bf16.msra.mxu3 %v6827_v42  ;;  %v2402_v17 = vadd.f32 %v2401_v14, %v2388_v13  ;;  %v6667_v42 = vor.u32 %v7600_v10, %v6666_v22  ;;  %v7312_v13 = vld [vmem:[%s8786_s23 + $0xc] sm:$0xf]  ;;  %v6580_v14 = vld [vmem:[%s8786_s23 + $0x18] sm:$0xf0]  ;;  %v6711_v10 = vor.u32 %v7609_v53, %v6708_v54  ;;  %v7603_v53 = vld [vmem:[#allocation16 + $0xc4] sm:$0xf] }
 0x20d   : > { %3880 = vmatpush.bf16.msra.mxu0 %v6627_v37  ;;  %v6795_v37 = vor.u32 %v7632_v27, %v6794_v25  ;;  %v6636_v25 = vld [vmem:[#allocation16 + $0x68] sm:$0xf0]  ;;  %v7607_v27 = vld [vmem:[#allocation16 + $0xe4] sm:$0xf] }
 0x20e   : > { %3894 = vmatpush.bf16.msra.mxu1 %v6691_v38  ;;  %v8964_v34 = vadd.f32 %v2402_v17, %v8878_v3  ;;  %v6722_v38 = vld [vmem:[#allocation16 + $0x110] sm:$0xf]  ;;  %v6778_v3 = vld [vmem:[#allocation16 + $0x180] sm:$0xf]  ;;  %v6839_v17 = vor.u32 %v7641_v57, %v6836_v60  ;;  %v6700_v29 = vld [vmem:[#allocation16 + $0xe8] sm:$0xf0] }
 0x20f   : > { %3908 = vmatpush.bf16.msra.mxu2 %v6755_v30  ;;  %v7614_v30 = vld [vmem:[#allocation16 + $0x114] sm:$0xf0]  ;;  %v6703_v2 = vor.u32 %v7607_v27, %v6700_v29  ;;  %v6748_v57 = vld [vmem:[#allocation16 + $0x148] sm:$0xf0] }
 0x210   : > { %3922 = vmatpush.bf16.msra.mxu3 %v6819_v45  ;;  %v7580_v45 = vld [vmem:[#allocation16 + $0x4] sm:$0xf0]  ;;  %v6723_v49 = vor.u32 %v7614_v30, %v6722_v38  ;;  %v8980_v38 = vor.u32 %v7312_v13, %v6580_v14  ;;  %v6639_v30 = vor.u32 %v7591_v18, %v6636_v25  ;;  %v6812_v60 = vld [vmem:[#allocation16 + $0x1c8] sm:$0xf0]  ;;  %v7633_v13 = vld [vmem:[#allocation16 + $0x1b4] sm:$0xf]  ;;  %v8988_v18 = vpop.f32.mrf.mxu1 }
 0x211   : > { %3881 = vmatpush.bf16.msra.mxu0 %v6619_v43  ;;  %v6659_v43 = vor.u32 %v7598_v59, %v6658_v33  ;;  %v6587_v58 = vor.u32 %v7580_v45, %v6586_v44  ;;  %v7639_v59 = vld [vmem:[#allocation16 + $0x1e4] sm:$0xf]  ;;  %v7589_v44 = vld [vmem:[#allocation16 + $0x54] sm:$0xf]  ;;  %v6628_v45 = vld [vmem:[#allocation16 + $0x58] sm:$0xf0] }
 0x212   : > { %3895 = vmatpush.bf16.msra.mxu1 %v6683_v40  ;;  %v7628_v40 = vld [vmem:[#allocation16 + $0x184] sm:$0xf0]  ;;  %v6804_v14 = vld [vmem:[#allocation16 + $0x1b8] sm:$0xf0]  ;;  %v6604_v29 = vld [vmem:[#allocation16 + $0x28] sm:$0xf0] }
 0x213   : > { %3909 = vmatpush.bf16.msra.mxu2 %v6747_v50  ;;  %v7593_v50 = vld [vmem:[#allocation16 + $0x74] sm:$0xf]  ;;  %v6779_v16 = vor.u32 %v7628_v40, %v6778_v3  ;;  %v6631_v3 = vor.u32 %v7589_v44, %v6628_v45  ;;  %v8990_v45 = vpop.f32.mrf.mxu2 }
 0x214   : > { %3923 = vmatpush.bf16.msra.mxu3 %v6811_v55  ;;  %v7625_v55 = vld [vmem:[#allocation16 + $0x174] sm:$0xf]  ;;  %v6647_v22 = vor.u32 %v7593_v50, %v6644_v52  ;;  %v6620_v52 = vld [vmem:[#allocation16 + $0x48] sm:$0xf0] }
 0x215   : > { %3882 = vmatpush.bf16.msra.mxu0 %v6611_v35  ;;  %v6651_v35 = vor.u32 %v7596_v47, %v6650_v46  ;;  %v6775_v15 = vor.u32 %v7625_v55, %v6772_v56  ;;  %v6692_v47 = vld [vmem:[#allocation16 + $0xd8] sm:$0xf0]  ;;  %v6684_v55 = vld [vmem:[#allocation16 + $0xc8] sm:$0xf0]  ;;  %v7619_v56 = vld [vmem:[#allocation16 + $0x144] sm:$0xf] }
 0x216   : > { %3896 = vmatpush.bf16.msra.mxu1 %v6675_v0  ;;  %v6715_v0 = vor.u32 %v7612_v63, %v6714_v48  ;;  %v7621_v48 = vld [vmem:[#allocation16 + $0x154] sm:$0xf]  ;;  %v6756_v63 = vld [vmem:[#allocation16 + $0x158] sm:$0xf0] }
 0x217   : > { %3910 = vmatpush.bf16.msra.mxu2 %v6739_v4  ;;  %v6578_v4 = vld [vmem:[%s8786_s23 + $0x8] sm:$0xf]  ;;  %v6759_v50 = vor.u32 %v7621_v48, %v6756_v63  ;;  %v6596_v48 = vld [vmem:[#allocation16 + $0x18] sm:$0xf0]  ;;  %v7597_v63 = vld [vmem:[#allocation16 + $0x94] sm:$0xf] }
 0x218   : > { %3924 = vmatpush.bf16.msra.mxu3 %v6803_v12  ;;  %v6572_v12 = vld [vmem:[%s8786_s23 + $0x10] sm:$0xf0]  ;;  %v8976_v26 = vor.u32 %v7314_v6, %v6578_v4  ;;  %v6612_v4 = vld [vmem:[#allocation16 + $0x38] sm:$0xf0] }
 0x219   : > { %3883 = vmatpush.bf16.msra.mxu0 %v6603_v24  ;;  %v8974_v24 = vor.u32 %v7313_v62, %v6570_v61  ;;  %v8978_v33 = vor.u32 %v7311_v11, %v6572_v12  ;;  %v6687_v62 = vor.u32 %v7603_v53, %v6684_v55  ;;  %v7601_v6 = vld [vmem:[#allocation16 + $0xb4] sm:$0xf]  ;;  %v6740_v12 = vld [vmem:[#allocation16 + $0x138] sm:$0xf0]  ;;  %v7579_v55 = vld [vmem:[#allocation16 + $0x4] sm:$0xf] }
 0x21a   : > { %3897 = vmatpush.bf16.msra.mxu1 %v6667_v42  ;;  %v7623_v42 = vld [vmem:[#allocation16 + $0x164] sm:$0xf] }
 0x21b   : > { %3911 = vmatpush.bf16.msra.mxu2 %v6731_v32  ;;  %v6764_v32 = vld [vmem:[#allocation16 + $0x168] sm:$0xf0] }
 0x21c   : > { %3925 = vmatpush.bf16.msra.mxu3 %v6795_v37  ;;  %v6828_v37 = vld [vmem:[#allocation16 + $0x1e8] sm:$0xf0]  ;;  %v6767_v5 = vor.u32 %v7623_v42, %v6764_v32  ;;  %v7599_v42 = vld [vmem:[#allocation16 + $0xa4] sm:$0xf]  ;;  %v6807_v32 = vor.u32 %v7633_v13, %v6804_v14  ;;  %v7770_v14 = vld [vmem:[#allocation19 + $0x1f4] sm:$0xf0] }
 0x21d   : > { %3884 = vmatpush.bf16.msra.mxu0 %v6595_v41  ;;  %v7605_v41 = vld [vmem:[#allocation16 + $0xd4] sm:$0xf]  ;;  %v6831_v46 = vor.u32 %v7639_v59, %v6828_v37  ;;  %v6668_v59 = vld [vmem:[#allocation16 + $0xa8] sm:$0xf0]  ;;  %v7615_v37 = vld [vmem:[#allocation16 + $0x124] sm:$0xf] }
 0x21e   : > { %3898 = vmatpush.bf16.msra.mxu1 %v6659_v43  ;;  %v7637_v43 = vld [vmem:[#allocation16 + $0x1d4] sm:$0xf]  ;;  %v6695_v40 = vor.u32 %v7605_v41, %v6692_v47  ;;  %v6671_v41 = vor.u32 %v7599_v42, %v6668_v59 }
 0x21f   : > { %3912 = vmatpush.bf16.msra.mxu2 %v6723_v49  ;;  %v6820_v49 = vld [vmem:[#allocation16 + $0x1d8] sm:$0xf0]  ;;  %v7581_v47 = vld [vmem:[#allocation16 + $0x14] sm:$0xf] }
 0x220   : > { %3926 = vmatpush.bf16.msra.mxu3 %v6787_v51  ;;  %v7587_v51 = vld [vmem:[#allocation16 + $0x44] sm:$0xf]  ;;  %v6823_v54 = vor.u32 %v7637_v43, %v6820_v49  ;;  %v8992_v43 = vpop.f32.mrf.mxu3  ;;  %v7769_v42 = vld [vmem:[#allocation19 + $0x1f4] sm:$0xf] }
 0x221   : > { %3885 = vmatpush.bf16.msra.mxu0 %v6587_v58  ;;  %v7635_v58 = vld [vmem:[#allocation16 + $0x1c4] sm:$0xf]  ;;  %v6623_v61 = vor.u32 %v7587_v51, %v6620_v52  ;;  %v7629_v51 = vld [vmem:[#allocation16 + $0x194] sm:$0xf]  ;;  %v6788_v52 = vld [vmem:[#allocation16 + $0x198] sm:$0xf0] }
 0x222   : > { %3899 = vmatpush.bf16.msra.mxu1 %v6651_v35  ;;  %v6751_v35 = vor.u32 %v7619_v56, %v6748_v57  ;;  %v6815_v11 = vor.u32 %v7635_v58, %v6812_v60  ;;  %v6588_v56 = vld [vmem:[#allocation16 + $0x8] sm:$0xf0]  ;;  %v8996_v57 = vpop.f32.mrf.mxu1 }
 0x223   : > { %3913 = vmatpush.bf16.msra.mxu2 %v6715_v0  ;;  %v7585_v0 = vld [vmem:[#allocation16 + $0x34] sm:$0xf]  ;;  %v6591_v13 = vor.u32 %v7579_v55, %v6588_v56  ;;  %v6882_v56 = vld [vmem:[#allocation19 + $0x150] sm:$0xf] }
 0x224   : > { %3927 = vmatpush.bf16.msra.mxu3 %v6779_v16  ;;  %3886 = vmatmul.bf16.vlgmr.msra.gmra.mxu0 %v8974_v24  ;;  %v6676_v16 = vld [vmem:[#allocation16 + $0xb8] sm:$0xf0] }
 0x225   : > { %3934 = vmatpush.bf16.msrb.mxu0 %v6647_v22  ;;  %3900 = vmatmul.bf16.vlgmr.msra.gmra.mxu1 %v8978_v33  ;;  %v7617_v22 = vld [vmem:[#allocation16 + $0x134] sm:$0xf]  ;;  %v6679_v25 = vor.u32 %v7601_v6, %v6676_v16  ;;  %v7627_v6 = vld [vmem:[#allocation16 + $0x184] sm:$0xf]  ;;  %v6898_v16 = vld [vmem:[#allocation19 + $0x170] sm:$0xf] }
 0x226   : > { %3948 = vmatpush.bf16.msrb.mxu1 %v6711_v10  ;;  %3914 = vmatmul.bf16.vlgmr.msra.gmra.mxu2 %v8976_v26  ;;  %v8986_v10 = vpop.f32.mrf.mxu0  ;;  %v6743_v27 = vor.u32 %v7617_v22, %v6740_v12  ;;  %v7754_v22 = vld [vmem:[#allocation19 + $0x174] sm:$0xf0]  ;;  %v6962_v12 = vld [vmem:[#allocation19 + $0x1f0] sm:$0xf] }
 0x227   : > { %3962 = vmatpush.bf16.msrb.mxu2 %v6775_v15  ;;  %3928 = vmatmul.bf16.vlgmr.msra.gmra.mxu3 %v8980_v38  ;;  %v6615_v15 = vor.u32 %v7585_v0, %v6612_v4  ;;  %v6791_v0 = vor.u32 %v7629_v51, %v6788_v52  ;;  %v6716_v4 = vld [vmem:[#allocation16 + $0x108] sm:$0xf0] }
 0x228   : > { %3976 = vmatpush.bf16.msrb.mxu3 %v6839_v17  ;;  %v7583_v17 = vld [vmem:[#allocation16 + $0x24] sm:$0xf] }
 0x229   : > { %3935 = vmatpush.bf16.msrb.mxu0 %v6639_v30  ;;  %v6732_v30 = vld [vmem:[#allocation16 + $0x128] sm:$0xf0]  ;;  %v6607_v44 = vor.u32 %v7583_v17, %v6604_v29 }
 0x22a   : > { %3949 = vmatpush.bf16.msrb.mxu1 %v6703_v2  ;;  %v7631_v2 = vld [vmem:[#allocation16 + $0x1a4] sm:$0xf]  ;;  %v9000_v59 = vpop.f32.mrf.mxu3  ;;  %v2853_v52 = vpop.f32.mrf.mxu1 }
 0x22b   : > { %3963 = vmatpush.bf16.msrb.mxu2 %v6767_v5  ;;  %v6796_v5 = vld [vmem:[#allocation16 + $0x1a8] sm:$0xf0] }
 0x22c   : > { %3977 = vmatpush.bf16.msrb.mxu3 %v6831_v46  ;;  %v6735_v46 = vor.u32 %v7615_v37, %v6732_v30  ;;  %v6799_v49 = vor.u32 %v7631_v2, %v6796_v5  ;;  %v6899_v30 = vor.u32 %v7754_v22, %v6898_v16  ;;  %v6963_v2 = vor.u32 %v7770_v14, %v6962_v12  ;;  %v7748_v14 = vld [vmem:[#allocation19 + $0x144] sm:$0xf0] }
 0x22d   : > { %3936 = vmatpush.bf16.msrb.mxu0 %v6631_v3  ;;  %v6660_v3 = vld [vmem:[#allocation16 + $0x98] sm:$0xf0] }
 0x22e   : > { %3950 = vmatpush.bf16.msrb.mxu1 %v6695_v40  ;;  %v7613_v40 = vld [vmem:[#allocation16 + $0x114] sm:$0xf]  ;;  %v8994_v53 = vpop.f32.mrf.mxu0  ;;  %v6663_v58 = vor.u32 %v7597_v63, %v6660_v3  ;;  %v7751_v63 = vld [vmem:[#allocation19 + $0x164] sm:$0xf] }
 0x22f   : > { %3964 = vmatpush.bf16.msrb.mxu2 %v6759_v50  ;;  %v6724_v50 = vld [vmem:[#allocation16 + $0x118] sm:$0xf0]  ;;  %v7767_v3 = vld [vmem:[#allocation19 + $0x1e4] sm:$0xf]  ;;  %v2852_v16 = vadd.f32 %v8996_v57, %v8994_v53  ;;  %v1804_v53 = vadd.f32 %v8912_v19, %v8910_v7  ;;  %v7761_v19 = vld [vmem:[#allocation19 + $0x1b4] sm:$0xf] }
 0x230   : > { %3978 = vmatpush.bf16.msrb.mxu3 %v6823_v54  ;;  %v6599_v54 = vor.u32 %v7581_v47, %v6596_v48  ;;  %v6727_v60 = vor.u32 %v7613_v40, %v6724_v50  ;;  %v7768_v48 = vld [vmem:[#allocation19 + $0x1e4] sm:$0xf0]  ;;  %v6956_v40 = vld [vmem:[#allocation19 + $0x1e8] sm:$0xf0]  ;;  %v6868_v7 = vld [vmem:[#allocation19 + $0x138] sm:$0xf0] }
 0x231   : > { %3937 = vmatpush.bf16.msrb.mxu0 %v6623_v61  ;;  %v7595_v61 = vld [vmem:[#allocation16 + $0x84] sm:$0xf] }
 0x232   : > { %3951 = vmatpush.bf16.msrb.mxu1 %v6687_v62  ;;  %v6652_v62 = vld [vmem:[#allocation16 + $0x88] sm:$0xf0] }
 0x233   : > { %3965 = vmatpush.bf16.msrb.mxu2 %v6751_v35  ;;  %v7611_v35 = vld [vmem:[#allocation16 + $0x104] sm:$0xf]  ;;  %v6655_v17 = vor.u32 %v7595_v61, %v6652_v62  ;;  %v6959_v61 = vor.u32 %v7767_v3, %v6956_v40  ;;  %v7766_v62 = vld [vmem:[#allocation19 + $0x1d4] sm:$0xf0]  ;;  %v7745_v40 = vld [vmem:[#allocation19 + $0x134] sm:$0xf] }
 0x234   : > { %3979 = vmatpush.bf16.msrb.mxu3 %v6815_v11  ;;  %v6780_v11 = vld [vmem:[#allocation16 + $0x188] sm:$0xf0]  ;;  %v6719_v29 = vor.u32 %v7611_v35, %v6716_v4  ;;  %v7749_v35 = vld [vmem:[#allocation19 + $0x154] sm:$0xf]  ;;  %v7762_v3 = vld [vmem:[#allocation19 + $0x1b4] sm:$0xf0] }
 0x235   : > { %3938 = vmatpush.bf16.msrb.mxu0 %v6615_v15  ;;  %v7753_v15 = vld [vmem:[#allocation19 + $0x174] sm:$0xf]  ;;  %v6783_v37 = vor.u32 %v7627_v6, %v6780_v11  ;;  %v6948_v6 = vld [vmem:[#allocation19 + $0x1d8] sm:$0xf0] }
 0x236   : > { %3952 = vmatpush.bf16.msrb.mxu1 %v6679_v25  ;;  %v6900_v25 = vld [vmem:[#allocation19 + $0x178] sm:$0xf0]  ;;  %v2839_v50 = vpop.f32.mrf.mxu0  ;;  %v7765_v4 = vld [vmem:[#allocation19 + $0x1d4] sm:$0xf] }
 0x237   : > { %3966 = vmatpush.bf16.msrb.mxu2 %v6743_v27  ;;  %v8998_v27 = vpop.f32.mrf.mxu2  ;;  %v6903_v5 = vor.u32 %v7753_v15, %v6900_v25  ;;  %v6938_v15 = vld [vmem:[#allocation19 + $0x1c0] sm:$0xf]  ;;  %v2881_v25 = vpop.f32.mrf.mxu3 }
 0x238   : > { %3980 = vmatpush.bf16.msrb.mxu3 %v6807_v32  ;;  %v6964_v32 = vld [vmem:[#allocation19 + $0x1f8] sm:$0xf0] }
 0x239   : > { %3939 = vmatpush.bf16.msrb.mxu0 %v6607_v44  ;;  %v6890_v44 = vld [vmem:[#allocation19 + $0x160] sm:$0xf]  ;;  %v6967_v47 = vor.u32 %v7769_v42, %v6964_v32  ;;  %v7763_v42 = vld [vmem:[#allocation19 + $0x1c4] sm:$0xf]  ;;  %v6940_v32 = vld [vmem:[#allocation19 + $0x1c8] sm:$0xf0] }
 0x23a   : > { %3953 = vmatpush.bf16.msrb.mxu1 %v6671_v41  ;;  %v7752_v41 = vld [vmem:[#allocation19 + $0x164] sm:$0xf0] }
 0x23b   : > { %3967 = vmatpush.bf16.msrb.mxu2 %v6735_v46  ;;  %v6954_v46 = vld [vmem:[#allocation19 + $0x1e0] sm:$0xf]  ;;  %v6891_v51 = vor.u32 %v7752_v41, %v6890_v44  ;;  %v6866_v41 = vld [vmem:[#allocation19 + $0x130] sm:$0xf] }
 0x23c   : > { %3981 = vmatpush.bf16.msrb.mxu3 %v6799_v49  ;;  %v6892_v49 = vld [vmem:[#allocation19 + $0x168] sm:$0xf0] }
 0x23d   : > { %3940 = vmatpush.bf16.msrb.mxu0 %v6599_v54  ;;  %v6955_v54 = vor.u32 %v7768_v48, %v6954_v46  ;;  %v6895_v55 = vor.u32 %v7751_v63, %v6892_v49  ;;  %v7746_v46 = vld [vmem:[#allocation19 + $0x134] sm:$0xf0]  ;;  %v6943_v63 = vor.u32 %v7763_v42, %v6940_v32 }
 0x23e   : > { %3954 = vmatpush.bf16.msrb.mxu1 %v6663_v58  ;;  %v7750_v58 = vld [vmem:[#allocation19 + $0x154] sm:$0xf0] }
 0x23f   : > { %3968 = vmatpush.bf16.msrb.mxu2 %v6727_v60  ;;  %v6946_v60 = vld [vmem:[#allocation19 + $0x1d0] sm:$0xf]  ;;  %v6883_v11 = vor.u32 %v7750_v58, %v6882_v56  ;;  %v2867_v22 = vpop.f32.mrf.mxu2  ;;  %v6871_v56 = vor.u32 %v7745_v40, %v6868_v7  ;;  %v7756_v40 = vld [vmem:[#allocation19 + $0x184] sm:$0xf0]  ;;  %v7739_v7 = vld [vmem:[#allocation19 + $0x104] sm:$0xf] }
 0x240   : > { %3982 = vmatpush.bf16.msrb.mxu3 %v6791_v0  ;;  %v6884_v0 = vld [vmem:[#allocation19 + $0x158] sm:$0xf0] }
 0x241   : > { %3941 = vmatpush.bf16.msrb.mxu0 %v6591_v13  ;;  %v6887_v12 = vor.u32 %v7749_v35, %v6884_v0  ;;  %v6874_v13 = vld [vmem:[#allocation19 + $0x140] sm:$0xf] }
 0x242   : > { %3955 = vmatpush.bf16.msrb.mxu1 %v6655_v17  ;;  %v7764_v17 = vld [vmem:[#allocation19 + $0x1c4] sm:$0xf0]  ;;  %v6875_v57 = vor.u32 %v7748_v14, %v6874_v13  ;;  %v2907_v44 = vpop.f32.mrf.mxu1 }
 0x243   : > { %3969 = vmatpush.bf16.msrb.mxu2 %v6719_v29  ;;  %v7747_v29 = vld [vmem:[#allocation19 + $0x144] sm:$0xf] }
 0x244   : > { %3983 = vmatpush.bf16.msrb.mxu3 %v6783_v37  ;;  %3942 = vmatmul.bf16.vlgmr.msrb.gmra.mxu0 %v8974_v24  ;;  %v6947_v24 = vor.u32 %v7766_v62, %v6946_v60  ;;  %v2893_v37 = vpop.f32.mrf.mxu0  ;;  %v6858_v60 = vld [vmem:[#allocation19 + $0x120] sm:$0xf] }
 0x245   : > { %4232 = vmatpush.bf16.msra.mxu0 %v6899_v30  ;;  %3956 = vmatmul.bf16.vlgmr.msrb.gmra.mxu1 %v8978_v33  ;;  %v2854_v33 = vadd.f32 %v2853_v52, %v2839_v50  ;;  %v2866_v30 = vadd.f32 %v8998_v27, %v2852_v16  ;;  %v2908_v49 = vadd.f32 %v2907_v44, %v2893_v37  ;;  %v6932_v50 = vld [vmem:[#allocation19 + $0x1b8] sm:$0xf0]  ;;  %v9015_v27 = vld [vmem:[%s9237_s6] sm:$0x3]  ;;  %v6860_v16 = vld [vmem:[#allocation19 + $0x128] sm:$0xf0] }
 0x246   : > { %4246 = vmatpush.bf16.msra.mxu1 %v6963_v2  ;;  %3970 = vmatmul.bf16.vlgmr.msrb.gmra.mxu2 %v8976_v26  ;;  %v6951_v26 = vor.u32 %v7765_v4, %v6948_v6  ;;  %v6939_v2 = vor.u32 %v7764_v17, %v6938_v15  ;;  %v6867_v52 = vor.u32 %v7746_v46, %v6866_v41  ;;  %v6922_v62 = vld [vmem:[#allocation19 + $0x1a0] sm:$0xf]  ;;  %v7760_v6 = vld [vmem:[#allocation19 + $0x1a4] sm:$0xf0]  ;;  %v6850_v17 = vld [vmem:[#allocation19 + $0x110] sm:$0xf] }
 0x247   : > { %4260 = vmatpush.bf16.msra.mxu2 %v6903_v5  ;;  %3984 = vmatmul.bf16.vlgmr.msrb.gmra.mxu3 %v8980_v38  ;;  %v6876_v38 = vld [vmem:[#allocation19 + $0x148] sm:$0xf0]  ;;  %v2868_v48 = vadd.f32 %v2867_v22, %v2854_v33  ;;  %v7759_v22 = vld [vmem:[#allocation19 + $0x1a4] sm:$0xf]  ;;  %v6923_v33 = vor.u32 %v7760_v6, %v6922_v62  ;;  %v7741_v37 = vld [vmem:[#allocation19 + $0x114] sm:$0xf] }
 0x248   : > { %4274 = vmatpush.bf16.msra.mxu3 %v6967_v47  ;;  %v6879_v5 = vor.u32 %v7747_v29, %v6876_v38  ;;  %v6930_v47 = vld [vmem:[#allocation19 + $0x1b0] sm:$0xf]  ;;  %v7742_v29 = vld [vmem:[#allocation19 + $0x114] sm:$0xf0]  ;;  %v6842_v41 = vld [vmem:[#allocation19 + $0x100] sm:$0xf] }
 0x249   : > { %4233 = vmatpush.bf16.msra.mxu0 %v6891_v51  ;;  %v1818_v51 = vadd.f32 %v8918_v28, %v1804_v53  ;;  %v2921_v58 = vpop.f32.mrf.mxu2  ;;  %v2882_v35 = vadd.f32 %v2881_v25, %v2868_v48  ;;  %v6935_v28 = vor.u32 %v7761_v19, %v6932_v50  ;;  %v6914_v38 = vld [vmem:[#allocation19 + $0x190] sm:$0xf]  ;;  %v6851_v44 = vor.u32 %v7742_v29, %v6850_v17  ;;  %v7740_v46 = vld [vmem:[#allocation19 + $0x104] sm:$0xf0]  ;;  %v7082_v17 = vld [vmem:[#allocation19 + $0xe0] sm:$0xf] }
 0x24a   : > { %4247 = vmatpush.bf16.msra.mxu1 %v6955_v54  ;;  %v2880_v54 = vadd.f32 %v9000_v59, %v2866_v30  ;;  %v2922_v0 = vadd.f32 %v2921_v58, %v2908_v49  ;;  %v2935_v4 = vpop.f32.mrf.mxu3  ;;  %v6852_v30 = vld [vmem:[#allocation19 + $0x118] sm:$0xf0]  ;;  %v7026_v58 = vld [vmem:[#allocation19 + $0x70] sm:$0xf] }
 0x24b   : > { %4261 = vmatpush.bf16.msra.mxu2 %v6895_v55  ;;  %v6931_v55 = vor.u32 %v7762_v3, %v6930_v47  ;;  %v1832_v59 = vadd.f32 %v8920_v39, %v1818_v51  ;;  %v6906_v3 = vld [vmem:[#allocation19 + $0x180] sm:$0xf] }
 0x24c   : > { %4275 = vmatpush.bf16.msra.mxu3 %v6959_v61  ;;  %v7744_v61 = vld [vmem:[#allocation19 + $0x124] sm:$0xf0]  ;;  %v2895_v14 = vpop.f32.mrf.mxu0  ;;  %v2940_v15 = vadd.f32 %v2880_v54, %v8908_v23  ;;  %v2936_v32 = vadd.f32 %v2935_v4, %v2922_v0  ;;  %v2947_v23 = vperm.slane %v9015_v27, 1  ;;  %v6844_v54 = vld [vmem:[#allocation19 + $0x108] sm:$0xf0] }
 0x24d   : > { %4234 = vmatpush.bf16.msra.mxu0 %v6883_v11  ;;  %v7743_v11 = vld [vmem:[#allocation19 + $0x124] sm:$0xf]  ;;  %v6859_v13 = vor.u32 %v7744_v61, %v6858_v60  ;;  %v2942_v42 = vadd.f32 %v2882_v35, %v1832_v59  ;;  %v7722_v60 = vld [vmem:[#allocation19 + $0x74] sm:$0xf0]  ;;  %v7090_v61 = vld [vmem:[#allocation19 + $0xf0] sm:$0xf]  ;;  %v6843_v35 = vor.u32 %v7740_v46, %v6842_v41 }
 0x24e   : > { %4248 = vmatpush.bf16.msra.mxu1 %v6947_v24  ;;  %v6924_v24 = vld [vmem:[#allocation19 + $0x1a8] sm:$0xf0]  ;;  %v6863_v25 = vor.u32 %v7743_v11, %v6860_v16  ;;  %v2941_v50 = vadd.f32 %v2936_v32, %v8922_v20  ;;  %v7721_v0 = vld [vmem:[#allocation19 + $0x74] sm:$0xf]  ;;  %v7028_v4 = vld [vmem:[#allocation19 + $0x78] sm:$0xf0]  ;;  %v6907_v20 = vor.u32 %v7756_v40, %v6906_v3  ;;  %v6847_v11 = vor.u32 %v7739_v7, %v6844_v54 }
 0x24f   : > { %4262 = vmatpush.bf16.msra.mxu2 %v6887_v12  ;;  %v2946_v12 = vperm.slane %v9015_v27, 0  ;;  %v6927_v53 = vor.u32 %v7759_v22, %v6924_v24  ;;  %v7737_v22 = vld [vmem:[#allocation19 + $0xf4] sm:$0xf]  ;;  %v7092_v24 = vld [vmem:[#allocation19 + $0xf8] sm:$0xf0] }
 0x250   : > { %4276 = vmatpush.bf16.msra.mxu3 %v6951_v26  ;;  %v2909_v26 = vpop.f32.mrf.mxu1  ;;  %v7719_v32 = vld [vmem:[#allocation19 + $0x64] sm:$0xf]  ;;  %v7718_v41 = vld [vmem:[#allocation19 + $0x54] sm:$0xf0]  ;;  %v7074_v46 = vld [vmem:[#allocation19 + $0xd0] sm:$0xf] }
 0x251   : > { %4235 = vmatpush.bf16.msra.mxu0 %v6875_v57  ;;  %v2910_v39 = vadd.f32 %v2909_v26, %v2895_v14  ;;  %v7758_v57 = vld [vmem:[#allocation19 + $0x194] sm:$0xf0]  ;;  %v2950_v47 = vadd.f32 %v2946_v12, %v2940_v15  ;;  %v2923_v49 = vpop.f32.mrf.mxu2  ;;  %v2952_v19 = vadd.f32 %v2946_v12, %v2942_v42  ;;  %v2951_v12 = vadd.f32 %v2947_v23, %v2941_v50  ;;  %v7720_v26 = vld [vmem:[#allocation19 + $0x64] sm:$0xf0]  ;;  %v7012_v3 = vld [vmem:[#allocation19 + $0x58] sm:$0xf0] }
 0x252   : > { %4249 = vmatpush.bf16.msra.mxu1 %v6939_v2  ;;  %v7757_v2 = vld [vmem:[#allocation19 + $0x194] sm:$0xf]  ;;  %v6915_v48 = vor.u32 %v7758_v57, %v6914_v38  ;;  %v2937_v27 = vpop.f32.mrf.mxu3  ;;  %v7027_v14 = vor.u32 %v7722_v60, %v7026_v58  ;;  %v7095_v38 = vor.u32 %v7737_v22, %v7092_v24  ;;  %v7736_v42 = vld [vmem:[#allocation19 + $0xe4] sm:$0xf0]  ;;  %v7084_v57 = vld [vmem:[#allocation19 + $0xe8] sm:$0xf0] }
 0x253   : > { %4263 = vmatpush.bf16.msra.mxu2 %v6879_v5  ;;  %v6916_v5 = vld [vmem:[#allocation19 + $0x198] sm:$0xf0]  ;;  %v2954_v6 = vmax.f32 %v2950_v47, 0.0  ;;  %v2956_v59 = vmax.f32 %v2952_v19, 0.0  ;;  %v7733_v40 = vld [vmem:[#allocation19 + $0xd4] sm:$0xf] }
 0x254   : > { %4277 = vmatpush.bf16.msra.mxu3 %v6943_v63  ;;  %v6855_v63 = vor.u32 %v7741_v37, %v6852_v30  ;;  %v6919_v51 = vor.u32 %v7757_v2, %v6916_v5  ;;  %v2955_v30 = vmax.f32 %v2951_v12, 0.0  ;;  %v7083_v5 = vor.u32 %v7736_v42, %v7082_v17  ;;  %v7076_v7 = vld [vmem:[#allocation19 + $0xd8] sm:$0xf0]  ;;  %v7066_v54 = vld [vmem:[#allocation19 + $0xc0] sm:$0xf] }
 0x255   : > { %4236 = vmatpush.bf16.msra.mxu0 %v6867_v52  ;;  %v2924_v52 = vadd.f32 %v2923_v49, %v2910_v39  ;;  %v7735_v39 = vld [vmem:[#allocation19 + $0xe4] sm:$0xf]  ;;  %v4038_v37 = vpack.c.bf16 %v2956_v59, %v2954_v6  ;;  %v7717_v49 = vld [vmem:[#allocation19 + $0x54] sm:$0xf]  ;;  %v7732_v58 = vld [vmem:[#allocation19 + $0xc4] sm:$0xf0] }
 0x256   : > { %4250 = vmatpush.bf16.msra.mxu1 %v6931_v55  ;;  %v7755_v55 = vld [vmem:[#allocation19 + $0x184] sm:$0xf]  ;;  %v7730_v22 = vld [vmem:[#allocation19 + $0xb4] sm:$0xf0]  ;;  %v7713_v24 = vld [vmem:[#allocation19 + $0x34] sm:$0xf] }
 0x257   : > { %4264 = vmatpush.bf16.msra.mxu2 %v6871_v56  ;;  %v6908_v56 = vld [vmem:[#allocation19 + $0x188] sm:$0xf0]  ;;  %v2938_v62 = vadd.f32 %v2937_v27, %v2924_v52  ;;  %v7002_v52 = vld [vmem:[#allocation19 + $0x40] sm:$0xf]  ;;  %v7716_v27 = vld [vmem:[#allocation19 + $0x44] sm:$0xf0] }
 0x258   : > { %4278 = vmatpush.bf16.msra.mxu3 %v6935_v28  ;;  %v7738_v28 = vld [vmem:[#allocation19 + $0xf4] sm:$0xf0]  ;;  %v6911_v16 = vor.u32 %v7755_v55, %v6908_v56  ;;  %v2376_v55 = vadd.f32 %v8988_v18, %v8986_v10  ;;  %v7079_v56 = vor.u32 %v7733_v40, %v7076_v7  ;;  %v7715_v60 = vld [vmem:[#allocation19 + $0x44] sm:$0xf]  ;;  %v7058_v10 = vld [vmem:[#allocation19 + $0xb0] sm:$0xf] }
 0x259   : > { %4237 = vmatpush.bf16.msra.mxu0 %v6859_v13  ;;  %v2943_v13 = vadd.f32 %v2938_v62, %v8924_v1  ;;  %v7091_v15 = vor.u32 %v7738_v28, %v7090_v61  ;;  %v7004_v61 = vld [vmem:[#allocation19 + $0x48] sm:$0xf0]  ;;  %v7731_v62 = vld [vmem:[#allocation19 + $0xc4] sm:$0xf]  ;;  %v1748_v28 = vadd.f32 %v8898_v9, %v8896_v8  ;;  %v6996_v59 = vld [vmem:[#allocation19 + $0x38] sm:$0xf0] }
 0x25a   : > { %4251 = vmatpush.bf16.msra.mxu1 %v6923_v33  ;;  %v7031_v33 = vor.u32 %v7721_v0, %v7028_v4  ;;  %v7003_v0 = vor.u32 %v7716_v27, %v7002_v52  ;;  %v7067_v4 = vor.u32 %v7732_v58, %v7066_v54  ;;  %v7007_v6 = vor.u32 %v7715_v60, %v7004_v61  ;;  %v7729_v12 = vld [vmem:[#allocation19 + $0xb4] sm:$0xf]  ;;  %v6988_v42 = vld [vmem:[#allocation19 + $0x28] sm:$0xf0]  ;;  %v7708_v7 = vld [vmem:[#allocation19 + $0x4] sm:$0xf0] }
 0x25b   : > { %4265 = vmatpush.bf16.msra.mxu2 %v6863_v25  ;;  %v7018_v25 = vld [vmem:[#allocation19 + $0x60] sm:$0xf]  ;;  %v2953_v29 = vadd.f32 %v2947_v23, %v2943_v13  ;;  %v7010_v23 = vld [vmem:[#allocation19 + $0x50] sm:$0xf]  ;;  %v2390_v18 = vadd.f32 %v8990_v45, %v2376_v55  ;;  %v7060_v13 = vld [vmem:[#allocation19 + $0xb8] sm:$0xf0]  ;;  %v1762_v8 = vadd.f32 %v8904_v31, %v1748_v28 }
 0x25c   : > { %4279 = vmatpush.bf16.msra.mxu3 %v6927_v53  ;;  %v7020_v53 = vld [vmem:[#allocation19 + $0x68] sm:$0xf0]  ;;  %v7019_v1 = vor.u32 %v7720_v26, %v7018_v25  ;;  %v7011_v19 = vor.u32 %v7718_v41, %v7010_v23  ;;  %v7712_v25 = vld [vmem:[#allocation19 + $0x24] sm:$0xf0]  ;;  %v7050_v26 = vld [vmem:[#allocation19 + $0xa0] sm:$0xf]  ;;  %v7063_v17 = vor.u32 %v7729_v12, %v7060_v13 }
 0x25d   : > { %4238 = vmatpush.bf16.msra.mxu0 %v6851_v44  ;;  %v2957_v2 = vmax.f32 %v2953_v29, 0.0  ;;  %v7023_v44 = vor.u32 %v7719_v32, %v7020_v53  ;;  %v2404_v45 = vadd.f32 %v8992_v43, %v2390_v18  ;;  %v7728_v29 = vld [vmem:[#allocation19 + $0xa4] sm:$0xf0]  ;;  %v7727_v32 = vld [vmem:[#allocation19 + $0xa4] sm:$0xf]  ;;  %v1776_v31 = vadd.f32 %v8906_v36, %v1762_v8 }
 0x25e   : > { %4252 = vmatpush.bf16.msra.mxu1 %v6915_v48  ;;  %v7087_v48 = vor.u32 %v7735_v39, %v7084_v57  ;;  %v7052_v53 = vld [vmem:[#allocation19 + $0xa8] sm:$0xf0]  ;;  %v7051_v57 = vor.u32 %v7728_v29, %v7050_v26  ;;  %v7709_v23 = vld [vmem:[#allocation19 + $0x14] sm:$0xf]  ;;  %v6980_v41 = vld [vmem:[#allocation19 + $0x18] sm:$0xf0] }
 0x25f   : > { %4266 = vmatpush.bf16.msra.mxu2 %v6855_v63  ;;  %v4039_v47 = vpack.c.bf16 %v2957_v2, %v2955_v30  ;;  %v7734_v63 = vld [vmem:[#allocation19 + $0xd4] sm:$0xf0]  ;;  %v6978_v30 = vld [vmem:[#allocation19 + $0x10] sm:$0xf]  ;;  %v7055_v43 = vor.u32 %v7727_v32, %v7052_v53  ;;  %v7966_v36 = vld [vmem:[%s9236_s7] sm:$0x3]  ;;  %v6983_v40 = vor.u32 %v7709_v23, %v6980_v41 }
 0x260   : > { %4280 = vmatpush.bf16.msra.mxu3 %v6919_v51  ;;  %v7075_v50 = vor.u32 %v7734_v63, %v7074_v46  ;;  %v7015_v51 = vor.u32 %v7717_v49, %v7012_v3  ;;  %v7710_v2 = vld [vmem:[#allocation19 + $0x14] sm:$0xf0]  ;;  %v7725_v46 = vld [vmem:[#allocation19 + $0x94] sm:$0xf]  ;;  %v6970_v49 = vld [vmem:[#allocation19] sm:$0xf] }
 0x261   : > { %4239 = vmatpush.bf16.msra.mxu0 %v6843_v35  ;;  %v7068_v35 = vld [vmem:[#allocation19 + $0xc8] sm:$0xf0]  ;;  %v6979_v63 = vor.u32 %v7710_v2, %v6978_v30  ;;  %v7707_v27 = vld [vmem:[#allocation19 + $0x4] sm:$0xf]  ;;  %v7154_v58 = vld [vmem:[#allocation19 + $0x270] sm:$0xf] }
 0x262   : > { %4253 = vmatpush.bf16.msra.mxu1 %v6907_v20  ;;  %v6994_v20 = vld [vmem:[#allocation19 + $0x30] sm:$0xf]  ;;  %v6972_v54 = vld [vmem:[#allocation19 + $0x8] sm:$0xf0]  ;;  %v7723_v55 = vld [vmem:[#allocation19 + $0x84] sm:$0xf]  ;;  %v9038_v13 = vpop.f32.mrf.mxu1 }
 0x263   : > { %4267 = vmatpush.bf16.msra.mxu2 %v6847_v11  ;;  %v7714_v11 = vld [vmem:[#allocation19 + $0x34] sm:$0xf0]  ;;  %v7156_v28 = vld [vmem:[#allocation19 + $0x278] sm:$0xf0]  ;;  %v7146_v18 = vld [vmem:[#allocation19 + $0x260] sm:$0xf] }
 0x264   : > { %4281 = vmatpush.bf16.msra.mxu3 %v6911_v16  ;;  %4240 = vmatmul.bf16.vlgmr.msra.gmra.mxu0 %v4038_v37  ;;  %v7071_v16 = vor.u32 %v7731_v62, %v7068_v35  ;;  %v6995_v9 = vor.u32 %v7714_v11, %v6994_v20  ;;  %v7786_v60 = vld [vmem:[#allocation19 + $0x274] sm:$0xf0]  ;;  %v6971_v62 = vor.u32 %v7708_v7, %v6970_v49  ;;  %v7785_v35 = vld [vmem:[#allocation19 + $0x274] sm:$0xf]  ;;  %v7140_v29 = vld [vmem:[#allocation19 + $0x258] sm:$0xf0] }
 0x265   : > { %4448 = vmatpush.bf16.msrb.mxu0 %v7027_v14  ;;  %4254 = vmatmul.bf16.vlgmr.msra.gmra.mxu1 %v4039_v47  ;;  %v7059_v14 = vor.u32 %v7730_v22, %v7058_v10  ;;  %v7155_v11 = vor.u32 %v7786_v60, %v7154_v58  ;;  %v7159_v10 = vor.u32 %v7785_v35, %v7156_v28  ;;  %v7781_v26 = vld [vmem:[#allocation19 + $0x254] sm:$0xf]  ;;  %v7780_v32 = vld [vmem:[#allocation19 + $0x244] sm:$0xf0]  ;;  %v7779_v53 = vld [vmem:[#allocation19 + $0x244] sm:$0xf] }
 0x266   : > { %4462 = vmatpush.bf16.msrb.mxu1 %v7091_v15  ;;  %4268 = vmatmul.bf16.vlgmr.msra.gmra.mxu2 %v4038_v37  ;;  %v6999_v15 = vor.u32 %v7713_v24, %v6996_v59  ;;  %v7783_v24 = vld [vmem:[#allocation19 + $0x264] sm:$0xf]  ;;  %v7148_v59 = vld [vmem:[#allocation19 + $0x268] sm:$0xf0]  ;;  %v7122_v30 = vld [vmem:[#allocation19 + $0x230] sm:$0xf] }
 0x267   : > { %4476 = vmatpush.bf16.msrb.mxu2 %v7031_v33  ;;  %4282 = vmatmul.bf16.vlgmr.msra.gmra.mxu3 %v4039_v47  ;;  %v6986_v33 = vld [vmem:[#allocation19 + $0x20] sm:$0xf]  ;;  %v7044_v47 = vld [vmem:[#allocation19 + $0x98] sm:$0xf0]  ;;  %v7778_v2 = vld [vmem:[#allocation19 + $0x234] sm:$0xf0] }
 0x268   : > { %4490 = vmatpush.bf16.msrb.mxu3 %v7095_v38  ;;  %v7711_v38 = vld [vmem:[#allocation19 + $0x24] sm:$0xf]  ;;  %v6987_v39 = vor.u32 %v7712_v25, %v6986_v33  ;;  %v7047_v52 = vor.u32 %v7725_v46, %v7044_v47  ;;  %v7138_v33 = vld [vmem:[#allocation19 + $0x250] sm:$0xf]  ;;  %v7782_v25 = vld [vmem:[#allocation19 + $0x254] sm:$0xf0] }
 0x269   : > { %4449 = vmatpush.bf16.msrb.mxu0 %v7019_v1  ;;  %v6991_v37 = vor.u32 %v7711_v38, %v6988_v42  ;;  %v7042_v1 = vld [vmem:[#allocation19 + $0x90] sm:$0xf]  ;;  %v7143_v42 = vor.u32 %v7781_v26, %v7140_v29  ;;  %v7124_v23 = vld [vmem:[#allocation19 + $0x238] sm:$0xf0]  ;;  %v7114_v47 = vld [vmem:[#allocation19 + $0x220] sm:$0xf] }
 0x26a   : > { %4463 = vmatpush.bf16.msrb.mxu1 %v7083_v5  ;;  %v2409_v5 = vadd.f32 %v2404_v45, %v1776_v31  ;;  %v9048_v38 = vpop.f32.mrf.mxu1  ;;  %v7116_v49 = vld [vmem:[#allocation19 + $0x228] sm:$0xf0]  ;;  %v7106_v7 = vld [vmem:[#allocation19 + $0x210] sm:$0xf]  ;;  %v7098_v58 = vld [vmem:[#allocation19 + $0x200] sm:$0xf] }
 0x26b   : > { %4477 = vmatpush.bf16.msrb.mxu2 %v7023_v44  ;;  %v7726_v44 = vld [vmem:[#allocation19 + $0x94] sm:$0xf0]  ;;  %v7772_v60 = vld [vmem:[#allocation19 + $0x204] sm:$0xf0]  ;;  %v7100_v35 = vld [vmem:[#allocation19 + $0x208] sm:$0xf0] }
 0x26c   : > { %4491 = vmatpush.bf16.msrb.mxu3 %v7087_v48  ;;  %v2413_v48 = vperm.slane %v7966_v36, 1  ;;  %v7043_v3 = vor.u32 %v7726_v44, %v7042_v1  ;;  %v7777_v44 = vld [vmem:[#allocation19 + $0x234] sm:$0xf]  ;;  %v7776_v36 = vld [vmem:[#allocation19 + $0x224] sm:$0xf0] }
 0x26d   : > { %4450 = vmatpush.bf16.msrb.mxu0 %v7011_v19  ;;  %v7034_v19 = vld [vmem:[#allocation19 + $0x80] sm:$0xf]  ;;  %v7127_v46 = vor.u32 %v7777_v44, %v7124_v23  ;;  %v7218_v28 = vld [vmem:[#allocation19 + $0x2f0] sm:$0xf]  ;;  %v7797_v29 = vld [vmem:[#allocation19 + $0x2d4] sm:$0xf] }
 0x26e   : > { %4464 = vmatpush.bf16.msrb.mxu1 %v7075_v50  ;;  %v7724_v50 = vld [vmem:[#allocation19 + $0x84] sm:$0xf0]  ;;  %v2417_v61 = vadd.f32 %v2413_v48, %v8964_v34  ;;  %v9036_v34 = vpop.f32.mrf.mxu0  ;;  %v7202_v26 = vld [vmem:[#allocation19 + $0x2d0] sm:$0xf] }
 0x26f   : > { %4478 = vmatpush.bf16.msrb.mxu2 %v7015_v51  ;;  %v2419_v51 = vadd.f32 %v2413_v48, %v2409_v5  ;;  %v7775_v48 = vld [vmem:[#allocation19 + $0x224] sm:$0xf] }
 0x270   : > { %4492 = vmatpush.bf16.msrb.mxu3 %v7079_v56  ;;  %v7036_v56 = vld [vmem:[#allocation19 + $0x88] sm:$0xf0]  ;;  %v2421_v22 = vmax.f32 %v2417_v61, 0.0  ;;  %v7771_v61 = vld [vmem:[#allocation19 + $0x204] sm:$0xf] }
 0x271   : > { %4451 = vmatpush.bf16.msrb.mxu0 %v7003_v0  ;;  %v7035_v0 = vor.u32 %v7724_v50, %v7034_v19  ;;  %v7039_v20 = vor.u32 %v7723_v55, %v7036_v56  ;;  %v7774_v19 = vld [vmem:[#allocation19 + $0x214] sm:$0xf0]  ;;  %v7773_v50 = vld [vmem:[#allocation19 + $0x214] sm:$0xf] }
 0x272   : > { %4465 = vmatpush.bf16.msrb.mxu1 %v7067_v4  ;;  %v6975_v4 = vor.u32 %v7707_v27, %v6972_v54  ;;  %v7108_v27 = vld [vmem:[#allocation19 + $0x218] sm:$0xf0] }
 0x273   : > { %4479 = vmatpush.bf16.msrb.mxu2 %v7007_v6  ;;  %v2423_v6 = vmax.f32 %v2419_v51, 0.0  ;;  %v7111_v54 = vor.u32 %v7773_v50, %v7108_v27  ;;  %v9081_v50 = vld [vmem:[%s9238_s0] sm:$0x3]  ;;  %v7792_v27 = vld [vmem:[#allocation19 + $0x2a4] sm:$0xf0] }
 0x274   : > { %4493 = vmatpush.bf16.msrb.mxu3 %v7071_v16  ;;  %v7784_v16 = vld [vmem:[#allocation19 + $0x264] sm:$0xf0] }
 0x275   : > { %4452 = vmatpush.bf16.msrb.mxu0 %v6995_v9  ;;  %v4005_v12 = vpack.c.bf16 %v2423_v6, %v2421_v22  ;;  %v7147_v8 = vor.u32 %v7784_v16, %v7146_v18  ;;  %v7151_v9 = vor.u32 %v7783_v24, %v7148_v59  ;;  %v7210_v16 = vld [vmem:[#allocation19 + $0x2e0] sm:$0xf]  ;;  %v7800_v22 = vld [vmem:[#allocation19 + $0x2e4] sm:$0xf0]  ;;  %v7799_v24 = vld [vmem:[#allocation19 + $0x2e4] sm:$0xf] }
 0x276   : > { %4466 = vmatpush.bf16.msrb.mxu1 %v7059_v14  ;;  %v9042_v14 = vpop.f32.mrf.mxu2  ;;  %v9046_v45 = vpop.f32.mrf.mxu0  ;;  %v7211_v59 = vor.u32 %v7800_v22, %v7210_v16  ;;  %v7172_v16 = vld [vmem:[#allocation19 + $0x298] sm:$0xf0] }
 0x277   : > { %4480 = vmatpush.bf16.msrb.mxu2 %v6999_v15  ;;  %v9044_v15 = vpop.f32.mrf.mxu3 }
 0x278   : > { %4494 = vmatpush.bf16.msrb.mxu3 %v7063_v17  ;;  %v7139_v17 = vor.u32 %v7782_v25, %v7138_v33 }
 0x279   : > { %4453 = vmatpush.bf16.msrb.mxu0 %v6987_v39  ;;  %v7132_v39 = vld [vmem:[#allocation19 + $0x248] sm:$0xf0] }
 0x27a   : > { %4467 = vmatpush.bf16.msrb.mxu1 %v7051_v57  ;;  %v7135_v57 = vor.u32 %v7779_v53, %v7132_v39 }
 0x27b   : > { %4481 = vmatpush.bf16.msrb.mxu2 %v6991_v37 }
 0x27c   : > { %4495 = vmatpush.bf16.msrb.mxu3 %v7055_v43  ;;  %v7123_v43 = vor.u32 %v7778_v2, %v7122_v30  ;;  %v7796_v30 = vld [vmem:[#allocation19 + $0x2c4] sm:$0xf0]  ;;  %v7795_v2 = vld [vmem:[#allocation19 + $0x2c4] sm:$0xf] }
 0x27d   : > { %4454 = vmatpush.bf16.msrb.mxu0 %v6979_v63  ;;  %v7115_v63 = vor.u32 %v7776_v36, %v7114_v47 }
 0x27e   : > { %4468 = vmatpush.bf16.msrb.mxu1 %v7043_v3  ;;  %v9050_v37 = vpop.f32.mrf.mxu2  ;;  %v7119_v3 = vor.u32 %v7775_v48, %v7116_v49  ;;  %v7794_v48 = vld [vmem:[#allocation19 + $0x2b4] sm:$0xf0]  ;;  %v7188_v49 = vld [vmem:[#allocation19 + $0x2b8] sm:$0xf0] }
 0x27f   : > { %4482 = vmatpush.bf16.msrb.mxu2 %v6983_v40  ;;  %v9052_v1 = vpop.f32.mrf.mxu3 }
 0x280   : > { %4496 = vmatpush.bf16.msrb.mxu3 %v7047_v52  ;;  %v7107_v52 = vor.u32 %v7774_v19, %v7106_v7 }
 0x281   : > { %4455 = vmatpush.bf16.msrb.mxu0 %v6971_v62  ;;  %v9054_v5 = vpop.f32.mrf.mxu0  ;;  %v7099_v62 = vor.u32 %v7772_v60, %v7098_v58  ;;  %v7180_v60 = vld [vmem:[#allocation19 + $0x2a8] sm:$0xf0] }
 0x282   : > { %4469 = vmatpush.bf16.msrb.mxu1 %v7035_v0  ;;  %v9056_v41 = vpop.f32.mrf.mxu1  ;;  %v7802_v0 = vld [vmem:[#allocation19 + $0x2f4] sm:$0xf0] }
 0x283   : > { %4483 = vmatpush.bf16.msrb.mxu2 %v6975_v4  ;;  %v7103_v4 = vor.u32 %v7771_v61, %v7100_v35  ;;  %v7219_v6 = vor.u32 %v7802_v0, %v7218_v28 }
 0x284   : > { %4497 = vmatpush.bf16.msrb.mxu3 %v7039_v20  ;;  %4456 = vmatmul.bf16.vlgmr.msrb.gmra.mxu0 %v8957_v21  ;;  %v7801_v20 = vld [vmem:[#allocation19 + $0x2f4] sm:$0xf] }
 0x285   : > { %4698 = vmatpush.bf16.msra.mxu0 %v7155_v11  ;;  %4470 = vmatmul.bf16.vlgmr.msrb.gmra.mxu1 %v4005_v12  ;;  %v7220_v11 = vld [vmem:[#allocation19 + $0x2f8] sm:$0xf0] }
 0x286   : > { %4484 = vmatmul.bf16.vlgmr.msrb.gmra.mxu2 %v8957_v21  ;;  %v7130_v21 = vld [vmem:[#allocation19 + $0x240] sm:$0xf]  ;;  %v7223_v18 = vor.u32 %v7801_v20, %v7220_v11  ;;  %4712 = vmatpush.bf16.msra.mxu1 %v7219_v6  ;;  %v7170_v20 = vld [vmem:[#allocation19 + $0x290] sm:$0xf]  ;;  %v7790_v11 = vld [vmem:[#allocation19 + $0x294] sm:$0xf0] }
 0x287   : > { %4726 = vmatpush.bf16.msra.mxu2 %v7159_v10  ;;  %4498 = vmatmul.bf16.vlgmr.msrb.gmra.mxu3 %v4005_v12  ;;  %v7131_v31 = vor.u32 %v7780_v32, %v7130_v21  ;;  %v3450_v10 = vadd.f32 %v9038_v13, %v9036_v34  ;;  %v7212_v12 = vld [vmem:[#allocation19 + $0x2e8] sm:$0xf0]  ;;  %v3452_v34 = vadd.f32 %v9048_v38, %v9046_v45  ;;  %v7204_v32 = vld [vmem:[#allocation19 + $0x2d8] sm:$0xf0] }
 0x288   : > { %4740 = vmatpush.bf16.msra.mxu3 %v7223_v18  ;;  %v7196_v38 = vld [vmem:[#allocation19 + $0x2c8] sm:$0xf0]  ;;  %v7171_v18 = vor.u32 %v7790_v11, %v7170_v20 }
 0x289   : > { %4699 = vmatpush.bf16.msra.mxu0 %v7147_v8  ;;  %v9058_v40 = vpop.f32.mrf.mxu2  ;;  %v9062_v55 = vpop.f32.mrf.mxu0  ;;  %v7215_v8 = vor.u32 %v7799_v24, %v7212_v12  ;;  %v3464_v33 = vadd.f32 %v9042_v14, %v3450_v10  ;;  %v3466_v14 = vadd.f32 %v9050_v37, %v3452_v34  ;;  %v7793_v37 = vld [vmem:[#allocation19 + $0x2b4] sm:$0xf]  ;;  %v7787_v34 = vld [vmem:[#allocation19 + $0x284] sm:$0xf] }
 0x28a   : > { %v9060_v51 = vpop.f32.mrf.mxu3  ;;  %v9064_v56 = vpop.f32.mrf.mxu1  ;;  %4713 = vmatpush.bf16.msra.mxu1 %v7211_v59  ;;  %v7191_v19 = vor.u32 %v7793_v37, %v7188_v49  ;;  %v7789_v10 = vld [vmem:[#allocation19 + $0x294] sm:$0xf] }
 0x28b   : > { %4727 = vmatpush.bf16.msra.mxu2 %v7151_v9  ;;  %v3478_v53 = vadd.f32 %v9044_v15, %v3464_v33  ;;  %v3480_v23 = vadd.f32 %v9052_v1, %v3466_v14  ;;  %v7186_v15 = vld [vmem:[#allocation19 + $0x2b0] sm:$0xf]  ;;  %v7178_v1 = vld [vmem:[#allocation19 + $0x2a0] sm:$0xf]  ;;  %v7175_v59 = vor.u32 %v7789_v10, %v7172_v16  ;;  %v7788_v33 = vld [vmem:[#allocation19 + $0x284] sm:$0xf0] }
 0x28c   : > { %4741 = vmatpush.bf16.msra.mxu3 %v7215_v8  ;;  %v7179_v58 = vor.u32 %v7792_v27, %v7178_v1  ;;  %v7162_v8 = vld [vmem:[#allocation19 + $0x280] sm:$0xf]  ;;  %v7804_v10 = vld [vmem:[#allocation20 + $0x8] sm:$0xff]  ;;  %v7813_v16 = vld [vmem:[#allocation20 + $0x50] sm:$0xff] }
 0x28d   : > { %4700 = vmatpush.bf16.msra.mxu0 %v7139_v17  ;;  %v7798_v17 = vld [vmem:[#allocation19 + $0x2d4] sm:$0xf0] }
 0x28e   : > { %v7203_v21 = vor.u32 %v7798_v17, %v7202_v26  ;;  %v7164_v26 = vld [vmem:[#allocation19 + $0x288] sm:$0xf0] }
 0x28f   : > { %4728 = vmatpush.bf16.msra.mxu2 %v7143_v42 }
 0x290   : > { %4714 = vmatpush.bf16.msra.mxu1 %v7203_v21  ;;  %v3506_v21 = vadd.f32 %v9056_v41, %v9054_v5 }
 0x291   : > { %4701 = vmatpush.bf16.msra.mxu0 %v7131_v31  ;;  %v9068_v9 = vpop.f32.mrf.mxu2  ;;  %v7207_v31 = vor.u32 %v7797_v29, %v7204_v32 }
 0x292   : > { %v9071_v25 = vpop.f32.mrf.mxu3 }
 0x293   : > { %4729 = vmatpush.bf16.msra.mxu2 %v7135_v57  ;;  %4742 = vmatpush.bf16.msra.mxu3 %v7207_v31  ;;  %v7194_v57 = vld [vmem:[#allocation19 + $0x2c0] sm:$0xf]  ;;  %v3508_v31 = vadd.f32 %v9064_v56, %v9062_v55 }
 0x294   : > { %v7195_v45 = vor.u32 %v7796_v30, %v7194_v57 }
 0x295   : > { %4702 = vmatpush.bf16.msra.mxu0 %v7123_v43  ;;  %v7199_v43 = vor.u32 %v7795_v2, %v7196_v38  ;;  %v3522_v30 = vadd.f32 %v9068_v9, %v3508_v31 }
 0x296   : > { %4715 = vmatpush.bf16.msra.mxu1 %v7195_v45 }
 0x297   : > { %4730 = vmatpush.bf16.msra.mxu2 %v7127_v46  ;;  %4743 = vmatpush.bf16.msra.mxu3 %v7199_v43  ;;  %v3536_v38 = vadd.f32 %v9071_v25, %v3522_v30  ;;  %v7810_v25 = vld [vmem:[#allocation20 + $0x38] sm:$0xff] }
 0x299   : > { %4703 = vmatpush.bf16.msra.mxu0 %v7115_v63  ;;  %v7187_v63 = vor.u32 %v7794_v48, %v7186_v15 }
 0x29b   : > { %4731 = vmatpush.bf16.msra.mxu2 %v7119_v3  ;;  %4716 = vmatpush.bf16.msra.mxu1 %v7187_v63 }
 0x29c   : > { %4744 = vmatpush.bf16.msra.mxu3 %v7191_v19  ;;  %v7817_v19 = vld [vmem:[#allocation20 + $0x70] sm:$0xff] }
 0x29d   : > { %4704 = vmatpush.bf16.msra.mxu0 %v7107_v52 }
 0x29f   : > { %4732 = vmatpush.bf16.msra.mxu2 %v7111_v54  ;;  %v7791_v54 = vld [vmem:[#allocation19 + $0x2a4] sm:$0xf]  ;;  %4717 = vmatpush.bf16.msra.mxu1 %v7179_v58 }
 0x2a0   : > { %v7183_v28 = vor.u32 %v7791_v54, %v7180_v60  ;;  %v7807_v54 = vld [vmem:[#allocation20 + $0x20] sm:$0xff]  ;;  %v7816_v60 = vld [vmem:[#allocation20 + $0x68] sm:$0xff] }
 0x2a1   : > { %4705 = vmatpush.bf16.msra.mxu0 %v7099_v62  ;;  %v3887_v13 = vpop.f32.mrf.mxu0  ;;  %v3992_v62 = vperm.slane %v9081_v50, 0 }
 0x2a2   : > { %v3901_v42 = vpop.f32.mrf.mxu1  ;;  %v3888_v39 = vadd.f32 %v3887_v13, %v3478_v53  ;;  %4745 = vmatpush.bf16.msra.mxu3 %v7183_v28  ;;  %v7163_v13 = vor.u32 %v7788_v33, %v7162_v8  ;;  %v3520_v53 = vadd.f32 %v9058_v40, %v3506_v21  ;;  %v7815_v28 = vld [vmem:[#allocation20 + $0x60] sm:$0xff] }
 0x2a3   : > { %4733 = vmatpush.bf16.msra.mxu2 %v7103_v4  ;;  %4718 = vmatpush.bf16.msra.mxu1 %v7171_v18  ;;  %v7811_v33 = vld [vmem:[#allocation20 + $0x40] sm:$0xff] }
 0x2a4   : > { %v3902_v46 = vadd.f32 %v3901_v42, %v3888_v39  ;;  %v7167_v42 = vor.u32 %v7787_v34, %v7164_v26  ;;  %v3534_v39 = vadd.f32 %v9060_v51, %v3520_v53 }
 0x2a5   : > { %4906 = vmatpush.bf16.msrb.mxu0 %v7810_v25 }
 0x2a6   : > { %4746 = vmatpush.bf16.msra.mxu3 %v7175_v59  ;;  %v7812_v59 = vld [vmem:[#allocation20 + $0x48] sm:$0xff] }
 0x2a7   : > { %4719 = vmatpush.bf16.msra.mxu1 %v7163_v13 }
 0x2a9   : > { %v3915_v44 = vpop.f32.mrf.mxu2  ;;  %v3889_v47 = vpop.f32.mrf.mxu0 }
 0x2aa   : > { %v3929_v36 = vpop.f32.mrf.mxu3  ;;  %v3916_v3 = vadd.f32 %v3915_v44, %v3902_v46  ;;  %v3890_v7 = vadd.f32 %v3889_v47, %v3480_v23  ;;  %v3903_v52 = vpop.f32.mrf.mxu1  ;;  %4747 = vmatpush.bf16.msra.mxu3 %v7167_v42  ;;  %v3993_v47 = vperm.slane %v9081_v50, 1  ;;  %v7808_v50 = vld [vmem:[#allocation20 + $0x28] sm:$0xff] }
 0x2ac   : > { %v3930_v61 = vadd.f32 %v3929_v36, %v3916_v3  ;;  %v3904_v35 = vadd.f32 %v3903_v52, %v3890_v7  ;;  %v7818_v3 = vld [vmem:[#allocation20 + $0x78] sm:$0xff]  ;;  %v7809_v7 = vld [vmem:[#allocation20 + $0x30] sm:$0xff] }
 0x2ad   : > { %4920 = vmatpush.bf16.msrb.mxu1 %v7818_v3  ;;  %4907 = vmatpush.bf16.msrb.mxu0 %v7809_v7 }
 0x2ae   : > { %v3996_v22 = vadd.f32 %v3992_v62, %v3930_v61 }
 0x2b0   : > { %v4000_v17 = vmax.f32 %v3996_v22, 0.0  ;;  %v7803_v22 = vld [vmem:[#allocation20] sm:$0xff] }
 0x2b1   : > { %v3917_v0 = vpop.f32.mrf.mxu2  ;;  %4921 = vmatpush.bf16.msrb.mxu1 %v7817_v19  ;;  %4908 = vmatpush.bf16.msrb.mxu0 %v7808_v50 }
 0x2b2   : > { %v3918_v4 = vadd.f32 %v3917_v0, %v3904_v35  ;;  %v3931_v6 = vpop.f32.mrf.mxu3  ;;  %v7805_v0 = vld [vmem:[#allocation20 + $0x10] sm:$0xff] }
 0x2b4   : > { %v3932_v24 = vadd.f32 %v3931_v6, %v3918_v4  ;;  %v7814_v6 = vld [vmem:[#allocation20 + $0x58] sm:$0xff] }
 0x2b5   : > { %4909 = vmatpush.bf16.msrb.mxu0 %v7807_v54  ;;  %4922 = vmatpush.bf16.msrb.mxu1 %v7816_v60  ;;  %v7965_v60 = vld [vmem:[%s9240_s29] ss:$0 sm:$0xff] }
 0x2b6   : > { %v3998_v12 = vadd.f32 %v3992_v62, %v3932_v24  ;;  %v7806_v62 = vld [vmem:[#allocation20 + $0x18] sm:$0xff] }
 0x2b8   : > { %v4002_v29 = vmax.f32 %v3998_v12, 0.0 }
 0x2b9   : > { %4910 = vmatpush.bf16.msrb.mxu0 %v7806_v62  ;;  %4923 = vmatpush.bf16.msrb.mxu1 %v7815_v28 }
 0x2ba   : > { %v4504_v32 = vpack.c.bf16 %v4002_v29, %v4000_v17 }
 0x2bc   : > { %4706 = vmatmul.bf16.vlgmr.msra.gmra.mxu0 %v4504_v32  ;;  %4734 = vmatmul.bf16.vlgmr.msra.gmra.mxu2 %v4504_v32 }
 0x2bd   : > { %4911 = vmatpush.bf16.msrb.mxu0 %v7805_v0  ;;  %4924 = vmatpush.bf16.msrb.mxu1 %v7814_v6 }
 0x2c1   : > { %v3943_v14 = vpop.f32.mrf.mxu0  ;;  %4912 = vmatpush.bf16.msrb.mxu0 %v7804_v10  ;;  %4925 = vmatpush.bf16.msrb.mxu1 %v7813_v16 }
 0x2c2   : > { %v3957_v57 = vpop.f32.mrf.mxu1  ;;  %v3944_v2 = vadd.f32 %v3943_v14, %v3534_v39  ;;  %v4758_v14 = vld [vmem:[%s9239_s14] sm:$0x3] }
 0x2c4   : > { %v3958_v5 = vadd.f32 %v3957_v57, %v3944_v2 }
 0x2c5   : > { %4913 = vmatpush.bf16.msrb.mxu0 %v7803_v22  ;;  %4926 = vmatpush.bf16.msrb.mxu1 %v7812_v59 }
 0x2c9   : > { %v3971_v45 = vpop.f32.mrf.mxu2  ;;  %v3945_v43 = vpop.f32.mrf.mxu0  ;;  %4927 = vmatpush.bf16.msrb.mxu1 %v7811_v33 }
 0x2ca   : > { %v3985_v41 = vpop.f32.mrf.mxu3  ;;  %v3972_v44 = vadd.f32 %v3971_v45, %v3958_v5  ;;  %v3946_v23 = vadd.f32 %v3945_v43, %v3536_v38  ;;  %v3959_v46 = vpop.f32.mrf.mxu1  ;;  %v4760_v5 = vperm.slane %v4758_v14, 0 }
 0x2cc   : > { %v3986_v40 = vadd.f32 %v3985_v41, %v3972_v44  ;;  %v3960_v55 = vadd.f32 %v3959_v46, %v3946_v23 }
 0x2ce   : > { %v3997_v15 = vadd.f32 %v3993_v47, %v3986_v40 }
 0x2d0   : > { %v4001_v63 = vmax.f32 %v3997_v15, 0.0  ;;  %v4761_v15 = vperm.slane %v4758_v14, 1 }
 0x2d1   : > { %v3973_v56 = vpop.f32.mrf.mxu2 }
 0x2d2   : > { %v3974_v36 = vadd.f32 %v3973_v56, %v3960_v55  ;;  %v3987_v51 = vpop.f32.mrf.mxu3 }
 0x2d4   : > { %v3988_v48 = vadd.f32 %v3987_v51, %v3974_v36 }
 0x2d6   : > { %v3999_v9 = vadd.f32 %v3993_v47, %v3988_v48 }
 0x2d8   : > { %v4003_v37 = vmax.f32 %v3999_v9, 0.0 }
 0x2da   : > { %v4505_v49 = vpack.c.bf16 %v4003_v37, %v4001_v63 }
 0x2dc   : > { %4720 = vmatmul.bf16.vlgmr.msra.gmra.mxu1 %v4505_v49  ;;  %4748 = vmatmul.bf16.vlgmr.msra.gmra.mxu3 %v4505_v49 }
 0x2e1   : > { %v4241_v52 = vpop.f32.mrf.mxu0 }
 0x2e2   : > { %v4255_v1 = vpop.f32.mrf.mxu1 }
 0x2e3   : > { %v4256_v29 = vadd.f32 %v4255_v1, %v4241_v52 }
 0x2e9   : > { %v4269_v27 = vpop.f32.mrf.mxu2  ;;  %v4243_v61 = vpop.f32.mrf.mxu0 }
 0x2ea   : > { %v4283_v58 = vpop.f32.mrf.mxu3  ;;  %v4257_v35 = vpop.f32.mrf.mxu1 }
 0x2eb   : > { %v4258_v32 = vadd.f32 %v4257_v35, %v4243_v61  ;;  %v4284_v39 = vadd.f32 %v4283_v58, %v4269_v27 }
 0x2f1   : > { %v4271_v4 = vpop.f32.mrf.mxu2 }
 0x2f2   : > { %v4285_v20 = vpop.f32.mrf.mxu3 }
 0x2f3   : > { %v4286_v44 = vadd.f32 %v4285_v20, %v4271_v4 }
 0x301   : > { %v4457_v11 = vpop.f32.mrf.mxu0 }
 0x302   : > { %v4471_v18 = vpop.f32.mrf.mxu1  ;;  %v4458_v21 = vadd.f32 %v4457_v11, %v4256_v29 }
 0x304   : > { %v4472_v57 = vadd.f32 %v4471_v18, %v4458_v21 }
 0x309   : > { %v4485_v24 = vpop.f32.mrf.mxu2  ;;  %v4459_v8 = vpop.f32.mrf.mxu0 }
 0x30a   : > { %v4499_v12 = vpop.f32.mrf.mxu3  ;;  %v4473_v34 = vpop.f32.mrf.mxu1  ;;  %v4460_v30 = vadd.f32 %v4459_v8, %v4258_v32  ;;  %v4486_v45 = vadd.f32 %v4485_v24, %v4284_v39 }
 0x30c   : > { %v4474_v23 = vadd.f32 %v4473_v34, %v4460_v30  ;;  %v4500_v47 = vadd.f32 %v4499_v12, %v4486_v45 }
 0x311   : > { %v4487_v13 = vpop.f32.mrf.mxu2 }
 0x312   : > { %v4501_v26 = vpop.f32.mrf.mxu3  ;;  %v4488_v55 = vadd.f32 %v4487_v13, %v4286_v44 }
 0x314   : > { %v4502_v37 = vadd.f32 %v4501_v26, %v4488_v55 }
 0x339   : > { %v4707_v17 = vpop.f32.mrf.mxu0 }
 0x33f   : > { %v4735_v31 = vpop.f32.mrf.mxu2 }
 0x341   : > { %v4709_v41 = vpop.f32.mrf.mxu0 }
 0x347   : > { %v4737_v9 = vpop.f32.mrf.mxu2 }
 0x359   : > { %v4721_v42 = vpop.f32.mrf.mxu1 }
 0x35a   : > { %v4722_v53 = vadd.f32 %v4721_v42, %v4707_v17 }
 0x35c   : > { %v4754_v38 = vadd.f32 %v4722_v53, %v4472_v57 }
 0x35e   : > { %v4764_v56 = vadd.f32 %v4760_v5, %v4754_v38 }
 0x35f   : > { %v4749_v2 = vpop.f32.mrf.mxu3 }
 0x360   : > { %v4750_v46 = vadd.f32 %v4749_v2, %v4735_v31  ;;  %v4768_v49 = vmax.f32 %v4764_v56, 0.0 }
 0x361   : > { %v4723_v43 = vpop.f32.mrf.mxu1 }
 0x362   : > { %v4724_v40 = vadd.f32 %v4723_v43, %v4709_v41  ;;  %v4755_v51 = vadd.f32 %v4750_v46, %v4500_v47 }
 0x364   : > { %v4756_v36 = vadd.f32 %v4724_v40, %v4474_v23  ;;  %v4765_v7 = vadd.f32 %v4761_v15, %v4755_v51 }
 0x366   : > { %v4766_v48 = vadd.f32 %v4760_v5, %v4756_v36  ;;  %v4769_v1 = vmax.f32 %v4765_v7, 0.0 }
 0x367   : > { %v4751_v63 = vpop.f32.mrf.mxu3 }
 0x368   : > { %v4770_v25 = vmax.f32 %v4766_v48, 0.0  ;;  %v4752_v3 = vadd.f32 %v4751_v63, %v4737_v9 }
 0x36a   : > { %v4772_v19 = vpack.c.bf16 %v4770_v25, %v4768_v49  ;;  %v4757_v50 = vadd.f32 %v4752_v3, %v4502_v37 }
 0x36c   : > { %v4767_v52 = vadd.f32 %v4761_v15, %v4757_v50  ;;  %4914 = vmatmul.bf16.vlgmr.msrb.gmra.mxu0 %v4772_v19 }
 0x36e   : > { %v4771_v27 = vmax.f32 %v4767_v52, 0.0 }
 0x370   : > { %v4773_v54 = vpack.c.bf16 %v4771_v27, %v4769_v1 }
 0x372   : > { %4928 = vmatmul.bf16.vlgmr.msrb.gmra.mxu1 %v4773_v54 }
 0x3e9   : > { %v4915_v58 = vpop.f32.mrf.mxu0 }
 0x3ea   : > { %v4916_v61 = vadd.f32 %v7965_v60, %v4915_v58 }
 0x3ef   : > { %v4929_v62 = vpop.f32.mrf.mxu1 }
 0x3f0   : > { %v4930_v35 = vadd.f32 %v4929_v62, %v4916_v61 }
 0x3f1   : > { %v4917_v0 = vpop.f32.mrf.mxu0 }
 0x3f2   : > { %v4934_v28 = vmax.f32 %v4930_v35, 0.0  ;;  %v4918_v4 = vadd.f32 %v7965_v60, %v4917_v0 }
 0x3f4   : > { %4936 = vst [vmem:[%s851_s13] sm:$0xff] %v4934_v28 }
 0x3f7   : > { %v4931_v6 = vpop.f32.mrf.mxu1 }
 0x3f8   : > { %v4932_v20 = vadd.f32 %v4931_v6, %v4918_v4 }
 0x3fa   : > { %v4935_v11 = vmax.f32 %v4932_v20, 0.0 }
 0x3fc   : > { %4937 = vst [vmem:[%s851_s13 + $0x8] sm:$0xff] %v4935_v11 }
 0x3fd   : > { %8354 = shalt.err (!%p8351_p9)
}
 0x3fe   : > { %s8432_s22 = smov 128   ;;  %s8433_s0 = smov 8  }
 0x3ff   : > { %7858 = dma.vmem_to_hbm [thread:$0]  (%p8609_p0), %s4952_s20, 256, %s4954_s30, %s4939_s24, %s8432_s22, %s8432_s22, %s8433_s0  }
 0x400 PF: > { %s9243_s28 = sld [smem:[#allocation31_spill]] }
 0x401   : > { %s9245_s14 = sld [smem:[#allocation33_spill]] }
 0x406   : > { %s4968_s1 = sand.u32 1, %s9243_s28  }
 0x407   : > { %p9246_p12 = scmp.ge.s32.totalorder %s9245_s14, 2  ;;  %s4969_s5 = scalar_lea.sflag [#allocation4], %s4968_s1 }
 0x409   : > { %p7899_p2 = pnand %p9246_p12, %p8615_p5 }
 0x40b   : > { %p7900_p4 = pneg %p7899_p2 }
 0x40d   : > { %8400 = dma.done.wait (%p7900_p4), %s4969_s5, 256  }
 0x40e   : > { %8402 = vsyncadd (%p7900_p4), %s4969_s5, 4294967040  ;;  %s9247_s27 = sld [smem:[#allocation35_spill]]  ;;  %s9250_s25 = smov %s8413_s26 }
 0x40f   : > { %s9248_s24 = sld [smem:[#allocation32_spill]] }
 0x410   : > { %s9249_s29 = sld [smem:[#allocation36_spill]] }
 0x414   : > { %p40_p13 = scmp.ge.s32.totalorder %s9247_s27, 4  }
 0x416   : > { %s9251_s26 = smov %s9249_s29  ;;  %42 = sbr.rel (!%p40_p13) target bundleno = 30 (0x1e), region = 209 }
 0x41b   :  { %4975 = vsyncpa [#allocation3], 1 }
 0x41c   :  { %4977 = vsyncpa [#allocation3 + $0x1], 1 }
 0x41d   :  { %4978 = vsyncpa [#allocation6], 1 }
 0x41e   :  { %4980 = vsyncpa [#allocation6 + $0x1], 1 }
 0x41f   :  { %4981 = vsyncpa [#allocation9], 1 }
 0x420   :  { %4983 = vsyncpa [#allocation9 + $0x1], 1 }
 0x421   :  { %4984 = vsyncpa [#allocation12], 1 }
 0x422   :  { %4985 = vsyncpa [#allocation15], 1 }
 0x423   :  { %4986 = vsyncpa [#allocation18], 1 }
 0x424   :  { %4987 = vsyncpa [#allocation21], 1 }
 0x425   :  { %4988 = vsyncpa [#allocation4], 1 }
 0x426   :  { %4990 = vsyncpa [#allocation4 + $0x1], 1 }

// kernel: tpu_custom_call.1
= control target key start
LH: loop header
LB: loop body
LE: loop exit
PB: predicated region body
PF: predicated region fallthrough
CT: control target
= control target key end

     0   :  { %s9133_s0 = inlined_call_operand.hbm [shape: bf16[32,512], index: 0, kind: input, shape index: {}]   ;;  %s9134_s1 = inlined_call_operand.hbm [shape: bf16[32,512], index: 1, kind: input, shape index: {}]   ;;  %s9135_s2 = inlined_call_operand.hbm [shape: bf16[32,512], index: 2, kind: input, shape index: {}]   ;;  %s9136_s3 = inlined_call_operand.hbm [shape: bf16[32,512], index: 3, kind: input, shape index: {}]   ;;  %s9137_s4 = inlined_call_operand.hbm [shape: bf16[32,512], index: 4, kind: input, shape index: {}]   ;;  %s9138_s5 = inlined_call_operand.hbm [shape: bf16[512,512], index: 5, kind: input, shape index: {}]   ;;  %s9139_s6 = inlined_call_operand.hbm [shape: bf16[512,256], index: 6, kind: input, shape index: {}]   ;;  %s9140_s7 = inlined_call_operand.hbm [shape: bf16[512,256], index: 7, kind: input, shape index: {}]   ;;  %s9141_s8 = inlined_call_operand.hbm [shape: bf16[512,256], index: 8, kind: input, shape index: {}]   ;;  %s9142_s9 = inlined_call_operand.hbm [shape: bf16[512,256], index: 9, kind: input, shape index: {}]   ;;  %s9143_s10 = inlined_call_operand.hbm [shape: bf16[768,256], index: 10, kind: input, shape index: {}]   ;;  %s9144_s11 = inlined_call_operand.hbm [shape: bf16[256,128], index: 11, kind: input, shape index: {}]   ;;  %s9145_s12 = inlined_call_operand.vmem [shape: f32[1,256], index: 12, kind: input, shape index: {}]   ;;  %s9146_s13 = inlined_call_operand.vmem [shape: f32[1,256], index: 13, kind: input, shape index: {}]   ;;  %s9147_s14 = inlined_call_operand.vmem [shape: f32[1,256], index: 14, kind: input, shape index: {}]   ;;  %s9148_s15 = inlined_call_operand.vmem [shape: f32[1,256], index: 15, kind: input, shape index: {}]   ;;  %s9149_s16 = inlined_call_operand.vmem [shape: f32[1,128], index: 16, kind: input, shape index: {}]   ;;  %s9150_s17 = inlined_call_operand.hbm [shape: f32[32,128], index: 17, kind: output, shape index: {}]  }
   0x1   :  { %9178 = sst [smem:[#allocation40_spill]] %s9133_s0 }
   0x2   :  { %9179 = sst [smem:[#allocation41_spill]] %s9134_s1 }
   0x3   :  { %9180 = sst [smem:[#allocation42_spill]] %s9136_s3 }
   0x4   :  { %9181 = sst [smem:[#allocation43_spill]] %s9138_s5 }
   0x5   :  { %9182 = sst [smem:[#allocation44_spill]] %s9139_s6 }
   0x6   :  { %9183 = sst [smem:[#allocation45_spill]] %s9140_s7 }
   0x7   :  { %9184 = sst [smem:[#allocation46_spill]] %s9141_s8 }
   0x8   :  { %9185 = sst [smem:[#allocation47_spill]] %s9142_s9 }
   0x9   :  { %9186 = sst [smem:[#allocation48_spill]] %s9143_s10 }
   0xa   :  { %9187 = sst [smem:[#allocation49_spill]] %s9144_s11 }
   0xb   :  { %9188 = sst [smem:[#allocation50_spill]] %s9145_s12 }
   0xc   :  { %9189 = sst [smem:[#allocation51_spill]] %s9146_s13 }
   0xd   :  { %9190 = sst [smem:[#allocation52_spill]] %s9147_s14 }
   0xe   :  { %9191 = sst [smem:[#allocation53_spill]] %s9148_s15 }
   0xf   :  { %9192 = sst [smem:[#allocation54_spill]] %s9149_s16 }
  0x10   :  { %9193 = sst [smem:[#allocation55_spill]] %s9150_s17 }
  0x11   :  { %22 = vsyncpa [#allocation3], 0 }
  0x12   :  { %24 = vsyncpa [#allocation3 + $0x1], 0 }
  0x13   :  { %25 = vsyncpa [#allocation6], 0 }
  0x14   :  { %27 = vsyncpa [#allocation6 + $0x1], 0 }
  0x15   :  { %28 = vsyncpa [#allocation9], 0 }
  0x16   :  { %30 = vsyncpa [#allocation9 + $0x1], 0 }
  0x17   :  { %31 = vsyncpa [#allocation12], 0 }
  0x18   :  { %32 = vsyncpa [#allocation15], 0 }
  0x19   :  { %33 = vsyncpa [#allocation18], 0 }
  0x1a   :  { %34 = vsyncpa [#allocation21], 0 }
  0x1b   :  { %35 = vsyncpa [#allocation4], 0 }
  0x1c   :  { %37 = vsyncpa [#allocation4 + $0x1], 0  ;;  %s8524_s24 = smov 0   ;;  %s8526_s25 = smov 0  }
  0x1d   :  { %s8528_s26 = smov 0   ;;  %s8530_s27 = smov 0  }
  0x1e LB: > { %9194 = sst [smem:[#allocation31_spill]] %s8405_s24  ;;  %s8548_s30 = sadd.s32 4294967295, %s8417_s27   ;;  %s8417_s27 = sphi %s8530_s27, %s9247_s27   ;;  %s8413_s26 = sphi %s8528_s26, %s9251_s26   ;;  %s8409_s25 = sphi %s8526_s25, %s9250_s25   ;;  %s8405_s24 = sphi %s8524_s24, %s9248_s24  }
  0x1f   : > { %9195 = sst [smem:[#allocation32_spill]] %s8409_s25  ;;  %p5181_p0 = scmp.ge.s32.totalorder %s8417_s27, 1 }
  0x20   : > { %9196 = sst [smem:[#allocation33_spill]] %s8417_s27  ;;  %p9170_p1 = scmp.eq.s32.totalorder %s8548_s30, 0 }
  0x21   : > { %s9197_s5 = sld [smem:[#allocation43_spill]]  ;;  %p456_p2 = scmp.lt.s32.totalorder %s8417_s27, 3 }
  0x22   : > { %9198 = sst [smem:[#allocation34_spill]] %s8548_s30  ;;  %s8419_s19 = smov [#allocation11]  }
  0x23   : > { %p8553_p3 = pnand %p5181_p0, %p456_p2  ;;  %s469_s1 = sshll.u32 %s8419_s19, 4  ;;  %s470_s1 = int_to_ptr.vmem [resolvable:$true] %s469_s1 }
  0x24   : > { %s9201_s7 = sld [smem:[#allocation45_spill]]  ;;  %s9154_s28 = smov 256  }
  0x25   : > { %p7860_p4 = pneg %p8553_p3  ;;  %s9160_s29 = smov 16  }
  0x26   : > { %s8422_s19 = smov [#allocation14]   ;;  %s9202_s9 = sld [smem:[#allocation47_spill]] }
  0x27   : > { %s467_s0 = sshll.u32 %s9197_s5, 4  ;;  %p8562_p6 = pnand %p7860_p4, %p9170_p1  ;;  %s468_s0 = int_to_ptr.hbm [resolvable:$true] %s467_s0 }
  0x28   : > { %s497_s21 = sshll.u32 %s8422_s19, 4  ;;  %s9156_s17 = smov 128   ;;  %s498_s21 = int_to_ptr.vmem [resolvable:$true] %s497_s21 }
  0x29   : > { %7863 = dma.hbm_to_vmem [thread:$0]  (!%p8562_p6), %s468_s0, 16384, %s470_s1, [#allocation12], %s9154_s28, %s9154_s28, %s9160_s29  }
  0x2a   : > { %s495_s23 = sshll.u32 %s9201_s7, 4  ;;  %s9158_s16 = smov 8   ;;  %s496_s23 = int_to_ptr.hbm [resolvable:$true] %s495_s23 }
  0x2b   : > { %7869 = dma.hbm_to_vmem [thread:$0]  (!%p8562_p6), %s496_s23, 8192, %s498_s21, [#allocation15], %s9156_s17, %s9156_s17, %s9158_s16  }
  0x2c   : > { %s523_s7 = sshll.u32 %s9202_s9, 4  ;;  %s8425_s0 = smov [#allocation17]   ;;  %s524_s7 = int_to_ptr.hbm [resolvable:$true] %s523_s7 }
  0x2d   : > { %s525_s1 = sshll.u32 %s8425_s0, 4  ;;  %s5180_s5 = sadd.s32 4294967294, %s8417_s27   ;;  %s526_s1 = int_to_ptr.vmem [resolvable:$true] %s525_s1 }
  0x2e   : > { %7875 = dma.hbm_to_vmem [thread:$0]  (!%p8562_p6), %s524_s7, 8192, %s526_s1, [#allocation18], %s9156_s17, %s9156_s17, %s9158_s16  }
  0x2f   : > { %s8589_s19 = sadd.s32 1, %s8417_s27   ;;  %s50_s22 = sadd.s32 1, %s8413_s26 }
  0x30   : > { %9203 = sst [smem:[#allocation35_spill]] %s8589_s19  ;;  %s47_s28 = ssub.s32 %s8417_s27, %s8589_s19 }
  0x31   : > { %p57_p7 = scmp.ne.s32.totalorder %s8413_s26, %s8409_s25  ;;  %p48_p8 = scmp.eq.s32.totalorder %s47_s28, 0 }
  0x32   : > { %p58_p9 = scmp.eq.s32.totalorder %s8417_s27, 0  ;;  %p63_p10 = scmp.ne.s32.totalorder %s8409_s25, %s8405_s24 }
  0x33   : > { %p443_p11 = scmp.eq.s32.totalorder %s8548_s30, 1  ;;  %p449_p2 = scmp.eq.s32.totalorder %s5180_s5, 1 }
  0x34   : > { %s8601_s23 = scalar_select %p48_p8, %s8413_s26, %s50_s22  }
  0x35   : > { %p59_p12 = por %p58_p9, %p57_p7  ;;  %p8605_p13 = por %p9170_p1, %p63_p10 }
  0x36   : > { %9204 = sst [smem:[#allocation36_spill]] %s8601_s23  ;;  %p8609_p0 = por %p443_p11, %p57_p7 }
  0x37   : > { %s9205_s7 = scalar_select %p8605_p13, 1, 0 }
  0x38   : > { %s9207_s21 = scalar_select %p8609_p0, 1, 0 }
  0x39   : > { %9206 = sst [smem:[#allocation37_spill]] %s9205_s7  ;;  %p7909_p4 = scmp.lt.s32.totalorder %s8417_s27, 2 }
  0x3a   : > { %9208 = sst [smem:[#allocation38_spill]] %s9207_s21  ;;  %s9166_s0 = sand.u32 1, %s8413_s26  }
  0x3b   : > { %p8615_p5 = por %p449_p2, %p63_p10  ;;  %s8621_s1 = sshll.u32 %s9166_s0, 5 }
  0x3c   : > { %s8624_s22 = sshll.u32 %s8417_s27, 5  ;;  %p8626_p8 = pnand %p7909_p4, %p59_p12 }
  0x3d   : > { %s9209_s28 = scalar_select %p8615_p5, 1, 0 }
  0x3e   : > { %s605_s16 = sand.u32 1, %s8417_s27   ;;  %s9212_s9 = sld [smem:[#allocation41_spill]] }
  0x3f   : > { %9210 = sst [smem:[#allocation39_spill]] %s9209_s28  ;;  %s609_s19 = scalar_lea.vmem [#allocation5], %s8621_s1 }
  0x40   : > { %s618_s24 = sshll.u32 %s609_s19, 4  ;;  %s8636_s0 = scalar_lea.sflag [#allocation6], %s605_s16  ;;  %s619_s24 = int_to_ptr.vmem [resolvable:$true] %s618_s24 }
  0x41   : > { %p8640_p9 = pneg %p8626_p8 }
  0x44   : > { %s615_s23 = scalar_lea.hbm %s9212_s9, %s8624_s22 }
  0x45   : > { %s616_s28 = sshll.u32 %s615_s23, 4  ;;  %s8064_s23 = scalar_lea.hbm %s9212_s9, 64  ;;  %s617_s28 = int_to_ptr.hbm [resolvable:$true] %s616_s28 }
  0x46   : > { %s8057_s21 = sshra.s32 %s617_s28, 4  ;;  %s8058_s21 = int_to_ptr.hbm [resolvable:$true] %s8057_s21 }
  0x47   : > { %s8059_s15 = scalar_lea.hbm %s8058_s21, 32  ;;  %p8065_p12 = scmp.lt.s32.totalorder %s8058_s21, %s9212_s9 }
  0x48   : > { %p8060_p7 = scmp.ne.s32.totalorder %s8058_s21, %s8059_s15  ;;  %p8066_p2 = scmp.lt.s32.totalorder %s8064_s23, %s8059_s15 }
  0x4a   : > { %p8062_p10 = pnand %p8640_p9, %p8060_p7  ;;  %p8067_p4 = por %p8066_p2, %p8065_p12 }
  0x4c   : > { %p8063_p11 = pneg %p8062_p10 }
  0x4e   : > { %p8068_p1 = pnand %p8067_p4, %p8063_p11 }
  0x50   : > { %8071 = shalt.err (!%p8068_p1)
}
  0x51   : > { %s9214_s13 = smov 16   ;;  %s9215_s12 = smov 256  }
  0x52   : > { %7888 = dma.hbm_to_vmem [thread:$0]  (!%p8626_p8), %s617_s28, 512, %s619_s24, %s8636_s0, %s9215_s12, %s9215_s12, %s9214_s13  }
  0x53   : > { %s9216_s3 = sld [smem:[#allocation42_spill]]  ;;  %s655_s21 = scalar_lea.vmem [#allocation8], %s8621_s1 }
  0x54   : > { %s664_s15 = sshll.u32 %s655_s21, 4  ;;  %s8663_s23 = scalar_lea.sflag [#allocation9], %s605_s16  ;;  %s665_s15 = int_to_ptr.vmem [resolvable:$true] %s664_s15 }
  0x59   : > { %s661_s30 = scalar_lea.hbm %s9216_s3, %s8624_s22  ;;  %s8094_s28 = scalar_lea.hbm %s9216_s3, 64 }
  0x5a   : > { %s662_s27 = sshll.u32 %s661_s30, 4  ;;  %s663_s27 = int_to_ptr.hbm [resolvable:$true] %s662_s27 }
  0x5b   : > { %s8087_s5 = sshra.s32 %s663_s27, 4  ;;  %s8088_s5 = int_to_ptr.hbm [resolvable:$true] %s8087_s5 }
  0x5c   : > { %s8089_s9 = scalar_lea.hbm %s8088_s5, 32  ;;  %p8095_p11 = scmp.lt.s32.totalorder %s8088_s5, %s9216_s3 }
  0x5d   : > { %p8090_p1 = scmp.ne.s32.totalorder %s8088_s5, %s8089_s9  ;;  %p8096_p12 = scmp.lt.s32.totalorder %s8094_s28, %s8089_s9 }
  0x5f   : > { %p8092_p7 = pnand %p8090_p1, %p8640_p9  ;;  %p8097_p2 = por %p8096_p12, %p8095_p11 }
  0x61   : > { %p8093_p10 = pneg %p8092_p7 }
  0x63   : > { %p8098_p4 = pnand %p8097_p2, %p8093_p10 }
  0x65   : > { %8101 = shalt.err (!%p8098_p4)
}
  0x66   : > { %7894 = dma.hbm_to_vmem [thread:$0]  (!%p8626_p8), %s663_s27, 512, %s665_s15, %s8663_s23, %s9215_s12, %s9215_s12, %s9214_s13  }
  0x67   : > { %s9217_s6 = sld [smem:[#allocation44_spill]]  ;;  %s8426_s21 = smov [#allocation13]  }
  0x68   : > { %s483_s5 = sshll.u32 %s8426_s21, 4  ;;  %s9218_s8 = sld [smem:[#allocation46_spill]]  ;;  %s484_s5 = int_to_ptr.vmem [resolvable:$true] %s483_s5 }
  0x69   : > { %s9219_s29 = smov 8   ;;  %s9220_s19 = smov 128  }
  0x6a   : > { %s8427_s27 = smov [#allocation16]   ;;  %s9221_s10 = sld [smem:[#allocation48_spill]] }
  0x6b   : > { %s511_s15 = sshll.u32 %s8427_s27, 4  ;;  %s9222_s11 = sld [smem:[#allocation49_spill]]  ;;  %s512_s15 = int_to_ptr.vmem [resolvable:$true] %s511_s15 }
  0x6c   : > { %s8429_s3 = smov [#allocation20]   ;;  %s8430_s16 = smov 64  }
  0x6d   : > { %s481_s7 = sshll.u32 %s9217_s6, 4  ;;  %s553_s27 = sshll.u32 %s8429_s3, 4  ;;  %s482_s7 = int_to_ptr.hbm [resolvable:$true] %s481_s7  ;;  %s554_s27 = int_to_ptr.vmem [resolvable:$true] %s553_s27 }
  0x6e   : > { %s509_s28 = sshll.u32 %s9218_s8, 4  ;;  %s9223_s9 = sld [smem:[#allocation40_spill]]  ;;  %s510_s28 = int_to_ptr.hbm [resolvable:$true] %s509_s28 }
  0x6f   : > { %7866 = dma.hbm_to_vmem [thread:$0]  (!%p8562_p6), %s482_s7, 8192, %s484_s5, [#allocation12], %s9220_s19, %s9220_s19, %s9219_s29  }
  0x70   : > { %s537_s30 = sshll.u32 %s9221_s10, 4  ;;  %s8428_s5 = smov [#allocation19]   ;;  %s538_s30 = int_to_ptr.hbm [resolvable:$true] %s537_s30 }
  0x71   : > { %7872 = dma.hbm_to_vmem [thread:$0]  (!%p8562_p6), %s510_s28, 8192, %s512_s15, [#allocation15], %s9220_s19, %s9220_s19, %s9219_s29  }
  0x72   : > { %s551_s7 = sshll.u32 %s9222_s11, 4  ;;  %s539_s24 = sshll.u32 %s8428_s5, 4  ;;  %s552_s7 = int_to_ptr.hbm [resolvable:$true] %s551_s7  ;;  %s540_s24 = int_to_ptr.vmem [resolvable:$true] %s539_s24 }
  0x73   : > { %7878 = dma.hbm_to_vmem [thread:$0]  (!%p8562_p6), %s538_s30, 12288, %s540_s24, [#allocation18], %s9220_s19, %s9220_s19, %s9219_s29  }
  0x74   : > { %s8431_s28 = smov 4   ;;  %s592_s5 = scalar_lea.hbm %s9223_s9, %s8624_s22 }
  0x75   : > { %7881 = dma.hbm_to_vmem [thread:$0]  (!%p8562_p6), %s552_s7, 2048, %s554_s27, [#allocation21], %s8430_s16, %s8430_s16, %s8431_s28  }
  0x76   : > { %s586_s6 = scalar_lea.vmem [#allocation2], %s8621_s1  ;;  %s593_s10 = sshll.u32 %s592_s5, 4  ;;  %s594_s10 = int_to_ptr.hbm [resolvable:$true] %s593_s10 }
  0x77   : > { %s595_s8 = sshll.u32 %s586_s6, 4  ;;  %s9224_s11 = sand.u32 1, %s8413_s26   ;;  %s596_s8 = int_to_ptr.vmem [resolvable:$true] %s595_s8 }
  0x78   : > { %s583_s25 = scalar_lea.sflag [#allocation3], %s9224_s11  ;;  %s8237_s29 = sshra.s32 %s594_s10, 4  ;;  %s8238_s29 = int_to_ptr.hbm [resolvable:$true] %s8237_s29 }
  0x79   : > { %s8239_s19 = scalar_lea.hbm %s8238_s29, 32  ;;  %s8244_s7 = scalar_lea.hbm %s9223_s9, 64 }
  0x7a   : > { %p8240_p1 = scmp.ne.s32.totalorder %s8238_s29, %s8239_s19  ;;  %p8245_p6 = scmp.lt.s32.totalorder %s8238_s29, %s9223_s9 }
  0x7b   : > { %p8246_p11 = scmp.lt.s32.totalorder %s8244_s7, %s8239_s19 }
  0x7c   : > { %p8242_p7 = pnand %p8240_p1, %p8640_p9 }
  0x7d   : > { %p8247_p12 = por %p8246_p11, %p8245_p6 }
  0x7e   : > { %p8243_p10 = pneg %p8242_p7 }
  0x80   : > { %p8248_p2 = pnand %p8247_p12, %p8243_p10 }
  0x82   : > { %8251 = shalt.err (!%p8248_p2)
}
  0x83   : > { %7885 = dma.hbm_to_vmem [thread:$0]  (!%p8626_p8), %s594_s10, 512, %s596_s8, %s583_s25, %s9215_s12, %s9215_s12, %s9214_s13  }
  0x84   : > { %s638_s27 = scalar_lea.hbm %s9135_s2, %s8624_s22  ;;  %s632_s16 = scalar_lea.vmem [#allocation7], %s8621_s1 }
  0x85   : > { %s641_s28 = sshll.u32 %s632_s16, 4  ;;  %s639_s15 = sshll.u32 %s638_s27, 4  ;;  %s642_s28 = int_to_ptr.vmem [resolvable:$true] %s641_s28  ;;  %s640_s15 = int_to_ptr.hbm [resolvable:$true] %s639_s15 }
  0x86   : > { %s8267_s21 = sshra.s32 %s640_s15, 4  ;;  %s8274_s8 = scalar_lea.hbm %s9135_s2, 64  ;;  %s8268_s21 = int_to_ptr.hbm [resolvable:$true] %s8267_s21 }
  0x87   : > { %s8269_s5 = scalar_lea.hbm %s8268_s21, 32  ;;  %p8275_p10 = scmp.lt.s32.totalorder %s8268_s21, %s9135_s2 }
  0x88   : > { %p8270_p4 = scmp.ne.s32.totalorder %s8268_s21, %s8269_s5  ;;  %p8276_p6 = scmp.lt.s32.totalorder %s8274_s8, %s8269_s5 }
  0x8a   : > { %p8272_p1 = pnand %p8270_p4, %p8640_p9  ;;  %p8277_p11 = por %p8276_p6, %p8275_p10 }
  0x8c   : > { %p8273_p7 = pneg %p8272_p1 }
  0x8e   : > { %p8278_p12 = pnand %p8277_p11, %p8273_p7 }
  0x90   : > { %8281 = shalt.err (!%p8278_p12)
}
  0x91   : > { %7891 = dma.hbm_to_vmem [thread:$0]  (!%p8626_p8), %s640_s15, 512, %s642_s28, %s8636_s0, %s9215_s12, %s9215_s12, %s9214_s13  }
  0x92   : > { %s684_s7 = scalar_lea.hbm %s9137_s4, %s8624_s22  ;;  %s678_s24 = scalar_lea.vmem [#allocation10], %s8621_s1 }
  0x93   : > { %s687_s3 = sshll.u32 %s678_s24, 4  ;;  %s685_s6 = sshll.u32 %s684_s7, 4  ;;  %s688_s3 = int_to_ptr.vmem [resolvable:$true] %s687_s3  ;;  %s686_s6 = int_to_ptr.hbm [resolvable:$true] %s685_s6 }
  0x94   : > { %s8297_s11 = sshra.s32 %s686_s6, 4  ;;  %s8304_s0 = scalar_lea.hbm %s9137_s4, 64  ;;  %s8298_s11 = int_to_ptr.hbm [resolvable:$true] %s8297_s11 }
  0x95   : > { %s8299_s27 = scalar_lea.hbm %s8298_s11, 32  ;;  %p8305_p7 = scmp.lt.s32.totalorder %s8298_s11, %s9137_s4 }
  0x96   : > { %p8300_p2 = scmp.ne.s32.totalorder %s8298_s11, %s8299_s27  ;;  %p8306_p10 = scmp.lt.s32.totalorder %s8304_s0, %s8299_s27 }
  0x98   : > { %p8302_p4 = pnand %p8300_p2, %p8640_p9  ;;  %p8307_p6 = por %p8306_p10, %p8305_p7 }
  0x9a   : > { %p8303_p1 = pneg %p8302_p4 }
  0x9c   : > { %p8308_p11 = pnand %p8307_p6, %p8303_p1 }
  0x9e   : > { %8311 = shalt.err (!%p8308_p11)
}
  0x9f   : > { %7897 = dma.hbm_to_vmem [thread:$0]  (!%p8626_p8), %s686_s6, 512, %s688_s3, %s8663_s23, %s9215_s12, %s9215_s12, %s9214_s13  }
  0xa0   : > { %699 = sbr.rel (%p8553_p3) target bundleno = 1024 (0x400), region = 88  ;;  %s9225_s14 = sld [smem:[#allocation32_spill]] (!%p8553_p3) }
  0xa6   : > { %s8769_s22 = sand.u32 1, %s9225_s14  }
  0xa7   : > { %s5211_s5 = sshll.u32 %s8769_s22, 5  ;;  %s702_s29 = scalar_lea.sflag [#allocation3], %s8769_s22 }
  0xa8   : > { %s8773_s19 = scalar_lea.vmem [#allocation2], %s5211_s5 }
  0xa9   : > { %8372 = dma.done.wait (%p8605_p13), %s702_s29, 512  }
  0xaa   : > { %8374 = vsyncadd (%p8605_p13), %s702_s29, 4294966784  ;;  %s9227_s17 = sld [smem:[#allocation34_spill]]  ;;  %s8780_s18 = scalar_lea.vmem [#allocation5], %s5211_s5 }
  0xb0   : > { %s711_s12 = sand.u32 1, %s9227_s17  }
  0xb1   : > { %s712_s13 = scalar_lea.sflag [#allocation6], %s711_s12 }
  0xb2   : > { %8376 = dma.done.wait (%p8605_p13), %s712_s13, 1024  }
  0xb3   : > { %8378 = vsyncadd (%p8605_p13), %s712_s13, 4294966272  ;;  %s8786_s23 = scalar_lea.vmem [#allocation7], %s5211_s5  ;;  %s732_s8 = scalar_lea.sflag [#allocation9], %s711_s12 }
  0xb4   : > { %s8788_s10 = scalar_lea.vmem [#allocation8], %s5211_s5 }
  0xb5   : > { %8380 = dma.done.wait (%p8605_p13), %s732_s8, 1024  }
  0xb6   : > { %8382 = vsyncadd (%p8605_p13), %s732_s8, 4294966272  ;;  %s8794_s25 = scalar_lea.vmem [#allocation10], %s5211_s5  ;;  %p9228_p3 = scmp.eq.s32.totalorder %s9227_s17, 0 }
  0xb8   : > { %8384 = dma.done.wait (%p9228_p3), [#allocation12], 24576   ;;  %p9229_p8 = pmov %p9228_p3 }
  0xb9   : > { %p9230_p9 = pmov %p9228_p3 }
  0xba   : > { %8386 = vsyncadd (%p9229_p8), [#allocation12], 4294942720 }
  0xbb   : > { %8388 = dma.done.wait (%p9230_p9), [#allocation15], 16384   ;;  %p9231_p12 = pmov %p9228_p3 }
  0xbc   : > { %p9232_p2 = pmov %p9228_p3 }
  0xbd   : > { %8390 = vsyncadd (%p9231_p12), [#allocation15], 4294950912 }
  0xbe   : > { %8392 = dma.done.wait (%p9232_p2), [#allocation18], 20480   ;;  %p9233_p4 = pmov %p9232_p2 }
  0xbf   : > { %p9234_p13 = pmov %p9232_p2 }
  0xc0   : > { %8394 = vsyncadd (%p9233_p4), [#allocation18], 4294946816 }
  0xc1   : > { %8396 = dma.done.wait (%p9234_p13), [#allocation21], 2048   ;;  %p9235_p1 = pmov %p9232_p2 }
  0xc2   : > { %v5354_v0 = vld [vmem:[#allocation11 + $0xe0] sm:$0xf]  ;;  %v7353_v1 = vld [vmem:[#allocation11 + $0xec] sm:$0xf0]  ;;  %s9236_s7 = sld [smem:[#allocation50_spill]]  ;;  %s7819_s12 = sshll.u32 %s9227_s17, 4 }
  0xc3   : > { %8398 = vsyncadd (%p9235_p1), [#allocation21], 4294965248  ;;  %v5482_v2 = vld [vmem:[#allocation11 + $0x1e0] sm:$0xf]  ;;  %v5355_v3 = vor.u32 %v7353_v1, %v5354_v0  ;;  %v7385_v4 = vld [vmem:[#allocation11 + $0x1ec] sm:$0xf0] }
  0xc4   : > { %v5610_v5 = vld [vmem:[#allocation11 + $0x2e0] sm:$0xf]  ;;  %v7417_v6 = vld [vmem:[#allocation11 + $0x2ec] sm:$0xf0]  ;;  %v5483_v7 = vor.u32 %v7385_v4, %v5482_v2  ;;  %s9237_s6 = sld [smem:[#allocation51_spill]]  ;;  %s4939_s24 = scalar_lea.sflag [#allocation4], %s8769_s22 }
  0xc5   : > { %v5611_v8 = vor.u32 %v7417_v6, %v5610_v5  ;;  %v5738_v9 = vld [vmem:[#allocation11 + $0x3e0] sm:$0xf]  ;;  %v7449_v10 = vld [vmem:[#allocation11 + $0x3ec] sm:$0xf0]  ;;  %1666 = vmatpush.bf16.msra.mxu0 %v5355_v3  ;;  %s9238_s0 = sld [smem:[#allocation52_spill]] }
  0xc6   : > { %v5338_v11 = vld [vmem:[#allocation11 + $0xc0] sm:$0xf]  ;;  %v5739_v12 = vor.u32 %v7449_v10, %v5738_v9  ;;  %v7349_v13 = vld [vmem:[#allocation11 + $0xcc] sm:$0xf0]  ;;  %1680 = vmatpush.bf16.msra.mxu1 %v5483_v7  ;;  %s9239_s14 = sld [smem:[#allocation53_spill]] }
  0xc7   : > { %v5466_v14 = vld [vmem:[#allocation11 + $0x1c0] sm:$0xf]  ;;  %v7381_v15 = vld [vmem:[#allocation11 + $0x1cc] sm:$0xf0]  ;;  %1694 = vmatpush.bf16.msra.mxu2 %v5611_v8  ;;  %v5339_v16 = vor.u32 %v7349_v13, %v5338_v11  ;;  %s9240_s29 = sld [smem:[#allocation54_spill]] }
  0xc8   : > { %v5467_v17 = vor.u32 %v7381_v15, %v5466_v14  ;;  %v5594_v18 = vld [vmem:[#allocation11 + $0x2c0] sm:$0xf]  ;;  %v7413_v19 = vld [vmem:[#allocation11 + $0x2cc] sm:$0xf0]  ;;  %1708 = vmatpush.bf16.msra.mxu3 %v5739_v12  ;;  %s9241_s8 = sld [smem:[#allocation55_spill]] }
  0xc9   : > { %v5722_v20 = vld [vmem:[#allocation11 + $0x3c0] sm:$0xf]  ;;  %v5595_v21 = vor.u32 %v7413_v19, %v5594_v18  ;;  %v7445_v22 = vld [vmem:[#allocation11 + $0x3cc] sm:$0xf0]  ;;  %1667 = vmatpush.bf16.msra.mxu0 %v5339_v16 }
  0xca   : > { %v5322_v23 = vld [vmem:[#allocation11 + $0xa0] sm:$0xf]  ;;  %v7345_v24 = vld [vmem:[#allocation11 + $0xac] sm:$0xf0]  ;;  %v5723_v25 = vor.u32 %v7445_v22, %v5722_v20  ;;  %1681 = vmatpush.bf16.msra.mxu1 %v5467_v17 }
  0xcb   : > { %v5450_v26 = vld [vmem:[#allocation11 + $0x1a0] sm:$0xf]  ;;  %v7377_v27 = vld [vmem:[#allocation11 + $0x1ac] sm:$0xf0]  ;;  %v5323_v29 = vor.u32 %v7345_v24, %v5322_v23  ;;  %1695 = vmatpush.bf16.msra.mxu2 %v5595_v21 }
  0xcc   : > { %v5578_v28 = vld [vmem:[#allocation11 + $0x2a0] sm:$0xf]  ;;  %v7409_v30 = vld [vmem:[#allocation11 + $0x2ac] sm:$0xf0]  ;;  %v5451_v33 = vor.u32 %v7377_v27, %v5450_v26  ;;  %1709 = vmatpush.bf16.msra.mxu3 %v5723_v25 }
  0xcd   : > { %v5706_v31 = vld [vmem:[#allocation11 + $0x3a0] sm:$0xf]  ;;  %v7441_v32 = vld [vmem:[#allocation11 + $0x3ac] sm:$0xf0]  ;;  %v5579_v34 = vor.u32 %v7409_v30, %v5578_v28  ;;  %1668 = vmatpush.bf16.msra.mxu0 %v5323_v29  ;;  %v7351_v28 = vld [vmem:[#allocation11 + $0xe4] sm:$0xf] }
  0xce   : > { %v5306_v35 = vld [vmem:[#allocation11 + $0x80] sm:$0xf]  ;;  %v7341_v36 = vld [vmem:[#allocation11 + $0x8c] sm:$0xf0]  ;;  %v5707_v38 = vor.u32 %v7441_v32, %v5706_v31  ;;  %1682 = vmatpush.bf16.msra.mxu1 %v5451_v33  ;;  %v5356_v29 = vld [vmem:[#allocation11 + $0xf0] sm:$0xf0] }
  0xcf   : > { %v5434_v37 = vld [vmem:[#allocation11 + $0x180] sm:$0xf]  ;;  %v7373_v39 = vld [vmem:[#allocation11 + $0x18c] sm:$0xf0]  ;;  %v5307_v44 = vor.u32 %v7341_v36, %v5306_v35  ;;  %1696 = vmatpush.bf16.msra.mxu2 %v5579_v34  ;;  %v7383_v30 = vld [vmem:[#allocation11 + $0x1e4] sm:$0xf] }
  0xd0   : > { %v5562_v40 = vld [vmem:[#allocation11 + $0x280] sm:$0xf]  ;;  %v7405_v41 = vld [vmem:[#allocation11 + $0x28c] sm:$0xf0]  ;;  %v5435_v45 = vor.u32 %v7373_v39, %v5434_v37  ;;  %1710 = vmatpush.bf16.msra.mxu3 %v5707_v38  ;;  %v5484_v32 = vld [vmem:[#allocation11 + $0x1f0] sm:$0xf0] }
  0xd1   : > { %v5690_v42 = vld [vmem:[#allocation11 + $0x380] sm:$0xf]  ;;  %v7437_v43 = vld [vmem:[#allocation11 + $0x38c] sm:$0xf0]  ;;  %v5563_v46 = vor.u32 %v7405_v41, %v5562_v40  ;;  %1669 = vmatpush.bf16.msra.mxu0 %v5307_v44  ;;  %v7415_v33 = vld [vmem:[#allocation11 + $0x2e4] sm:$0xf]  ;;  %v5359_v40 = vor.u32 %v7351_v28, %v5356_v29  ;;  %v5487_v41 = vor.u32 %v7383_v30, %v5484_v32 }
  0xd2   : > { %v5290_v47 = vld [vmem:[#allocation11 + $0x60] sm:$0xf]  ;;  %v7337_v48 = vld [vmem:[#allocation11 + $0x6c] sm:$0xf0]  ;;  %v5691_v50 = vor.u32 %v7437_v43, %v5690_v42  ;;  %1683 = vmatpush.bf16.msra.mxu1 %v5435_v45  ;;  %v5612_v34 = vld [vmem:[#allocation11 + $0x2f0] sm:$0xf0] }
  0xd3   : > { %v5418_v49 = vld [vmem:[#allocation11 + $0x160] sm:$0xf]  ;;  %v7369_v51 = vld [vmem:[#allocation11 + $0x16c] sm:$0xf0]  ;;  %v5291_v56 = vor.u32 %v7337_v48, %v5290_v47  ;;  %1697 = vmatpush.bf16.msra.mxu2 %v5563_v46  ;;  %v7447_v37 = vld [vmem:[#allocation11 + $0x3e4] sm:$0xf]  ;;  %v5615_v42 = vor.u32 %v7415_v33, %v5612_v34 }
  0xd4   : > { %v5546_v52 = vld [vmem:[#allocation11 + $0x260] sm:$0xf]  ;;  %v7401_v53 = vld [vmem:[#allocation11 + $0x26c] sm:$0xf0]  ;;  %v5419_v57 = vor.u32 %v7369_v51, %v5418_v49  ;;  %1711 = vmatpush.bf16.msra.mxu3 %v5691_v50  ;;  %v5740_v38 = vld [vmem:[#allocation11 + $0x3f0] sm:$0xf0] }
  0xd5   : > { %v5674_v54 = vld [vmem:[#allocation11 + $0x360] sm:$0xf]  ;;  %v7433_v55 = vld [vmem:[#allocation11 + $0x36c] sm:$0xf0]  ;;  %v5547_v58 = vor.u32 %v7401_v53, %v5546_v52  ;;  %1670 = vmatpush.bf16.msra.mxu0 %v5291_v56  ;;  %v7347_v43 = vld [vmem:[#allocation11 + $0xc4] sm:$0xf]  ;;  %v5743_v46 = vor.u32 %v7447_v37, %v5740_v38 }
  0xd6   : > { %v5274_v59 = vld [vmem:[#allocation11 + $0x40] sm:$0xf]  ;;  %v7333_v60 = vld [vmem:[#allocation11 + $0x4c] sm:$0xf0]  ;;  %v5675_v62 = vor.u32 %v7433_v55, %v5674_v54  ;;  %1684 = vmatpush.bf16.msra.mxu1 %v5419_v57  ;;  %v5340_v44 = vld [vmem:[#allocation11 + $0xd0] sm:$0xf0] }
  0xd7   : > { %v5402_v61 = vld [vmem:[#allocation11 + $0x140] sm:$0xf]  ;;  %v7365_v63 = vld [vmem:[#allocation11 + $0x14c] sm:$0xf0]  ;;  %v5275_v4 = vor.u32 %v7333_v60, %v5274_v59  ;;  %1698 = vmatpush.bf16.msra.mxu2 %v5547_v58  ;;  %v7379_v45 = vld [vmem:[#allocation11 + $0x1c4] sm:$0xf]  ;;  %v5343_v52 = vor.u32 %v7347_v43, %v5340_v44 }
  0xd8   : > { %v5530_v0 = vld [vmem:[#allocation11 + $0x240] sm:$0xf]  ;;  %v7397_v1 = vld [vmem:[#allocation11 + $0x24c] sm:$0xf0]  ;;  %v5403_v5 = vor.u32 %v7365_v63, %v5402_v61  ;;  %1712 = vmatpush.bf16.msra.mxu3 %v5675_v62  ;;  %v5468_v47 = vld [vmem:[#allocation11 + $0x1d0] sm:$0xf0] }
  0xd9   : > { %v5658_v2 = vld [vmem:[#allocation11 + $0x340] sm:$0xf]  ;;  %v7429_v3 = vld [vmem:[#allocation11 + $0x34c] sm:$0xf0]  ;;  %v5531_v6 = vor.u32 %v7397_v1, %v5530_v0  ;;  %1671 = vmatpush.bf16.msra.mxu0 %v5275_v4  ;;  %v7411_v48 = vld [vmem:[#allocation11 + $0x2c4] sm:$0xf]  ;;  %v5471_v56 = vor.u32 %v7379_v45, %v5468_v47 }
  0xda   : > { %v5258_v7 = vld [vmem:[#allocation11 + $0x20] sm:$0xf]  ;;  %v7329_v8 = vld [vmem:[#allocation11 + $0x2c] sm:$0xf0]  ;;  %v5659_v10 = vor.u32 %v7429_v3, %v5658_v2  ;;  %1685 = vmatpush.bf16.msra.mxu1 %v5403_v5  ;;  %v5596_v49 = vld [vmem:[#allocation11 + $0x2d0] sm:$0xf0] }
  0xdb   : > { %v5386_v9 = vld [vmem:[#allocation11 + $0x120] sm:$0xf]  ;;  %v7361_v11 = vld [vmem:[#allocation11 + $0x12c] sm:$0xf0]  ;;  %v5259_v16 = vor.u32 %v7329_v8, %v5258_v7  ;;  %1699 = vmatpush.bf16.msra.mxu2 %v5531_v6  ;;  %v7443_v50 = vld [vmem:[#allocation11 + $0x3c4] sm:$0xf]  ;;  %v5599_v57 = vor.u32 %v7411_v48, %v5596_v49 }
  0xdc   : > { %v5514_v12 = vld [vmem:[#allocation11 + $0x220] sm:$0xf]  ;;  %v7393_v13 = vld [vmem:[#allocation11 + $0x22c] sm:$0xf0]  ;;  %v5387_v19 = vor.u32 %v7361_v11, %v5386_v9  ;;  %1713 = vmatpush.bf16.msra.mxu3 %v5659_v10  ;;  %v5724_v51 = vld [vmem:[#allocation11 + $0x3d0] sm:$0xf0] }
  0xdd   : > { %v5642_v14 = vld [vmem:[#allocation11 + $0x320] sm:$0xf]  ;;  %v7425_v15 = vld [vmem:[#allocation11 + $0x32c] sm:$0xf0]  ;;  %v5515_v20 = vor.u32 %v7393_v13, %v5514_v12  ;;  %1672 = vmatpush.bf16.msra.mxu0 %v5259_v16  ;;  %v7343_v53 = vld [vmem:[#allocation11 + $0xa4] sm:$0xf]  ;;  %v5727_v61 = vor.u32 %v7443_v50, %v5724_v51 }
  0xde   : > { %v5242_v17 = vld [vmem:[#allocation11] sm:$0xf]  ;;  %v7325_v18 = vld [vmem:[#allocation11 + $0xc] sm:$0xf0]  ;;  %v5643_v24 = vor.u32 %v7425_v15, %v5642_v14  ;;  %1686 = vmatpush.bf16.msra.mxu1 %v5387_v19  ;;  %v5324_v54 = vld [vmem:[#allocation11 + $0xb0] sm:$0xf0] }
  0xdf   : > { %v5370_v21 = vld [vmem:[#allocation11 + $0x100] sm:$0xf]  ;;  %v7357_v22 = vld [vmem:[#allocation11 + $0x10c] sm:$0xf0]  ;;  %v5243_v31 = vor.u32 %v7325_v18, %v5242_v17  ;;  %1700 = vmatpush.bf16.msra.mxu2 %v5515_v20  ;;  %v7375_v55 = vld [vmem:[#allocation11 + $0x1a4] sm:$0xf]  ;;  %v5327_v5 = vor.u32 %v7343_v53, %v5324_v54 }
  0xe0   : > { %v5498_v23 = vld [vmem:[#allocation11 + $0x200] sm:$0xf]  ;;  %v7389_v25 = vld [vmem:[#allocation11 + $0x20c] sm:$0xf0]  ;;  %v5371_v35 = vor.u32 %v7357_v22, %v5370_v21  ;;  %1714 = vmatpush.bf16.msra.mxu3 %v5643_v24  ;;  %v5452_v58 = vld [vmem:[#allocation11 + $0x1b0] sm:$0xf0] }
  0xe1   : > { %v5626_v26 = vld [vmem:[#allocation11 + $0x300] sm:$0xf]  ;;  %v7421_v27 = vld [vmem:[#allocation11 + $0x30c] sm:$0xf0]  ;;  %v5499_v36 = vor.u32 %v7389_v25, %v5498_v23  ;;  %1673 = vmatpush.bf16.msra.mxu0 %v5243_v31  ;;  %v7407_v59 = vld [vmem:[#allocation11 + $0x2a4] sm:$0xf]  ;;  %v5455_v10 = vor.u32 %v7375_v55, %v5452_v58 }
  0xe2   : > { %v5627_v39 = vor.u32 %v7421_v27, %v5626_v26  ;;  %1687 = vmatpush.bf16.msra.mxu1 %v5371_v35  ;;  %v5234_v60 = vld [vmem:[%s8773_s19 + $0x8] sm:$0xf]  ;;  %v5580_v62 = vld [vmem:[#allocation11 + $0x2b0] sm:$0xf0]  ;;  %v7439_v63 = vld [vmem:[#allocation11 + $0x3a4] sm:$0xf] }
  0xe3   : > { %1701 = vmatpush.bf16.msra.mxu2 %v5499_v36  ;;  %v7306_v0 = vld [vmem:[%s8773_s19 + $0x14] sm:$0xf0]  ;;  %v5708_v1 = vld [vmem:[#allocation11 + $0x3b0] sm:$0xf0]  ;;  %v7339_v2 = vld [vmem:[#allocation11 + $0x84] sm:$0xf]  ;;  %v5583_v11 = vor.u32 %v7407_v59, %v5580_v62 }
  0xe4   : > { %1715 = vmatpush.bf16.msra.mxu3 %v5627_v39  ;;  %v5308_v3 = vld [vmem:[#allocation11 + $0x90] sm:$0xf0]  ;;  %v8814_v4 = vor.u32 %v7306_v0, %v5234_v60  ;;  %v7371_v6 = vld [vmem:[#allocation11 + $0x184] sm:$0xf]  ;;  %v7304_v12 = vld [vmem:[%s8773_s19 + $0xc] sm:$0xf]  ;;  %v5711_v15 = vor.u32 %v7439_v63, %v5708_v1 }
  0xe5   : > { %1722 = vmatpush.bf16.msrb.mxu0 %v5359_v40  ;;  %v5436_v7 = vld [vmem:[#allocation11 + $0x190] sm:$0xf0]  ;;  %v7403_v8 = vld [vmem:[#allocation11 + $0x284] sm:$0xf]  ;;  %v5236_v13 = vld [vmem:[%s8773_s19 + $0x18] sm:$0xf0]  ;;  %v5311_v24 = vor.u32 %v7339_v2, %v5308_v3 }
  0xe6   : > { %1736 = vmatpush.bf16.msrb.mxu1 %v5487_v41  ;;  %v5564_v9 = vld [vmem:[#allocation11 + $0x290] sm:$0xf0]  ;;  %v5226_v14 = vld [vmem:[%s8773_s19] sm:$0xf]  ;;  %1702 = vmatmul.bf16.vlgmr.msra.gmra.mxu2 %v8814_v4  ;;  %v8820_v16 = vor.u32 %v7304_v12, %v5236_v13  ;;  %v7305_v17 = vld [vmem:[%s8773_s19 + $0xc] sm:$0xf0]  ;;  %v5439_v25 = vor.u32 %v7371_v6, %v5436_v7 }
  0xe7   : > { %1750 = vmatpush.bf16.msrb.mxu2 %v5615_v42  ;;  %v7303_v18 = vld [vmem:[%s8773_s19 + $0x4] sm:$0xf]  ;;  %v5228_v19 = vld [vmem:[%s8773_s19 + $0x10] sm:$0xf0]  ;;  %v8825_v22 = vor.u32 %v7305_v17, %v5226_v14  ;;  %v5567_v26 = vor.u32 %v7403_v8, %v5564_v9  ;;  %v5362_v9 = vld [vmem:[#allocation11 + $0xe8] sm:$0xf] }
  0xe8   : > { %1764 = vmatpush.bf16.msrb.mxu3 %v5743_v46  ;;  %v7435_v20 = vld [vmem:[#allocation11 + $0x384] sm:$0xf]  ;;  %v5692_v21 = vld [vmem:[#allocation11 + $0x390] sm:$0xf0]  ;;  %v8827_v23 = vor.u32 %v7303_v18, %v5228_v19  ;;  %v7386_v13 = vld [vmem:[#allocation11 + $0x1f4] sm:$0xf0] }
  0xe9   : > { %1723 = vmatpush.bf16.msrb.mxu0 %v5343_v52  ;;  %1716 = vmatmul.bf16.vlgmr.msra.gmra.mxu3 %v8820_v16  ;;  %v7335_v27 = vld [vmem:[#allocation11 + $0x64] sm:$0xf]  ;;  %v5292_v28 = vld [vmem:[#allocation11 + $0x70] sm:$0xf0]  ;;  %v5695_v30 = vor.u32 %v7435_v20, %v5692_v21  ;;  %v5618_v14 = vld [vmem:[#allocation11 + $0x2e8] sm:$0xf] }
  0xea   : > { %1737 = vmatpush.bf16.msrb.mxu1 %v5471_v56  ;;  %v7367_v29 = vld [vmem:[#allocation11 + $0x164] sm:$0xf]  ;;  %v5420_v31 = vld [vmem:[#allocation11 + $0x170] sm:$0xf0]  ;;  %1674 = vmatmul.bf16.vlgmr.msra.gmra.mxu0 %v8825_v22  ;;  %v5295_v36 = vor.u32 %v7335_v27, %v5292_v28  ;;  %v5746_v19 = vld [vmem:[#allocation11 + $0x3e8] sm:$0xf] }
  0xeb   : > { %1751 = vmatpush.bf16.msrb.mxu2 %v5599_v57  ;;  %v7399_v32 = vld [vmem:[#allocation11 + $0x264] sm:$0xf]  ;;  %v5548_v33 = vld [vmem:[#allocation11 + $0x270] sm:$0xf0]  ;;  %1688 = vmatmul.bf16.vlgmr.msra.gmra.mxu1 %v8827_v23  ;;  %v5423_v37 = vor.u32 %v7367_v29, %v5420_v31  ;;  %v7450_v20 = vld [vmem:[#allocation11 + $0x3f4] sm:$0xf0] }
  0xec   : > { %1765 = vmatpush.bf16.msrb.mxu3 %v5727_v61  ;;  %v7431_v34 = vld [vmem:[#allocation11 + $0x364] sm:$0xf]  ;;  %v5676_v35 = vld [vmem:[#allocation11 + $0x370] sm:$0xf0]  ;;  %v5551_v38 = vor.u32 %v7399_v32, %v5548_v33  ;;  %v5346_v27 = vld [vmem:[#allocation11 + $0xc8] sm:$0xf] }
  0xed   : > { %1724 = vmatpush.bf16.msrb.mxu0 %v5327_v5  ;;  %v7331_v39 = vld [vmem:[#allocation11 + $0x44] sm:$0xf]  ;;  %v5276_v40 = vld [vmem:[#allocation11 + $0x50] sm:$0xf0]  ;;  %v5679_v42 = vor.u32 %v7431_v34, %v5676_v35  ;;  %v7350_v28 = vld [vmem:[#allocation11 + $0xd4] sm:$0xf0] }
  0xee   : > { %1738 = vmatpush.bf16.msrb.mxu1 %v5455_v10  ;;  %v7363_v41 = vld [vmem:[#allocation11 + $0x144] sm:$0xf]  ;;  %v5404_v43 = vld [vmem:[#allocation11 + $0x150] sm:$0xf0]  ;;  %v5279_v48 = vor.u32 %v7331_v39, %v5276_v40  ;;  %v7354_v10 = vld [vmem:[#allocation11 + $0xf4] sm:$0xf0] }
  0xef   : > { %1752 = vmatpush.bf16.msrb.mxu2 %v5583_v11  ;;  %v7395_v44 = vld [vmem:[#allocation11 + $0x244] sm:$0xf]  ;;  %v5532_v45 = vld [vmem:[#allocation11 + $0x250] sm:$0xf0]  ;;  %v5407_v49 = vor.u32 %v7363_v41, %v5404_v43  ;;  %v5490_v11 = vld [vmem:[#allocation11 + $0x1e8] sm:$0xf] }
  0xf0   : > { %1766 = vmatpush.bf16.msrb.mxu3 %v5711_v15  ;;  %v7427_v46 = vld [vmem:[#allocation11 + $0x344] sm:$0xf]  ;;  %v5660_v47 = vld [vmem:[#allocation11 + $0x350] sm:$0xf0]  ;;  %v5535_v50 = vor.u32 %v7395_v44, %v5532_v45  ;;  %v7418_v15 = vld [vmem:[#allocation11 + $0x2f4] sm:$0xf0] }
  0xf1   : > { %1725 = vmatpush.bf16.msrb.mxu0 %v5311_v24  ;;  %v7327_v51 = vld [vmem:[#allocation11 + $0x24] sm:$0xf]  ;;  %v5260_v52 = vld [vmem:[#allocation11 + $0x30] sm:$0xf0]  ;;  %v5663_v54 = vor.u32 %v7427_v46, %v5660_v47  ;;  %v5363_v24 = vor.u32 %v7354_v10, %v5362_v9  ;;  %v5474_v29 = vld [vmem:[#allocation11 + $0x1c8] sm:$0xf] }
  0xf2   : > { %1739 = vmatpush.bf16.msrb.mxu1 %v5439_v25  ;;  %v7359_v53 = vld [vmem:[#allocation11 + $0x124] sm:$0xf]  ;;  %v5388_v55 = vld [vmem:[#allocation11 + $0x130] sm:$0xf0]  ;;  %v5263_v60 = vor.u32 %v7327_v51, %v5260_v52  ;;  %v5491_v25 = vor.u32 %v7386_v13, %v5490_v11  ;;  %v7382_v31 = vld [vmem:[#allocation11 + $0x1d4] sm:$0xf0] }
  0xf3   : > { %1753 = vmatpush.bf16.msrb.mxu2 %v5567_v26  ;;  %v7391_v56 = vld [vmem:[#allocation11 + $0x224] sm:$0xf]  ;;  %v5516_v57 = vld [vmem:[#allocation11 + $0x230] sm:$0xf0]  ;;  %v5391_v63 = vor.u32 %v7359_v53, %v5388_v55  ;;  %v5619_v26 = vor.u32 %v7418_v15, %v5618_v14  ;;  %v5602_v32 = vld [vmem:[#allocation11 + $0x2c8] sm:$0xf] }
  0xf4   : > { %1767 = vmatpush.bf16.msrb.mxu3 %v5695_v30  ;;  %v7423_v58 = vld [vmem:[#allocation11 + $0x324] sm:$0xf]  ;;  %v5644_v59 = vld [vmem:[#allocation11 + $0x330] sm:$0xf0]  ;;  %v5519_v0 = vor.u32 %v7391_v56, %v5516_v57  ;;  %v5747_v30 = vor.u32 %v7450_v20, %v5746_v19  ;;  %v7414_v33 = vld [vmem:[#allocation11 + $0x2d4] sm:$0xf0] }
  0xf5   : > { %1726 = vmatpush.bf16.msrb.mxu0 %v5295_v36  ;;  %v7323_v61 = vld [vmem:[#allocation11 + $0x4] sm:$0xf]  ;;  %v5244_v62 = vld [vmem:[#allocation11 + $0x10] sm:$0xf0]  ;;  %v5647_v5 = vor.u32 %v7423_v58, %v5644_v59  ;;  %v5730_v34 = vld [vmem:[#allocation11 + $0x3c8] sm:$0xf]  ;;  %v5347_v36 = vor.u32 %v7350_v28, %v5346_v27 }
  0xf6   : > { %1740 = vmatpush.bf16.msrb.mxu1 %v5423_v37  ;;  %v7355_v1 = vld [vmem:[#allocation11 + $0x104] sm:$0xf]  ;;  %v5372_v2 = vld [vmem:[#allocation11 + $0x110] sm:$0xf0]  ;;  %v5247_v12 = vor.u32 %v7323_v61, %v5244_v62  ;;  %v7446_v35 = vld [vmem:[#allocation11 + $0x3d4] sm:$0xf0]  ;;  %v5475_v37 = vor.u32 %v7382_v31, %v5474_v29 }
  0xf7   : > { %1754 = vmatpush.bf16.msrb.mxu2 %v5551_v38  ;;  %v7387_v3 = vld [vmem:[#allocation11 + $0x204] sm:$0xf]  ;;  %v5500_v6 = vld [vmem:[#allocation11 + $0x210] sm:$0xf0]  ;;  %v5375_v17 = vor.u32 %v7355_v1, %v5372_v2  ;;  %v5603_v38 = vor.u32 %v7414_v33, %v5602_v32  ;;  %v5330_v39 = vld [vmem:[#allocation11 + $0xa8] sm:$0xf] }
  0xf8   : > { %1768 = vmatpush.bf16.msrb.mxu3 %v5679_v42  ;;  %v7419_v7 = vld [vmem:[#allocation11 + $0x304] sm:$0xf]  ;;  %v5628_v8 = vld [vmem:[#allocation11 + $0x310] sm:$0xf0]  ;;  %v5503_v18 = vor.u32 %v7387_v3, %v5500_v6  ;;  %v7346_v40 = vld [vmem:[#allocation11 + $0xb4] sm:$0xf0]  ;;  %v5731_v42 = vor.u32 %v7446_v35, %v5730_v34 }
  0xf9   : > { %1727 = vmatpush.bf16.msrb.mxu0 %v5279_v48  ;;  %v5631_v21 = vor.u32 %v7419_v7, %v5628_v8  ;;  %v5458_v41 = vld [vmem:[#allocation11 + $0x1a8] sm:$0xf]  ;;  %v7378_v43 = vld [vmem:[#allocation11 + $0x1b4] sm:$0xf0]  ;;  %v5331_v48 = vor.u32 %v7346_v40, %v5330_v39  ;;  %s5223_s19 = sshll.u32 %s8769_s22, 4  ;;  %s8347_s27 = scalar_lea.hbm %s9241_s8, 32 }
  0xfa   : > { %1741 = vmatpush.bf16.msrb.mxu1 %v5407_v49  ;;  %v5586_v44 = vld [vmem:[#allocation11 + $0x2a8] sm:$0xf]  ;;  %v7410_v45 = vld [vmem:[#allocation11 + $0x2b4] sm:$0xf0]  ;;  %v5459_v49 = vor.u32 %v7378_v43, %v5458_v41  ;;  %s851_s13 = scalar_lea.vmem [#allocation22], %s5223_s19 }
  0xfb   : > { %1755 = vmatpush.bf16.msrb.mxu2 %v5535_v50  ;;  %v5714_v46 = vld [vmem:[#allocation11 + $0x3a8] sm:$0xf]  ;;  %v7442_v47 = vld [vmem:[#allocation11 + $0x3b4] sm:$0xf0]  ;;  %v5587_v50 = vor.u32 %v7410_v45, %v5586_v44  ;;  %s4951_s20 = sshll.u32 %s851_s13, 4  ;;  %s4952_s20 = int_to_ptr.vmem [resolvable:$true] %s4951_s20 }
  0xfc   : > { %1769 = vmatpush.bf16.msrb.mxu3 %v5663_v54  ;;  %v5314_v51 = vld [vmem:[#allocation11 + $0x88] sm:$0xf]  ;;  %v7342_v52 = vld [vmem:[#allocation11 + $0x94] sm:$0xf0]  ;;  %v5715_v54 = vor.u32 %v7442_v47, %v5714_v46 }
  0xfd   : > { %1728 = vmatpush.bf16.msrb.mxu0 %v5263_v60  ;;  %v5442_v53 = vld [vmem:[#allocation11 + $0x188] sm:$0xf]  ;;  %v7374_v55 = vld [vmem:[#allocation11 + $0x194] sm:$0xf0]  ;;  %v5315_v60 = vor.u32 %v7342_v52, %v5314_v51  ;;  %v5492_v52 = vld [vmem:[#allocation11 + $0x1f8] sm:$0xf0] }
  0xfe   : > { %1742 = vmatpush.bf16.msrb.mxu1 %v5391_v63  ;;  %v5570_v56 = vld [vmem:[#allocation11 + $0x288] sm:$0xf]  ;;  %v7406_v57 = vld [vmem:[#allocation11 + $0x294] sm:$0xf0]  ;;  %v5443_v61 = vor.u32 %v7374_v55, %v5442_v53  ;;  %v7416_v53 = vld [vmem:[#allocation11 + $0x2ec] sm:$0xf] }
  0xff   : > { %1756 = vmatpush.bf16.msrb.mxu2 %v5519_v0  ;;  %v5698_v58 = vld [vmem:[#allocation11 + $0x388] sm:$0xf]  ;;  %v7438_v59 = vld [vmem:[#allocation11 + $0x394] sm:$0xf0]  ;;  %v5571_v62 = vor.u32 %v7406_v57, %v5570_v56  ;;  %v7448_v57 = vld [vmem:[#allocation11 + $0x3ec] sm:$0xf] }
 0x100   : > { %1770 = vmatpush.bf16.msrb.mxu3 %v5647_v5  ;;  %v5298_v63 = vld [vmem:[#allocation11 + $0x68] sm:$0xf]  ;;  %v7338_v0 = vld [vmem:[#allocation11 + $0x74] sm:$0xf0]  ;;  %v5699_v2 = vor.u32 %v7438_v59, %v5698_v58  ;;  %v5748_v58 = vld [vmem:[#allocation11 + $0x3f8] sm:$0xf0] }
 0x101   : > { %1729 = vmatpush.bf16.msrb.mxu0 %v5247_v12  ;;  %v5426_v1 = vld [vmem:[#allocation11 + $0x168] sm:$0xf]  ;;  %v7370_v3 = vld [vmem:[#allocation11 + $0x174] sm:$0xf0]  ;;  %v5299_v9 = vor.u32 %v7338_v0, %v5298_v63  ;;  %v7348_v63 = vld [vmem:[#allocation11 + $0xcc] sm:$0xf] }
 0x102   : > { %1743 = vmatpush.bf16.msrb.mxu1 %v5375_v17  ;;  %v5554_v5 = vld [vmem:[#allocation11 + $0x268] sm:$0xf]  ;;  %v7402_v6 = vld [vmem:[#allocation11 + $0x274] sm:$0xf0]  ;;  %v5427_v10 = vor.u32 %v7370_v3, %v5426_v1  ;;  %v5348_v0 = vld [vmem:[#allocation11 + $0xd8] sm:$0xf0] }
 0x103   : > { %1757 = vmatpush.bf16.msrb.mxu2 %v5503_v18  ;;  %v5682_v7 = vld [vmem:[#allocation11 + $0x368] sm:$0xf]  ;;  %v7434_v8 = vld [vmem:[#allocation11 + $0x374] sm:$0xf0]  ;;  %v5555_v11 = vor.u32 %v7402_v6, %v5554_v5  ;;  %v7380_v1 = vld [vmem:[#allocation11 + $0x1cc] sm:$0xf] }
 0x104   : > { %1771 = vmatpush.bf16.msrb.mxu3 %v5631_v21  ;;  %1730 = vmatmul.bf16.vlgmr.msrb.gmra.mxu0 %v8825_v22  ;;  %v5282_v12 = vld [vmem:[#allocation11 + $0x48] sm:$0xf]  ;;  %v7334_v13 = vld [vmem:[#allocation11 + $0x54] sm:$0xf0]  ;;  %v5683_v15 = vor.u32 %v7434_v8, %v5682_v7  ;;  %v5476_v3 = vld [vmem:[#allocation11 + $0x1d8] sm:$0xf0] }
 0x105   : > { %1778 = vmatpush.bf16.msra.mxu0 %v5363_v24  ;;  %1744 = vmatmul.bf16.vlgmr.msrb.gmra.mxu1 %v8827_v23  ;;  %v5410_v14 = vld [vmem:[#allocation11 + $0x148] sm:$0xf]  ;;  %v7366_v17 = vld [vmem:[#allocation11 + $0x154] sm:$0xf0]  ;;  %v5283_v24 = vor.u32 %v7334_v13, %v5282_v12  ;;  %v7412_v5 = vld [vmem:[#allocation11 + $0x2cc] sm:$0xf] }
 0x106   : > { %1792 = vmatpush.bf16.msra.mxu1 %v5491_v25  ;;  %1758 = vmatmul.bf16.vlgmr.msrb.gmra.mxu2 %v8814_v4  ;;  %v5538_v18 = vld [vmem:[#allocation11 + $0x248] sm:$0xf]  ;;  %v7398_v19 = vld [vmem:[#allocation11 + $0x254] sm:$0xf0]  ;;  %v5411_v25 = vor.u32 %v7366_v17, %v5410_v14  ;;  %v5604_v6 = vld [vmem:[#allocation11 + $0x2d8] sm:$0xf0] }
 0x107   : > { %1806 = vmatpush.bf16.msra.mxu2 %v5619_v26  ;;  %1772 = vmatmul.bf16.vlgmr.msrb.gmra.mxu3 %v8820_v16  ;;  %v5666_v20 = vld [vmem:[#allocation11 + $0x348] sm:$0xf]  ;;  %v7430_v21 = vld [vmem:[#allocation11 + $0x354] sm:$0xf0]  ;;  %v5539_v26 = vor.u32 %v7398_v19, %v5538_v18  ;;  %v7444_v7 = vld [vmem:[#allocation11 + $0x3cc] sm:$0xf] }
 0x108   : > { %1820 = vmatpush.bf16.msra.mxu3 %v5747_v30  ;;  %v5266_v27 = vld [vmem:[#allocation11 + $0x28] sm:$0xf]  ;;  %v7330_v28 = vld [vmem:[#allocation11 + $0x34] sm:$0xf0]  ;;  %v5667_v30 = vor.u32 %v7430_v21, %v5666_v20  ;;  %v5732_v8 = vld [vmem:[#allocation11 + $0x3d8] sm:$0xf0] }
 0x109   : > { %1779 = vmatpush.bf16.msra.mxu0 %v5347_v36  ;;  %v5394_v29 = vld [vmem:[#allocation11 + $0x128] sm:$0xf]  ;;  %v7362_v31 = vld [vmem:[#allocation11 + $0x134] sm:$0xf0]  ;;  %v5267_v36 = vor.u32 %v7330_v28, %v5266_v27  ;;  %v7344_v12 = vld [vmem:[#allocation11 + $0xac] sm:$0xf] }
 0x10a   : > { %1793 = vmatpush.bf16.msra.mxu1 %v5475_v37  ;;  %v5522_v32 = vld [vmem:[#allocation11 + $0x228] sm:$0xf]  ;;  %v7394_v33 = vld [vmem:[#allocation11 + $0x234] sm:$0xf0]  ;;  %v5395_v39 = vor.u32 %v7362_v31, %v5394_v29  ;;  %v5332_v13 = vld [vmem:[#allocation11 + $0xb8] sm:$0xf0] }
 0x10b   : > { %1807 = vmatpush.bf16.msra.mxu2 %v5603_v38  ;;  %v5650_v34 = vld [vmem:[#allocation11 + $0x328] sm:$0xf]  ;;  %v7426_v35 = vld [vmem:[#allocation11 + $0x334] sm:$0xf0]  ;;  %v5523_v40 = vor.u32 %v7394_v33, %v5522_v32  ;;  %v7376_v14 = vld [vmem:[#allocation11 + $0x1ac] sm:$0xf] }
 0x10c   : > { %1821 = vmatpush.bf16.msra.mxu3 %v5731_v42  ;;  %v5250_v37 = vld [vmem:[#allocation11 + $0x8] sm:$0xf]  ;;  %v7326_v38 = vld [vmem:[#allocation11 + $0x14] sm:$0xf0]  ;;  %v5651_v44 = vor.u32 %v7426_v35, %v5650_v34  ;;  %v5460_v17 = vld [vmem:[#allocation11 + $0x1b8] sm:$0xf0] }
 0x10d   : > { %1780 = vmatpush.bf16.msra.mxu0 %v5331_v48  ;;  %v5378_v41 = vld [vmem:[#allocation11 + $0x108] sm:$0xf]  ;;  %v7358_v42 = vld [vmem:[#allocation11 + $0x114] sm:$0xf0]  ;;  %v7352_v48 = vld [vmem:[#allocation11 + $0xec] sm:$0xf]  ;;  %v5251_v51 = vor.u32 %v7326_v38, %v5250_v37 }
 0x10e   : > { %1794 = vmatpush.bf16.msra.mxu1 %v5459_v49  ;;  %v5506_v43 = vld [vmem:[#allocation11 + $0x208] sm:$0xf]  ;;  %v7390_v45 = vld [vmem:[#allocation11 + $0x214] sm:$0xf0]  ;;  %v5364_v49 = vld [vmem:[#allocation11 + $0xf8] sm:$0xf0]  ;;  %v5379_v55 = vor.u32 %v7358_v42, %v5378_v41 }
 0x10f   : > { %1808 = vmatpush.bf16.msra.mxu2 %v5587_v50  ;;  %v5634_v46 = vld [vmem:[#allocation11 + $0x308] sm:$0xf]  ;;  %v7422_v47 = vld [vmem:[#allocation11 + $0x314] sm:$0xf0]  ;;  %v7384_v50 = vld [vmem:[#allocation11 + $0x1ec] sm:$0xf]  ;;  %v5507_v56 = vor.u32 %v7390_v45, %v5506_v43 }
 0x110   : > { %1822 = vmatpush.bf16.msra.mxu3 %v5715_v54  ;;  %v5620_v54 = vld [vmem:[#allocation11 + $0x2f8] sm:$0xf0]  ;;  %v5635_v59 = vor.u32 %v7422_v47, %v5634_v46  ;;  %v7408_v18 = vld [vmem:[#allocation11 + $0x2ac] sm:$0xf] }
 0x111   : > { %1781 = vmatpush.bf16.msra.mxu0 %v5315_v60  ;;  %v5367_v60 = vor.u32 %v7352_v48, %v5364_v49  ;;  %v5588_v19 = vld [vmem:[#allocation11 + $0x2b8] sm:$0xf0]  ;;  %v7440_v20 = vld [vmem:[#allocation11 + $0x3ac] sm:$0xf] }
 0x112   : > { %1795 = vmatpush.bf16.msra.mxu1 %v5443_v61  ;;  %v5495_v61 = vor.u32 %v7384_v50, %v5492_v52  ;;  %v5716_v21 = vld [vmem:[#allocation11 + $0x3b8] sm:$0xf0]  ;;  %v7340_v27 = vld [vmem:[#allocation11 + $0x8c] sm:$0xf] }
 0x113   : > { %1809 = vmatpush.bf16.msra.mxu2 %v5571_v62  ;;  %v5623_v62 = vor.u32 %v7416_v53, %v5620_v54  ;;  %v5316_v28 = vld [vmem:[#allocation11 + $0x98] sm:$0xf0]  ;;  %v7372_v29 = vld [vmem:[#allocation11 + $0x18c] sm:$0xf] }
 0x114   : > { %1823 = vmatpush.bf16.msra.mxu3 %v5699_v2  ;;  %v5751_v2 = vor.u32 %v7448_v57, %v5748_v58  ;;  %v5444_v31 = vld [vmem:[#allocation11 + $0x198] sm:$0xf0]  ;;  %v7404_v32 = vld [vmem:[#allocation11 + $0x28c] sm:$0xf] }
 0x115   : > { %1782 = vmatpush.bf16.msra.mxu0 %v5299_v9  ;;  %v5351_v9 = vor.u32 %v7348_v63, %v5348_v0  ;;  %v5572_v33 = vld [vmem:[#allocation11 + $0x298] sm:$0xf0]  ;;  %v7436_v34 = vld [vmem:[#allocation11 + $0x38c] sm:$0xf]  ;;  %v5447_v37 = vor.u32 %v7372_v29, %v5444_v31  ;;  %v5954_v29 = vld [vmem:[#allocation13 + $0x170] sm:$0xf] }
 0x116   : > { %1796 = vmatpush.bf16.msra.mxu1 %v5427_v10  ;;  %v5479_v10 = vor.u32 %v7380_v1, %v5476_v3  ;;  %v5700_v35 = vld [vmem:[#allocation11 + $0x398] sm:$0xf0]  ;;  %v5575_v38 = vor.u32 %v7404_v32, %v5572_v33  ;;  %v7368_v41 = vld [vmem:[#allocation11 + $0x16c] sm:$0xf]  ;;  %v6018_v33 = vld [vmem:[#allocation13 + $0x1f0] sm:$0xf] }
 0x117   : > { %1810 = vmatpush.bf16.msra.mxu2 %v5555_v11  ;;  %v5607_v11 = vor.u32 %v7412_v5, %v5604_v6  ;;  %v5703_v42 = vor.u32 %v7436_v34, %v5700_v35  ;;  %v5428_v43 = vld [vmem:[#allocation11 + $0x178] sm:$0xf0]  ;;  %v7432_v46 = vld [vmem:[#allocation11 + $0x36c] sm:$0xf]  ;;  %v7514_v34 = vld [vmem:[#allocation13 + $0x1f4] sm:$0xf0] }
 0x118   : > { %1824 = vmatpush.bf16.msra.mxu3 %v5683_v15  ;;  %v5735_v15 = vor.u32 %v7444_v7, %v5732_v8  ;;  %v5556_v45 = vld [vmem:[#allocation11 + $0x278] sm:$0xf0]  ;;  %v5431_v49 = vor.u32 %v7368_v41, %v5428_v43  ;;  %v7364_v53 = vld [vmem:[#allocation11 + $0x14c] sm:$0xf]  ;;  %v5882_v41 = vld [vmem:[#allocation13 + $0xe0] sm:$0xf] }
 0x119   : > { %1783 = vmatpush.bf16.msra.mxu0 %v5283_v24  ;;  %v5335_v24 = vor.u32 %v7344_v12, %v5332_v13  ;;  %v5684_v47 = vld [vmem:[#allocation11 + $0x378] sm:$0xf0]  ;;  %v7428_v58 = vld [vmem:[#allocation11 + $0x34c] sm:$0xf]  ;;  %v7480_v43 = vld [vmem:[#allocation13 + $0xe4] sm:$0xf0] }
 0x11a   : > { %1797 = vmatpush.bf16.msra.mxu1 %v5411_v25  ;;  %v5463_v25 = vor.u32 %v7376_v14, %v5460_v17  ;;  %v5284_v52 = vld [vmem:[#allocation11 + $0x58] sm:$0xf0]  ;;  %v5687_v54 = vor.u32 %v7432_v46, %v5684_v47  ;;  %v7328_v63 = vld [vmem:[#allocation11 + $0x2c] sm:$0xf]  ;;  %v6010_v46 = vld [vmem:[#allocation13 + $0x1e0] sm:$0xf] }
 0x11b   : > { %1811 = vmatpush.bf16.msra.mxu2 %v5539_v26  ;;  %v5591_v26 = vor.u32 %v7408_v18, %v5588_v19  ;;  %v5540_v57 = vld [vmem:[#allocation11 + $0x258] sm:$0xf0]  ;;  %v7360_v1 = vld [vmem:[#allocation11 + $0x12c] sm:$0xf]  ;;  %v7512_v47 = vld [vmem:[#allocation13 + $0x1e4] sm:$0xf0] }
 0x11c   : > { %1825 = vmatpush.bf16.msra.mxu3 %v5667_v30  ;;  %v5719_v30 = vor.u32 %v7440_v20, %v5716_v21  ;;  %v5268_v0 = vld [vmem:[#allocation11 + $0x38] sm:$0xf0]  ;;  %v7392_v5 = vld [vmem:[#allocation11 + $0x22c] sm:$0xf] }
 0x11d   : > { %1784 = vmatpush.bf16.msra.mxu0 %v5267_v36  ;;  %v5319_v36 = vor.u32 %v7340_v27, %v5316_v28  ;;  %v5396_v3 = vld [vmem:[#allocation11 + $0x138] sm:$0xf0]  ;;  %v7424_v7 = vld [vmem:[#allocation11 + $0x32c] sm:$0xf]  ;;  %v7482_v28 = vld [vmem:[#allocation13 + $0xf4] sm:$0xf0] }
 0x11e   : > { %1798 = vmatpush.bf16.msra.mxu1 %v5395_v39  ;;  %v7336_v39 = vld [vmem:[#allocation11 + $0x6c] sm:$0xf]  ;;  %v5524_v6 = vld [vmem:[#allocation11 + $0x238] sm:$0xf0]  ;;  %v5399_v12 = vor.u32 %v7360_v1, %v5396_v3  ;;  %v5866_v1 = vld [vmem:[#allocation13 + $0xc0] sm:$0xf] }
 0x11f   : > { %1812 = vmatpush.bf16.msra.mxu2 %v5523_v40  ;;  %v5300_v40 = vld [vmem:[#allocation11 + $0x78] sm:$0xf0]  ;;  %v5527_v13 = vor.u32 %v7392_v5, %v5524_v6  ;;  %v7356_v14 = vld [vmem:[#allocation11 + $0x10c] sm:$0xf]  ;;  %v5930_v3 = vld [vmem:[#allocation13 + $0x140] sm:$0xf] }
 0x120   : > { %1826 = vmatpush.bf16.msra.mxu3 %v5651_v44  ;;  %v7400_v44 = vld [vmem:[#allocation11 + $0x26c] sm:$0xf]  ;;  %v5303_v48 = vor.u32 %v7336_v39, %v5300_v40  ;;  %v5652_v8 = vld [vmem:[#allocation11 + $0x338] sm:$0xf0]  ;;  %v5818_v39 = vld [vmem:[#allocation13 + $0x60] sm:$0xf] }
 0x121   : > { %1785 = vmatpush.bf16.msra.mxu0 %v5251_v51  ;;  %v5559_v50 = vor.u32 %v7400_v44, %v5556_v45  ;;  %v7332_v51 = vld [vmem:[#allocation11 + $0x4c] sm:$0xf]  ;;  %v5655_v18 = vor.u32 %v7424_v7, %v5652_v8  ;;  %v5508_v19 = vld [vmem:[#allocation11 + $0x218] sm:$0xf0]  ;;  %v7464_v40 = vld [vmem:[#allocation13 + $0x64] sm:$0xf0] }
 0x122   : > { %1799 = vmatpush.bf16.msra.mxu1 %v5379_v55  ;;  %v5412_v55 = vld [vmem:[#allocation11 + $0x158] sm:$0xf0]  ;;  %v7388_v17 = vld [vmem:[#allocation11 + $0x20c] sm:$0xf]  ;;  %v5946_v44 = vld [vmem:[#allocation13 + $0x160] sm:$0xf] }
 0x123   : > { %1813 = vmatpush.bf16.msra.mxu2 %v5507_v56  ;;  %v7396_v56 = vld [vmem:[#allocation11 + $0x24c] sm:$0xf]  ;;  %v5636_v21 = vld [vmem:[#allocation11 + $0x318] sm:$0xf0]  ;;  %v5511_v32 = vor.u32 %v7388_v17, %v5508_v19  ;;  %v7496_v45 = vld [vmem:[#allocation13 + $0x164] sm:$0xf0] }
 0x124   : > { %1827 = vmatpush.bf16.msra.mxu3 %v5635_v59  ;;  %1786 = vmatmul.bf16.vlgmr.msra.gmra.mxu0 %v8825_v22  ;;  %v5668_v59 = vld [vmem:[#allocation11 + $0x358] sm:$0xf0]  ;;  %v7420_v20 = vld [vmem:[#allocation11 + $0x30c] sm:$0xf]  ;;  %v7492_v5 = vld [vmem:[#allocation13 + $0x144] sm:$0xf0] }
 0x125   : > { %1834 = vmatpush.bf16.msrb.mxu0 %v5367_v60  ;;  %1800 = vmatmul.bf16.vlgmr.msra.gmra.mxu1 %v8827_v23  ;;  %v5287_v60 = vor.u32 %v7332_v51, %v5284_v52  ;;  %v5639_v35 = vor.u32 %v7420_v20, %v5636_v21  ;;  %v5810_v51 = vld [vmem:[#allocation13 + $0x50] sm:$0xf]  ;;  %v7462_v52 = vld [vmem:[#allocation13 + $0x54] sm:$0xf0]  ;;  %v5994_v6 = vld [vmem:[#allocation13 + $0x1c0] sm:$0xf] }
 0x126   : > { %1848 = vmatpush.bf16.msrb.mxu1 %v5495_v61  ;;  %1814 = vmatmul.bf16.vlgmr.msra.gmra.mxu2 %v8814_v4  ;;  %v5415_v61 = vor.u32 %v7364_v53, %v5412_v55  ;;  %v5874_v53 = vld [vmem:[#allocation13 + $0xd0] sm:$0xf]  ;;  %v7478_v55 = vld [vmem:[#allocation13 + $0xd4] sm:$0xf0]  ;;  %v5786_v21 = vld [vmem:[#allocation13 + $0x20] sm:$0xf] }
 0x127   : > { %1862 = vmatpush.bf16.msrb.mxu2 %v5623_v62  ;;  %1828 = vmatmul.bf16.vlgmr.msra.gmra.mxu3 %v8820_v16  ;;  %v5543_v62 = vor.u32 %v7396_v56, %v5540_v57  ;;  %v5938_v56 = vld [vmem:[#allocation13 + $0x150] sm:$0xf]  ;;  %v7494_v57 = vld [vmem:[#allocation13 + $0x154] sm:$0xf0] }
 0x128   : > { %1876 = vmatpush.bf16.msrb.mxu3 %v5751_v2  ;;  %v5671_v2 = vor.u32 %v7428_v58, %v5668_v59  ;;  %v6002_v58 = vld [vmem:[#allocation13 + $0x1d0] sm:$0xf]  ;;  %v7510_v59 = vld [vmem:[#allocation13 + $0x1d4] sm:$0xf0] }
 0x129   : > { %1835 = vmatpush.bf16.msrb.mxu0 %v5351_v9  ;;  %v5271_v9 = vor.u32 %v7328_v63, %v5268_v0  ;;  %v5802_v63 = vld [vmem:[#allocation13 + $0x40] sm:$0xf]  ;;  %v7460_v0 = vld [vmem:[#allocation13 + $0x44] sm:$0xf0]  ;;  %v5794_v8 = vld [vmem:[#allocation13 + $0x30] sm:$0xf] }
 0x12a   : > { %1849 = vmatpush.bf16.msrb.mxu1 %v5479_v10  ;;  %v7324_v10 = vld [vmem:[#allocation11 + $0xc] sm:$0xf]  ;;  %v7506_v17 = vld [vmem:[#allocation13 + $0x1b4] sm:$0xf0] }
 0x12b   : > { %1863 = vmatpush.bf16.msrb.mxu2 %v5607_v11  ;;  %v5252_v11 = vld [vmem:[#allocation11 + $0x18] sm:$0xf0] }
 0x12c   : > { %1877 = vmatpush.bf16.msrb.mxu3 %v5735_v15  ;;  %v5380_v15 = vld [vmem:[#allocation11 + $0x118] sm:$0xf0]  ;;  %v5255_v27 = vor.u32 %v7324_v10, %v5252_v11  ;;  %v5858_v10 = vld [vmem:[#allocation13 + $0xb0] sm:$0xf] }
 0x12d   : > { %1836 = vmatpush.bf16.msrb.mxu0 %v5335_v24  ;;  %v5826_v24 = vld [vmem:[#allocation13 + $0x70] sm:$0xf]  ;;  %v5383_v31 = vor.u32 %v7356_v14, %v5380_v15  ;;  %v7490_v14 = vld [vmem:[#allocation13 + $0x134] sm:$0xf0] }
 0x12e   : > { %1850 = vmatpush.bf16.msrb.mxu1 %v5463_v25  ;;  %v7466_v25 = vld [vmem:[#allocation13 + $0x74] sm:$0xf0]  ;;  %v5986_v15 = vld [vmem:[#allocation13 + $0x1b0] sm:$0xf] }
 0x12f   : > { %1864 = vmatpush.bf16.msrb.mxu2 %v5591_v26  ;;  %v5890_v26 = vld [vmem:[#allocation13 + $0xf0] sm:$0xf] }
 0x130   : > { %1878 = vmatpush.bf16.msrb.mxu3 %v5719_v30  ;;  %v7498_v30 = vld [vmem:[#allocation13 + $0x174] sm:$0xf0] }
 0x131   : > { %1837 = vmatpush.bf16.msrb.mxu0 %v5319_v36  ;;  %v5827_v36 = vor.u32 %v7466_v25, %v5826_v24  ;;  %v7456_v24 = vld [vmem:[#allocation13 + $0x24] sm:$0xf0]  ;;  %v5850_v25 = vld [vmem:[#allocation13 + $0xa0] sm:$0xf] }
 0x132   : > { %1851 = vmatpush.bf16.msrb.mxu1 %v5447_v37  ;;  %v5891_v37 = vor.u32 %v7482_v28, %v5890_v26  ;;  %v5987_v26 = vor.u32 %v7506_v17, %v5986_v15  ;;  %v5914_v28 = vld [vmem:[#allocation13 + $0x120] sm:$0xf] }
 0x133   : > { %1865 = vmatpush.bf16.msrb.mxu2 %v5575_v38  ;;  %v5955_v38 = vor.u32 %v7498_v30, %v5954_v29  ;;  %v7488_v29 = vld [vmem:[#allocation13 + $0x124] sm:$0xf0]  ;;  %v5978_v30 = vld [vmem:[#allocation13 + $0x1a0] sm:$0xf] }
 0x134   : > { %1879 = vmatpush.bf16.msrb.mxu3 %v5703_v42  ;;  %v6019_v42 = vor.u32 %v7514_v34, %v6018_v33  ;;  %v5778_v33 = vld [vmem:[#allocation13 + $0x10] sm:$0xf] }
 0x135   : > { %1838 = vmatpush.bf16.msrb.mxu0 %v5303_v48  ;;  %v5819_v48 = vor.u32 %v7464_v40, %v5818_v39  ;;  %v5906_v40 = vld [vmem:[#allocation13 + $0x110] sm:$0xf] }
 0x136   : > { %1852 = vmatpush.bf16.msrb.mxu1 %v5431_v49  ;;  %v5883_v49 = vor.u32 %v7480_v43, %v5882_v41  ;;  %v7486_v41 = vld [vmem:[#allocation13 + $0x114] sm:$0xf0] }
 0x137   : > { %1866 = vmatpush.bf16.msrb.mxu2 %v5559_v50  ;;  %v5947_v50 = vor.u32 %v7496_v45, %v5946_v44  ;;  %v7502_v43 = vld [vmem:[#allocation13 + $0x194] sm:$0xf0]  ;;  %v5770_v44 = vld [vmem:[#allocation13] sm:$0xf]  ;;  %v7452_v45 = vld [vmem:[#allocation13 + $0x4] sm:$0xf0] }
 0x138   : > { %1880 = vmatpush.bf16.msrb.mxu3 %v5687_v54  ;;  %v6011_v54 = vor.u32 %v7512_v47, %v6010_v46  ;;  %v5834_v47 = vld [vmem:[#allocation13 + $0x80] sm:$0xf] }
 0x139   : > { %1839 = vmatpush.bf16.msrb.mxu0 %v5287_v60  ;;  %v5811_v60 = vor.u32 %v7462_v52, %v5810_v51  ;;  %v5907_v52 = vor.u32 %v7486_v41, %v5906_v40 }
 0x13a   : > { %1853 = vmatpush.bf16.msrb.mxu1 %v5415_v61  ;;  %v5875_v61 = vor.u32 %v7478_v55, %v5874_v53  ;;  %v5962_v53 = vld [vmem:[#allocation13 + $0x180] sm:$0xf]  ;;  %v7465_v55 = vld [vmem:[#allocation13 + $0x74] sm:$0xf] }
 0x13b   : > { %1867 = vmatpush.bf16.msrb.mxu2 %v5543_v62  ;;  %v5939_v62 = vor.u32 %v7494_v57, %v5938_v56  ;;  %v5828_v57 = vld [vmem:[#allocation13 + $0x78] sm:$0xf0] }
 0x13c   : > { %1881 = vmatpush.bf16.msrb.mxu3 %v5671_v2  ;;  %v6003_v2 = vor.u32 %v7510_v59, %v6002_v58  ;;  %v7481_v58 = vld [vmem:[#allocation13 + $0xf4] sm:$0xf]  ;;  %v5892_v59 = vld [vmem:[#allocation13 + $0xf8] sm:$0xf0] }
 0x13d   : > { %1840 = vmatpush.bf16.msrb.mxu0 %v5271_v9  ;;  %v7458_v9 = vld [vmem:[#allocation13 + $0x34] sm:$0xf0] }
 0x13e   : > { %1854 = vmatpush.bf16.msrb.mxu1 %v5399_v12  ;;  %v7474_v12 = vld [vmem:[#allocation13 + $0xb4] sm:$0xf0] }
 0x13f   : > { %1868 = vmatpush.bf16.msrb.mxu2 %v5527_v13  ;;  %v5922_v13 = vld [vmem:[#allocation13 + $0x130] sm:$0xf]  ;;  %v5859_v19 = vor.u32 %v7474_v12, %v5858_v10  ;;  %v5895_v10 = vor.u32 %v7481_v58, %v5892_v59  ;;  %v7479_v12 = vld [vmem:[#allocation13 + $0xe4] sm:$0xf]  ;;  %v5860_v59 = vld [vmem:[#allocation13 + $0xb8] sm:$0xf0] }
 0x140   : > { %1882 = vmatpush.bf16.msrb.mxu3 %v5655_v18  ;;  %v5795_v18 = vor.u32 %v7458_v9, %v5794_v8  ;;  %v5923_v20 = vor.u32 %v7490_v14, %v5922_v13  ;;  %v5754_v8 = vld [vmem:[%s8794_s25] sm:$0xf]  ;;  %v7321_v9 = vld [vmem:[%s8794_s25 + $0xc] sm:$0xf0]  ;;  %v7319_v13 = vld [vmem:[%s8794_s25 + $0x4] sm:$0xf] }
 0x141   : > { %1841 = vmatpush.bf16.msrb.mxu0 %v5255_v27  ;;  %v7472_v27 = vld [vmem:[#allocation13 + $0xa4] sm:$0xf0]  ;;  %v5756_v14 = vld [vmem:[%s8794_s25 + $0x10] sm:$0xf0] }
 0x142   : > { %1855 = vmatpush.bf16.msrb.mxu1 %v5383_v31  ;;  %v7504_v31 = vld [vmem:[#allocation13 + $0x1a4] sm:$0xf0]  ;;  %v5851_v34 = vor.u32 %v7472_v27, %v5850_v25  ;;  %v6012_v25 = vld [vmem:[#allocation13 + $0x1e8] sm:$0xf0] }
 0x143   : > { %1869 = vmatpush.bf16.msrb.mxu2 %v5511_v32  ;;  %v5787_v32 = vor.u32 %v7456_v24, %v5786_v21  ;;  %v5979_v39 = vor.u32 %v7504_v31, %v5978_v30  ;;  %v7511_v24 = vld [vmem:[#allocation13 + $0x1e4] sm:$0xf]  ;;  %v7461_v31 = vld [vmem:[#allocation13 + $0x54] sm:$0xf] }
 0x144   : > { %1883 = vmatpush.bf16.msrb.mxu3 %v5639_v35  ;;  %1842 = vmatmul.bf16.vlgmr.msrb.gmra.mxu0 %v8825_v22  ;;  %v5803_v22 = vor.u32 %v7460_v0, %v5802_v63  ;;  %v5915_v35 = vor.u32 %v7488_v29, %v5914_v28  ;;  %v5771_v63 = vor.u32 %v7452_v45, %v5770_v44  ;;  %v6020_v0 = vld [vmem:[#allocation13 + $0x1f8] sm:$0xf0]  ;;  %v5804_v44 = vld [vmem:[#allocation13 + $0x48] sm:$0xf0]  ;;  %v7475_v45 = vld [vmem:[#allocation13 + $0xc4] sm:$0xf] }
 0x145   : > { %2294 = vmatpush.bf16.msra.mxu0 %v5827_v36  ;;  %1856 = vmatmul.bf16.vlgmr.msrb.gmra.mxu1 %v8827_v23  ;;  %v5931_v23 = vor.u32 %v7492_v5, %v5930_v3  ;;  %v7454_v36 = vld [vmem:[#allocation13 + $0x14] sm:$0xf0]  ;;  %v7320_v5 = vld [vmem:[%s8794_s25 + $0xc] sm:$0xf]  ;;  %v8858_v28 = vor.u32 %v7319_v13, %v5756_v14  ;;  %v7453_v14 = vld [vmem:[#allocation13 + $0x14] sm:$0xf] }
 0x146   : > { %2308 = vmatpush.bf16.msra.mxu1 %v5891_v37  ;;  %1870 = vmatmul.bf16.vlgmr.msrb.gmra.mxu2 %v8814_v4  ;;  %v7476_v4 = vld [vmem:[#allocation13 + $0xc4] sm:$0xf0]  ;;  %v5842_v37 = vld [vmem:[#allocation13 + $0x90] sm:$0xf]  ;;  %v5779_v46 = vor.u32 %v7454_v36, %v5778_v33  ;;  %v7477_v33 = vld [vmem:[#allocation13 + $0xd4] sm:$0xf] }
 0x147   : > { %2322 = vmatpush.bf16.msra.mxu2 %v5955_v38  ;;  %1884 = vmatmul.bf16.vlgmr.msrb.gmra.mxu3 %v8820_v16  ;;  %v7508_v16 = vld [vmem:[#allocation13 + $0x1c4] sm:$0xf0]  ;;  %v5867_v7 = vor.u32 %v7476_v4, %v5866_v1  ;;  %v7470_v38 = vld [vmem:[#allocation13 + $0x94] sm:$0xf0]  ;;  %v7493_v36 = vld [vmem:[#allocation13 + $0x154] sm:$0xf] }
 0x148   : > { %2336 = vmatpush.bf16.msra.mxu3 %v6019_v42  ;;  %v5995_v11 = vor.u32 %v7508_v16, %v5994_v6  ;;  %v5970_v42 = vld [vmem:[#allocation13 + $0x190] sm:$0xf]  ;;  %v5843_v51 = vor.u32 %v7470_v38, %v5842_v37  ;;  %v5762_v1 = vld [vmem:[%s8794_s25 + $0x8] sm:$0xf]  ;;  %v5764_v6 = vld [vmem:[%s8794_s25 + $0x18] sm:$0xf0] }
 0x149   : > { %2295 = vmatpush.bf16.msra.mxu0 %v5819_v48  ;;  %v7468_v48 = vld [vmem:[#allocation13 + $0x84] sm:$0xf0]  ;;  %v5971_v56 = vor.u32 %v7502_v43, %v5970_v42  ;;  %v7463_v16 = vld [vmem:[#allocation13 + $0x64] sm:$0xf]  ;;  %v8854_v21 = vor.u32 %v7320_v5, %v5764_v6  ;;  %v5940_v37 = vld [vmem:[#allocation13 + $0x158] sm:$0xf0] }
 0x14a   : > { %2309 = vmatpush.bf16.msra.mxu1 %v5883_v49  ;;  %v5898_v49 = vld [vmem:[#allocation13 + $0x100] sm:$0xf]  ;;  %v5835_v4 = vor.u32 %v7468_v48, %v5834_v47  ;;  %v7509_v38 = vld [vmem:[#allocation13 + $0x1d4] sm:$0xf]  ;;  %v5943_v42 = vor.u32 %v7493_v36, %v5940_v37  ;;  %v7459_v43 = vld [vmem:[#allocation13 + $0x44] sm:$0xf] }
 0x14b   : > { %2323 = vmatpush.bf16.msra.mxu2 %v5947_v50  ;;  %v7484_v50 = vld [vmem:[#allocation13 + $0x104] sm:$0xf0]  ;;  %v5868_v47 = vld [vmem:[#allocation13 + $0xc8] sm:$0xf0]  ;;  %v7491_v48 = vld [vmem:[#allocation13 + $0x144] sm:$0xf] }
 0x14c   : > { %2337 = vmatpush.bf16.msra.mxu3 %v6011_v54  ;;  %v7500_v54 = vld [vmem:[#allocation13 + $0x184] sm:$0xf0]  ;;  %v5899_v3 = vor.u32 %v7484_v50, %v5898_v49  ;;  %v5932_v49 = vld [vmem:[#allocation13 + $0x148] sm:$0xf0]  ;;  %v7507_v50 = vld [vmem:[#allocation13 + $0x1c4] sm:$0xf] }
 0x14d   : > { %2296 = vmatpush.bf16.msra.mxu0 %v5811_v60  ;;  %v7497_v60 = vld [vmem:[#allocation13 + $0x174] sm:$0xf]  ;;  %v7471_v5 = vld [vmem:[#allocation13 + $0xa4] sm:$0xf] }
 0x14e   : > { %2310 = vmatpush.bf16.msra.mxu1 %v5875_v61  ;;  %v5956_v61 = vld [vmem:[#allocation13 + $0x178] sm:$0xf0] }
 0x14f   : > { %2324 = vmatpush.bf16.msra.mxu2 %v5939_v62  ;;  %v7513_v62 = vld [vmem:[#allocation13 + $0x1f4] sm:$0xf] }
 0x150   : > { %2338 = vmatpush.bf16.msra.mxu3 %v6003_v2  ;;  %v7322_v2 = vld [vmem:[%s8794_s25 + $0x14] sm:$0xf0]  ;;  %v6023_v15 = vor.u32 %v7513_v62, %v6020_v0  ;;  %v7505_v62 = vld [vmem:[#allocation13 + $0x1b4] sm:$0xf]  ;;  %s4950_s25 = scalar_lea.hbm %s9241_s8, %s7819_s12 }
 0x151   : > { %2297 = vmatpush.bf16.msra.mxu0 %v5803_v22  ;;  %v5963_v22 = vor.u32 %v7500_v54, %v5962_v53  ;;  %v8852_v17 = vor.u32 %v7322_v2, %v5762_v1  ;;  %v5871_v53 = vor.u32 %v7475_v45, %v5868_v47  ;;  %v5935_v54 = vor.u32 %v7491_v48, %v5932_v49  ;;  %v7499_v45 = vld [vmem:[#allocation13 + $0x184] sm:$0xf]  ;;  %v6098_v47 = vld [vmem:[#allocation14 + $0x70] sm:$0xf]  ;;  %v7530_v48 = vld [vmem:[#allocation14 + $0x74] sm:$0xf0] }
 0x152   : > { %2311 = vmatpush.bf16.msra.mxu1 %v5867_v7  ;;  %v5831_v7 = vor.u32 %v7465_v55, %v5828_v57  ;;  %v7457_v55 = vld [vmem:[#allocation13 + $0x34] sm:$0xf]  ;;  %v6162_v49 = vld [vmem:[#allocation14 + $0xf0] sm:$0xf]  ;;  %s4953_s30 = sshll.u32 %s4950_s25, 4  ;;  %s4954_s30 = int_to_ptr.hbm [resolvable:$true] %s4953_s30 }
 0x153   : > { %2325 = vmatpush.bf16.msra.mxu2 %v5931_v23  ;;  %v5820_v23 = vld [vmem:[#allocation13 + $0x68] sm:$0xf0]  ;;  %v7473_v57 = vld [vmem:[#allocation13 + $0xb4] sm:$0xf]  ;;  %s8341_s17 = sshra.s32 %s4954_s30, 4  ;;  %s8342_s17 = int_to_ptr.hbm [resolvable:$true] %s8341_s17 }
 0x154   : > { %2339 = vmatpush.bf16.msra.mxu3 %v5995_v11  ;;  %v5959_v11 = vor.u32 %v7497_v60, %v5956_v61  ;;  %v5823_v27 = vor.u32 %v7463_v16, %v5820_v23  ;;  %v7489_v60 = vld [vmem:[#allocation13 + $0x134] sm:$0xf]  ;;  %v5924_v61 = vld [vmem:[#allocation13 + $0x138] sm:$0xf0]  ;;  %v5863_v1 = vor.u32 %v7473_v57, %v5860_v59  ;;  %v5852_v16 = vld [vmem:[#allocation13 + $0xa8] sm:$0xf0]  ;;  %v6099_v59 = vor.u32 %v7530_v48, %v6098_v47  ;;  %p8348_p11 = scmp.lt.s32.totalorder %s8342_s17, %s9241_s8 }
 0x155   : > { %2298 = vmatpush.bf16.msra.mxu0 %v5795_v18  ;;  %v5884_v18 = vld [vmem:[#allocation13 + $0xe8] sm:$0xf0]  ;;  %v5927_v2 = vor.u32 %v7489_v60, %v5924_v61  ;;  %v7503_v23 = vld [vmem:[#allocation13 + $0x1a4] sm:$0xf]  ;;  %v7578_v57 = vld [vmem:[#allocation14 + $0x1f4] sm:$0xf0] }
 0x156   : > { %2312 = vmatpush.bf16.msra.mxu1 %v5859_v19  ;;  %v7495_v19 = vld [vmem:[#allocation13 + $0x164] sm:$0xf]  ;;  %v5887_v29 = vor.u32 %v7479_v12, %v5884_v18  ;;  %v5855_v12 = vor.u32 %v7471_v5, %v5852_v16  ;;  %v7469_v18 = vld [vmem:[#allocation13 + $0x94] sm:$0xf]  ;;  %v6282_v5 = vld [vmem:[#allocation14 + $0x1e0] sm:$0xf] }
 0x157   : > { %2326 = vmatpush.bf16.msra.mxu2 %v5923_v20  ;;  %v5948_v20 = vld [vmem:[#allocation13 + $0x168] sm:$0xf0]  ;;  %v7554_v47 = vld [vmem:[#allocation14 + $0x134] sm:$0xf0]  ;;  %s8343_s3 = scalar_lea.hbm %s8342_s17, 16 }
 0x158   : > { %2340 = vmatpush.bf16.msra.mxu3 %v5987_v26  ;;  %v8856_v26 = vor.u32 %v7321_v9, %v5754_v8  ;;  %v5951_v30 = vor.u32 %v7495_v19, %v5948_v20  ;;  %v5980_v8 = vld [vmem:[#allocation13 + $0x1a8] sm:$0xf0]  ;;  %p8344_p7 = scmp.ne.s32.totalorder %s8342_s17, %s8343_s3  ;;  %p8349_p3 = scmp.lt.s32.totalorder %s8347_s27, %s8343_s3 }
 0x159   : > { %2299 = vmatpush.bf16.msra.mxu0 %v5787_v32  ;;  %v5812_v32 = vld [vmem:[#allocation13 + $0x58] sm:$0xf0]  ;;  %v5983_v20 = vor.u32 %v7503_v23, %v5980_v8  ;;  %v6082_v23 = vld [vmem:[#allocation14 + $0x50] sm:$0xf]  ;;  %v7526_v8 = vld [vmem:[#allocation14 + $0x54] sm:$0xf0] }
 0x15a   : > { %2313 = vmatpush.bf16.msra.mxu1 %v5851_v34  ;;  %v6015_v34 = vor.u32 %v7511_v24, %v6012_v25  ;;  %v5815_v40 = vor.u32 %v7461_v31, %v5812_v32  ;;  %v5844_v24 = vld [vmem:[#allocation13 + $0x98] sm:$0xf0]  ;;  %v7485_v25 = vld [vmem:[#allocation13 + $0x114] sm:$0xf]  ;;  %p8345_p10 = pnand %p8344_p7, %p8609_p0  ;;  %p8350_p8 = por %p8349_p3, %p8348_p11 }
 0x15b   : > { %2327 = vmatpush.bf16.msra.mxu2 %v5915_v35  ;;  %v5876_v35 = vld [vmem:[#allocation13 + $0xd8] sm:$0xf0]  ;;  %v5847_v37 = vor.u32 %v7469_v18, %v5844_v24  ;;  %v6274_v18 = vld [vmem:[#allocation14 + $0x1d0] sm:$0xf] }
 0x15c   : > { %2341 = vmatpush.bf16.msra.mxu3 %v5979_v39  ;;  %v6004_v39 = vld [vmem:[#allocation13 + $0x1d8] sm:$0xf0]  ;;  %v5879_v41 = vor.u32 %v7477_v33, %v5876_v35  ;;  %v5772_v35 = vld [vmem:[#allocation13 + $0x8] sm:$0xf0]  ;;  %p8346_p6 = pneg %p8345_p10 }
 0x15d   : > { %2300 = vmatpush.bf16.msra.mxu0 %v5779_v46  ;;  %v6007_v46 = vor.u32 %v7509_v38, %v6004_v39  ;;  %v5972_v31 = vld [vmem:[#allocation13 + $0x198] sm:$0xf0]  ;;  %v7467_v39 = vld [vmem:[#allocation13 + $0x84] sm:$0xf] }
 0x15e   : > { %2314 = vmatpush.bf16.msra.mxu1 %v5843_v51  ;;  %v5996_v51 = vld [vmem:[#allocation13 + $0x1c8] sm:$0xf0]  ;;  %p8351_p9 = pnand %p8350_p8, %p8346_p6 }
 0x15f   : > { %2328 = vmatpush.bf16.msra.mxu2 %v5907_v52  ;;  %v5807_v52 = vor.u32 %v7459_v43, %v5804_v44  ;;  %v5999_v58 = vor.u32 %v7507_v50, %v5996_v51  ;;  %v5900_v44 = vld [vmem:[#allocation13 + $0x108] sm:$0xf0]  ;;  %v7546_v51 = vld [vmem:[#allocation14 + $0xf4] sm:$0xf0] }
 0x160   : > { %2342 = vmatpush.bf16.msra.mxu3 %v5971_v56  ;;  %v5796_v56 = vld [vmem:[#allocation13 + $0x38] sm:$0xf0]  ;;  %v6163_v60 = vor.u32 %v7546_v51, %v6162_v49  ;;  %v6258_v49 = vld [vmem:[#allocation14 + $0x1b0] sm:$0xf] }
 0x161   : > { %2301 = vmatpush.bf16.msra.mxu0 %v5771_v63  ;;  %v5988_v63 = vld [vmem:[#allocation13 + $0x1b8] sm:$0xf0]  ;;  %v5799_v0 = vor.u32 %v7457_v55, %v5796_v56  ;;  %v6290_v56 = vld [vmem:[#allocation14 + $0x1f0] sm:$0xf] }
 0x162   : > { %2315 = vmatpush.bf16.msra.mxu1 %v5835_v4  ;;  %v7455_v4 = vld [vmem:[#allocation13 + $0x24] sm:$0xf]  ;;  %v5991_v6 = vor.u32 %v7505_v62, %v5988_v63  ;;  %v6090_v62 = vld [vmem:[#allocation14 + $0x60] sm:$0xf]  ;;  %v7528_v63 = vld [vmem:[#allocation14 + $0x64] sm:$0xf0] }
 0x163   : > { %2329 = vmatpush.bf16.msra.mxu2 %v5899_v3  ;;  %v5788_v3 = vld [vmem:[#allocation13 + $0x28] sm:$0xf0]  ;;  %v6091_v16 = vor.u32 %v7528_v63, %v6090_v62  ;;  %v6250_v63 = vld [vmem:[#allocation14 + $0x1a0] sm:$0xf] }
 0x164   : > { %2343 = vmatpush.bf16.msra.mxu3 %v5963_v22  ;;  %2302 = vmatmul.bf16.vlgmr.msra.gmra.mxu0 %v8856_v26  ;;  %v7487_v22 = vld [vmem:[#allocation13 + $0x124] sm:$0xf]  ;;  %v5791_v9 = vor.u32 %v7455_v4, %v5788_v3  ;;  %v6218_v4 = vld [vmem:[#allocation14 + $0x160] sm:$0xf]  ;;  %v7560_v3 = vld [vmem:[#allocation14 + $0x164] sm:$0xf0] }
 0x165   : > { %2350 = vmatpush.bf16.msrb.mxu0 %v5831_v7  ;;  %2316 = vmatmul.bf16.vlgmr.msra.gmra.mxu1 %v8858_v28  ;;  %v5916_v7 = vld [vmem:[#allocation13 + $0x128] sm:$0xf0] }
 0x166   : > { %2364 = vmatpush.bf16.msrb.mxu1 %v5895_v10  ;;  %2330 = vmatmul.bf16.vlgmr.msra.gmra.mxu2 %v8852_v17  ;;  %v5919_v13 = vor.u32 %v7487_v22, %v5916_v7  ;;  %v6219_v7 = vor.u32 %v7560_v3, %v6218_v4  ;;  %v6050_v4 = vld [vmem:[#allocation14 + $0x10] sm:$0xf] }
 0x167   : > { %2378 = vmatpush.bf16.msrb.mxu2 %v5959_v11  ;;  %2344 = vmatmul.bf16.vlgmr.msra.gmra.mxu3 %v8854_v21  ;;  %v1675_v10 = vpop.f32.mrf.mxu0 }
 0x168   : > { %2392 = vmatpush.bf16.msrb.mxu3 %v6023_v15  ;;  %v1689_v11 = vpop.f32.mrf.mxu1  ;;  %v5780_v15 = vld [vmem:[#allocation13 + $0x18] sm:$0xf0] }
 0x169   : > { %2351 = vmatpush.bf16.msrb.mxu0 %v5823_v27  ;;  %v1690_v19 = vadd.f32 %v1689_v11, %v1675_v10  ;;  %v5908_v27 = vld [vmem:[#allocation13 + $0x118] sm:$0xf0]  ;;  %v5783_v33 = vor.u32 %v7453_v14, %v5780_v15  ;;  %v6210_v14 = vld [vmem:[#allocation14 + $0x150] sm:$0xf]  ;;  %v7558_v15 = vld [vmem:[#allocation14 + $0x154] sm:$0xf0] }
 0x16a   : > { %2365 = vmatpush.bf16.msrb.mxu1 %v5887_v29  ;;  %v1703_v29 = vpop.f32.mrf.mxu2  ;;  %v5911_v38 = vor.u32 %v7485_v25, %v5908_v27  ;;  %v6211_v25 = vor.u32 %v7558_v15, %v6210_v14  ;;  %v6074_v27 = vld [vmem:[#allocation14 + $0x40] sm:$0xf]  ;;  %v7516_v15 = vld [vmem:[#allocation14 + $0x4] sm:$0xf0] }
 0x16b   : > { %2379 = vmatpush.bf16.msrb.mxu2 %v5951_v30  ;;  %v7501_v30 = vld [vmem:[#allocation13 + $0x194] sm:$0xf]  ;;  %v1704_v32 = vadd.f32 %v1703_v29, %v1690_v19  ;;  %v7574_v19 = vld [vmem:[#allocation14 + $0x1d4] sm:$0xf0]  ;;  %v6138_v29 = vld [vmem:[#allocation14 + $0xc0] sm:$0xf] }
 0x16c   : > { %2393 = vmatpush.bf16.msrb.mxu3 %v6015_v34  ;;  %v7451_v34 = vld [vmem:[#allocation13 + $0x4] sm:$0xf]  ;;  %v1717_v36 = vpop.f32.mrf.mxu3  ;;  %v5975_v43 = vor.u32 %v7501_v30, %v5972_v31  ;;  %v6275_v31 = vor.u32 %v7574_v19, %v6274_v18  ;;  %v6042_v14 = vld [vmem:[#allocation14] sm:$0xf] }
 0x16d   : > { %2352 = vmatpush.bf16.msrb.mxu0 %v5815_v40  ;;  %v5836_v40 = vld [vmem:[#allocation13 + $0x88] sm:$0xf0]  ;;  %v5775_v50 = vor.u32 %v7451_v34, %v5772_v35  ;;  %v7572_v34 = vld [vmem:[#allocation14 + $0x1c4] sm:$0xf0]  ;;  %v6106_v19 = vld [vmem:[#allocation14 + $0x80] sm:$0xf] }
 0x16e   : > { %2366 = vmatpush.bf16.msrb.mxu1 %v5879_v41  ;;  %v7483_v41 = vld [vmem:[#allocation13 + $0x104] sm:$0xf] }
 0x16f   : > { %2380 = vmatpush.bf16.msrb.mxu2 %v5943_v42  ;;  %v8864_v42 = vadd.f32 %v1717_v36, %v1704_v32  ;;  %v5903_v55 = vor.u32 %v7483_v41, %v5900_v44  ;;  %v8866_v10 = vpop.f32.mrf.mxu0  ;;  %v6202_v32 = vld [vmem:[#allocation14 + $0x140] sm:$0xf] }
 0x170   : > { %2394 = vmatpush.bf16.msrb.mxu3 %v6007_v46  ;;  %v5964_v46 = vld [vmem:[#allocation13 + $0x188] sm:$0xf0]  ;;  %v8868_v11 = vpop.f32.mrf.mxu1 }
 0x171   : > { %2353 = vmatpush.bf16.msrb.mxu0 %v5807_v52  ;;  %v6226_v52 = vld [vmem:[#allocation14 + $0x170] sm:$0xf] }
 0x172   : > { %2367 = vmatpush.bf16.msrb.mxu1 %v5871_v53  ;;  %v7562_v53 = vld [vmem:[#allocation14 + $0x174] sm:$0xf0]  ;;  %v8874_v30 = vpop.f32.mrf.mxu2 }
 0x173   : > { %2381 = vmatpush.bf16.msrb.mxu2 %v5935_v54  ;;  %v5839_v54 = vor.u32 %v7467_v39, %v5836_v40  ;;  %v6227_v61 = vor.u32 %v7562_v53, %v6226_v52  ;;  %v7522_v39 = vld [vmem:[#allocation14 + $0x34] sm:$0xf0]  ;;  %v6130_v40 = vld [vmem:[#allocation14 + $0xb0] sm:$0xf] }
 0x174   : > { %2395 = vmatpush.bf16.msrb.mxu3 %v5999_v58  ;;  %v5967_v58 = vor.u32 %v7499_v45, %v5964_v46  ;;  %v8876_v35 = vpop.f32.mrf.mxu3  ;;  %v7538_v45 = vld [vmem:[#allocation14 + $0xb4] sm:$0xf0]  ;;  %v6194_v46 = vld [vmem:[#allocation14 + $0x130] sm:$0xf] }
 0x175   : > { %2354 = vmatpush.bf16.msrb.mxu0 %v5799_v0  ;;  %v6154_v0 = vld [vmem:[#allocation14 + $0xe0] sm:$0xf]  ;;  %v6131_v52 = vor.u32 %v7538_v45, %v6130_v40  ;;  %v6195_v53 = vor.u32 %v7554_v47, %v6194_v46  ;;  %v6034_v40 = vld [vmem:[%s8780_s18 + $0x8] sm:$0xf]  ;;  %v7308_v45 = vld [vmem:[%s8780_s18 + $0xc] sm:$0xf] }
 0x176   : > { %2368 = vmatpush.bf16.msrb.mxu1 %v5863_v1  ;;  %v6291_v1 = vor.u32 %v7578_v57, %v6290_v56  ;;  %v6122_v56 = vld [vmem:[#allocation14 + $0xa0] sm:$0xf]  ;;  %v6036_v46 = vld [vmem:[%s8780_s18 + $0x18] sm:$0xf0]  ;;  %v7527_v47 = vld [vmem:[#allocation14 + $0x64] sm:$0xf] }
 0x177   : > { %2382 = vmatpush.bf16.msrb.mxu2 %v5927_v2  ;;  %v7544_v2 = vld [vmem:[#allocation14 + $0xe4] sm:$0xf0] }
 0x178   : > { %2396 = vmatpush.bf16.msrb.mxu3 %v5991_v6  ;;  %v7576_v6 = vld [vmem:[#allocation14 + $0x1e4] sm:$0xf0]  ;;  %v6155_v22 = vor.u32 %v7544_v2, %v6154_v0 }
 0x179   : > { %2355 = vmatpush.bf16.msrb.mxu0 %v5791_v9  ;;  %v6146_v9 = vld [vmem:[#allocation14 + $0xd0] sm:$0xf]  ;;  %v7568_v0 = vld [vmem:[#allocation14 + $0x1a4] sm:$0xf0] }
 0x17a   : > { %2369 = vmatpush.bf16.msrb.mxu1 %v5855_v12  ;;  %v6283_v12 = vor.u32 %v7576_v6, %v6282_v5 }
 0x17b   : > { %2383 = vmatpush.bf16.msrb.mxu2 %v5919_v13  ;;  %v7542_v13 = vld [vmem:[#allocation14 + $0xd4] sm:$0xf0] }
 0x17c   : > { %2397 = vmatpush.bf16.msrb.mxu3 %v5983_v20  ;;  %v6083_v20 = vor.u32 %v7526_v8, %v6082_v23  ;;  %v6147_v24 = vor.u32 %v7542_v13, %v6146_v9  ;;  %v6251_v23 = vor.u32 %v7568_v0, %v6250_v63  ;;  %v6178_v8 = vld [vmem:[#allocation14 + $0x110] sm:$0xf]  ;;  %v7550_v9 = vld [vmem:[#allocation14 + $0x114] sm:$0xf0]  ;;  %v8890_v63 = vor.u32 %v7308_v45, %v6036_v46  ;;  %v7575_v0 = vld [vmem:[#allocation14 + $0x1e4] sm:$0xf] }
 0x17d   : > { %2356 = vmatpush.bf16.msrb.mxu0 %v5783_v33  ;;  %v6266_v33 = vld [vmem:[#allocation14 + $0x1c0] sm:$0xf]  ;;  %v7566_v13 = vld [vmem:[#allocation14 + $0x194] sm:$0xf0] }
 0x17e   : > { %2370 = vmatpush.bf16.msrb.mxu1 %v5847_v37  ;;  %v6267_v44 = vor.u32 %v7572_v34, %v6266_v33  ;;  %v7545_v33 = vld [vmem:[#allocation14 + $0xf4] sm:$0xf]  ;;  %v6164_v34 = vld [vmem:[#allocation14 + $0xf8] sm:$0xf0] }
 0x17f   : > { %2384 = vmatpush.bf16.msrb.mxu2 %v5911_v38  ;;  %v6066_v38 = vld [vmem:[#allocation14 + $0x30] sm:$0xf] }
 0x180   : > { %2398 = vmatpush.bf16.msrb.mxu3 %v5975_v43  ;;  %v6067_v51 = vor.u32 %v7522_v39, %v6066_v38  ;;  %v6043_v38 = vor.u32 %v7516_v15, %v6042_v14  ;;  %v6292_v39 = vld [vmem:[#allocation14 + $0x1f8] sm:$0xf0]  ;;  %v7557_v14 = vld [vmem:[#allocation14 + $0x154] sm:$0xf] }
 0x181   : > { %2357 = vmatpush.bf16.msrb.mxu0 %v5775_v50  ;;  %v1731_v41 = vpop.f32.mrf.mxu0  ;;  %v7570_v50 = vld [vmem:[#allocation14 + $0x1b4] sm:$0xf0]  ;;  %v6212_v15 = vld [vmem:[#allocation14 + $0x158] sm:$0xf0] }
 0x182   : > { %2371 = vmatpush.bf16.msrb.mxu1 %v5839_v54  ;;  %v1745_v43 = vpop.f32.mrf.mxu1  ;;  %v6058_v54 = vld [vmem:[#allocation14 + $0x20] sm:$0xf] }
 0x183   : > { %2385 = vmatpush.bf16.msrb.mxu2 %v5903_v55  ;;  %v1746_v48 = vadd.f32 %v1745_v43, %v1731_v41  ;;  %v7520_v55 = vld [vmem:[#allocation14 + $0x24] sm:$0xf0]  ;;  %v7310_v41 = vld [vmem:[%s8780_s18 + $0x14] sm:$0xf0] }
 0x184   : > { %2399 = vmatpush.bf16.msrb.mxu3 %v5967_v58  ;;  %2358 = vmatmul.bf16.vlgmr.msrb.gmra.mxu0 %v8856_v26  ;;  %v7556_v26 = vld [vmem:[#allocation14 + $0x144] sm:$0xf0]  ;;  %v6259_v58 = vor.u32 %v7570_v50, %v6258_v49  ;;  %v6059_v2 = vor.u32 %v7520_v55, %v6058_v54  ;;  %v6092_v50 = vld [vmem:[#allocation14 + $0x68] sm:$0xf0]  ;;  %v7543_v55 = vld [vmem:[#allocation14 + $0xe4] sm:$0xf] }
 0x185   : > { %2828 = vmatpush.bf16.msra.mxu0 %v6099_v59  ;;  %2372 = vmatmul.bf16.vlgmr.msrb.gmra.mxu1 %v8858_v28  ;;  %v6203_v37 = vor.u32 %v7556_v26, %v6202_v32  ;;  %v7536_v59 = vld [vmem:[#allocation14 + $0xa4] sm:$0xf0]  ;;  %v6100_v26 = vld [vmem:[#allocation14 + $0x78] sm:$0xf0] }
 0x186   : > { %2842 = vmatpush.bf16.msra.mxu1 %v6163_v60  ;;  %2386 = vmatmul.bf16.vlgmr.msrb.gmra.mxu2 %v8852_v17  ;;  %v7524_v17 = vld [vmem:[#allocation14 + $0x44] sm:$0xf0]  ;;  %v6186_v60 = vld [vmem:[#allocation14 + $0x120] sm:$0xf]  ;;  %v6123_v5 = vor.u32 %v7536_v59, %v6122_v56  ;;  %v7307_v56 = vld [vmem:[%s8780_s18 + $0x4] sm:$0xf]  ;;  %v8888_v59 = vor.u32 %v7310_v41, %v6034_v40 }
 0x187   : > { %2856 = vmatpush.bf16.msra.mxu2 %v6227_v61  ;;  %2400 = vmatmul.bf16.vlgmr.msrb.gmra.mxu3 %v8854_v21  ;;  %v7540_v21 = vld [vmem:[#allocation14 + $0xc4] sm:$0xf0]  ;;  %v6075_v28 = vor.u32 %v7524_v17, %v6074_v27  ;;  %v6179_v17 = vor.u32 %v7550_v9, %v6178_v8  ;;  %v7521_v40 = vld [vmem:[#allocation14 + $0x34] sm:$0xf]  ;;  %v6068_v41 = vld [vmem:[#allocation14 + $0x38] sm:$0xf0] }
 0x188   : > { %2870 = vmatpush.bf16.msra.mxu3 %v6291_v1  ;;  %v6139_v36 = vor.u32 %v7540_v21, %v6138_v29  ;;  %v7552_v61 = vld [vmem:[#allocation14 + $0x124] sm:$0xf0]  ;;  %v6234_v29 = vld [vmem:[#allocation14 + $0x180] sm:$0xf]  ;;  %v7529_v21 = vld [vmem:[#allocation14 + $0x74] sm:$0xf] }
 0x189   : > { %2829 = vmatpush.bf16.msra.mxu0 %v6091_v16  ;;  %v1759_v57 = vpop.f32.mrf.mxu2  ;;  %v6187_v6 = vor.u32 %v7552_v61, %v6186_v60  ;;  %v7518_v16 = vld [vmem:[#allocation14 + $0x14] sm:$0xf0]  ;;  %v6103_v49 = vor.u32 %v7529_v21, %v6100_v26  ;;  %v6156_v60 = vld [vmem:[#allocation14 + $0xe8] sm:$0xf0]  ;;  %v7559_v61 = vld [vmem:[#allocation14 + $0x164] sm:$0xf]  ;;  %v8896_v8 = vpop.f32.mrf.mxu0 }
 0x18a   : > { %2843 = vmatpush.bf16.msra.mxu1 %v6155_v22  ;;  %v1760_v62 = vadd.f32 %v1759_v57, %v1746_v48  ;;  %v1773_v1 = vpop.f32.mrf.mxu3  ;;  %v6114_v22 = vld [vmem:[#allocation14 + $0x90] sm:$0xf]  ;;  %v6051_v18 = vor.u32 %v7518_v16, %v6050_v4  ;;  %v6028_v57 = vld [vmem:[%s8780_s18 + $0x10] sm:$0xf0]  ;;  %v6095_v4 = vor.u32 %v7527_v47, %v6092_v50  ;;  %v8898_v9 = vpop.f32.mrf.mxu1  ;;  %v7555_v26 = vld [vmem:[#allocation14 + $0x144] sm:$0xf] }
 0x18b   : > { %2857 = vmatpush.bf16.msra.mxu2 %v6219_v7  ;;  %v7534_v7 = vld [vmem:[#allocation14 + $0x94] sm:$0xf0]  ;;  %v6132_v47 = vld [vmem:[#allocation14 + $0xb8] sm:$0xf0] }
 0x18c   : > { %2871 = vmatpush.bf16.msra.mxu3 %v6283_v12  ;;  %v8878_v3 = vadd.f32 %v1773_v1, %v1760_v62  ;;  %v6242_v12 = vld [vmem:[#allocation14 + $0x190] sm:$0xf]  ;;  %v6115_v27 = vor.u32 %v7534_v7, %v6114_v22  ;;  %v6220_v62 = vld [vmem:[#allocation14 + $0x168] sm:$0xf0]  ;;  %v7525_v22 = vld [vmem:[#allocation14 + $0x54] sm:$0xf] }
 0x18d   : > { %2830 = vmatpush.bf16.msra.mxu0 %v6083_v20  ;;  %v7532_v20 = vld [vmem:[#allocation14 + $0x84] sm:$0xf0]  ;;  %v6243_v32 = vor.u32 %v7566_v13, %v6242_v12  ;;  %v6284_v1 = vld [vmem:[#allocation14 + $0x1e8] sm:$0xf0]  ;;  %v6223_v16 = vor.u32 %v7559_v61, %v6220_v62  ;;  %v6084_v7 = vld [vmem:[#allocation14 + $0x58] sm:$0xf0] }
 0x18e   : > { %2844 = vmatpush.bf16.msra.mxu1 %v6147_v24  ;;  %v6170_v24 = vld [vmem:[#allocation14 + $0x100] sm:$0xf]  ;;  %v6107_v43 = vor.u32 %v7532_v20, %v6106_v19  ;;  %v6287_v12 = vor.u32 %v7575_v0, %v6284_v1  ;;  %v6148_v13 = vld [vmem:[#allocation14 + $0xd8] sm:$0xf0]  ;;  %v6087_v20 = vor.u32 %v7525_v22, %v6084_v7  ;;  %v6124_v62 = vld [vmem:[#allocation14 + $0xa8] sm:$0xf0] }
 0x18f   : > { %2858 = vmatpush.bf16.msra.mxu2 %v6211_v25  ;;  %v7548_v25 = vld [vmem:[#allocation14 + $0x104] sm:$0xf0]  ;;  %v6276_v19 = vld [vmem:[#allocation14 + $0x1d8] sm:$0xf0]  ;;  %v7551_v0 = vld [vmem:[#allocation14 + $0x124] sm:$0xf] }
 0x190   : > { %2872 = vmatpush.bf16.msra.mxu3 %v6275_v31  ;;  %v7564_v31 = vld [vmem:[#allocation14 + $0x184] sm:$0xf0]  ;;  %v6188_v1 = vld [vmem:[#allocation14 + $0x128] sm:$0xf0] }
 0x191   : > { %2831 = vmatpush.bf16.msra.mxu0 %v6075_v28  ;;  %v7561_v28 = vld [vmem:[#allocation14 + $0x174] sm:$0xf]  ;;  %v6235_v48 = vor.u32 %v7564_v31, %v6234_v29  ;;  %v7539_v29 = vld [vmem:[#allocation14 + $0xc4] sm:$0xf]  ;;  %v8904_v31 = vpop.f32.mrf.mxu2 }
 0x192   : > { %2845 = vmatpush.bf16.msra.mxu1 %v6139_v36  ;;  %v6228_v36 = vld [vmem:[#allocation14 + $0x178] sm:$0xf0] }
 0x193   : > { %2859 = vmatpush.bf16.msra.mxu2 %v6203_v37  ;;  %v7577_v37 = vld [vmem:[#allocation14 + $0x1f4] sm:$0xf]  ;;  %v6231_v54 = vor.u32 %v7561_v28, %v6228_v36  ;;  %v6268_v28 = vld [vmem:[#allocation14 + $0x1c8] sm:$0xf0]  ;;  %v8906_v36 = vpop.f32.mrf.mxu3 }
 0x194   : > { %2873 = vmatpush.bf16.msra.mxu3 %v6267_v44  ;;  %v6171_v44 = vor.u32 %v7548_v25, %v6170_v24  ;;  %v6215_v25 = vor.u32 %v7557_v14, %v6212_v15  ;;  %v7517_v14 = vld [vmem:[#allocation14 + $0x14] sm:$0xf]  ;;  %v6052_v15 = vld [vmem:[#allocation14 + $0x18] sm:$0xf0] }
 0x195   : > { %2832 = vmatpush.bf16.msra.mxu0 %v6067_v51  ;;  %v6026_v51 = vld [vmem:[%s8780_s18] sm:$0xf] }
 0x196   : > { %2846 = vmatpush.bf16.msra.mxu1 %v6131_v52  ;;  %v7309_v52 = vld [vmem:[%s8780_s18 + $0xc] sm:$0xf0] }
 0x197   : > { %2860 = vmatpush.bf16.msra.mxu2 %v6195_v53  ;;  %v6167_v53 = vor.u32 %v7545_v33, %v6164_v34  ;;  %v6204_v33 = vld [vmem:[#allocation14 + $0x148] sm:$0xf0]  ;;  %v7571_v34 = vld [vmem:[#allocation14 + $0x1c4] sm:$0xf] }
 0x198   : > { %2874 = vmatpush.bf16.msra.mxu3 %v6259_v58  ;;  %v6295_v58 = vor.u32 %v7577_v37, %v6292_v39  ;;  %v6207_v39 = vor.u32 %v7555_v26, %v6204_v33  ;;  %v6271_v46 = vor.u32 %v7571_v34, %v6268_v28  ;;  %v7531_v34 = vld [vmem:[#allocation14 + $0x84] sm:$0xf]  ;;  %v6108_v28 = vld [vmem:[#allocation14 + $0x88] sm:$0xf0] }
 0x199   : > { %2833 = vmatpush.bf16.msra.mxu0 %v6059_v2  ;;  %v8892_v2 = vor.u32 %v7309_v52, %v6026_v51  ;;  %v7569_v51 = vld [vmem:[#allocation14 + $0x1b4] sm:$0xf]  ;;  %v6260_v52 = vld [vmem:[#allocation14 + $0x1b8] sm:$0xf0] }
 0x19a   : > { %2847 = vmatpush.bf16.msra.mxu1 %v6123_v5  ;;  %v8894_v5 = vor.u32 %v7307_v56, %v6028_v57  ;;  %v7519_v56 = vld [vmem:[#allocation14 + $0x24] sm:$0xf]  ;;  %v6060_v57 = vld [vmem:[#allocation14 + $0x28] sm:$0xf0]  ;;  %v6263_v61 = vor.u32 %v7569_v51, %v6260_v52  ;;  %v6562_v52 = vld [vmem:[#allocation17 + $0x1f0] sm:$0xf] }
 0x19b   : > { %2861 = vmatpush.bf16.msra.mxu2 %v6187_v6  ;;  %v6159_v6 = vor.u32 %v7543_v55, %v6156_v60  ;;  %v6063_v7 = vor.u32 %v7519_v56, %v6060_v57 }
 0x19c   : > { %2875 = vmatpush.bf16.msra.mxu3 %v6251_v23  ;;  %v7541_v23 = vld [vmem:[#allocation14 + $0xd4] sm:$0xf] }
 0x19d   : > { %2834 = vmatpush.bf16.msra.mxu0 %v6051_v18  ;;  %v7573_v18 = vld [vmem:[#allocation14 + $0x1d4] sm:$0xf]  ;;  %v6151_v24 = vor.u32 %v7541_v23, %v6148_v13  ;;  %v6191_v13 = vor.u32 %v7551_v0, %v6188_v1  ;;  %v7672_v0 = vld [vmem:[#allocation17 + $0xe4] sm:$0xf0]  ;;  %v6490_v1 = vld [vmem:[#allocation17 + $0x160] sm:$0xf] }
 0x19e   : > { %2848 = vmatpush.bf16.msra.mxu1 %v6115_v27  ;;  %v7523_v27 = vld [vmem:[#allocation14 + $0x44] sm:$0xf]  ;;  %v6279_v21 = vor.u32 %v7573_v18, %v6276_v19  ;;  %v7533_v18 = vld [vmem:[#allocation14 + $0x94] sm:$0xf] }
 0x19f   : > { %2862 = vmatpush.bf16.msra.mxu2 %v6179_v17  ;;  %v6076_v17 = vld [vmem:[#allocation14 + $0x48] sm:$0xf0] }
 0x1a0   : > { %2876 = vmatpush.bf16.msra.mxu3 %v6243_v32  ;;  %v6140_v32 = vld [vmem:[#allocation14 + $0xc8] sm:$0xf0]  ;;  %v6079_v37 = vor.u32 %v7523_v27, %v6076_v17  ;;  %v7565_v27 = vld [vmem:[#allocation14 + $0x194] sm:$0xf]  ;;  %v6244_v17 = vld [vmem:[#allocation14 + $0x198] sm:$0xf0] }
 0x1a1   : > { %2835 = vmatpush.bf16.msra.mxu0 %v6043_v38  ;;  %v6143_v38 = vor.u32 %v7539_v29, %v6140_v32  ;;  %v6055_v29 = vor.u32 %v7517_v14, %v6052_v15  ;;  %v6044_v32 = vld [vmem:[#allocation14 + $0x8] sm:$0xf0]  ;;  %v6354_v14 = vld [vmem:[#allocation17 + $0x50] sm:$0xf]  ;;  %v7654_v15 = vld [vmem:[#allocation17 + $0x54] sm:$0xf0] }
 0x1a2   : > { %2849 = vmatpush.bf16.msra.mxu1 %v6107_v43  ;;  %v7537_v43 = vld [vmem:[#allocation14 + $0xb4] sm:$0xf]  ;;  %v1801_v45 = vpop.f32.mrf.mxu1 }
 0x1a3   : > { %2863 = vmatpush.bf16.msra.mxu2 %v6171_v44  ;;  %v1787_v44 = vpop.f32.mrf.mxu0 }
 0x1a4   : > { %2877 = vmatpush.bf16.msra.mxu3 %v6235_v48  ;;  %2836 = vmatmul.bf16.vlgmr.msra.gmra.mxu0 %v8892_v2  ;;  %v7553_v48 = vld [vmem:[#allocation14 + $0x134] sm:$0xf]  ;;  %v1802_v50 = vadd.f32 %v1801_v45, %v1787_v44  ;;  %v7658_v44 = vld [vmem:[#allocation17 + $0x74] sm:$0xf0]  ;;  %v6434_v45 = vld [vmem:[#allocation17 + $0xf0] sm:$0xf] }
 0x1a5   : > { %2884 = vmatpush.bf16.msrb.mxu0 %v6103_v49  ;;  %2850 = vmatmul.bf16.vlgmr.msra.gmra.mxu1 %v8894_v5  ;;  %v6196_v49 = vld [vmem:[#allocation14 + $0x138] sm:$0xf0] }
 0x1a6   : > { %2898 = vmatpush.bf16.msrb.mxu1 %v6167_v53  ;;  %2864 = vmatmul.bf16.vlgmr.msra.gmra.mxu2 %v8888_v59  ;;  %v6071_v53 = vor.u32 %v7521_v40, %v6068_v41  ;;  %v6199_v55 = vor.u32 %v7553_v48, %v6196_v49  ;;  %v7563_v40 = vld [vmem:[#allocation14 + $0x184] sm:$0xf]  ;;  %v6236_v41 = vld [vmem:[#allocation14 + $0x188] sm:$0xf0]  ;;  %v6498_v48 = vld [vmem:[#allocation17 + $0x170] sm:$0xf] }
 0x1a7   : > { %2912 = vmatpush.bf16.msrb.mxu2 %v6231_v54  ;;  %2878 = vmatmul.bf16.vlgmr.msra.gmra.mxu3 %v8890_v63  ;;  %v6135_v54 = vor.u32 %v7537_v43, %v6132_v47  ;;  %v6370_v43 = vld [vmem:[#allocation17 + $0x70] sm:$0xf]  ;;  %v7674_v47 = vld [vmem:[#allocation17 + $0xf4] sm:$0xf0] }
 0x1a8   : > { %2926 = vmatpush.bf16.msrb.mxu3 %v6295_v58  ;;  %v7535_v58 = vld [vmem:[#allocation14 + $0xa4] sm:$0xf]  ;;  %v7690_v49 = vld [vmem:[#allocation17 + $0x174] sm:$0xf0]  ;;  %v6435_v56 = vor.u32 %v7674_v47, %v6434_v45 }
 0x1a9   : > { %2885 = vmatpush.bf16.msrb.mxu0 %v6095_v4  ;;  %v1815_v60 = vpop.f32.mrf.mxu2  ;;  %v6499_v57 = vor.u32 %v7690_v49, %v6498_v48  ;;  %v7650_v47 = vld [vmem:[#allocation17 + $0x34] sm:$0xf0]  ;;  %v6402_v48 = vld [vmem:[#allocation17 + $0xb0] sm:$0xf] }
 0x1aa   : > { %2899 = vmatpush.bf16.msrb.mxu1 %v6159_v6  ;;  %v1816_v4 = vadd.f32 %v1815_v60, %v1802_v50  ;;  %v7567_v6 = vld [vmem:[#allocation14 + $0x1a4] sm:$0xf]  ;;  %v1829_v22 = vpop.f32.mrf.mxu3  ;;  %v6111_v50 = vor.u32 %v7531_v34, %v6108_v28  ;;  %v7656_v60 = vld [vmem:[#allocation17 + $0x64] sm:$0xf0]  ;;  %v6410_v34 = vld [vmem:[#allocation17 + $0xc0] sm:$0xf] }
 0x1ab   : > { %2913 = vmatpush.bf16.msrb.mxu2 %v6223_v16  ;;  %v6252_v16 = vld [vmem:[#allocation14 + $0x1a8] sm:$0xf0] }
 0x1ac   : > { %2927 = vmatpush.bf16.msrb.mxu3 %v6287_v12  ;;  %v8908_v23 = vadd.f32 %v1829_v22, %v1816_v4  ;;  %v6127_v12 = vor.u32 %v7535_v58, %v6124_v62  ;;  %v6255_v19 = vor.u32 %v7567_v6, %v6252_v16  ;;  %v6362_v58 = vld [vmem:[#allocation17 + $0x60] sm:$0xf]  ;;  %v7688_v4 = vld [vmem:[#allocation17 + $0x164] sm:$0xf0] }
 0x1ad   : > { %2886 = vmatpush.bf16.msrb.mxu0 %v6087_v20  ;;  %v6116_v20 = vld [vmem:[#allocation14 + $0x98] sm:$0xf0]  ;;  %v6554_v6 = vld [vmem:[#allocation17 + $0x1e0] sm:$0xf]  ;;  %v7704_v16 = vld [vmem:[#allocation17 + $0x1e4] sm:$0xf0]  ;;  %v6363_v22 = vor.u32 %v7656_v60, %v6362_v58 }
 0x1ae   : > { %2900 = vmatpush.bf16.msrb.mxu1 %v6151_v24  ;;  %v7549_v24 = vld [vmem:[#allocation14 + $0x114] sm:$0xf]  ;;  %v6119_v26 = vor.u32 %v7533_v18, %v6116_v20  ;;  %v6418_v18 = vld [vmem:[#allocation17 + $0xd0] sm:$0xf]  ;;  %v6555_v20 = vor.u32 %v7704_v16, %v6554_v6  ;;  %v7664_v6 = vld [vmem:[#allocation17 + $0xa4] sm:$0xf0] }
 0x1af   : > { %2914 = vmatpush.bf16.msrb.mxu2 %v6215_v25  ;;  %v6180_v25 = vld [vmem:[#allocation14 + $0x118] sm:$0xf0]  ;;  %v6458_v16 = vld [vmem:[#allocation17 + $0x120] sm:$0xf] }
 0x1b0   : > { %2928 = vmatpush.bf16.msrb.mxu3 %v6279_v21  ;;  %v7515_v21 = vld [vmem:[#allocation14 + $0x4] sm:$0xf]  ;;  %v6183_v33 = vor.u32 %v7549_v24, %v6180_v25  ;;  %v7670_v24 = vld [vmem:[#allocation17 + $0xd4] sm:$0xf0]  ;;  %v6482_v25 = vld [vmem:[#allocation17 + $0x150] sm:$0xf] }
 0x1b1   : > { %2887 = vmatpush.bf16.msrb.mxu0 %v6079_v37  ;;  %v7547_v37 = vld [vmem:[#allocation14 + $0x104] sm:$0xf]  ;;  %v8918_v28 = vpop.f32.mrf.mxu2 }
 0x1b2   : > { %2901 = vmatpush.bf16.msrb.mxu1 %v6143_v38  ;;  %v6247_v38 = vor.u32 %v7565_v27, %v6244_v17  ;;  %v7686_v27 = vld [vmem:[#allocation17 + $0x154] sm:$0xf0]  ;;  %v6546_v17 = vld [vmem:[#allocation17 + $0x1d0] sm:$0xf] }
 0x1b3   : > { %2915 = vmatpush.bf16.msrb.mxu2 %v6207_v39  ;;  %v6172_v39 = vld [vmem:[#allocation14 + $0x108] sm:$0xf0] }
 0x1b4   : > { %2929 = vmatpush.bf16.msrb.mxu3 %v6271_v46  ;;  %v6047_v46 = vor.u32 %v7515_v21, %v6044_v32  ;;  %v6175_v51 = vor.u32 %v7547_v37, %v6172_v39  ;;  %v6355_v21 = vor.u32 %v7654_v15, %v6354_v14  ;;  %v6419_v32 = vor.u32 %v7670_v24, %v6418_v18  ;;  %v8920_v39 = vpop.f32.mrf.mxu3  ;;  %v6522_v14 = vld [vmem:[#allocation17 + $0x1a0] sm:$0xf]  ;;  %v7696_v15 = vld [vmem:[#allocation17 + $0x1a4] sm:$0xf0] }
 0x1b5   : > { %2888 = vmatpush.bf16.msrb.mxu0 %v6071_v53  ;;  %v7706_v53 = vld [vmem:[#allocation17 + $0x1f4] sm:$0xf0] }
 0x1b6   : > { %2902 = vmatpush.bf16.msrb.mxu1 %v6135_v54  ;;  %v6239_v54 = vor.u32 %v7563_v40, %v6236_v41  ;;  %v6563_v62 = vor.u32 %v7706_v53, %v6562_v52  ;;  %v6538_v40 = vld [vmem:[#allocation17 + $0x1c0] sm:$0xf]  ;;  %v7700_v41 = vld [vmem:[#allocation17 + $0x1c4] sm:$0xf0]  ;;  %v6466_v52 = vld [vmem:[#allocation17 + $0x130] sm:$0xf] }
 0x1b7   : > { %2916 = vmatpush.bf16.msrb.mxu2 %v6199_v55  ;;  %v6371_v55 = vor.u32 %v7658_v44, %v6370_v43  ;;  %v7682_v53 = vld [vmem:[#allocation17 + $0x134] sm:$0xf0] }
 0x1b8   : > { %2930 = vmatpush.bf16.msrb.mxu3 %v6263_v61  ;;  %v6426_v61 = vld [vmem:[#allocation17 + $0xe0] sm:$0xf]  ;;  %v6467_v60 = vor.u32 %v7682_v53, %v6466_v52  ;;  %v7657_v52 = vld [vmem:[#allocation17 + $0x74] sm:$0xf]  ;;  %v6372_v53 = vld [vmem:[#allocation17 + $0x78] sm:$0xf0] }
 0x1b9   : > { %2889 = vmatpush.bf16.msrb.mxu0 %v6063_v7  ;;  %v8910_v7 = vpop.f32.mrf.mxu0 }
 0x1ba   : > { %2903 = vmatpush.bf16.msrb.mxu1 %v6127_v12  ;;  %v6427_v12 = vor.u32 %v7672_v0, %v6426_v61  ;;  %v6330_v61 = vld [vmem:[#allocation17 + $0x20] sm:$0xf] }
 0x1bb   : > { %2917 = vmatpush.bf16.msrb.mxu2 %v6191_v13  ;;  %v6491_v13 = vor.u32 %v7688_v4, %v6490_v1  ;;  %v6394_v0 = vld [vmem:[#allocation17 + $0xa0] sm:$0xf] }
 0x1bc   : > { %2931 = vmatpush.bf16.msrb.mxu3 %v6255_v19  ;;  %v8912_v19 = vpop.f32.mrf.mxu1  ;;  %v6395_v24 = vor.u32 %v7664_v6, %v6394_v0  ;;  %v6564_v0 = vld [vmem:[#allocation17 + $0x1f8] sm:$0xf0] }
 0x1bd   : > { %2890 = vmatpush.bf16.msrb.mxu0 %v6055_v29  ;;  %v7702_v29 = vld [vmem:[#allocation17 + $0x1d4] sm:$0xf0] }
 0x1be   : > { %2904 = vmatpush.bf16.msrb.mxu1 %v6119_v26  ;;  %v6483_v26 = vor.u32 %v7686_v27, %v6482_v25  ;;  %v6547_v37 = vor.u32 %v7702_v29, %v6546_v17  ;;  %v6322_v27 = vld [vmem:[#allocation17 + $0x10] sm:$0xf]  ;;  %v7646_v17 = vld [vmem:[#allocation17 + $0x14] sm:$0xf0] }
 0x1bf   : > { %2918 = vmatpush.bf16.msrb.mxu2 %v6183_v33  ;;  %v6346_v33 = vld [vmem:[#allocation17 + $0x40] sm:$0xf]  ;;  %v6386_v29 = vld [vmem:[#allocation17 + $0x90] sm:$0xf] }
 0x1c0   : > { %2932 = vmatpush.bf16.msrb.mxu3 %v6247_v38  ;;  %v6474_v38 = vld [vmem:[#allocation17 + $0x140] sm:$0xf] }
 0x1c1   : > { %2891 = vmatpush.bf16.msrb.mxu0 %v6047_v46  ;;  %v1843_v43 = vpop.f32.mrf.mxu0  ;;  %v6338_v46 = vld [vmem:[#allocation17 + $0x30] sm:$0xf] }
 0x1c2   : > { %2905 = vmatpush.bf16.msrb.mxu1 %v6111_v50  ;;  %v6539_v50 = vor.u32 %v7700_v41, %v6538_v40  ;;  %v6323_v40 = vor.u32 %v7646_v17, %v6322_v27  ;;  %v7644_v41 = vld [vmem:[#allocation17 + $0x4] sm:$0xf0]  ;;  %v7317_v27 = vld [vmem:[%s8788_s10 + $0xc] sm:$0xf0] }
 0x1c3   : > { %2919 = vmatpush.bf16.msrb.mxu2 %v6175_v51  ;;  %v7666_v51 = vld [vmem:[#allocation17 + $0xb4] sm:$0xf0] }
 0x1c4   : > { %2933 = vmatpush.bf16.msrb.mxu3 %v6239_v54  ;;  %2892 = vmatmul.bf16.vlgmr.msrb.gmra.mxu0 %v8892_v2  ;;  %v7684_v2 = vld [vmem:[#allocation17 + $0x144] sm:$0xf0]  ;;  %v1857_v49 = vpop.f32.mrf.mxu1  ;;  %v6403_v58 = vor.u32 %v7666_v51, %v6402_v48  ;;  %v6506_v48 = vld [vmem:[#allocation17 + $0x180] sm:$0xf] }
 0x1c5   : > { %3426 = vmatpush.bf16.msra.mxu0 %v6371_v55  ;;  %2906 = vmatmul.bf16.vlgmr.msrb.gmra.mxu1 %v8894_v5  ;;  %v6475_v45 = vor.u32 %v7684_v2, %v6474_v38  ;;  %v1858_v54 = vadd.f32 %v1857_v49, %v1843_v43  ;;  %v6530_v55 = vld [vmem:[#allocation17 + $0x1b0] sm:$0xf]  ;;  %v7694_v38 = vld [vmem:[#allocation17 + $0x194] sm:$0xf0]  ;;  %v6314_v2 = vld [vmem:[#allocation17] sm:$0xf] }
 0x1c6   : > { %3440 = vmatpush.bf16.msra.mxu1 %v6435_v56  ;;  %2920 = vmatmul.bf16.vlgmr.msrb.gmra.mxu2 %v8888_v59  ;;  %v7652_v59 = vld [vmem:[#allocation17 + $0x44] sm:$0xf0]  ;;  %v7698_v56 = vld [vmem:[#allocation17 + $0x1b4] sm:$0xf0] }
 0x1c7   : > { %3454 = vmatpush.bf16.msra.mxu2 %v6499_v57  ;;  %2934 = vmatmul.bf16.vlgmr.msrb.gmra.mxu3 %v8890_v63  ;;  %v7668_v63 = vld [vmem:[#allocation17 + $0xc4] sm:$0xf0]  ;;  %v6347_v5 = vor.u32 %v7652_v59, %v6346_v33  ;;  %v6339_v57 = vor.u32 %v7650_v47, %v6338_v46  ;;  %v6531_v4 = vor.u32 %v7698_v56, %v6530_v55  ;;  %v7662_v33 = vld [vmem:[#allocation17 + $0x94] sm:$0xf0]  ;;  %v6450_v59 = vld [vmem:[#allocation17 + $0x110] sm:$0xf] }
 0x1c8   : > { %3468 = vmatpush.bf16.msra.mxu3 %v6563_v62  ;;  %v6411_v44 = vor.u32 %v7668_v63, %v6410_v34  ;;  %v7648_v62 = vld [vmem:[#allocation17 + $0x24] sm:$0xf0]  ;;  %v7678_v34 = vld [vmem:[#allocation17 + $0x114] sm:$0xf0]  ;;  %v6514_v63 = vld [vmem:[#allocation17 + $0x190] sm:$0xf] }
 0x1c9   : > { %3427 = vmatpush.bf16.msra.mxu0 %v6363_v22  ;;  %v1871_v1 = vpop.f32.mrf.mxu2  ;;  %v7680_v22 = vld [vmem:[#allocation17 + $0x124] sm:$0xf0]  ;;  %v6331_v18 = vor.u32 %v7648_v62, %v6330_v61  ;;  %v6442_v46 = vld [vmem:[#allocation17 + $0x100] sm:$0xf]  ;;  %v7673_v55 = vld [vmem:[#allocation17 + $0xf4] sm:$0xf] }
 0x1ca   : > { %3441 = vmatpush.bf16.msra.mxu1 %v6427_v12  ;;  %v1872_v12 = vadd.f32 %v1871_v1, %v1858_v54  ;;  %v6459_v25 = vor.u32 %v7680_v22, %v6458_v16  ;;  %v7660_v43 = vld [vmem:[#allocation17 + $0x84] sm:$0xf0]  ;;  %v6436_v56 = vld [vmem:[#allocation17 + $0xf8] sm:$0xf0]  ;;  %v7705_v62 = vld [vmem:[#allocation17 + $0x1f4] sm:$0xf] }
 0x1cb   : > { %3455 = vmatpush.bf16.msra.mxu2 %v6491_v13  ;;  %v1885_v13 = vpop.f32.mrf.mxu3  ;;  %v7676_v47 = vld [vmem:[#allocation17 + $0x104] sm:$0xf0]  ;;  %v6500_v61 = vld [vmem:[#allocation17 + $0x178] sm:$0xf0]  ;;  %v7655_v16 = vld [vmem:[#allocation17 + $0x64] sm:$0xf]  ;;  %v6439_v17 = vor.u32 %v7673_v55, %v6436_v56 }
 0x1cc   : > { %3469 = vmatpush.bf16.msra.mxu3 %v6555_v20  ;;  %v8922_v20 = vadd.f32 %v1885_v13, %v1872_v12  ;;  %v7692_v51 = vld [vmem:[#allocation17 + $0x184] sm:$0xf0]  ;;  %v6443_v6 = vor.u32 %v7676_v47, %v6442_v46  ;;  %v6364_v22 = vld [vmem:[#allocation17 + $0x68] sm:$0xf0]  ;;  %v7318_v13 = vld [vmem:[%s8788_s10 + $0x14] sm:$0xf0] }
 0x1cd   : > { %3428 = vmatpush.bf16.msra.mxu0 %v6355_v21  ;;  %v1845_v21 = vpop.f32.mrf.mxu0  ;;  %v6306_v12 = vld [vmem:[%s8788_s10 + $0x8] sm:$0xf]  ;;  %v7653_v46 = vld [vmem:[#allocation17 + $0x54] sm:$0xf]  ;;  %v6356_v47 = vld [vmem:[#allocation17 + $0x58] sm:$0xf0] }
 0x1ce   : > { %3442 = vmatpush.bf16.msra.mxu1 %v6419_v32  ;;  %v1859_v32 = vpop.f32.mrf.mxu1  ;;  %v6359_v55 = vor.u32 %v7653_v46, %v6356_v47 }
 0x1cf   : > { %3456 = vmatpush.bf16.msra.mxu2 %v6483_v26  ;;  %v6523_v26 = vor.u32 %v7696_v15, %v6522_v14  ;;  %v7316_v14 = vld [vmem:[%s8788_s10 + $0xc] sm:$0xf]  ;;  %v6507_v15 = vor.u32 %v7692_v51, %v6506_v48  ;;  %v7669_v48 = vld [vmem:[#allocation17 + $0xd4] sm:$0xf] }
 0x1d0   : > { %3470 = vmatpush.bf16.msra.mxu3 %v6547_v37  ;;  %v1860_v37 = vadd.f32 %v1859_v32, %v1845_v21  ;;  %v7671_v21 = vld [vmem:[#allocation17 + $0xe4] sm:$0xf]  ;;  %v7685_v51 = vld [vmem:[#allocation17 + $0x154] sm:$0xf] }
 0x1d1   : > { %3429 = vmatpush.bf16.msra.mxu0 %v6347_v5  ;;  %v6378_v5 = vld [vmem:[#allocation17 + $0x80] sm:$0xf]  ;;  %v1873_v49 = vpop.f32.mrf.mxu2  ;;  %v7315_v32 = vld [vmem:[%s8788_s10 + $0x4] sm:$0xf] }
 0x1d2   : > { %3443 = vmatpush.bf16.msra.mxu1 %v6411_v44  ;;  %v6387_v44 = vor.u32 %v7662_v33, %v6386_v29  ;;  %v1874_v54 = vadd.f32 %v1873_v49, %v1860_v37  ;;  %v6567_v33 = vor.u32 %v7705_v62, %v6564_v0  ;;  %v6492_v37 = vld [vmem:[#allocation17 + $0x168] sm:$0xf0] }
 0x1d3   : > { %3457 = vmatpush.bf16.msra.mxu2 %v6475_v45  ;;  %v6451_v45 = vor.u32 %v7678_v34, %v6450_v59  ;;  %v6428_v59 = vld [vmem:[#allocation17 + $0xe8] sm:$0xf0]  ;;  %v7687_v34 = vld [vmem:[#allocation17 + $0x164] sm:$0xf] }
 0x1d4   : > { %3471 = vmatpush.bf16.msra.mxu3 %v6539_v50  ;;  %v6515_v50 = vor.u32 %v7694_v38, %v6514_v63  ;;  %v8934_v63 = vor.u32 %v7318_v13, %v6306_v12  ;;  %v7703_v38 = vld [vmem:[#allocation17 + $0x1e4] sm:$0xf]  ;;  %v6412_v0 = vld [vmem:[#allocation17 + $0xc8] sm:$0xf0] }
 0x1d5   : > { %3430 = vmatpush.bf16.msra.mxu0 %v6339_v57  ;;  %v7689_v57 = vld [vmem:[#allocation17 + $0x174] sm:$0xf] }
 0x1d6   : > { %3444 = vmatpush.bf16.msra.mxu1 %v6403_v58  ;;  %v1887_v58 = vpop.f32.mrf.mxu3  ;;  %v6503_v29 = vor.u32 %v7689_v57, %v6500_v61  ;;  %v7667_v61 = vld [vmem:[#allocation17 + $0xc4] sm:$0xf] }
 0x1d7   : > { %3458 = vmatpush.bf16.msra.mxu2 %v6467_v60  ;;  %v6315_v60 = vor.u32 %v7644_v41, %v6314_v2  ;;  %v8924_v1 = vadd.f32 %v1887_v58, %v1874_v54  ;;  %v6556_v2 = vld [vmem:[#allocation17 + $0x1e8] sm:$0xf0]  ;;  %v6548_v54 = vld [vmem:[#allocation17 + $0x1d8] sm:$0xf0]  ;;  %v7651_v58 = vld [vmem:[#allocation17 + $0x44] sm:$0xf] }
 0x1d8   : > { %3472 = vmatpush.bf16.msra.mxu3 %v6531_v4  ;;  %v6379_v4 = vor.u32 %v7660_v43, %v6378_v5  ;;  %v6367_v5 = vor.u32 %v7655_v16, %v6364_v22  ;;  %v6559_v49 = vor.u32 %v7703_v38, %v6556_v2  ;;  %v7699_v16 = vld [vmem:[#allocation17 + $0x1c4] sm:$0xf]  ;;  %v6540_v22 = vld [vmem:[#allocation17 + $0x1c8] sm:$0xf0] }
 0x1d9   : > { %3431 = vmatpush.bf16.msra.mxu0 %v6331_v18  ;;  %v6375_v18 = vor.u32 %v7657_v52, %v6372_v53  ;;  %v6484_v52 = vld [vmem:[#allocation17 + $0x158] sm:$0xf0]  ;;  %v7701_v53 = vld [vmem:[#allocation17 + $0x1d4] sm:$0xf] }
 0x1da   : > { %3445 = vmatpush.bf16.msra.mxu1 %v6395_v24  ;;  %v6308_v24 = vld [vmem:[%s8788_s10 + $0x18] sm:$0xf0]  ;;  %v6487_v57 = vor.u32 %v7685_v51, %v6484_v52  ;;  %v6551_v62 = vor.u32 %v7701_v53, %v6548_v54  ;;  %v6460_v51 = vld [vmem:[#allocation17 + $0x128] sm:$0xf0]  ;;  %v7695_v52 = vld [vmem:[#allocation17 + $0x1a4] sm:$0xf]  ;;  %v1692_v54 = vadd.f32 %v8868_v11, %v8866_v10 }
 0x1db   : > { %3459 = vmatpush.bf16.msra.mxu2 %v6459_v25  ;;  %v6298_v25 = vld [vmem:[%s8788_s10] sm:$0xf]  ;;  %v6524_v53 = vld [vmem:[#allocation17 + $0x1a8] sm:$0xf0] }
 0x1dc   : > { %3473 = vmatpush.bf16.msra.mxu3 %v6523_v26  ;;  %v6300_v26 = vld [vmem:[%s8788_s10 + $0x10] sm:$0xf0]  ;;  %v8938_v41 = vor.u32 %v7317_v27, %v6298_v25  ;;  %v6340_v25 = vld [vmem:[#allocation17 + $0x38] sm:$0xf0]  ;;  %v6527_v11 = vor.u32 %v7695_v52, %v6524_v53 }
 0x1dd   : > { %3432 = vmatpush.bf16.msra.mxu0 %v6323_v40  ;;  %v8936_v40 = vor.u32 %v7316_v14, %v6308_v24  ;;  %v8940_v43 = vor.u32 %v7315_v32, %v6300_v26  ;;  %v6415_v14 = vor.u32 %v7667_v61, %v6412_v0  ;;  %v7649_v24 = vld [vmem:[#allocation17 + $0x34] sm:$0xf]  ;;  %v6468_v26 = vld [vmem:[#allocation17 + $0x138] sm:$0xf0] }
 0x1de   : > { %3446 = vmatpush.bf16.msra.mxu1 %v6387_v44  ;;  %v6431_v44 = vor.u32 %v7671_v21, %v6428_v59  ;;  %v7665_v27 = vld [vmem:[#allocation17 + $0xb4] sm:$0xf]  ;;  %v6404_v21 = vld [vmem:[#allocation17 + $0xb8] sm:$0xf0] }
 0x1df   : > { %3460 = vmatpush.bf16.msra.mxu2 %v6451_v45  ;;  %v6495_v45 = vor.u32 %v7687_v34, %v6492_v37  ;;  %v7681_v32 = vld [vmem:[#allocation17 + $0x134] sm:$0xf]  ;;  %v6532_v59 = vld [vmem:[#allocation17 + $0x1b8] sm:$0xf0]  ;;  %v6343_v34 = vor.u32 %v7649_v24, %v6340_v25  ;;  %v6407_v37 = vor.u32 %v7665_v27, %v6404_v21  ;;  %v7643_v27 = vld [vmem:[#allocation17 + $0x4] sm:$0xf] }
 0x1e0   : > { %3474 = vmatpush.bf16.msra.mxu3 %v6515_v50  ;;  %v6420_v50 = vld [vmem:[#allocation17 + $0xd8] sm:$0xf0]  ;;  %v6471_v38 = vor.u32 %v7681_v32, %v6468_v26  ;;  %v7645_v0 = vld [vmem:[#allocation17 + $0x14] sm:$0xf]  ;;  %v7659_v32 = vld [vmem:[#allocation17 + $0x84] sm:$0xf] }
 0x1e1   : > { %3433 = vmatpush.bf16.msra.mxu0 %v6315_v60  ;;  %v6423_v56 = vor.u32 %v7669_v48, %v6420_v50  ;;  %v6348_v60 = vld [vmem:[#allocation17 + $0x48] sm:$0xf0]  ;;  %v2303_v13 = vpop.f32.mrf.mxu0  ;;  %v7679_v50 = vld [vmem:[#allocation17 + $0x124] sm:$0xf] }
 0x1e2   : > { %3447 = vmatpush.bf16.msra.mxu1 %v6379_v4  ;;  %v7683_v4 = vld [vmem:[#allocation17 + $0x144] sm:$0xf]  ;;  %v6351_v12 = vor.u32 %v7651_v58, %v6348_v60  ;;  %v6463_v61 = vor.u32 %v7679_v50, %v6460_v51  ;;  %v6380_v26 = vld [vmem:[#allocation17 + $0x88] sm:$0xf0]  ;;  %v6770_v50 = vld [vmem:[#allocation16 + $0x170] sm:$0xf] }
 0x1e3   : > { %3461 = vmatpush.bf16.msra.mxu2 %v6443_v6  ;;  %v6476_v6 = vld [vmem:[#allocation17 + $0x148] sm:$0xf0]  ;;  %v7626_v51 = vld [vmem:[#allocation16 + $0x174] sm:$0xf0]  ;;  %v6383_v52 = vor.u32 %v7659_v32, %v6380_v26  ;;  %v6754_v26 = vld [vmem:[#allocation16 + $0x150] sm:$0xf] }
 0x1e4   : > { %3475 = vmatpush.bf16.msra.mxu3 %v6507_v15  ;;  %3434 = vmatmul.bf16.vlgmr.msra.gmra.mxu0 %v8938_v41  ;;  %v6479_v15 = vor.u32 %v7683_v4, %v6476_v6  ;;  %v6324_v4 = vld [vmem:[#allocation17 + $0x18] sm:$0xf0]  ;;  %v7661_v6 = vld [vmem:[#allocation17 + $0x94] sm:$0xf]  ;;  %v7606_v32 = vld [vmem:[#allocation16 + $0xd4] sm:$0xf0] }
 0x1e5   : > { %3482 = vmatpush.bf16.msrb.mxu0 %v6375_v18  ;;  %3448 = vmatmul.bf16.vlgmr.msra.gmra.mxu1 %v8940_v43  ;;  %v2317_v18 = vpop.f32.mrf.mxu1  ;;  %v6327_v25 = vor.u32 %v7645_v0, %v6324_v4  ;;  %v7592_v0 = vld [vmem:[#allocation16 + $0x64] sm:$0xf0]  ;;  %v6698_v4 = vld [vmem:[#allocation16 + $0xe0] sm:$0xf] }
 0x1e6   : > { %3496 = vmatpush.bf16.msrb.mxu1 %v6439_v17  ;;  %3462 = vmatmul.bf16.vlgmr.msra.gmra.mxu2 %v8934_v63  ;;  %v6543_v17 = vor.u32 %v7699_v16, %v6540_v22  ;;  %v6388_v22 = vld [vmem:[#allocation17 + $0x98] sm:$0xf0] }
 0x1e7   : > { %3510 = vmatpush.bf16.msrb.mxu2 %v6503_v29  ;;  %3476 = vmatmul.bf16.vlgmr.msra.gmra.mxu3 %v8936_v40  ;;  %v2318_v29 = vadd.f32 %v2317_v18, %v2303_v13  ;;  %v6452_v13 = vld [vmem:[#allocation17 + $0x118] sm:$0xf0]  ;;  %v1706_v18 = vadd.f32 %v8874_v30, %v1692_v54  ;;  %v7691_v30 = vld [vmem:[#allocation17 + $0x184] sm:$0xf]  ;;  %v6834_v54 = vld [vmem:[#allocation16 + $0x1f0] sm:$0xf] }
 0x1e8   : > { %3524 = vmatpush.bf16.msrb.mxu3 %v6567_v33  ;;  %v7697_v33 = vld [vmem:[#allocation17 + $0x1b4] sm:$0xf] }
 0x1e9   : > { %3483 = vmatpush.bf16.msrb.mxu0 %v6367_v5  ;;  %v2331_v2 = vpop.f32.mrf.mxu2  ;;  %v7647_v5 = vld [vmem:[#allocation17 + $0x24] sm:$0xf]  ;;  %v6535_v46 = vor.u32 %v7697_v33, %v6532_v59  ;;  %v2305_v58 = vpop.f32.mrf.mxu0 }
 0x1ea   : > { %3497 = vmatpush.bf16.msrb.mxu1 %v6431_v44  ;;  %v6332_v44 = vld [vmem:[#allocation17 + $0x28] sm:$0xf0]  ;;  %v2332_v47 = vadd.f32 %v2331_v2, %v2318_v29  ;;  %v2345_v48 = vpop.f32.mrf.mxu3  ;;  %v6391_v29 = vor.u32 %v7661_v6, %v6388_v22  ;;  %v7675_v33 = vld [vmem:[#allocation17 + $0x104] sm:$0xf]  ;;  %v6762_v22 = vld [vmem:[#allocation16 + $0x160] sm:$0xf] }
 0x1eb   : > { %3511 = vmatpush.bf16.msrb.mxu2 %v6495_v45  ;;  %v7663_v45 = vld [vmem:[#allocation17 + $0xa4] sm:$0xf]  ;;  %v6508_v2 = vld [vmem:[#allocation17 + $0x188] sm:$0xf0] }
 0x1ec   : > { %3525 = vmatpush.bf16.msrb.mxu3 %v6559_v49  ;;  %v6396_v49 = vld [vmem:[#allocation17 + $0xa8] sm:$0xf0] }
 0x1ed   : > { %3484 = vmatpush.bf16.msrb.mxu0 %v6359_v55  ;;  %v2346_v55 = vadd.f32 %v2345_v48, %v2332_v47  ;;  %v6399_v60 = vor.u32 %v7663_v45, %v6396_v49  ;;  %v6706_v45 = vld [vmem:[#allocation16 + $0xf0] sm:$0xf]  ;;  %v7610_v49 = vld [vmem:[#allocation16 + $0xf4] sm:$0xf0] }
 0x1ee   : > { %3498 = vmatpush.bf16.msrb.mxu1 %v6423_v56  ;;  %v8951_v56 = vld [vmem:[%s9236_s7] sm:$0x3] }
 0x1ef   : > { %3512 = vmatpush.bf16.msrb.mxu2 %v6487_v57  ;;  %v6335_v57 = vor.u32 %v7647_v5, %v6332_v44  ;;  %v2406_v10 = vadd.f32 %v2346_v55, %v8864_v42  ;;  %v2412_v24 = vperm.slane %v8951_v56, 0  ;;  %v6642_v5 = vld [vmem:[#allocation16 + $0x70] sm:$0xf]  ;;  %v7594_v44 = vld [vmem:[#allocation16 + $0x74] sm:$0xf0] }
 0x1f0   : > { %3526 = vmatpush.bf16.msrb.mxu3 %v6551_v62  ;;  %v2319_v62 = vpop.f32.mrf.mxu1  ;;  %v7642_v55 = vld [vmem:[#allocation16 + $0x1f4] sm:$0xf0] }
 0x1f1   : > { %3485 = vmatpush.bf16.msrb.mxu0 %v6351_v12  ;;  %v2320_v16 = vadd.f32 %v2319_v62, %v2305_v58  ;;  %v7677_v12 = vld [vmem:[#allocation17 + $0x114] sm:$0xf]  ;;  %v2333_v42 = vpop.f32.mrf.mxu2  ;;  %v2416_v56 = vadd.f32 %v2412_v24, %v2406_v10  ;;  %v6511_v58 = vor.u32 %v7691_v30, %v6508_v2  ;;  %v6771_v62 = vor.u32 %v7626_v51, %v6770_v50  ;;  %v6618_v2 = vld [vmem:[#allocation16 + $0x40] sm:$0xf] }
 0x1f2   : > { %3499 = vmatpush.bf16.msrb.mxu1 %v6415_v14  ;;  %v7693_v14 = vld [vmem:[#allocation17 + $0x194] sm:$0xf]  ;;  %v6455_v21 = vor.u32 %v7677_v12, %v6452_v13  ;;  %v7624_v12 = vld [vmem:[#allocation16 + $0x164] sm:$0xf0]  ;;  %v6826_v13 = vld [vmem:[#allocation16 + $0x1e0] sm:$0xf] }
 0x1f3   : > { %3513 = vmatpush.bf16.msrb.mxu2 %v6479_v15  ;;  %v6516_v15 = vld [vmem:[#allocation17 + $0x198] sm:$0xf0]  ;;  %v2420_v10 = vmax.f32 %v2416_v56, 0.0 }
 0x1f4   : > { %3527 = vmatpush.bf16.msrb.mxu3 %v6543_v17  ;;  %v6316_v17 = vld [vmem:[#allocation17 + $0x8] sm:$0xf0]  ;;  %v6519_v59 = vor.u32 %v7693_v14, %v6516_v15  ;;  %v7640_v14 = vld [vmem:[#allocation16 + $0x1e4] sm:$0xf0] }
 0x1f5   : > { %3486 = vmatpush.bf16.msrb.mxu0 %v6343_v34  ;;  %v2334_v34 = vadd.f32 %v2333_v42, %v2320_v16  ;;  %v6319_v48 = vor.u32 %v7643_v27, %v6316_v17  ;;  %v7608_v16 = vld [vmem:[#allocation16 + $0xe4] sm:$0xf0]  ;;  %v6763_v27 = vor.u32 %v7624_v12, %v6762_v22  ;;  %v6626_v17 = vld [vmem:[#allocation16 + $0x50] sm:$0xf]  ;;  %v6827_v42 = vor.u32 %v7640_v14, %v6826_v13  ;;  %v6666_v22 = vld [vmem:[#allocation16 + $0xa0] sm:$0xf] }
 0x1f6   : > { %3500 = vmatpush.bf16.msrb.mxu1 %v6407_v37  ;;  %v2347_v37 = vpop.f32.mrf.mxu3 }
 0x1f7   : > { %3514 = vmatpush.bf16.msrb.mxu2 %v6471_v38  ;;  %v6444_v38 = vld [vmem:[#allocation17 + $0x108] sm:$0xf0]  ;;  %v2348_v47 = vadd.f32 %v2347_v37, %v2334_v34  ;;  %v7638_v34 = vld [vmem:[#allocation16 + $0x1d4] sm:$0xf0] }
 0x1f8   : > { %3528 = vmatpush.bf16.msrb.mxu3 %v6535_v46  ;;  %v1720_v46 = vadd.f32 %v8876_v35, %v1706_v18  ;;  %v6447_v53 = vor.u32 %v7675_v33, %v6444_v38  ;;  %v6634_v35 = vld [vmem:[#allocation16 + $0x60] sm:$0xf]  ;;  %v7622_v33 = vld [vmem:[#allocation16 + $0x154] sm:$0xf0] }
 0x1f9   : > { %3487 = vmatpush.bf16.msrb.mxu0 %v6335_v57  ;;  %v6635_v18 = vor.u32 %v7592_v0, %v6634_v35  ;;  %v6755_v30 = vor.u32 %v7622_v33, %v6754_v26  ;;  %v7582_v26 = vld [vmem:[#allocation16 + $0x14] sm:$0xf0]  ;;  %v6658_v33 = vld [vmem:[#allocation16 + $0x90] sm:$0xf] }
 0x1fa   : > { %3501 = vmatpush.bf16.msrb.mxu1 %v6399_v60  ;;  %v2408_v57 = vadd.f32 %v2348_v47, %v1720_v46  ;;  %v6643_v60 = vor.u32 %v7594_v44, %v6642_v5  ;;  %v7588_v5 = vld [vmem:[#allocation16 + $0x44] sm:$0xf0]  ;;  %v6682_v44 = vld [vmem:[#allocation16 + $0xc0] sm:$0xf] }
 0x1fb   : > { %3515 = vmatpush.bf16.msrb.mxu2 %v6463_v61  ;;  %v6707_v61 = vor.u32 %v7610_v49, %v6706_v45  ;;  %v6746_v46 = vld [vmem:[#allocation16 + $0x140] sm:$0xf]  ;;  %v7620_v47 = vld [vmem:[#allocation16 + $0x144] sm:$0xf0] }
 0x1fc   : > { %3529 = vmatpush.bf16.msrb.mxu3 %v6527_v11  ;;  %v2418_v6 = vadd.f32 %v2412_v24, %v2408_v57  ;;  %v6835_v11 = vor.u32 %v7642_v55, %v6834_v54  ;;  %v7590_v24 = vld [vmem:[#allocation16 + $0x54] sm:$0xf0]  ;;  %v6747_v50 = vor.u32 %v7620_v47, %v6746_v46  ;;  %v6674_v54 = vld [vmem:[#allocation16 + $0xb0] sm:$0xf]  ;;  %v6650_v46 = vld [vmem:[#allocation16 + $0x80] sm:$0xf] }
 0x1fd   : > { %3488 = vmatpush.bf16.msrb.mxu0 %v6327_v25  ;;  %v6699_v25 = vor.u32 %v7608_v16, %v6698_v4  ;;  %v6627_v37 = vor.u32 %v7590_v24, %v6626_v17  ;;  %v7602_v57 = vld [vmem:[#allocation16 + $0xb4] sm:$0xf0]  ;;  %v7584_v16 = vld [vmem:[#allocation16 + $0x24] sm:$0xf0] }
 0x1fe   : > { %3502 = vmatpush.bf16.msrb.mxu1 %v6391_v29  ;;  %v2422_v15 = vmax.f32 %v2418_v6, 0.0  ;;  %v6690_v29 = vld [vmem:[#allocation16 + $0xd0] sm:$0xf]  ;;  %v6675_v0 = vor.u32 %v7602_v57, %v6674_v54  ;;  %v7596_v47 = vld [vmem:[#allocation16 + $0x84] sm:$0xf0] }
 0x1ff   : > { %3516 = vmatpush.bf16.msrb.mxu2 %v6455_v21  ;;  %v6691_v38 = vor.u32 %v7606_v32, %v6690_v29  ;;  %v6594_v29 = vld [vmem:[#allocation16 + $0x10] sm:$0xf]  ;;  %v6708_v54 = vld [vmem:[#allocation16 + $0xf8] sm:$0xf0]  ;;  %v7641_v57 = vld [vmem:[#allocation16 + $0x1f4] sm:$0xf] }
 0x200   : > { %3530 = vmatpush.bf16.msrb.mxu3 %v6519_v59  ;;  %v8957_v21 = vpack.c.bf16 %v2422_v15, %v2420_v10  ;;  %v6818_v59 = vld [vmem:[#allocation16 + $0x1d0] sm:$0xf]  ;;  %v7600_v10 = vld [vmem:[#allocation16 + $0xa4] sm:$0xf0]  ;;  %v6730_v15 = vld [vmem:[#allocation16 + $0x120] sm:$0xf] }
 0x201   : > { %3489 = vmatpush.bf16.msrb.mxu0 %v6319_v48  ;;  %v6819_v45 = vor.u32 %v7638_v34, %v6818_v59  ;;  %v6810_v48 = vld [vmem:[#allocation16 + $0x1c0] sm:$0xf]  ;;  %v2359_v49 = vpop.f32.mrf.mxu0  ;;  %v7598_v59 = vld [vmem:[#allocation16 + $0x94] sm:$0xf0] }
 0x202   : > { %3503 = vmatpush.bf16.msrb.mxu1 %v6383_v52  ;;  %v2373_v51 = vpop.f32.mrf.mxu1  ;;  %v6610_v52 = vld [vmem:[#allocation16 + $0x30] sm:$0xf] }
 0x203   : > { %3517 = vmatpush.bf16.msrb.mxu2 %v6447_v53  ;;  %v7586_v53 = vld [vmem:[#allocation16 + $0x34] sm:$0xf0]  ;;  %v2374_v56 = vadd.f32 %v2373_v51, %v2359_v49 }
 0x204   : > { %3531 = vmatpush.bf16.msrb.mxu3 %v6511_v58  ;;  %3490 = vmatmul.bf16.vlgmr.msrb.gmra.mxu0 %v8938_v41  ;;  %v7604_v41 = vld [vmem:[#allocation16 + $0xc4] sm:$0xf0]  ;;  %v6738_v58 = vld [vmem:[#allocation16 + $0x130] sm:$0xf]  ;;  %v6611_v35 = vor.u32 %v7586_v53, %v6610_v52  ;;  %v6644_v52 = vld [vmem:[#allocation16 + $0x78] sm:$0xf0] }
 0x205   : > { %3878 = vmatpush.bf16.msra.mxu0 %v6643_v60  ;;  %3504 = vmatmul.bf16.vlgmr.msrb.gmra.mxu1 %v8940_v43  ;;  %v6619_v43 = vor.u32 %v7588_v5, %v6618_v2  ;;  %v7618_v60 = vld [vmem:[#allocation16 + $0x134] sm:$0xf0]  ;;  %v6786_v2 = vld [vmem:[#allocation16 + $0x190] sm:$0xf]  ;;  %v7609_v53 = vld [vmem:[#allocation16 + $0xf4] sm:$0xf] }
 0x206   : > { %3892 = vmatpush.bf16.msra.mxu1 %v6707_v61  ;;  %3518 = vmatmul.bf16.vlgmr.msrb.gmra.mxu2 %v8934_v63  ;;  %v7636_v63 = vld [vmem:[#allocation16 + $0x1c4] sm:$0xf0]  ;;  %v6802_v61 = vld [vmem:[#allocation16 + $0x1b0] sm:$0xf]  ;;  %v6739_v4 = vor.u32 %v7618_v60, %v6738_v58  ;;  %v7630_v5 = vld [vmem:[#allocation16 + $0x194] sm:$0xf0] }
 0x207   : > { %3906 = vmatpush.bf16.msra.mxu2 %v6771_v62  ;;  %3532 = vmatmul.bf16.vlgmr.msrb.gmra.mxu3 %v8936_v40  ;;  %v6683_v40 = vor.u32 %v7604_v41, %v6682_v44  ;;  %v6811_v55 = vor.u32 %v7636_v63, %v6810_v48  ;;  %v7634_v62 = vld [vmem:[#allocation16 + $0x1b4] sm:$0xf0]  ;;  %v6586_v44 = vld [vmem:[#allocation16] sm:$0xf]  ;;  %v6595_v41 = vor.u32 %v7582_v26, %v6594_v29  ;;  %v7612_v63 = vld [vmem:[#allocation16 + $0x104] sm:$0xf0] }
 0x208   : > { %3920 = vmatpush.bf16.msra.mxu3 %v6835_v11  ;;  %v6602_v11 = vld [vmem:[#allocation16 + $0x20] sm:$0xf]  ;;  %v6803_v12 = vor.u32 %v7634_v62, %v6802_v61  ;;  %v6787_v51 = vor.u32 %v7630_v5, %v6786_v2  ;;  %v6836_v60 = vld [vmem:[#allocation16 + $0x1f8] sm:$0xf0]  ;;  %v7313_v62 = vld [vmem:[%s8786_s23 + $0xc] sm:$0xf0] }
 0x209   : > { %3879 = vmatpush.bf16.msra.mxu0 %v6635_v18  ;;  %v2387_v6 = vpop.f32.mrf.mxu2  ;;  %v7616_v18 = vld [vmem:[#allocation16 + $0x124] sm:$0xf0]  ;;  %v6603_v24 = vor.u32 %v7584_v16, %v6602_v11  ;;  %v6714_v48 = vld [vmem:[#allocation16 + $0x100] sm:$0xf]  ;;  %v7311_v11 = vld [vmem:[%s8786_s23 + $0x4] sm:$0xf] }
 0x20a   : > { %3893 = vmatpush.bf16.msra.mxu1 %v6699_v25  ;;  %v2388_v13 = vadd.f32 %v2387_v6, %v2374_v56  ;;  %v2401_v14 = vpop.f32.mrf.mxu3  ;;  %v6794_v25 = vld [vmem:[#allocation16 + $0x1a0] sm:$0xf]  ;;  %v6731_v32 = vor.u32 %v7616_v18, %v6730_v15  ;;  %v6772_v56 = vld [vmem:[#allocation16 + $0x178] sm:$0xf0]  ;;  %v7314_v6 = vld [vmem:[%s8786_s23 + $0x14] sm:$0xf0] }
 0x20b   : > { %3907 = vmatpush.bf16.msra.mxu2 %v6763_v27  ;;  %v7632_v27 = vld [vmem:[#allocation16 + $0x1a4] sm:$0xf0]  ;;  %v6570_v61 = vld [vmem:[%s8786_s23] sm:$0xf]  ;;  %v7591_v18 = vld [vmem:[#allocation16 + $0x64] sm:$0xf] }
 0x20c   : > { %3921 = vmatpush.bf16.msra.mxu3 %v6827_v42  ;;  %v2402_v17 = vadd.f32 %v2401_v14, %v2388_v13  ;;  %v6667_v42 = vor.u32 %v7600_v10, %v6666_v22  ;;  %v7312_v13 = vld [vmem:[%s8786_s23 + $0xc] sm:$0xf]  ;;  %v6580_v14 = vld [vmem:[%s8786_s23 + $0x18] sm:$0xf0]  ;;  %v6711_v10 = vor.u32 %v7609_v53, %v6708_v54  ;;  %v7603_v53 = vld [vmem:[#allocation16 + $0xc4] sm:$0xf] }
 0x20d   : > { %3880 = vmatpush.bf16.msra.mxu0 %v6627_v37  ;;  %v6795_v37 = vor.u32 %v7632_v27, %v6794_v25  ;;  %v6636_v25 = vld [vmem:[#allocation16 + $0x68] sm:$0xf0]  ;;  %v7607_v27 = vld [vmem:[#allocation16 + $0xe4] sm:$0xf] }
 0x20e   : > { %3894 = vmatpush.bf16.msra.mxu1 %v6691_v38  ;;  %v8964_v34 = vadd.f32 %v2402_v17, %v8878_v3  ;;  %v6722_v38 = vld [vmem:[#allocation16 + $0x110] sm:$0xf]  ;;  %v6778_v3 = vld [vmem:[#allocation16 + $0x180] sm:$0xf]  ;;  %v6839_v17 = vor.u32 %v7641_v57, %v6836_v60  ;;  %v6700_v29 = vld [vmem:[#allocation16 + $0xe8] sm:$0xf0] }
 0x20f   : > { %3908 = vmatpush.bf16.msra.mxu2 %v6755_v30  ;;  %v7614_v30 = vld [vmem:[#allocation16 + $0x114] sm:$0xf0]  ;;  %v6703_v2 = vor.u32 %v7607_v27, %v6700_v29  ;;  %v6748_v57 = vld [vmem:[#allocation16 + $0x148] sm:$0xf0] }
 0x210   : > { %3922 = vmatpush.bf16.msra.mxu3 %v6819_v45  ;;  %v7580_v45 = vld [vmem:[#allocation16 + $0x4] sm:$0xf0]  ;;  %v6723_v49 = vor.u32 %v7614_v30, %v6722_v38  ;;  %v8980_v38 = vor.u32 %v7312_v13, %v6580_v14  ;;  %v6639_v30 = vor.u32 %v7591_v18, %v6636_v25  ;;  %v6812_v60 = vld [vmem:[#allocation16 + $0x1c8] sm:$0xf0]  ;;  %v7633_v13 = vld [vmem:[#allocation16 + $0x1b4] sm:$0xf]  ;;  %v8988_v18 = vpop.f32.mrf.mxu1 }
 0x211   : > { %3881 = vmatpush.bf16.msra.mxu0 %v6619_v43  ;;  %v6659_v43 = vor.u32 %v7598_v59, %v6658_v33  ;;  %v6587_v58 = vor.u32 %v7580_v45, %v6586_v44  ;;  %v7639_v59 = vld [vmem:[#allocation16 + $0x1e4] sm:$0xf]  ;;  %v7589_v44 = vld [vmem:[#allocation16 + $0x54] sm:$0xf]  ;;  %v6628_v45 = vld [vmem:[#allocation16 + $0x58] sm:$0xf0] }
 0x212   : > { %3895 = vmatpush.bf16.msra.mxu1 %v6683_v40  ;;  %v7628_v40 = vld [vmem:[#allocation16 + $0x184] sm:$0xf0]  ;;  %v6804_v14 = vld [vmem:[#allocation16 + $0x1b8] sm:$0xf0]  ;;  %v6604_v29 = vld [vmem:[#allocation16 + $0x28] sm:$0xf0] }
 0x213   : > { %3909 = vmatpush.bf16.msra.mxu2 %v6747_v50  ;;  %v7593_v50 = vld [vmem:[#allocation16 + $0x74] sm:$0xf]  ;;  %v6779_v16 = vor.u32 %v7628_v40, %v6778_v3  ;;  %v6631_v3 = vor.u32 %v7589_v44, %v6628_v45  ;;  %v8990_v45 = vpop.f32.mrf.mxu2 }
 0x214   : > { %3923 = vmatpush.bf16.msra.mxu3 %v6811_v55  ;;  %v7625_v55 = vld [vmem:[#allocation16 + $0x174] sm:$0xf]  ;;  %v6647_v22 = vor.u32 %v7593_v50, %v6644_v52  ;;  %v6620_v52 = vld [vmem:[#allocation16 + $0x48] sm:$0xf0] }
 0x215   : > { %3882 = vmatpush.bf16.msra.mxu0 %v6611_v35  ;;  %v6651_v35 = vor.u32 %v7596_v47, %v6650_v46  ;;  %v6775_v15 = vor.u32 %v7625_v55, %v6772_v56  ;;  %v6692_v47 = vld [vmem:[#allocation16 + $0xd8] sm:$0xf0]  ;;  %v6684_v55 = vld [vmem:[#allocation16 + $0xc8] sm:$0xf0]  ;;  %v7619_v56 = vld [vmem:[#allocation16 + $0x144] sm:$0xf] }
 0x216   : > { %3896 = vmatpush.bf16.msra.mxu1 %v6675_v0  ;;  %v6715_v0 = vor.u32 %v7612_v63, %v6714_v48  ;;  %v7621_v48 = vld [vmem:[#allocation16 + $0x154] sm:$0xf]  ;;  %v6756_v63 = vld [vmem:[#allocation16 + $0x158] sm:$0xf0] }
 0x217   : > { %3910 = vmatpush.bf16.msra.mxu2 %v6739_v4  ;;  %v6578_v4 = vld [vmem:[%s8786_s23 + $0x8] sm:$0xf]  ;;  %v6759_v50 = vor.u32 %v7621_v48, %v6756_v63  ;;  %v6596_v48 = vld [vmem:[#allocation16 + $0x18] sm:$0xf0]  ;;  %v7597_v63 = vld [vmem:[#allocation16 + $0x94] sm:$0xf] }
 0x218   : > { %3924 = vmatpush.bf16.msra.mxu3 %v6803_v12  ;;  %v6572_v12 = vld [vmem:[%s8786_s23 + $0x10] sm:$0xf0]  ;;  %v8976_v26 = vor.u32 %v7314_v6, %v6578_v4  ;;  %v6612_v4 = vld [vmem:[#allocation16 + $0x38] sm:$0xf0] }
 0x219   : > { %3883 = vmatpush.bf16.msra.mxu0 %v6603_v24  ;;  %v8974_v24 = vor.u32 %v7313_v62, %v6570_v61  ;;  %v8978_v33 = vor.u32 %v7311_v11, %v6572_v12  ;;  %v6687_v62 = vor.u32 %v7603_v53, %v6684_v55  ;;  %v7601_v6 = vld [vmem:[#allocation16 + $0xb4] sm:$0xf]  ;;  %v6740_v12 = vld [vmem:[#allocation16 + $0x138] sm:$0xf0]  ;;  %v7579_v55 = vld [vmem:[#allocation16 + $0x4] sm:$0xf] }
 0x21a   : > { %3897 = vmatpush.bf16.msra.mxu1 %v6667_v42  ;;  %v7623_v42 = vld [vmem:[#allocation16 + $0x164] sm:$0xf] }
 0x21b   : > { %3911 = vmatpush.bf16.msra.mxu2 %v6731_v32  ;;  %v6764_v32 = vld [vmem:[#allocation16 + $0x168] sm:$0xf0] }
 0x21c   : > { %3925 = vmatpush.bf16.msra.mxu3 %v6795_v37  ;;  %v6828_v37 = vld [vmem:[#allocation16 + $0x1e8] sm:$0xf0]  ;;  %v6767_v5 = vor.u32 %v7623_v42, %v6764_v32  ;;  %v7599_v42 = vld [vmem:[#allocation16 + $0xa4] sm:$0xf]  ;;  %v6807_v32 = vor.u32 %v7633_v13, %v6804_v14  ;;  %v7770_v14 = vld [vmem:[#allocation19 + $0x1f4] sm:$0xf0] }
 0x21d   : > { %3884 = vmatpush.bf16.msra.mxu0 %v6595_v41  ;;  %v7605_v41 = vld [vmem:[#allocation16 + $0xd4] sm:$0xf]  ;;  %v6831_v46 = vor.u32 %v7639_v59, %v6828_v37  ;;  %v6668_v59 = vld [vmem:[#allocation16 + $0xa8] sm:$0xf0]  ;;  %v7615_v37 = vld [vmem:[#allocation16 + $0x124] sm:$0xf] }
 0x21e   : > { %3898 = vmatpush.bf16.msra.mxu1 %v6659_v43  ;;  %v7637_v43 = vld [vmem:[#allocation16 + $0x1d4] sm:$0xf]  ;;  %v6695_v40 = vor.u32 %v7605_v41, %v6692_v47  ;;  %v6671_v41 = vor.u32 %v7599_v42, %v6668_v59 }
 0x21f   : > { %3912 = vmatpush.bf16.msra.mxu2 %v6723_v49  ;;  %v6820_v49 = vld [vmem:[#allocation16 + $0x1d8] sm:$0xf0]  ;;  %v7581_v47 = vld [vmem:[#allocation16 + $0x14] sm:$0xf] }
 0x220   : > { %3926 = vmatpush.bf16.msra.mxu3 %v6787_v51  ;;  %v7587_v51 = vld [vmem:[#allocation16 + $0x44] sm:$0xf]  ;;  %v6823_v54 = vor.u32 %v7637_v43, %v6820_v49  ;;  %v8992_v43 = vpop.f32.mrf.mxu3  ;;  %v7769_v42 = vld [vmem:[#allocation19 + $0x1f4] sm:$0xf] }
 0x221   : > { %3885 = vmatpush.bf16.msra.mxu0 %v6587_v58  ;;  %v7635_v58 = vld [vmem:[#allocation16 + $0x1c4] sm:$0xf]  ;;  %v6623_v61 = vor.u32 %v7587_v51, %v6620_v52  ;;  %v7629_v51 = vld [vmem:[#allocation16 + $0x194] sm:$0xf]  ;;  %v6788_v52 = vld [vmem:[#allocation16 + $0x198] sm:$0xf0] }
 0x222   : > { %3899 = vmatpush.bf16.msra.mxu1 %v6651_v35  ;;  %v6751_v35 = vor.u32 %v7619_v56, %v6748_v57  ;;  %v6815_v11 = vor.u32 %v7635_v58, %v6812_v60  ;;  %v6588_v56 = vld [vmem:[#allocation16 + $0x8] sm:$0xf0]  ;;  %v8996_v57 = vpop.f32.mrf.mxu1 }
 0x223   : > { %3913 = vmatpush.bf16.msra.mxu2 %v6715_v0  ;;  %v7585_v0 = vld [vmem:[#allocation16 + $0x34] sm:$0xf]  ;;  %v6591_v13 = vor.u32 %v7579_v55, %v6588_v56  ;;  %v6882_v56 = vld [vmem:[#allocation19 + $0x150] sm:$0xf] }
 0x224   : > { %3927 = vmatpush.bf16.msra.mxu3 %v6779_v16  ;;  %3886 = vmatmul.bf16.vlgmr.msra.gmra.mxu0 %v8974_v24  ;;  %v6676_v16 = vld [vmem:[#allocation16 + $0xb8] sm:$0xf0] }
 0x225   : > { %3934 = vmatpush.bf16.msrb.mxu0 %v6647_v22  ;;  %3900 = vmatmul.bf16.vlgmr.msra.gmra.mxu1 %v8978_v33  ;;  %v7617_v22 = vld [vmem:[#allocation16 + $0x134] sm:$0xf]  ;;  %v6679_v25 = vor.u32 %v7601_v6, %v6676_v16  ;;  %v7627_v6 = vld [vmem:[#allocation16 + $0x184] sm:$0xf]  ;;  %v6898_v16 = vld [vmem:[#allocation19 + $0x170] sm:$0xf] }
 0x226   : > { %3948 = vmatpush.bf16.msrb.mxu1 %v6711_v10  ;;  %3914 = vmatmul.bf16.vlgmr.msra.gmra.mxu2 %v8976_v26  ;;  %v8986_v10 = vpop.f32.mrf.mxu0  ;;  %v6743_v27 = vor.u32 %v7617_v22, %v6740_v12  ;;  %v7754_v22 = vld [vmem:[#allocation19 + $0x174] sm:$0xf0]  ;;  %v6962_v12 = vld [vmem:[#allocation19 + $0x1f0] sm:$0xf] }
 0x227   : > { %3962 = vmatpush.bf16.msrb.mxu2 %v6775_v15  ;;  %3928 = vmatmul.bf16.vlgmr.msra.gmra.mxu3 %v8980_v38  ;;  %v6615_v15 = vor.u32 %v7585_v0, %v6612_v4  ;;  %v6791_v0 = vor.u32 %v7629_v51, %v6788_v52  ;;  %v6716_v4 = vld [vmem:[#allocation16 + $0x108] sm:$0xf0] }
 0x228   : > { %3976 = vmatpush.bf16.msrb.mxu3 %v6839_v17  ;;  %v7583_v17 = vld [vmem:[#allocation16 + $0x24] sm:$0xf] }
 0x229   : > { %3935 = vmatpush.bf16.msrb.mxu0 %v6639_v30  ;;  %v6732_v30 = vld [vmem:[#allocation16 + $0x128] sm:$0xf0]  ;;  %v6607_v44 = vor.u32 %v7583_v17, %v6604_v29 }
 0x22a   : > { %3949 = vmatpush.bf16.msrb.mxu1 %v6703_v2  ;;  %v7631_v2 = vld [vmem:[#allocation16 + $0x1a4] sm:$0xf]  ;;  %v9000_v59 = vpop.f32.mrf.mxu3  ;;  %v2853_v52 = vpop.f32.mrf.mxu1 }
 0x22b   : > { %3963 = vmatpush.bf16.msrb.mxu2 %v6767_v5  ;;  %v6796_v5 = vld [vmem:[#allocation16 + $0x1a8] sm:$0xf0] }
 0x22c   : > { %3977 = vmatpush.bf16.msrb.mxu3 %v6831_v46  ;;  %v6735_v46 = vor.u32 %v7615_v37, %v6732_v30  ;;  %v6799_v49 = vor.u32 %v7631_v2, %v6796_v5  ;;  %v6899_v30 = vor.u32 %v7754_v22, %v6898_v16  ;;  %v6963_v2 = vor.u32 %v7770_v14, %v6962_v12  ;;  %v7748_v14 = vld [vmem:[#allocation19 + $0x144] sm:$0xf0] }
 0x22d   : > { %3936 = vmatpush.bf16.msrb.mxu0 %v6631_v3  ;;  %v6660_v3 = vld [vmem:[#allocation16 + $0x98] sm:$0xf0] }
 0x22e   : > { %3950 = vmatpush.bf16.msrb.mxu1 %v6695_v40  ;;  %v7613_v40 = vld [vmem:[#allocation16 + $0x114] sm:$0xf]  ;;  %v8994_v53 = vpop.f32.mrf.mxu0  ;;  %v6663_v58 = vor.u32 %v7597_v63, %v6660_v3  ;;  %v7751_v63 = vld [vmem:[#allocation19 + $0x164] sm:$0xf] }
 0x22f   : > { %3964 = vmatpush.bf16.msrb.mxu2 %v6759_v50  ;;  %v6724_v50 = vld [vmem:[#allocation16 + $0x118] sm:$0xf0]  ;;  %v7767_v3 = vld [vmem:[#allocation19 + $0x1e4] sm:$0xf]  ;;  %v2852_v16 = vadd.f32 %v8996_v57, %v8994_v53  ;;  %v1804_v53 = vadd.f32 %v8912_v19, %v8910_v7  ;;  %v7761_v19 = vld [vmem:[#allocation19 + $0x1b4] sm:$0xf] }
 0x230   : > { %3978 = vmatpush.bf16.msrb.mxu3 %v6823_v54  ;;  %v6599_v54 = vor.u32 %v7581_v47, %v6596_v48  ;;  %v6727_v60 = vor.u32 %v7613_v40, %v6724_v50  ;;  %v7768_v48 = vld [vmem:[#allocation19 + $0x1e4] sm:$0xf0]  ;;  %v6956_v40 = vld [vmem:[#allocation19 + $0x1e8] sm:$0xf0]  ;;  %v6868_v7 = vld [vmem:[#allocation19 + $0x138] sm:$0xf0] }
 0x231   : > { %3937 = vmatpush.bf16.msrb.mxu0 %v6623_v61  ;;  %v7595_v61 = vld [vmem:[#allocation16 + $0x84] sm:$0xf] }
 0x232   : > { %3951 = vmatpush.bf16.msrb.mxu1 %v6687_v62  ;;  %v6652_v62 = vld [vmem:[#allocation16 + $0x88] sm:$0xf0] }
 0x233   : > { %3965 = vmatpush.bf16.msrb.mxu2 %v6751_v35  ;;  %v7611_v35 = vld [vmem:[#allocation16 + $0x104] sm:$0xf]  ;;  %v6655_v17 = vor.u32 %v7595_v61, %v6652_v62  ;;  %v6959_v61 = vor.u32 %v7767_v3, %v6956_v40  ;;  %v7766_v62 = vld [vmem:[#allocation19 + $0x1d4] sm:$0xf0]  ;;  %v7745_v40 = vld [vmem:[#allocation19 + $0x134] sm:$0xf] }
 0x234   : > { %3979 = vmatpush.bf16.msrb.mxu3 %v6815_v11  ;;  %v6780_v11 = vld [vmem:[#allocation16 + $0x188] sm:$0xf0]  ;;  %v6719_v29 = vor.u32 %v7611_v35, %v6716_v4  ;;  %v7749_v35 = vld [vmem:[#allocation19 + $0x154] sm:$0xf]  ;;  %v7762_v3 = vld [vmem:[#allocation19 + $0x1b4] sm:$0xf0] }
 0x235   : > { %3938 = vmatpush.bf16.msrb.mxu0 %v6615_v15  ;;  %v7753_v15 = vld [vmem:[#allocation19 + $0x174] sm:$0xf]  ;;  %v6783_v37 = vor.u32 %v7627_v6, %v6780_v11  ;;  %v6948_v6 = vld [vmem:[#allocation19 + $0x1d8] sm:$0xf0] }
 0x236   : > { %3952 = vmatpush.bf16.msrb.mxu1 %v6679_v25  ;;  %v6900_v25 = vld [vmem:[#allocation19 + $0x178] sm:$0xf0]  ;;  %v2839_v50 = vpop.f32.mrf.mxu0  ;;  %v7765_v4 = vld [vmem:[#allocation19 + $0x1d4] sm:$0xf] }
 0x237   : > { %3966 = vmatpush.bf16.msrb.mxu2 %v6743_v27  ;;  %v8998_v27 = vpop.f32.mrf.mxu2  ;;  %v6903_v5 = vor.u32 %v7753_v15, %v6900_v25  ;;  %v6938_v15 = vld [vmem:[#allocation19 + $0x1c0] sm:$0xf]  ;;  %v2881_v25 = vpop.f32.mrf.mxu3 }
 0x238   : > { %3980 = vmatpush.bf16.msrb.mxu3 %v6807_v32  ;;  %v6964_v32 = vld [vmem:[#allocation19 + $0x1f8] sm:$0xf0] }
 0x239   : > { %3939 = vmatpush.bf16.msrb.mxu0 %v6607_v44  ;;  %v6890_v44 = vld [vmem:[#allocation19 + $0x160] sm:$0xf]  ;;  %v6967_v47 = vor.u32 %v7769_v42, %v6964_v32  ;;  %v7763_v42 = vld [vmem:[#allocation19 + $0x1c4] sm:$0xf]  ;;  %v6940_v32 = vld [vmem:[#allocation19 + $0x1c8] sm:$0xf0] }
 0x23a   : > { %3953 = vmatpush.bf16.msrb.mxu1 %v6671_v41  ;;  %v7752_v41 = vld [vmem:[#allocation19 + $0x164] sm:$0xf0] }
 0x23b   : > { %3967 = vmatpush.bf16.msrb.mxu2 %v6735_v46  ;;  %v6954_v46 = vld [vmem:[#allocation19 + $0x1e0] sm:$0xf]  ;;  %v6891_v51 = vor.u32 %v7752_v41, %v6890_v44  ;;  %v6866_v41 = vld [vmem:[#allocation19 + $0x130] sm:$0xf] }
 0x23c   : > { %3981 = vmatpush.bf16.msrb.mxu3 %v6799_v49  ;;  %v6892_v49 = vld [vmem:[#allocation19 + $0x168] sm:$0xf0] }
 0x23d   : > { %3940 = vmatpush.bf16.msrb.mxu0 %v6599_v54  ;;  %v6955_v54 = vor.u32 %v7768_v48, %v6954_v46  ;;  %v6895_v55 = vor.u32 %v7751_v63, %v6892_v49  ;;  %v7746_v46 = vld [vmem:[#allocation19 + $0x134] sm:$0xf0]  ;;  %v6943_v63 = vor.u32 %v7763_v42, %v6940_v32 }
 0x23e   : > { %3954 = vmatpush.bf16.msrb.mxu1 %v6663_v58  ;;  %v7750_v58 = vld [vmem:[#allocation19 + $0x154] sm:$0xf0] }
 0x23f   : > { %3968 = vmatpush.bf16.msrb.mxu2 %v6727_v60  ;;  %v6946_v60 = vld [vmem:[#allocation19 + $0x1d0] sm:$0xf]  ;;  %v6883_v11 = vor.u32 %v7750_v58, %v6882_v56  ;;  %v2867_v22 = vpop.f32.mrf.mxu2  ;;  %v6871_v56 = vor.u32 %v7745_v40, %v6868_v7  ;;  %v7756_v40 = vld [vmem:[#allocation19 + $0x184] sm:$0xf0]  ;;  %v7739_v7 = vld [vmem:[#allocation19 + $0x104] sm:$0xf] }
 0x240   : > { %3982 = vmatpush.bf16.msrb.mxu3 %v6791_v0  ;;  %v6884_v0 = vld [vmem:[#allocation19 + $0x158] sm:$0xf0] }
 0x241   : > { %3941 = vmatpush.bf16.msrb.mxu0 %v6591_v13  ;;  %v6887_v12 = vor.u32 %v7749_v35, %v6884_v0  ;;  %v6874_v13 = vld [vmem:[#allocation19 + $0x140] sm:$0xf] }
 0x242   : > { %3955 = vmatpush.bf16.msrb.mxu1 %v6655_v17  ;;  %v7764_v17 = vld [vmem:[#allocation19 + $0x1c4] sm:$0xf0]  ;;  %v6875_v57 = vor.u32 %v7748_v14, %v6874_v13  ;;  %v2907_v44 = vpop.f32.mrf.mxu1 }
 0x243   : > { %3969 = vmatpush.bf16.msrb.mxu2 %v6719_v29  ;;  %v7747_v29 = vld [vmem:[#allocation19 + $0x144] sm:$0xf] }
 0x244   : > { %3983 = vmatpush.bf16.msrb.mxu3 %v6783_v37  ;;  %3942 = vmatmul.bf16.vlgmr.msrb.gmra.mxu0 %v8974_v24  ;;  %v6947_v24 = vor.u32 %v7766_v62, %v6946_v60  ;;  %v2893_v37 = vpop.f32.mrf.mxu0  ;;  %v6858_v60 = vld [vmem:[#allocation19 + $0x120] sm:$0xf] }
 0x245   : > { %4232 = vmatpush.bf16.msra.mxu0 %v6899_v30  ;;  %3956 = vmatmul.bf16.vlgmr.msrb.gmra.mxu1 %v8978_v33  ;;  %v2854_v33 = vadd.f32 %v2853_v52, %v2839_v50  ;;  %v2866_v30 = vadd.f32 %v8998_v27, %v2852_v16  ;;  %v2908_v49 = vadd.f32 %v2907_v44, %v2893_v37  ;;  %v6932_v50 = vld [vmem:[#allocation19 + $0x1b8] sm:$0xf0]  ;;  %v9015_v27 = vld [vmem:[%s9237_s6] sm:$0x3]  ;;  %v6860_v16 = vld [vmem:[#allocation19 + $0x128] sm:$0xf0] }
 0x246   : > { %4246 = vmatpush.bf16.msra.mxu1 %v6963_v2  ;;  %3970 = vmatmul.bf16.vlgmr.msrb.gmra.mxu2 %v8976_v26  ;;  %v6951_v26 = vor.u32 %v7765_v4, %v6948_v6  ;;  %v6939_v2 = vor.u32 %v7764_v17, %v6938_v15  ;;  %v6867_v52 = vor.u32 %v7746_v46, %v6866_v41  ;;  %v6922_v62 = vld [vmem:[#allocation19 + $0x1a0] sm:$0xf]  ;;  %v7760_v6 = vld [vmem:[#allocation19 + $0x1a4] sm:$0xf0]  ;;  %v6850_v17 = vld [vmem:[#allocation19 + $0x110] sm:$0xf] }
 0x247   : > { %4260 = vmatpush.bf16.msra.mxu2 %v6903_v5  ;;  %3984 = vmatmul.bf16.vlgmr.msrb.gmra.mxu3 %v8980_v38  ;;  %v6876_v38 = vld [vmem:[#allocation19 + $0x148] sm:$0xf0]  ;;  %v2868_v48 = vadd.f32 %v2867_v22, %v2854_v33  ;;  %v7759_v22 = vld [vmem:[#allocation19 + $0x1a4] sm:$0xf]  ;;  %v6923_v33 = vor.u32 %v7760_v6, %v6922_v62  ;;  %v7741_v37 = vld [vmem:[#allocation19 + $0x114] sm:$0xf] }
 0x248   : > { %4274 = vmatpush.bf16.msra.mxu3 %v6967_v47  ;;  %v6879_v5 = vor.u32 %v7747_v29, %v6876_v38  ;;  %v6930_v47 = vld [vmem:[#allocation19 + $0x1b0] sm:$0xf]  ;;  %v7742_v29 = vld [vmem:[#allocation19 + $0x114] sm:$0xf0]  ;;  %v6842_v41 = vld [vmem:[#allocation19 + $0x100] sm:$0xf] }
 0x249   : > { %4233 = vmatpush.bf16.msra.mxu0 %v6891_v51  ;;  %v1818_v51 = vadd.f32 %v8918_v28, %v1804_v53  ;;  %v2921_v58 = vpop.f32.mrf.mxu2  ;;  %v2882_v35 = vadd.f32 %v2881_v25, %v2868_v48  ;;  %v6935_v28 = vor.u32 %v7761_v19, %v6932_v50  ;;  %v6914_v38 = vld [vmem:[#allocation19 + $0x190] sm:$0xf]  ;;  %v6851_v44 = vor.u32 %v7742_v29, %v6850_v17  ;;  %v7740_v46 = vld [vmem:[#allocation19 + $0x104] sm:$0xf0]  ;;  %v7082_v17 = vld [vmem:[#allocation19 + $0xe0] sm:$0xf] }
 0x24a   : > { %4247 = vmatpush.bf16.msra.mxu1 %v6955_v54  ;;  %v2880_v54 = vadd.f32 %v9000_v59, %v2866_v30  ;;  %v2922_v0 = vadd.f32 %v2921_v58, %v2908_v49  ;;  %v2935_v4 = vpop.f32.mrf.mxu3  ;;  %v6852_v30 = vld [vmem:[#allocation19 + $0x118] sm:$0xf0]  ;;  %v7026_v58 = vld [vmem:[#allocation19 + $0x70] sm:$0xf] }
 0x24b   : > { %4261 = vmatpush.bf16.msra.mxu2 %v6895_v55  ;;  %v6931_v55 = vor.u32 %v7762_v3, %v6930_v47  ;;  %v1832_v59 = vadd.f32 %v8920_v39, %v1818_v51  ;;  %v6906_v3 = vld [vmem:[#allocation19 + $0x180] sm:$0xf] }
 0x24c   : > { %4275 = vmatpush.bf16.msra.mxu3 %v6959_v61  ;;  %v7744_v61 = vld [vmem:[#allocation19 + $0x124] sm:$0xf0]  ;;  %v2895_v14 = vpop.f32.mrf.mxu0  ;;  %v2940_v15 = vadd.f32 %v2880_v54, %v8908_v23  ;;  %v2936_v32 = vadd.f32 %v2935_v4, %v2922_v0  ;;  %v2947_v23 = vperm.slane %v9015_v27, 1  ;;  %v6844_v54 = vld [vmem:[#allocation19 + $0x108] sm:$0xf0] }
 0x24d   : > { %4234 = vmatpush.bf16.msra.mxu0 %v6883_v11  ;;  %v7743_v11 = vld [vmem:[#allocation19 + $0x124] sm:$0xf]  ;;  %v6859_v13 = vor.u32 %v7744_v61, %v6858_v60  ;;  %v2942_v42 = vadd.f32 %v2882_v35, %v1832_v59  ;;  %v7722_v60 = vld [vmem:[#allocation19 + $0x74] sm:$0xf0]  ;;  %v7090_v61 = vld [vmem:[#allocation19 + $0xf0] sm:$0xf]  ;;  %v6843_v35 = vor.u32 %v7740_v46, %v6842_v41 }
 0x24e   : > { %4248 = vmatpush.bf16.msra.mxu1 %v6947_v24  ;;  %v6924_v24 = vld [vmem:[#allocation19 + $0x1a8] sm:$0xf0]  ;;  %v6863_v25 = vor.u32 %v7743_v11, %v6860_v16  ;;  %v2941_v50 = vadd.f32 %v2936_v32, %v8922_v20  ;;  %v7721_v0 = vld [vmem:[#allocation19 + $0x74] sm:$0xf]  ;;  %v7028_v4 = vld [vmem:[#allocation19 + $0x78] sm:$0xf0]  ;;  %v6907_v20 = vor.u32 %v7756_v40, %v6906_v3  ;;  %v6847_v11 = vor.u32 %v7739_v7, %v6844_v54 }
 0x24f   : > { %4262 = vmatpush.bf16.msra.mxu2 %v6887_v12  ;;  %v2946_v12 = vperm.slane %v9015_v27, 0  ;;  %v6927_v53 = vor.u32 %v7759_v22, %v6924_v24  ;;  %v7737_v22 = vld [vmem:[#allocation19 + $0xf4] sm:$0xf]  ;;  %v7092_v24 = vld [vmem:[#allocation19 + $0xf8] sm:$0xf0] }
 0x250   : > { %4276 = vmatpush.bf16.msra.mxu3 %v6951_v26  ;;  %v2909_v26 = vpop.f32.mrf.mxu1  ;;  %v7719_v32 = vld [vmem:[#allocation19 + $0x64] sm:$0xf]  ;;  %v7718_v41 = vld [vmem:[#allocation19 + $0x54] sm:$0xf0]  ;;  %v7074_v46 = vld [vmem:[#allocation19 + $0xd0] sm:$0xf] }
 0x251   : > { %4235 = vmatpush.bf16.msra.mxu0 %v6875_v57  ;;  %v2910_v39 = vadd.f32 %v2909_v26, %v2895_v14  ;;  %v7758_v57 = vld [vmem:[#allocation19 + $0x194] sm:$0xf0]  ;;  %v2950_v47 = vadd.f32 %v2946_v12, %v2940_v15  ;;  %v2923_v49 = vpop.f32.mrf.mxu2  ;;  %v2952_v19 = vadd.f32 %v2946_v12, %v2942_v42  ;;  %v2951_v12 = vadd.f32 %v2947_v23, %v2941_v50  ;;  %v7720_v26 = vld [vmem:[#allocation19 + $0x64] sm:$0xf0]  ;;  %v7012_v3 = vld [vmem:[#allocation19 + $0x58] sm:$0xf0] }
 0x252   : > { %4249 = vmatpush.bf16.msra.mxu1 %v6939_v2  ;;  %v7757_v2 = vld [vmem:[#allocation19 + $0x194] sm:$0xf]  ;;  %v6915_v48 = vor.u32 %v7758_v57, %v6914_v38  ;;  %v2937_v27 = vpop.f32.mrf.mxu3  ;;  %v7027_v14 = vor.u32 %v7722_v60, %v7026_v58  ;;  %v7095_v38 = vor.u32 %v7737_v22, %v7092_v24  ;;  %v7736_v42 = vld [vmem:[#allocation19 + $0xe4] sm:$0xf0]  ;;  %v7084_v57 = vld [vmem:[#allocation19 + $0xe8] sm:$0xf0] }
 0x253   : > { %4263 = vmatpush.bf16.msra.mxu2 %v6879_v5  ;;  %v6916_v5 = vld [vmem:[#allocation19 + $0x198] sm:$0xf0]  ;;  %v2954_v6 = vmax.f32 %v2950_v47, 0.0  ;;  %v2956_v59 = vmax.f32 %v2952_v19, 0.0  ;;  %v7733_v40 = vld [vmem:[#allocation19 + $0xd4] sm:$0xf] }
 0x254   : > { %4277 = vmatpush.bf16.msra.mxu3 %v6943_v63  ;;  %v6855_v63 = vor.u32 %v7741_v37, %v6852_v30  ;;  %v6919_v51 = vor.u32 %v7757_v2, %v6916_v5  ;;  %v2955_v30 = vmax.f32 %v2951_v12, 0.0  ;;  %v7083_v5 = vor.u32 %v7736_v42, %v7082_v17  ;;  %v7076_v7 = vld [vmem:[#allocation19 + $0xd8] sm:$0xf0]  ;;  %v7066_v54 = vld [vmem:[#allocation19 + $0xc0] sm:$0xf] }
 0x255   : > { %4236 = vmatpush.bf16.msra.mxu0 %v6867_v52  ;;  %v2924_v52 = vadd.f32 %v2923_v49, %v2910_v39  ;;  %v7735_v39 = vld [vmem:[#allocation19 + $0xe4] sm:$0xf]  ;;  %v4038_v37 = vpack.c.bf16 %v2956_v59, %v2954_v6  ;;  %v7717_v49 = vld [vmem:[#allocation19 + $0x54] sm:$0xf]  ;;  %v7732_v58 = vld [vmem:[#allocation19 + $0xc4] sm:$0xf0] }
 0x256   : > { %4250 = vmatpush.bf16.msra.mxu1 %v6931_v55  ;;  %v7755_v55 = vld [vmem:[#allocation19 + $0x184] sm:$0xf]  ;;  %v7730_v22 = vld [vmem:[#allocation19 + $0xb4] sm:$0xf0]  ;;  %v7713_v24 = vld [vmem:[#allocation19 + $0x34] sm:$0xf] }
 0x257   : > { %4264 = vmatpush.bf16.msra.mxu2 %v6871_v56  ;;  %v6908_v56 = vld [vmem:[#allocation19 + $0x188] sm:$0xf0]  ;;  %v2938_v62 = vadd.f32 %v2937_v27, %v2924_v52  ;;  %v7002_v52 = vld [vmem:[#allocation19 + $0x40] sm:$0xf]  ;;  %v7716_v27 = vld [vmem:[#allocation19 + $0x44] sm:$0xf0] }
 0x258   : > { %4278 = vmatpush.bf16.msra.mxu3 %v6935_v28  ;;  %v7738_v28 = vld [vmem:[#allocation19 + $0xf4] sm:$0xf0]  ;;  %v6911_v16 = vor.u32 %v7755_v55, %v6908_v56  ;;  %v2376_v55 = vadd.f32 %v8988_v18, %v8986_v10  ;;  %v7079_v56 = vor.u32 %v7733_v40, %v7076_v7  ;;  %v7715_v60 = vld [vmem:[#allocation19 + $0x44] sm:$0xf]  ;;  %v7058_v10 = vld [vmem:[#allocation19 + $0xb0] sm:$0xf] }
 0x259   : > { %4237 = vmatpush.bf16.msra.mxu0 %v6859_v13  ;;  %v2943_v13 = vadd.f32 %v2938_v62, %v8924_v1  ;;  %v7091_v15 = vor.u32 %v7738_v28, %v7090_v61  ;;  %v7004_v61 = vld [vmem:[#allocation19 + $0x48] sm:$0xf0]  ;;  %v7731_v62 = vld [vmem:[#allocation19 + $0xc4] sm:$0xf]  ;;  %v1748_v28 = vadd.f32 %v8898_v9, %v8896_v8  ;;  %v6996_v59 = vld [vmem:[#allocation19 + $0x38] sm:$0xf0] }
 0x25a   : > { %4251 = vmatpush.bf16.msra.mxu1 %v6923_v33  ;;  %v7031_v33 = vor.u32 %v7721_v0, %v7028_v4  ;;  %v7003_v0 = vor.u32 %v7716_v27, %v7002_v52  ;;  %v7067_v4 = vor.u32 %v7732_v58, %v7066_v54  ;;  %v7007_v6 = vor.u32 %v7715_v60, %v7004_v61  ;;  %v7729_v12 = vld [vmem:[#allocation19 + $0xb4] sm:$0xf]  ;;  %v6988_v42 = vld [vmem:[#allocation19 + $0x28] sm:$0xf0]  ;;  %v7708_v7 = vld [vmem:[#allocation19 + $0x4] sm:$0xf0] }
 0x25b   : > { %4265 = vmatpush.bf16.msra.mxu2 %v6863_v25  ;;  %v7018_v25 = vld [vmem:[#allocation19 + $0x60] sm:$0xf]  ;;  %v2953_v29 = vadd.f32 %v2947_v23, %v2943_v13  ;;  %v7010_v23 = vld [vmem:[#allocation19 + $0x50] sm:$0xf]  ;;  %v2390_v18 = vadd.f32 %v8990_v45, %v2376_v55  ;;  %v7060_v13 = vld [vmem:[#allocation19 + $0xb8] sm:$0xf0]  ;;  %v1762_v8 = vadd.f32 %v8904_v31, %v1748_v28 }
 0x25c   : > { %4279 = vmatpush.bf16.msra.mxu3 %v6927_v53  ;;  %v7020_v53 = vld [vmem:[#allocation19 + $0x68] sm:$0xf0]  ;;  %v7019_v1 = vor.u32 %v7720_v26, %v7018_v25  ;;  %v7011_v19 = vor.u32 %v7718_v41, %v7010_v23  ;;  %v7712_v25 = vld [vmem:[#allocation19 + $0x24] sm:$0xf0]  ;;  %v7050_v26 = vld [vmem:[#allocation19 + $0xa0] sm:$0xf]  ;;  %v7063_v17 = vor.u32 %v7729_v12, %v7060_v13 }
 0x25d   : > { %4238 = vmatpush.bf16.msra.mxu0 %v6851_v44  ;;  %v2957_v2 = vmax.f32 %v2953_v29, 0.0  ;;  %v7023_v44 = vor.u32 %v7719_v32, %v7020_v53  ;;  %v2404_v45 = vadd.f32 %v8992_v43, %v2390_v18  ;;  %v7728_v29 = vld [vmem:[#allocation19 + $0xa4] sm:$0xf0]  ;;  %v7727_v32 = vld [vmem:[#allocation19 + $0xa4] sm:$0xf]  ;;  %v1776_v31 = vadd.f32 %v8906_v36, %v1762_v8 }
 0x25e   : > { %4252 = vmatpush.bf16.msra.mxu1 %v6915_v48  ;;  %v7087_v48 = vor.u32 %v7735_v39, %v7084_v57  ;;  %v7052_v53 = vld [vmem:[#allocation19 + $0xa8] sm:$0xf0]  ;;  %v7051_v57 = vor.u32 %v7728_v29, %v7050_v26  ;;  %v7709_v23 = vld [vmem:[#allocation19 + $0x14] sm:$0xf]  ;;  %v6980_v41 = vld [vmem:[#allocation19 + $0x18] sm:$0xf0] }
 0x25f   : > { %4266 = vmatpush.bf16.msra.mxu2 %v6855_v63  ;;  %v4039_v47 = vpack.c.bf16 %v2957_v2, %v2955_v30  ;;  %v7734_v63 = vld [vmem:[#allocation19 + $0xd4] sm:$0xf0]  ;;  %v6978_v30 = vld [vmem:[#allocation19 + $0x10] sm:$0xf]  ;;  %v7055_v43 = vor.u32 %v7727_v32, %v7052_v53  ;;  %v7966_v36 = vld [vmem:[%s9236_s7] sm:$0x3]  ;;  %v6983_v40 = vor.u32 %v7709_v23, %v6980_v41 }
 0x260   : > { %4280 = vmatpush.bf16.msra.mxu3 %v6919_v51  ;;  %v7075_v50 = vor.u32 %v7734_v63, %v7074_v46  ;;  %v7015_v51 = vor.u32 %v7717_v49, %v7012_v3  ;;  %v7710_v2 = vld [vmem:[#allocation19 + $0x14] sm:$0xf0]  ;;  %v7725_v46 = vld [vmem:[#allocation19 + $0x94] sm:$0xf]  ;;  %v6970_v49 = vld [vmem:[#allocation19] sm:$0xf] }
 0x261   : > { %4239 = vmatpush.bf16.msra.mxu0 %v6843_v35  ;;  %v7068_v35 = vld [vmem:[#allocation19 + $0xc8] sm:$0xf0]  ;;  %v6979_v63 = vor.u32 %v7710_v2, %v6978_v30  ;;  %v7707_v27 = vld [vmem:[#allocation19 + $0x4] sm:$0xf]  ;;  %v7154_v58 = vld [vmem:[#allocation19 + $0x270] sm:$0xf] }
 0x262   : > { %4253 = vmatpush.bf16.msra.mxu1 %v6907_v20  ;;  %v6994_v20 = vld [vmem:[#allocation19 + $0x30] sm:$0xf]  ;;  %v6972_v54 = vld [vmem:[#allocation19 + $0x8] sm:$0xf0]  ;;  %v7723_v55 = vld [vmem:[#allocation19 + $0x84] sm:$0xf]  ;;  %v9038_v13 = vpop.f32.mrf.mxu1 }
 0x263   : > { %4267 = vmatpush.bf16.msra.mxu2 %v6847_v11  ;;  %v7714_v11 = vld [vmem:[#allocation19 + $0x34] sm:$0xf0]  ;;  %v7156_v28 = vld [vmem:[#allocation19 + $0x278] sm:$0xf0]  ;;  %v7146_v18 = vld [vmem:[#allocation19 + $0x260] sm:$0xf] }
 0x264   : > { %4281 = vmatpush.bf16.msra.mxu3 %v6911_v16  ;;  %4240 = vmatmul.bf16.vlgmr.msra.gmra.mxu0 %v4038_v37  ;;  %v7071_v16 = vor.u32 %v7731_v62, %v7068_v35  ;;  %v6995_v9 = vor.u32 %v7714_v11, %v6994_v20  ;;  %v7786_v60 = vld [vmem:[#allocation19 + $0x274] sm:$0xf0]  ;;  %v6971_v62 = vor.u32 %v7708_v7, %v6970_v49  ;;  %v7785_v35 = vld [vmem:[#allocation19 + $0x274] sm:$0xf]  ;;  %v7140_v29 = vld [vmem:[#allocation19 + $0x258] sm:$0xf0] }
 0x265   : > { %4448 = vmatpush.bf16.msrb.mxu0 %v7027_v14  ;;  %4254 = vmatmul.bf16.vlgmr.msra.gmra.mxu1 %v4039_v47  ;;  %v7059_v14 = vor.u32 %v7730_v22, %v7058_v10  ;;  %v7155_v11 = vor.u32 %v7786_v60, %v7154_v58  ;;  %v7159_v10 = vor.u32 %v7785_v35, %v7156_v28  ;;  %v7781_v26 = vld [vmem:[#allocation19 + $0x254] sm:$0xf]  ;;  %v7780_v32 = vld [vmem:[#allocation19 + $0x244] sm:$0xf0]  ;;  %v7779_v53 = vld [vmem:[#allocation19 + $0x244] sm:$0xf] }
 0x266   : > { %4462 = vmatpush.bf16.msrb.mxu1 %v7091_v15  ;;  %4268 = vmatmul.bf16.vlgmr.msra.gmra.mxu2 %v4038_v37  ;;  %v6999_v15 = vor.u32 %v7713_v24, %v6996_v59  ;;  %v7783_v24 = vld [vmem:[#allocation19 + $0x264] sm:$0xf]  ;;  %v7148_v59 = vld [vmem:[#allocation19 + $0x268] sm:$0xf0]  ;;  %v7122_v30 = vld [vmem:[#allocation19 + $0x230] sm:$0xf] }
 0x267   : > { %4476 = vmatpush.bf16.msrb.mxu2 %v7031_v33  ;;  %4282 = vmatmul.bf16.vlgmr.msra.gmra.mxu3 %v4039_v47  ;;  %v6986_v33 = vld [vmem:[#allocation19 + $0x20] sm:$0xf]  ;;  %v7044_v47 = vld [vmem:[#allocation19 + $0x98] sm:$0xf0]  ;;  %v7778_v2 = vld [vmem:[#allocation19 + $0x234] sm:$0xf0] }
 0x268   : > { %4490 = vmatpush.bf16.msrb.mxu3 %v7095_v38  ;;  %v7711_v38 = vld [vmem:[#allocation19 + $0x24] sm:$0xf]  ;;  %v6987_v39 = vor.u32 %v7712_v25, %v6986_v33  ;;  %v7047_v52 = vor.u32 %v7725_v46, %v7044_v47  ;;  %v7138_v33 = vld [vmem:[#allocation19 + $0x250] sm:$0xf]  ;;  %v7782_v25 = vld [vmem:[#allocation19 + $0x254] sm:$0xf0] }
 0x269   : > { %4449 = vmatpush.bf16.msrb.mxu0 %v7019_v1  ;;  %v6991_v37 = vor.u32 %v7711_v38, %v6988_v42  ;;  %v7042_v1 = vld [vmem:[#allocation19 + $0x90] sm:$0xf]  ;;  %v7143_v42 = vor.u32 %v7781_v26, %v7140_v29  ;;  %v7124_v23 = vld [vmem:[#allocation19 + $0x238] sm:$0xf0]  ;;  %v7114_v47 = vld [vmem:[#allocation19 + $0x220] sm:$0xf] }
 0x26a   : > { %4463 = vmatpush.bf16.msrb.mxu1 %v7083_v5  ;;  %v2409_v5 = vadd.f32 %v2404_v45, %v1776_v31  ;;  %v9048_v38 = vpop.f32.mrf.mxu1  ;;  %v7116_v49 = vld [vmem:[#allocation19 + $0x228] sm:$0xf0]  ;;  %v7106_v7 = vld [vmem:[#allocation19 + $0x210] sm:$0xf]  ;;  %v7098_v58 = vld [vmem:[#allocation19 + $0x200] sm:$0xf] }
 0x26b   : > { %4477 = vmatpush.bf16.msrb.mxu2 %v7023_v44  ;;  %v7726_v44 = vld [vmem:[#allocation19 + $0x94] sm:$0xf0]  ;;  %v7772_v60 = vld [vmem:[#allocation19 + $0x204] sm:$0xf0]  ;;  %v7100_v35 = vld [vmem:[#allocation19 + $0x208] sm:$0xf0] }
 0x26c   : > { %4491 = vmatpush.bf16.msrb.mxu3 %v7087_v48  ;;  %v2413_v48 = vperm.slane %v7966_v36, 1  ;;  %v7043_v3 = vor.u32 %v7726_v44, %v7042_v1  ;;  %v7777_v44 = vld [vmem:[#allocation19 + $0x234] sm:$0xf]  ;;  %v7776_v36 = vld [vmem:[#allocation19 + $0x224] sm:$0xf0] }
 0x26d   : > { %4450 = vmatpush.bf16.msrb.mxu0 %v7011_v19  ;;  %v7034_v19 = vld [vmem:[#allocation19 + $0x80] sm:$0xf]  ;;  %v7127_v46 = vor.u32 %v7777_v44, %v7124_v23  ;;  %v7218_v28 = vld [vmem:[#allocation19 + $0x2f0] sm:$0xf]  ;;  %v7797_v29 = vld [vmem:[#allocation19 + $0x2d4] sm:$0xf] }
 0x26e   : > { %4464 = vmatpush.bf16.msrb.mxu1 %v7075_v50  ;;  %v7724_v50 = vld [vmem:[#allocation19 + $0x84] sm:$0xf0]  ;;  %v2417_v61 = vadd.f32 %v2413_v48, %v8964_v34  ;;  %v9036_v34 = vpop.f32.mrf.mxu0  ;;  %v7202_v26 = vld [vmem:[#allocation19 + $0x2d0] sm:$0xf] }
 0x26f   : > { %4478 = vmatpush.bf16.msrb.mxu2 %v7015_v51  ;;  %v2419_v51 = vadd.f32 %v2413_v48, %v2409_v5  ;;  %v7775_v48 = vld [vmem:[#allocation19 + $0x224] sm:$0xf] }
 0x270   : > { %4492 = vmatpush.bf16.msrb.mxu3 %v7079_v56  ;;  %v7036_v56 = vld [vmem:[#allocation19 + $0x88] sm:$0xf0]  ;;  %v2421_v22 = vmax.f32 %v2417_v61, 0.0  ;;  %v7771_v61 = vld [vmem:[#allocation19 + $0x204] sm:$0xf] }
 0x271   : > { %4451 = vmatpush.bf16.msrb.mxu0 %v7003_v0  ;;  %v7035_v0 = vor.u32 %v7724_v50, %v7034_v19  ;;  %v7039_v20 = vor.u32 %v7723_v55, %v7036_v56  ;;  %v7774_v19 = vld [vmem:[#allocation19 + $0x214] sm:$0xf0]  ;;  %v7773_v50 = vld [vmem:[#allocation19 + $0x214] sm:$0xf] }
 0x272   : > { %4465 = vmatpush.bf16.msrb.mxu1 %v7067_v4  ;;  %v6975_v4 = vor.u32 %v7707_v27, %v6972_v54  ;;  %v7108_v27 = vld [vmem:[#allocation19 + $0x218] sm:$0xf0] }
 0x273   : > { %4479 = vmatpush.bf16.msrb.mxu2 %v7007_v6  ;;  %v2423_v6 = vmax.f32 %v2419_v51, 0.0  ;;  %v7111_v54 = vor.u32 %v7773_v50, %v7108_v27  ;;  %v9081_v50 = vld [vmem:[%s9238_s0] sm:$0x3]  ;;  %v7792_v27 = vld [vmem:[#allocation19 + $0x2a4] sm:$0xf0] }
 0x274   : > { %4493 = vmatpush.bf16.msrb.mxu3 %v7071_v16  ;;  %v7784_v16 = vld [vmem:[#allocation19 + $0x264] sm:$0xf0] }
 0x275   : > { %4452 = vmatpush.bf16.msrb.mxu0 %v6995_v9  ;;  %v4005_v12 = vpack.c.bf16 %v2423_v6, %v2421_v22  ;;  %v7147_v8 = vor.u32 %v7784_v16, %v7146_v18  ;;  %v7151_v9 = vor.u32 %v7783_v24, %v7148_v59  ;;  %v7210_v16 = vld [vmem:[#allocation19 + $0x2e0] sm:$0xf]  ;;  %v7800_v22 = vld [vmem:[#allocation19 + $0x2e4] sm:$0xf0]  ;;  %v7799_v24 = vld [vmem:[#allocation19 + $0x2e4] sm:$0xf] }
 0x276   : > { %4466 = vmatpush.bf16.msrb.mxu1 %v7059_v14  ;;  %v9042_v14 = vpop.f32.mrf.mxu2  ;;  %v9046_v45 = vpop.f32.mrf.mxu0  ;;  %v7211_v59 = vor.u32 %v7800_v22, %v7210_v16  ;;  %v7172_v16 = vld [vmem:[#allocation19 + $0x298] sm:$0xf0] }
 0x277   : > { %4480 = vmatpush.bf16.msrb.mxu2 %v6999_v15  ;;  %v9044_v15 = vpop.f32.mrf.mxu3 }
 0x278   : > { %4494 = vmatpush.bf16.msrb.mxu3 %v7063_v17  ;;  %v7139_v17 = vor.u32 %v7782_v25, %v7138_v33 }
 0x279   : > { %4453 = vmatpush.bf16.msrb.mxu0 %v6987_v39  ;;  %v7132_v39 = vld [vmem:[#allocation19 + $0x248] sm:$0xf0] }
 0x27a   : > { %4467 = vmatpush.bf16.msrb.mxu1 %v7051_v57  ;;  %v7135_v57 = vor.u32 %v7779_v53, %v7132_v39 }
 0x27b   : > { %4481 = vmatpush.bf16.msrb.mxu2 %v6991_v37 }
 0x27c   : > { %4495 = vmatpush.bf16.msrb.mxu3 %v7055_v43  ;;  %v7123_v43 = vor.u32 %v7778_v2, %v7122_v30  ;;  %v7796_v30 = vld [vmem:[#allocation19 + $0x2c4] sm:$0xf0]  ;;  %v7795_v2 = vld [vmem:[#allocation19 + $0x2c4] sm:$0xf] }
 0x27d   : > { %4454 = vmatpush.bf16.msrb.mxu0 %v6979_v63  ;;  %v7115_v63 = vor.u32 %v7776_v36, %v7114_v47 }
 0x27e   : > { %4468 = vmatpush.bf16.msrb.mxu1 %v7043_v3  ;;  %v9050_v37 = vpop.f32.mrf.mxu2  ;;  %v7119_v3 = vor.u32 %v7775_v48, %v7116_v49  ;;  %v7794_v48 = vld [vmem:[#allocation19 + $0x2b4] sm:$0xf0]  ;;  %v7188_v49 = vld [vmem:[#allocation19 + $0x2b8] sm:$0xf0] }
 0x27f   : > { %4482 = vmatpush.bf16.msrb.mxu2 %v6983_v40  ;;  %v9052_v1 = vpop.f32.mrf.mxu3 }
 0x280   : > { %4496 = vmatpush.bf16.msrb.mxu3 %v7047_v52  ;;  %v7107_v52 = vor.u32 %v7774_v19, %v7106_v7 }
 0x281   : > { %4455 = vmatpush.bf16.msrb.mxu0 %v6971_v62  ;;  %v9054_v5 = vpop.f32.mrf.mxu0  ;;  %v7099_v62 = vor.u32 %v7772_v60, %v7098_v58  ;;  %v7180_v60 = vld [vmem:[#allocation19 + $0x2a8] sm:$0xf0] }
 0x282   : > { %4469 = vmatpush.bf16.msrb.mxu1 %v7035_v0  ;;  %v9056_v41 = vpop.f32.mrf.mxu1  ;;  %v7802_v0 = vld [vmem:[#allocation19 + $0x2f4] sm:$0xf0] }
 0x283   : > { %4483 = vmatpush.bf16.msrb.mxu2 %v6975_v4  ;;  %v7103_v4 = vor.u32 %v7771_v61, %v7100_v35  ;;  %v7219_v6 = vor.u32 %v7802_v0, %v7218_v28 }
 0x284   : > { %4497 = vmatpush.bf16.msrb.mxu3 %v7039_v20  ;;  %4456 = vmatmul.bf16.vlgmr.msrb.gmra.mxu0 %v8957_v21  ;;  %v7801_v20 = vld [vmem:[#allocation19 + $0x2f4] sm:$0xf] }
 0x285   : > { %4698 = vmatpush.bf16.msra.mxu0 %v7155_v11  ;;  %4470 = vmatmul.bf16.vlgmr.msrb.gmra.mxu1 %v4005_v12  ;;  %v7220_v11 = vld [vmem:[#allocation19 + $0x2f8] sm:$0xf0] }
 0x286   : > { %4484 = vmatmul.bf16.vlgmr.msrb.gmra.mxu2 %v8957_v21  ;;  %v7130_v21 = vld [vmem:[#allocation19 + $0x240] sm:$0xf]  ;;  %v7223_v18 = vor.u32 %v7801_v20, %v7220_v11  ;;  %4712 = vmatpush.bf16.msra.mxu1 %v7219_v6  ;;  %v7170_v20 = vld [vmem:[#allocation19 + $0x290] sm:$0xf]  ;;  %v7790_v11 = vld [vmem:[#allocation19 + $0x294] sm:$0xf0] }
 0x287   : > { %4726 = vmatpush.bf16.msra.mxu2 %v7159_v10  ;;  %4498 = vmatmul.bf16.vlgmr.msrb.gmra.mxu3 %v4005_v12  ;;  %v7131_v31 = vor.u32 %v7780_v32, %v7130_v21  ;;  %v3450_v10 = vadd.f32 %v9038_v13, %v9036_v34  ;;  %v7212_v12 = vld [vmem:[#allocation19 + $0x2e8] sm:$0xf0]  ;;  %v3452_v34 = vadd.f32 %v9048_v38, %v9046_v45  ;;  %v7204_v32 = vld [vmem:[#allocation19 + $0x2d8] sm:$0xf0] }
 0x288   : > { %4740 = vmatpush.bf16.msra.mxu3 %v7223_v18  ;;  %v7196_v38 = vld [vmem:[#allocation19 + $0x2c8] sm:$0xf0]  ;;  %v7171_v18 = vor.u32 %v7790_v11, %v7170_v20 }
 0x289   : > { %4699 = vmatpush.bf16.msra.mxu0 %v7147_v8  ;;  %v9058_v40 = vpop.f32.mrf.mxu2  ;;  %v9062_v55 = vpop.f32.mrf.mxu0  ;;  %v7215_v8 = vor.u32 %v7799_v24, %v7212_v12  ;;  %v3464_v33 = vadd.f32 %v9042_v14, %v3450_v10  ;;  %v3466_v14 = vadd.f32 %v9050_v37, %v3452_v34  ;;  %v7793_v37 = vld [vmem:[#allocation19 + $0x2b4] sm:$0xf]  ;;  %v7787_v34 = vld [vmem:[#allocation19 + $0x284] sm:$0xf] }
 0x28a   : > { %v9060_v51 = vpop.f32.mrf.mxu3  ;;  %v9064_v56 = vpop.f32.mrf.mxu1  ;;  %4713 = vmatpush.bf16.msra.mxu1 %v7211_v59  ;;  %v7191_v19 = vor.u32 %v7793_v37, %v7188_v49  ;;  %v7789_v10 = vld [vmem:[#allocation19 + $0x294] sm:$0xf] }
 0x28b   : > { %4727 = vmatpush.bf16.msra.mxu2 %v7151_v9  ;;  %v3478_v53 = vadd.f32 %v9044_v15, %v3464_v33  ;;  %v3480_v23 = vadd.f32 %v9052_v1, %v3466_v14  ;;  %v7186_v15 = vld [vmem:[#allocation19 + $0x2b0] sm:$0xf]  ;;  %v7178_v1 = vld [vmem:[#allocation19 + $0x2a0] sm:$0xf]  ;;  %v7175_v59 = vor.u32 %v7789_v10, %v7172_v16  ;;  %v7788_v33 = vld [vmem:[#allocation19 + $0x284] sm:$0xf0] }
 0x28c   : > { %4741 = vmatpush.bf16.msra.mxu3 %v7215_v8  ;;  %v7179_v58 = vor.u32 %v7792_v27, %v7178_v1  ;;  %v7162_v8 = vld [vmem:[#allocation19 + $0x280] sm:$0xf]  ;;  %v7804_v10 = vld [vmem:[#allocation20 + $0x8] sm:$0xff]  ;;  %v7813_v16 = vld [vmem:[#allocation20 + $0x50] sm:$0xff] }
 0x28d   : > { %4700 = vmatpush.bf16.msra.mxu0 %v7139_v17  ;;  %v7798_v17 = vld [vmem:[#allocation19 + $0x2d4] sm:$0xf0] }
 0x28e   : > { %v7203_v21 = vor.u32 %v7798_v17, %v7202_v26  ;;  %v7164_v26 = vld [vmem:[#allocation19 + $0x288] sm:$0xf0] }
 0x28f   : > { %4728 = vmatpush.bf16.msra.mxu2 %v7143_v42 }
 0x290   : > { %4714 = vmatpush.bf16.msra.mxu1 %v7203_v21  ;;  %v3506_v21 = vadd.f32 %v9056_v41, %v9054_v5 }
 0x291   : > { %4701 = vmatpush.bf16.msra.mxu0 %v7131_v31  ;;  %v9068_v9 = vpop.f32.mrf.mxu2  ;;  %v7207_v31 = vor.u32 %v7797_v29, %v7204_v32 }
 0x292   : > { %v9071_v25 = vpop.f32.mrf.mxu3 }
 0x293   : > { %4729 = vmatpush.bf16.msra.mxu2 %v7135_v57  ;;  %4742 = vmatpush.bf16.msra.mxu3 %v7207_v31  ;;  %v7194_v57 = vld [vmem:[#allocation19 + $0x2c0] sm:$0xf]  ;;  %v3508_v31 = vadd.f32 %v9064_v56, %v9062_v55 }
 0x294   : > { %v7195_v45 = vor.u32 %v7796_v30, %v7194_v57 }
 0x295   : > { %4702 = vmatpush.bf16.msra.mxu0 %v7123_v43  ;;  %v7199_v43 = vor.u32 %v7795_v2, %v7196_v38  ;;  %v3522_v30 = vadd.f32 %v9068_v9, %v3508_v31 }
 0x296   : > { %4715 = vmatpush.bf16.msra.mxu1 %v7195_v45 }
 0x297   : > { %4730 = vmatpush.bf16.msra.mxu2 %v7127_v46  ;;  %4743 = vmatpush.bf16.msra.mxu3 %v7199_v43  ;;  %v3536_v38 = vadd.f32 %v9071_v25, %v3522_v30  ;;  %v7810_v25 = vld [vmem:[#allocation20 + $0x38] sm:$0xff] }
 0x299   : > { %4703 = vmatpush.bf16.msra.mxu0 %v7115_v63  ;;  %v7187_v63 = vor.u32 %v7794_v48, %v7186_v15 }
 0x29b   : > { %4731 = vmatpush.bf16.msra.mxu2 %v7119_v3  ;;  %4716 = vmatpush.bf16.msra.mxu1 %v7187_v63 }
 0x29c   : > { %4744 = vmatpush.bf16.msra.mxu3 %v7191_v19  ;;  %v7817_v19 = vld [vmem:[#allocation20 + $0x70] sm:$0xff] }
 0x29d   : > { %4704 = vmatpush.bf16.msra.mxu0 %v7107_v52 }
 0x29f   : > { %4732 = vmatpush.bf16.msra.mxu2 %v7111_v54  ;;  %v7791_v54 = vld [vmem:[#allocation19 + $0x2a4] sm:$0xf]  ;;  %4717 = vmatpush.bf16.msra.mxu1 %v7179_v58 }
 0x2a0   : > { %v7183_v28 = vor.u32 %v7791_v54, %v7180_v60  ;;  %v7807_v54 = vld [vmem:[#allocation20 + $0x20] sm:$0xff]  ;;  %v7816_v60 = vld [vmem:[#allocation20 + $0x68] sm:$0xff] }
 0x2a1   : > { %4705 = vmatpush.bf16.msra.mxu0 %v7099_v62  ;;  %v3887_v13 = vpop.f32.mrf.mxu0  ;;  %v3992_v62 = vperm.slane %v9081_v50, 0 }
 0x2a2   : > { %v3901_v42 = vpop.f32.mrf.mxu1  ;;  %v3888_v39 = vadd.f32 %v3887_v13, %v3478_v53  ;;  %4745 = vmatpush.bf16.msra.mxu3 %v7183_v28  ;;  %v7163_v13 = vor.u32 %v7788_v33, %v7162_v8  ;;  %v3520_v53 = vadd.f32 %v9058_v40, %v3506_v21  ;;  %v7815_v28 = vld [vmem:[#allocation20 + $0x60] sm:$0xff] }
 0x2a3   : > { %4733 = vmatpush.bf16.msra.mxu2 %v7103_v4  ;;  %4718 = vmatpush.bf16.msra.mxu1 %v7171_v18  ;;  %v7811_v33 = vld [vmem:[#allocation20 + $0x40] sm:$0xff] }
 0x2a4   : > { %v3902_v46 = vadd.f32 %v3901_v42, %v3888_v39  ;;  %v7167_v42 = vor.u32 %v7787_v34, %v7164_v26  ;;  %v3534_v39 = vadd.f32 %v9060_v51, %v3520_v53 }
 0x2a5   : > { %4906 = vmatpush.bf16.msrb.mxu0 %v7810_v25 }
 0x2a6   : > { %4746 = vmatpush.bf16.msra.mxu3 %v7175_v59  ;;  %v7812_v59 = vld [vmem:[#allocation20 + $0x48] sm:$0xff] }
 0x2a7   : > { %4719 = vmatpush.bf16.msra.mxu1 %v7163_v13 }
 0x2a9   : > { %v3915_v44 = vpop.f32.mrf.mxu2  ;;  %v3889_v47 = vpop.f32.mrf.mxu0 }
 0x2aa   : > { %v3929_v36 = vpop.f32.mrf.mxu3  ;;  %v3916_v3 = vadd.f32 %v3915_v44, %v3902_v46  ;;  %v3890_v7 = vadd.f32 %v3889_v47, %v3480_v23  ;;  %v3903_v52 = vpop.f32.mrf.mxu1  ;;  %4747 = vmatpush.bf16.msra.mxu3 %v7167_v42  ;;  %v3993_v47 = vperm.slane %v9081_v50, 1  ;;  %v7808_v50 = vld [vmem:[#allocation20 + $0x28] sm:$0xff] }
 0x2ac   : > { %v3930_v61 = vadd.f32 %v3929_v36, %v3916_v3  ;;  %v3904_v35 = vadd.f32 %v3903_v52, %v3890_v7  ;;  %v7818_v3 = vld [vmem:[#allocation20 + $0x78] sm:$0xff]  ;;  %v7809_v7 = vld [vmem:[#allocation20 + $0x30] sm:$0xff] }
 0x2ad   : > { %4920 = vmatpush.bf16.msrb.mxu1 %v7818_v3  ;;  %4907 = vmatpush.bf16.msrb.mxu0 %v7809_v7 }
 0x2ae   : > { %v3996_v22 = vadd.f32 %v3992_v62, %v3930_v61 }
 0x2b0   : > { %v4000_v17 = vmax.f32 %v3996_v22, 0.0  ;;  %v7803_v22 = vld [vmem:[#allocation20] sm:$0xff] }
 0x2b1   : > { %v3917_v0 = vpop.f32.mrf.mxu2  ;;  %4921 = vmatpush.bf16.msrb.mxu1 %v7817_v19  ;;  %4908 = vmatpush.bf16.msrb.mxu0 %v7808_v50 }
 0x2b2   : > { %v3918_v4 = vadd.f32 %v3917_v0, %v3904_v35  ;;  %v3931_v6 = vpop.f32.mrf.mxu3  ;;  %v7805_v0 = vld [vmem:[#allocation20 + $0x10] sm:$0xff] }
 0x2b4   : > { %v3932_v24 = vadd.f32 %v3931_v6, %v3918_v4  ;;  %v7814_v6 = vld [vmem:[#allocation20 + $0x58] sm:$0xff] }
 0x2b5   : > { %4909 = vmatpush.bf16.msrb.mxu0 %v7807_v54  ;;  %4922 = vmatpush.bf16.msrb.mxu1 %v7816_v60  ;;  %v7965_v60 = vld [vmem:[%s9240_s29] ss:$0 sm:$0xff] }
 0x2b6   : > { %v3998_v12 = vadd.f32 %v3992_v62, %v3932_v24  ;;  %v7806_v62 = vld [vmem:[#allocation20 + $0x18] sm:$0xff] }
 0x2b8   : > { %v4002_v29 = vmax.f32 %v3998_v12, 0.0 }
 0x2b9   : > { %4910 = vmatpush.bf16.msrb.mxu0 %v7806_v62  ;;  %4923 = vmatpush.bf16.msrb.mxu1 %v7815_v28 }
 0x2ba   : > { %v4504_v32 = vpack.c.bf16 %v4002_v29, %v4000_v17 }
 0x2bc   : > { %4706 = vmatmul.bf16.vlgmr.msra.gmra.mxu0 %v4504_v32  ;;  %4734 = vmatmul.bf16.vlgmr.msra.gmra.mxu2 %v4504_v32 }
 0x2bd   : > { %4911 = vmatpush.bf16.msrb.mxu0 %v7805_v0  ;;  %4924 = vmatpush.bf16.msrb.mxu1 %v7814_v6 }
 0x2c1   : > { %v3943_v14 = vpop.f32.mrf.mxu0  ;;  %4912 = vmatpush.bf16.msrb.mxu0 %v7804_v10  ;;  %4925 = vmatpush.bf16.msrb.mxu1 %v7813_v16 }
 0x2c2   : > { %v3957_v57 = vpop.f32.mrf.mxu1  ;;  %v3944_v2 = vadd.f32 %v3943_v14, %v3534_v39  ;;  %v4758_v14 = vld [vmem:[%s9239_s14] sm:$0x3] }
 0x2c4   : > { %v3958_v5 = vadd.f32 %v3957_v57, %v3944_v2 }
 0x2c5   : > { %4913 = vmatpush.bf16.msrb.mxu0 %v7803_v22  ;;  %4926 = vmatpush.bf16.msrb.mxu1 %v7812_v59 }
 0x2c9   : > { %v3971_v45 = vpop.f32.mrf.mxu2  ;;  %v3945_v43 = vpop.f32.mrf.mxu0  ;;  %4927 = vmatpush.bf16.msrb.mxu1 %v7811_v33 }
 0x2ca   : > { %v3985_v41 = vpop.f32.mrf.mxu3  ;;  %v3972_v44 = vadd.f32 %v3971_v45, %v3958_v5  ;;  %v3946_v23 = vadd.f32 %v3945_v43, %v3536_v38  ;;  %v3959_v46 = vpop.f32.mrf.mxu1  ;;  %v4760_v5 = vperm.slane %v4758_v14, 0 }
 0x2cc   : > { %v3986_v40 = vadd.f32 %v3985_v41, %v3972_v44  ;;  %v3960_v55 = vadd.f32 %v3959_v46, %v3946_v23 }
 0x2ce   : > { %v3997_v15 = vadd.f32 %v3993_v47, %v3986_v40 }
 0x2d0   : > { %v4001_v63 = vmax.f32 %v3997_v15, 0.0  ;;  %v4761_v15 = vperm.slane %v4758_v14, 1 }
 0x2d1   : > { %v3973_v56 = vpop.f32.mrf.mxu2 }
 0x2d2   : > { %v3974_v36 = vadd.f32 %v3973_v56, %v3960_v55  ;;  %v3987_v51 = vpop.f32.mrf.mxu3 }
 0x2d4   : > { %v3988_v48 = vadd.f32 %v3987_v51, %v3974_v36 }
 0x2d6   : > { %v3999_v9 = vadd.f32 %v3993_v47, %v3988_v48 }
 0x2d8   : > { %v4003_v37 = vmax.f32 %v3999_v9, 0.0 }
 0x2da   : > { %v4505_v49 = vpack.c.bf16 %v4003_v37, %v4001_v63 }
 0x2dc   : > { %4720 = vmatmul.bf16.vlgmr.msra.gmra.mxu1 %v4505_v49  ;;  %4748 = vmatmul.bf16.vlgmr.msra.gmra.mxu3 %v4505_v49 }
 0x2e1   : > { %v4241_v52 = vpop.f32.mrf.mxu0 }
 0x2e2   : > { %v4255_v1 = vpop.f32.mrf.mxu1 }
 0x2e3   : > { %v4256_v29 = vadd.f32 %v4255_v1, %v4241_v52 }
 0x2e9   : > { %v4269_v27 = vpop.f32.mrf.mxu2  ;;  %v4243_v61 = vpop.f32.mrf.mxu0 }
 0x2ea   : > { %v4283_v58 = vpop.f32.mrf.mxu3  ;;  %v4257_v35 = vpop.f32.mrf.mxu1 }
 0x2eb   : > { %v4258_v32 = vadd.f32 %v4257_v35, %v4243_v61  ;;  %v4284_v39 = vadd.f32 %v4283_v58, %v4269_v27 }
 0x2f1   : > { %v4271_v4 = vpop.f32.mrf.mxu2 }
 0x2f2   : > { %v4285_v20 = vpop.f32.mrf.mxu3 }
 0x2f3   : > { %v4286_v44 = vadd.f32 %v4285_v20, %v4271_v4 }
 0x301   : > { %v4457_v11 = vpop.f32.mrf.mxu0 }
 0x302   : > { %v4471_v18 = vpop.f32.mrf.mxu1  ;;  %v4458_v21 = vadd.f32 %v4457_v11, %v4256_v29 }
 0x304   : > { %v4472_v57 = vadd.f32 %v4471_v18, %v4458_v21 }
 0x309   : > { %v4485_v24 = vpop.f32.mrf.mxu2  ;;  %v4459_v8 = vpop.f32.mrf.mxu0 }
 0x30a   : > { %v4499_v12 = vpop.f32.mrf.mxu3  ;;  %v4473_v34 = vpop.f32.mrf.mxu1  ;;  %v4460_v30 = vadd.f32 %v4459_v8, %v4258_v32  ;;  %v4486_v45 = vadd.f32 %v4485_v24, %v4284_v39 }
 0x30c   : > { %v4474_v23 = vadd.f32 %v4473_v34, %v4460_v30  ;;  %v4500_v47 = vadd.f32 %v4499_v12, %v4486_v45 }
 0x311   : > { %v4487_v13 = vpop.f32.mrf.mxu2 }
 0x312   : > { %v4501_v26 = vpop.f32.mrf.mxu3  ;;  %v4488_v55 = vadd.f32 %v4487_v13, %v4286_v44 }
 0x314   : > { %v4502_v37 = vadd.f32 %v4501_v26, %v4488_v55 }
 0x339   : > { %v4707_v17 = vpop.f32.mrf.mxu0 }
 0x33f   : > { %v4735_v31 = vpop.f32.mrf.mxu2 }
 0x341   : > { %v4709_v41 = vpop.f32.mrf.mxu0 }
 0x347   : > { %v4737_v9 = vpop.f32.mrf.mxu2 }
 0x359   : > { %v4721_v42 = vpop.f32.mrf.mxu1 }
 0x35a   : > { %v4722_v53 = vadd.f32 %v4721_v42, %v4707_v17 }
 0x35c   : > { %v4754_v38 = vadd.f32 %v4722_v53, %v4472_v57 }
 0x35e   : > { %v4764_v56 = vadd.f32 %v4760_v5, %v4754_v38 }
 0x35f   : > { %v4749_v2 = vpop.f32.mrf.mxu3 }
 0x360   : > { %v4750_v46 = vadd.f32 %v4749_v2, %v4735_v31  ;;  %v4768_v49 = vmax.f32 %v4764_v56, 0.0 }
 0x361   : > { %v4723_v43 = vpop.f32.mrf.mxu1 }
 0x362   : > { %v4724_v40 = vadd.f32 %v4723_v43, %v4709_v41  ;;  %v4755_v51 = vadd.f32 %v4750_v46, %v4500_v47 }
 0x364   : > { %v4756_v36 = vadd.f32 %v4724_v40, %v4474_v23  ;;  %v4765_v7 = vadd.f32 %v4761_v15, %v4755_v51 }
 0x366   : > { %v4766_v48 = vadd.f32 %v4760_v5, %v4756_v36  ;;  %v4769_v1 = vmax.f32 %v4765_v7, 0.0 }
 0x367   : > { %v4751_v63 = vpop.f32.mrf.mxu3 }
 0x368   : > { %v4770_v25 = vmax.f32 %v4766_v48, 0.0  ;;  %v4752_v3 = vadd.f32 %v4751_v63, %v4737_v9 }
 0x36a   : > { %v4772_v19 = vpack.c.bf16 %v4770_v25, %v4768_v49  ;;  %v4757_v50 = vadd.f32 %v4752_v3, %v4502_v37 }
 0x36c   : > { %v4767_v52 = vadd.f32 %v4761_v15, %v4757_v50  ;;  %4914 = vmatmul.bf16.vlgmr.msrb.gmra.mxu0 %v4772_v19 }
 0x36e   : > { %v4771_v27 = vmax.f32 %v4767_v52, 0.0 }
 0x370   : > { %v4773_v54 = vpack.c.bf16 %v4771_v27, %v4769_v1 }
 0x372   : > { %4928 = vmatmul.bf16.vlgmr.msrb.gmra.mxu1 %v4773_v54 }
 0x3e9   : > { %v4915_v58 = vpop.f32.mrf.mxu0 }
 0x3ea   : > { %v4916_v61 = vadd.f32 %v7965_v60, %v4915_v58 }
 0x3ef   : > { %v4929_v62 = vpop.f32.mrf.mxu1 }
 0x3f0   : > { %v4930_v35 = vadd.f32 %v4929_v62, %v4916_v61 }
 0x3f1   : > { %v4917_v0 = vpop.f32.mrf.mxu0 }
 0x3f2   : > { %v4934_v28 = vmax.f32 %v4930_v35, 0.0  ;;  %v4918_v4 = vadd.f32 %v7965_v60, %v4917_v0 }
 0x3f4   : > { %4936 = vst [vmem:[%s851_s13] sm:$0xff] %v4934_v28 }
 0x3f7   : > { %v4931_v6 = vpop.f32.mrf.mxu1 }
 0x3f8   : > { %v4932_v20 = vadd.f32 %v4931_v6, %v4918_v4 }
 0x3fa   : > { %v4935_v11 = vmax.f32 %v4932_v20, 0.0 }
 0x3fc   : > { %4937 = vst [vmem:[%s851_s13 + $0x8] sm:$0xff] %v4935_v11 }
 0x3fd   : > { %8354 = shalt.err (!%p8351_p9)
}
 0x3fe   : > { %s8432_s22 = smov 128   ;;  %s8433_s0 = smov 8  }
 0x3ff   : > { %7858 = dma.vmem_to_hbm [thread:$0]  (%p8609_p0), %s4952_s20, 256, %s4954_s30, %s4939_s24, %s8432_s22, %s8432_s22, %s8433_s0  }
 0x400 PF: > { %s9243_s28 = sld [smem:[#allocation31_spill]] }
 0x401   : > { %s9245_s14 = sld [smem:[#allocation33_spill]] }
 0x406   : > { %s4968_s1 = sand.u32 1, %s9243_s28  }
 0x407   : > { %p9246_p12 = scmp.ge.s32.totalorder %s9245_s14, 2  ;;  %s4969_s5 = scalar_lea.sflag [#allocation4], %s4968_s1 }
 0x409   : > { %p7899_p2 = pnand %p9246_p12, %p8615_p5 }
 0x40b   : > { %p7900_p4 = pneg %p7899_p2 }
 0x40d   : > { %8400 = dma.done.wait (%p7900_p4), %s4969_s5, 256  }
 0x40e   : > { %8402 = vsyncadd (%p7900_p4), %s4969_s5, 4294967040  ;;  %s9247_s27 = sld [smem:[#allocation35_spill]]  ;;  %s9250_s25 = smov %s8413_s26 }
 0x40f   : > { %s9248_s24 = sld [smem:[#allocation32_spill]] }
 0x410   : > { %s9249_s29 = sld [smem:[#allocation36_spill]] }
 0x414   : > { %p40_p13 = scmp.ge.s32.totalorder %s9247_s27, 4  }
 0x416   : > { %s9251_s26 = smov %s9249_s29  ;;  %42 = sbr.rel (!%p40_p13) target bundleno = 30 (0x1e), region = 209 }
 0x41b   :  { %4975 = vsyncpa [#allocation3], 1 }
 0x41c   :  { %4977 = vsyncpa [#allocation3 + $0x1], 1 }
 0x41d   :  { %4978 = vsyncpa [#allocation6], 1 }
 0x41e   :  { %4980 = vsyncpa [#allocation6 + $0x1], 1 }
 0x41f   :  { %4981 = vsyncpa [#allocation9], 1 }
 0x420   :  { %4983 = vsyncpa [#allocation9 + $0x1], 1 }
 0x421   :  { %4984 = vsyncpa [#allocation12], 1 }
 0x422   :  { %4985 = vsyncpa [#allocation15], 1 }
 0x423   :  { %4986 = vsyncpa [#allocation18], 1 }
 0x424   :  { %4987 = vsyncpa [#allocation21], 1 }
 0x425   :  { %4988 = vsyncpa [#allocation4], 1 }
 0x426   :  { %4990 = vsyncpa [#allocation4 + $0x1], 1 }

</bundles_post_ra>
